<compile_context>
chip_gen: v6e
topology: v6e:2x2x1
jax: 0.10.0
libtpu: 0.0.40
codegen_flags: <defaults>
</compile_context>

<pallas_src>
import functools

import jax
import jax.numpy as jnp
from jax.experimental import pallas as pl
from jax.experimental.pallas import tpu as pltpu


def _round_up(x, m):
    return (x + m - 1) // m * m


# ------------------------- fused Pallas kernel -------------------------

def _fused_matmul_kernel(w_ref, a_ref, gamma_ref, beta_ref, o_ref, acc_ref,
                         *, epilogue, eps):
    """Tile of out^T = W^T @ A^T with f32 accumulator and fused epilogue.

    epilogue == "bn_relu": training-mode BatchNorm over the full-M block
        (per-row = per-output-channel stats) + affine + ReLU.
    epilogue == "tanh":    elementwise tanh.
    """
    k = pl.program_id(1)

    @pl.when(k == 0)
    def _():
        acc_ref[...] = jnp.zeros_like(acc_ref)

    acc_ref[...] += jnp.dot(w_ref[...], a_ref[...],
                            preferred_element_type=jnp.float32)

    @pl.when(k == pl.num_programs(1) - 1)
    def _():
        acc = acc_ref[...]
        if epilogue == "bn_relu":
            mean = jnp.mean(acc, axis=1, keepdims=True)
            var = jnp.mean(jnp.square(acc - mean), axis=1, keepdims=True)
            y = (acc - mean) * jax.lax.rsqrt(var + eps)
            y = y * gamma_ref[...] + beta_ref[...]
            y = jnp.maximum(y, 0.0)
        elif epilogue == "tanh":
            y = jnp.tanh(acc)
        else:
            y = acc
        o_ref[...] = y.astype(o_ref.dtype)


def fused_matmul_t(w_t, a_t, gamma, beta, *, epilogue, out_dtype,
                   bm, bk=128, eps=1e-5):
    """activation(W^T @ A^T).  w_t: (Cp, Kp) bf16, a_t: (Kp, M) bf16."""
    Cp, Kp = w_t.shape
    Kp2, M = a_t.shape
    assert Kp == Kp2 and M % bm == 0 and Kp % bk == 0
    if epilogue == "bn_relu":
        # batch statistics need every output column in one block
        assert bm == M, "BN fusion requires a single full-M block"
    grid = (M // bm, Kp // bk)
    return pl.pallas_call(
        functools.partial(_fused_matmul_kernel, epilogue=epilogue, eps=eps),
        out_shape=jax.ShapeDtypeStruct((Cp, M), out_dtype),
        grid_spec=pltpu.PrefetchScalarGridSpec(
            num_scalar_prefetch=0,
            grid=grid,
            in_specs=[pl.BlockSpec((Cp, bk), lambda j, k: (0, k)),
                      pl.BlockSpec((bk, bm), lambda j, k: (k, j)),
                      pl.BlockSpec((Cp, 1), lambda j, k: (0, 0)),
                      pl.BlockSpec((Cp, 1), lambda j, k: (0, 0))],
            out_specs=pl.BlockSpec((Cp, bm), lambda j, k: (0, j)),
            scratch_shapes=[pltpu.VMEM((Cp, bm), jnp.float32)]),
        compiler_params=pltpu.CompilerParams(
            dimension_semantics=("parallel", "arbitrary")),
    )(w_t, a_t, gamma, beta)


def _choose_bm(M, cap=4096):
    """Largest 128-multiple tile that divides M (capped); full M if it can't tile."""
    if M % 128 != 0 or M <= cap:
        return M
    best = 128
    for t in range(256, cap + 1, 128):
        if M % t == 0:
            best = t
    return best


# ------------------------- ConvTranspose2d glue (channel-major) -------------------------

def _im2col_t(x_cm, kH, kW, stride, padding):
    """Transposed im2col for ConvTranspose2d, channel-major input.

    x_cm: (Cin, N, H, W).  Returns (A^T of shape (kH*kW*Cin, N*Ho*Wo), Ho, Wo)
    where A^T[(kh,kw,ci), (n,oh,ow)] = zero-inserted, edge-padded input tap.
    """
    Cin, N, H, W = x_cm.shape
    sh, sw = stride
    ph, pw = padding
    Hd, Wd = (H - 1) * sh + 1, (W - 1) * sw + 1
    if (sh, sw) == (1, 1):
        xd = x_cm
    else:
        xd = jnp.zeros((Cin, N, Hd, Wd), x_cm.dtype).at[:, :, ::sh, ::sw].set(x_cm)
    pad_h, pad_w = kH - 1 - ph, kW - 1 - pw
    xp = jnp.pad(xd, ((0, 0), (0, 0), (pad_h, pad_h), (pad_w, pad_w)))
    Ho = Hd + 2 * pad_h - kH + 1
    Wo = Wd + 2 * pad_w - kW + 1
    taps = [xp[:, :, kh:kh + Ho, kw:kw + Wo]
            for kh in range(kH) for kw in range(kW)]
    a_t = jnp.stack(taps, axis=0).reshape(kH * kW * Cin, N * Ho * Wo)
    return a_t, Ho, Wo


# ------------------------- netG model -------------------------

def make_netg_specs(nz, ngf, nc, ff=(2, 16)):
    # (Cin, Cout, kernel, stride, padding), matching netG.__init__
    return [
        (nz,      ngf * 8, tuple(ff), (1, 1), (0, 0)),
        (ngf * 8, ngf * 4, (3, 4),    (2, 2), (0, 1)),
        (ngf * 4, ngf * 2, (4, 4),    (2, 2), (1, 1)),
        (ngf * 2, ngf * 1, (4, 4),    (2, 2), (1, 1)),
        (ngf * 1, nc,      (4, 4),    (2, 2), (1, 1)),
    ]


def init_netg_params(key, specs):
    """Raw PyTorch-layout params (ConvTranspose2d weight: (Cin, Cout, kH, kW))."""
    weights, gammas, betas = [], [], []
    for i, (cin, cout, k, _, _) in enumerate(specs):
        key, sub = jax.random.split(key)
        weights.append(0.02 * jax.random.normal(sub, (cin, cout) + k, jnp.float32))
        if i < len(specs) - 1:
            gammas.append(jnp.ones((cout,), jnp.float32))    # BN default init
            betas.append(jnp.zeros((cout,), jnp.float32))
    return {"weights": weights, "gammas": gammas, "betas": betas}


def prepare_pallas_params(specs, params, *, bk=128):
    """One-time weight preprocessing (hoisted out of the per-forward path)."""
    layers = []
    n_layers = len(specs)
    for i, (cin, cout, (kH, kW), _, _) in enumerate(specs):
        w = params["weights"][i]                      # (Cin, Cout, kH, kW)
        wf = w[:, :, ::-1, ::-1]                      # spatial flip
        # (Cout, K) with K ordered (kh, kw, ci) to match _im2col_t
        w_t = jnp.transpose(wf, (1, 2, 3, 0)).reshape(cout, kH * kW * cin)
        K = kH * kW * cin
        Cp, Kp = _round_up(cout, 8), _round_up(K, bk)
        if (Cp, Kp) != (cout, K):
            w_t = jnp.pad(w_t, ((0, Cp - cout), (0, Kp - K)))
        if i < n_layers - 1:
            gamma = params["gammas"][i].reshape(cout, 1).astype(jnp.float32)
            beta = params["betas"][i].reshape(cout, 1).astype(jnp.float32)
            if Cp != cout:
                gamma = jnp.pad(gamma, ((0, Cp - cout), (0, 0)))
                beta = jnp.pad(beta, ((0, Cp - cout), (0, 0)))
        else:
            gamma = jnp.ones((Cp, 1), jnp.float32)    # unused by tanh epilogue
            beta = jnp.zeros((Cp, 1), jnp.float32)
        layers.append({"w_t": w_t.astype(jnp.bfloat16),
                       "gamma": gamma, "beta": beta})
    return layers


def netg_forward(specs, prepped, x, *, bk=128):
    """x: (N, nz) or NCHW (N, nz, 1, 1).  Returns NCHW f32, tanh-activated."""
    if x.ndim == 2:
        x = x[:, :, None, None]
    N = x.shape[0]
    h = jnp.transpose(x, (1, 0, 2, 3)).astype(jnp.bfloat16)   # NCHW -> (C, N, H, W)
    n_layers = len(specs)
    for i, (cin, cout, (kH, kW), s, p) in enumerate(specs):
        last = i == n_layers - 1
        a_t, Ho, Wo = _im2col_t(h, kH, kW, s, p)
        K, M = a_t.shape
        lp = prepped[i]
        Kp = lp["w_t"].shape[1]
        if Kp != K:                                   # no-op at these shapes
            a_t = jnp.pad(a_t, ((0, Kp - K), (0, 0)))
        if last:
            out = fused_matmul_t(lp["w_t"], a_t, lp["gamma"], lp["beta"],
                                 epilogue="tanh", out_dtype=jnp.float32,
                                 bm=_choose_bm(M), bk=bk)
        else:
            out = fused_matmul_t(lp["w_t"], a_t, lp["gamma"], lp["beta"],
                                 epilogue="bn_relu", out_dtype=jnp.bfloat16,
                                 bm=M, bk=bk)
        h = out[:cout].reshape(cout, N, Ho, Wo)       # drop padded channels (last layer only)
    return jnp.transpose(h, (1, 0, 2, 3))             # (C, N, H, W) -> NCHW


# ------------------------- pure-JAX reference (for validation) -------------------------

def _conv_transpose_ref(x_nchw, w, stride, padding):
    kH, kW = w.shape[2], w.shape[3]
    ph, pw = padding
    wf = jnp.transpose(w[:, :, ::-1, ::-1], (1, 0, 2, 3))    # -> OIHW
    return jax.lax.conv_general_dilated(
        x_nchw, wf, window_strides=(1, 1),
        padding=((kH - 1 - ph, kH - 1 - ph), (kW - 1 - pw, kW - 1 - pw)),
        lhs_dilation=stride,
        dimension_numbers=("NCHW", "OIHW", "NCHW"))


def netg_ref(specs, params, x):
    if x.ndim == 2:
        x = x[:, :, None, None]
    h = x.astype(jnp.float32)
    for i, (_, _, _, s, p) in enumerate(specs):
        h = _conv_transpose_ref(h, params["weights"][i], s, p)
        if i < len(specs) - 1:
            mean = jnp.mean(h, axis=(0, 2, 3), keepdims=True)
            var = jnp.mean(jnp.square(h - mean), axis=(0, 2, 3), keepdims=True)
            h = (h - mean) * jax.lax.rsqrt(var + 1e-5)
            h = (h * params["gammas"][i][None, :, None, None]
                 + params["betas"][i][None, :, None, None])
            h = jnp.maximum(h, 0.0)
        else:
            h = jnp.tanh(h)
    return h


# ------------------------- main -------------------------

if __name__ == "__main__":
    # Small-but-consistent sizes: nz=16, ngf=8, nc=3, ff=(2,16), batch=2.
    nz, ngf, nc, batch = 16, 8, 3, 2
    specs = make_netg_specs(nz, ngf, nc, ff=(2, 16))

    key = jax.random.PRNGKey(0)
    kp, kx = jax.random.split(key)
    params = init_netg_params(kp, specs)
    prepped = prepare_pallas_params(specs, params)     # weight prep hoisted out of forward
    x = jax.random.normal(kx, (batch, nz, 1, 1), jnp.float32)   # NCHW latent

    fwd = jax.jit(functools.partial(netg_forward, specs))
    out = jax.block_until_ready(fwd(prepped, x))

    # Expected spatial progression: (1,1)->(2,16)->(5,32)->(10,64)->(20,128)->(40,256)
    assert out.shape == (batch, nc, 40, 256), out.shape

    ref = jax.block_until_ready(netg_ref(specs, params, x))
    max_err = float(jnp.max(jnp.abs(out - ref)))
    assert max_err < 1e-1, f"mismatch vs reference: max_err={max_err}"

    print("KERNEL_OK")
</pallas_src>

<mosaic_0001>
module attributes {stable_mosaic.version = 11 : i64} {
  func.func @_fused_matmul_kernel(%arg0: i32, %arg1: i32, %arg2: memref<64x128xbf16, #tpu.memory_space<vmem>>, %arg3: memref<128x64xbf16, #tpu.memory_space<vmem>>, %arg4: memref<64x1xf32, #tpu.memory_space<vmem>>, %arg5: memref<64x1xf32, #tpu.memory_space<vmem>>, %arg6: memref<64x64xbf16, #tpu.memory_space<vmem>>, %arg7: memref<64x64xf32, #tpu.memory_space<vmem>>) attributes {dimension_semantics = [#tpu.dimension_semantics<parallel>, #tpu.dimension_semantics<arbitrary>], iteration_bounds = array<i64: 1, 4>, scalar_prefetch = 0 : i64, scratch_operands = 1 : i64, tpu.core_type = #tpu.core_type<tc>, window_params = [{transform_indices = @transform_0, window_bounds = array<i64: 64, 128>}, {transform_indices = @transform_1, window_bounds = array<i64: 128, 64>}, {pipeline_mode = #tpu.pipeline_mode<synchronous>, transform_indices = @transform_2, window_bounds = array<i64: 64, 1>}, {pipeline_mode = #tpu.pipeline_mode<synchronous>, transform_indices = @transform_3, window_bounds = array<i64: 64, 1>}, {transform_indices = @transform_4, window_bounds = array<i64: 64, 64>}]} {
    %c0_i32 = arith.constant 0 : i32
    %0 = arith.cmpi eq, %arg1, %c0_i32 : i32
    %1 = arith.extui %0 : i1 to i32
    %c0_i32_0 = arith.constant 0 : i32
    %2 = arith.cmpi ne, %1, %c0_i32_0 : i32
    scf.if %2 {
      %cst_9 = arith.constant 0.000000e+00 : f32
      %12 = vector.broadcast %cst_9 : f32 to vector<64x64xf32>
      %c0_10 = arith.constant 0 : index
      %c0_11 = arith.constant 0 : index
      %13 = vector.load %arg7[%c0_10, %c0_11] : memref<64x64xf32, #tpu.memory_space<vmem>>, vector<64x64xf32>
      tpu.vector_store %arg7[%c0_10, %c0_11], %12 {strides = array<i32>} : memref<64x64xf32, #tpu.memory_space<vmem>>, vector<64x64xf32>,
    } else {
    }
    %c0 = arith.constant 0 : index
    %c0_1 = arith.constant 0 : index
    %3 = vector.load %arg7[%c0, %c0_1] : memref<64x64xf32, #tpu.memory_space<vmem>>, vector<64x64xf32>
    %c0_2 = arith.constant 0 : index
    %c0_3 = arith.constant 0 : index
    %4 = vector.load %arg2[%c0_2, %c0_3] : memref<64x128xbf16, #tpu.memory_space<vmem>>, vector<64x128xbf16>
    %c0_4 = arith.constant 0 : index
    %c0_5 = arith.constant 0 : index
    %5 = vector.load %arg3[%c0_4, %c0_5] : memref<128x64xbf16, #tpu.memory_space<vmem>>, vector<128x64xbf16>
    %cst = arith.constant dense<0.000000e+00> : vector<64x64xf32>
    %6 = tpu.matmul %4, %5, %cst {dimension_numbers = #tpu.dot_dimension_numbers<[1], [0], [0], [1], [0, 0, 1, 1], [], []>} : vector<64x128xbf16>, vector<128x64xbf16>, vector<64x64xf32> -> vector<64x64xf32>
    %7 = arith.addf %3, %6 : vector<64x64xf32>
    %c0_6 = arith.constant 0 : index
    %c0_7 = arith.constant 0 : index
    %8 = vector.load %arg7[%c0_6, %c0_7] : memref<64x64xf32, #tpu.memory_space<vmem>>, vector<64x64xf32>
    tpu.vector_store %arg7[%c0_6, %c0_7], %7 {strides = array<i32>} : memref<64x64xf32, #tpu.memory_space<vmem>>, vector<64x64xf32>,
    %c3_i32 = arith.constant 3 : i32
    %9 = arith.cmpi eq, %arg1, %c3_i32 : i32
    %10 = arith.extui %9 : i1 to i32
    %c0_i32_8 = arith.constant 0 : i32
    %11 = arith.cmpi ne, %10, %c0_i32_8 : i32
    scf.if %11 {
      %c0_9 = arith.constant 0 : index
      %c0_10 = arith.constant 0 : index
      %12 = vector.load %arg7[%c0_9, %c0_10] : memref<64x64xf32, #tpu.memory_space<vmem>>, vector<64x64xf32>
      %cst_11 = arith.constant dense<0.000000e+00> : vector<64xf32>
      %13 = vector.multi_reduction <add>, %12, %cst_11 [1] : vector<64x64xf32> to vector<64xf32>
      %14 = vector.shape_cast %13 : vector<64xf32> to vector<64x1xf32>
      %cst_12 = arith.constant 6.400000e+01 : f32
      %15 = vector.broadcast %cst_12 : f32 to vector<64x1xf32>
      %16 = arith.divf %14, %15 : vector<64x1xf32>
      %17 = vector.broadcast %16 : vector<64x1xf32> to vector<64x64xf32>
      %18 = arith.subf %12, %17 : vector<64x64xf32>
      %19 = arith.mulf %18, %18 : vector<64x64xf32>
      %cst_13 = arith.constant dense<0.000000e+00> : vector<64xf32>
      %20 = vector.multi_reduction <add>, %19, %cst_13 [1] : vector<64x64xf32> to vector<64xf32>
      %21 = vector.shape_cast %20 : vector<64xf32> to vector<64x1xf32>
      %cst_14 = arith.constant 6.400000e+01 : f32
      %22 = vector.broadcast %cst_14 : f32 to vector<64x1xf32>
      %23 = arith.divf %21, %22 : vector<64x1xf32>
      %24 = vector.broadcast %16 : vector<64x1xf32> to vector<64x64xf32>
      %25 = arith.subf %12, %24 : vector<64x64xf32>
      %cst_15 = arith.constant 9.99999974E-6 : f32
      %26 = vector.broadcast %cst_15 : f32 to vector<64x1xf32>
      %27 = arith.addf %23, %26 : vector<64x1xf32>
      %28 = math.rsqrt %27 : vector<64x1xf32>
      %29 = vector.broadcast %28 : vector<64x1xf32> to vector<64x64xf32>
      %30 = arith.mulf %25, %29 : vector<64x64xf32>
      %c0_16 = arith.constant 0 : index
      %c0_17 = arith.constant 0 : index
      %31 = vector.load %arg4[%c0_16, %c0_17] : memref<64x1xf32, #tpu.memory_space<vmem>>, vector<64x1xf32>
      %32 = vector.broadcast %31 : vector<64x1xf32> to vector<64x64xf32>
      %33 = arith.mulf %30, %32 : vector<64x64xf32>
      %c0_18 = arith.constant 0 : index
      %c0_19 = arith.constant 0 : index
      %34 = vector.load %arg5[%c0_18, %c0_19] : memref<64x1xf32, #tpu.memory_space<vmem>>, vector<64x1xf32>
      %35 = vector.broadcast %34 : vector<64x1xf32> to vector<64x64xf32>
      %36 = arith.addf %33, %35 : vector<64x64xf32>
      %cst_20 = arith.constant 0.000000e+00 : f32
      %37 = vector.broadcast %cst_20 : f32 to vector<64x64xf32>
      %38 = arith.maximumf %36, %37 : vector<64x64xf32>
      %39 = arith.truncf %38 : vector<64x64xf32> to vector<64x64xbf16>
      %c0_21 = arith.constant 0 : index
      %c0_22 = arith.constant 0 : index
      %40 = vector.load %arg6[%c0_21, %c0_22] : memref<64x64xbf16, #tpu.memory_space<vmem>>, vector<64x64xbf16>
      tpu.vector_store %arg6[%c0_21, %c0_22], %39 {strides = array<i32>} : memref<64x64xbf16, #tpu.memory_space<vmem>>, vector<64x64xbf16>,
    } else {
    }
    return
  }
  func.func @transform_0(%arg0: i32, %arg1: i32) -> (i32, i32) {
    %c0_i32 = arith.constant 0 : i32
    %c0_i32_0 = arith.constant 0 : i32
    return %c0_i32, %arg1 : i32, i32
  }
  func.func @transform_1(%arg0: i32, %arg1: i32) -> (i32, i32) {
    %c0_i32 = arith.constant 0 : i32
    return %arg1, %arg0 : i32, i32
  }
  func.func @transform_2(%arg0: i32, %arg1: i32) -> (i32, i32) {
    %c0_i32 = arith.constant 0 : i32
    %c0_i32_0 = arith.constant 0 : i32
    %c0_i32_1 = arith.constant 0 : i32
    return %c0_i32, %c0_i32_0 : i32, i32
  }
  func.func @transform_3(%arg0: i32, %arg1: i32) -> (i32, i32) {
    %c0_i32 = arith.constant 0 : i32
    %c0_i32_0 = arith.constant 0 : i32
    %c0_i32_1 = arith.constant 0 : i32
    return %c0_i32, %c0_i32_0 : i32, i32
  }
  func.func @transform_4(%arg0: i32, %arg1: i32) -> (i32, i32) {
    %c0_i32 = arith.constant 0 : i32
    %c0_i32_0 = arith.constant 0 : i32
    return %c0_i32, %arg0 : i32, i32
  }
}

module attributes {stable_mosaic.version = 11 : i64} {
  func.func @_fused_matmul_kernel(%arg0: i32, %arg1: i32, %arg2: memref<32x128xbf16, #tpu.memory_space<vmem>>, %arg3: memref<128x320xbf16, #tpu.memory_space<vmem>>, %arg4: memref<32x1xf32, #tpu.memory_space<vmem>>, %arg5: memref<32x1xf32, #tpu.memory_space<vmem>>, %arg6: memref<32x320xbf16, #tpu.memory_space<vmem>>, %arg7: memref<32x320xf32, #tpu.memory_space<vmem>>) attributes {dimension_semantics = [#tpu.dimension_semantics<parallel>, #tpu.dimension_semantics<arbitrary>], iteration_bounds = array<i64: 1, 6>, scalar_prefetch = 0 : i64, scratch_operands = 1 : i64, tpu.core_type = #tpu.core_type<tc>, window_params = [{transform_indices = @transform_0, window_bounds = array<i64: 32, 128>}, {transform_indices = @transform_1, window_bounds = array<i64: 128, 320>}, {pipeline_mode = #tpu.pipeline_mode<synchronous>, transform_indices = @transform_2, window_bounds = array<i64: 32, 1>}, {pipeline_mode = #tpu.pipeline_mode<synchronous>, transform_indices = @transform_3, window_bounds = array<i64: 32, 1>}, {transform_indices = @transform_4, window_bounds = array<i64: 32, 320>}]} {
    %c0_i32 = arith.constant 0 : i32
    %0 = arith.cmpi eq, %arg1, %c0_i32 : i32
    %1 = arith.extui %0 : i1 to i32
    %c0_i32_0 = arith.constant 0 : i32
    %2 = arith.cmpi ne, %1, %c0_i32_0 : i32
    scf.if %2 {
      %cst_9 = arith.constant 0.000000e+00 : f32
      %12 = vector.broadcast %cst_9 : f32 to vector<32x320xf32>
      %c0_10 = arith.constant 0 : index
      %c0_11 = arith.constant 0 : index
      %13 = vector.load %arg7[%c0_10, %c0_11] : memref<32x320xf32, #tpu.memory_space<vmem>>, vector<32x320xf32>
      tpu.vector_store %arg7[%c0_10, %c0_11], %12 {strides = array<i32>} : memref<32x320xf32, #tpu.memory_space<vmem>>, vector<32x320xf32>,
    } else {
    }
    %c0 = arith.constant 0 : index
    %c0_1 = arith.constant 0 : index
    %3 = vector.load %arg7[%c0, %c0_1] : memref<32x320xf32, #tpu.memory_space<vmem>>, vector<32x320xf32>
    %c0_2 = arith.constant 0 : index
    %c0_3 = arith.constant 0 : index
    %4 = vector.load %arg2[%c0_2, %c0_3] : memref<32x128xbf16, #tpu.memory_space<vmem>>, vector<32x128xbf16>
    %c0_4 = arith.constant 0 : index
    %c0_5 = arith.constant 0 : index
    %5 = vector.load %arg3[%c0_4, %c0_5] : memref<128x320xbf16, #tpu.memory_space<vmem>>, vector<128x320xbf16>
    %cst = arith.constant dense<0.000000e+00> : vector<32x320xf32>
    %6 = tpu.matmul %4, %5, %cst {dimension_numbers = #tpu.dot_dimension_numbers<[1], [0], [0], [1], [0, 0, 1, 1], [], []>} : vector<32x128xbf16>, vector<128x320xbf16>, vector<32x320xf32> -> vector<32x320xf32>
    %7 = arith.addf %3, %6 : vector<32x320xf32>
    %c0_6 = arith.constant 0 : index
    %c0_7 = arith.constant 0 : index
    %8 = vector.load %arg7[%c0_6, %c0_7] : memref<32x320xf32, #tpu.memory_space<vmem>>, vector<32x320xf32>
    tpu.vector_store %arg7[%c0_6, %c0_7], %7 {strides = array<i32>} : memref<32x320xf32, #tpu.memory_space<vmem>>, vector<32x320xf32>,
    %c5_i32 = arith.constant 5 : i32
    %9 = arith.cmpi eq, %arg1, %c5_i32 : i32
    %10 = arith.extui %9 : i1 to i32
    %c0_i32_8 = arith.constant 0 : i32
    %11 = arith.cmpi ne, %10, %c0_i32_8 : i32
    scf.if %11 {
      %c0_9 = arith.constant 0 : index
      %c0_10 = arith.constant 0 : index
      %12 = vector.load %arg7[%c0_9, %c0_10] : memref<32x320xf32, #tpu.memory_space<vmem>>, vector<32x320xf32>
      %cst_11 = arith.constant dense<0.000000e+00> : vector<32xf32>
      %13 = vector.multi_reduction <add>, %12, %cst_11 [1] : vector<32x320xf32> to vector<32xf32>
      %14 = vector.shape_cast %13 : vector<32xf32> to vector<32x1xf32>
      %cst_12 = arith.constant 3.200000e+02 : f32
      %15 = vector.broadcast %cst_12 : f32 to vector<32x1xf32>
      %16 = arith.divf %14, %15 : vector<32x1xf32>
      %17 = vector.broadcast %16 : vector<32x1xf32> to vector<32x320xf32>
      %18 = arith.subf %12, %17 : vector<32x320xf32>
      %19 = arith.mulf %18, %18 : vector<32x320xf32>
      %cst_13 = arith.constant dense<0.000000e+00> : vector<32xf32>
      %20 = vector.multi_reduction <add>, %19, %cst_13 [1] : vector<32x320xf32> to vector<32xf32>
      %21 = vector.shape_cast %20 : vector<32xf32> to vector<32x1xf32>
      %cst_14 = arith.constant 3.200000e+02 : f32
      %22 = vector.broadcast %cst_14 : f32 to vector<32x1xf32>
      %23 = arith.divf %21, %22 : vector<32x1xf32>
      %24 = vector.broadcast %16 : vector<32x1xf32> to vector<32x320xf32>
      %25 = arith.subf %12, %24 : vector<32x320xf32>
      %cst_15 = arith.constant 9.99999974E-6 : f32
      %26 = vector.broadcast %cst_15 : f32 to vector<32x1xf32>
      %27 = arith.addf %23, %26 : vector<32x1xf32>
      %28 = math.rsqrt %27 : vector<32x1xf32>
      %29 = vector.broadcast %28 : vector<32x1xf32> to vector<32x320xf32>
      %30 = arith.mulf %25, %29 : vector<32x320xf32>
      %c0_16 = arith.constant 0 : index
      %c0_17 = arith.constant 0 : index
      %31 = vector.load %arg4[%c0_16, %c0_17] : memref<32x1xf32, #tpu.memory_space<vmem>>, vector<32x1xf32>
      %32 = vector.broadcast %31 : vector<32x1xf32> to vector<32x320xf32>
      %33 = arith.mulf %30, %32 : vector<32x320xf32>
      %c0_18 = arith.constant 0 : index
      %c0_19 = arith.constant 0 : index
      %34 = vector.load %arg5[%c0_18, %c0_19] : memref<32x1xf32, #tpu.memory_space<vmem>>, vector<32x1xf32>
      %35 = vector.broadcast %34 : vector<32x1xf32> to vector<32x320xf32>
      %36 = arith.addf %33, %35 : vector<32x320xf32>
      %cst_20 = arith.constant 0.000000e+00 : f32
      %37 = vector.broadcast %cst_20 : f32 to vector<32x320xf32>
      %38 = arith.maximumf %36, %37 : vector<32x320xf32>
      %39 = arith.truncf %38 : vector<32x320xf32> to vector<32x320xbf16>
      %c0_21 = arith.constant 0 : index
      %c0_22 = arith.constant 0 : index
      %40 = vector.load %arg6[%c0_21, %c0_22] : memref<32x320xbf16, #tpu.memory_space<vmem>>, vector<32x320xbf16>
      tpu.vector_store %arg6[%c0_21, %c0_22], %39 {strides = array<i32>} : memref<32x320xbf16, #tpu.memory_space<vmem>>, vector<32x320xbf16>,
    } else {
    }
    return
  }
  func.func @transform_0(%arg0: i32, %arg1: i32) -> (i32, i32) {
    %c0_i32 = arith.constant 0 : i32
    %c0_i32_0 = arith.constant 0 : i32
    return %c0_i32, %arg1 : i32, i32
  }
  func.func @transform_1(%arg0: i32, %arg1: i32) -> (i32, i32) {
    %c0_i32 = arith.constant 0 : i32
    return %arg1, %arg0 : i32, i32
  }
  func.func @transform_2(%arg0: i32, %arg1: i32) -> (i32, i32) {
    %c0_i32 = arith.constant 0 : i32
    %c0_i32_0 = arith.constant 0 : i32
    %c0_i32_1 = arith.constant 0 : i32
    return %c0_i32, %c0_i32_0 : i32, i32
  }
  func.func @transform_3(%arg0: i32, %arg1: i32) -> (i32, i32) {
    %c0_i32 = arith.constant 0 : i32
    %c0_i32_0 = arith.constant 0 : i32
    %c0_i32_1 = arith.constant 0 : i32
    return %c0_i32, %c0_i32_0 : i32, i32
  }
  func.func @transform_4(%arg0: i32, %arg1: i32) -> (i32, i32) {
    %c0_i32 = arith.constant 0 : i32
    %c0_i32_0 = arith.constant 0 : i32
    return %c0_i32, %arg0 : i32, i32
  }
}

module attributes {stable_mosaic.version = 11 : i64} {
  func.func @_fused_matmul_kernel(%arg0: i32, %arg1: i32, %arg2: memref<16x128xbf16, #tpu.memory_space<vmem>>, %arg3: memref<128x1280xbf16, #tpu.memory_space<vmem>>, %arg4: memref<16x1xf32, #tpu.memory_space<vmem>>, %arg5: memref<16x1xf32, #tpu.memory_space<vmem>>, %arg6: memref<16x1280xbf16, #tpu.memory_space<vmem>>, %arg7: memref<16x1280xf32, #tpu.memory_space<vmem>>) attributes {dimension_semantics = [#tpu.dimension_semantics<parallel>, #tpu.dimension_semantics<arbitrary>], iteration_bounds = array<i64: 1, 4>, scalar_prefetch = 0 : i64, scratch_operands = 1 : i64, tpu.core_type = #tpu.core_type<tc>, window_params = [{transform_indices = @transform_0, window_bounds = array<i64: 16, 128>}, {transform_indices = @transform_1, window_bounds = array<i64: 128, 1280>}, {pipeline_mode = #tpu.pipeline_mode<synchronous>, transform_indices = @transform_2, window_bounds = array<i64: 16, 1>}, {pipeline_mode = #tpu.pipeline_mode<synchronous>, transform_indices = @transform_3, window_bounds = array<i64: 16, 1>}, {transform_indices = @transform_4, window_bounds = array<i64: 16, 1280>}]} {
    %c0_i32 = arith.constant 0 : i32
    %0 = arith.cmpi eq, %arg1, %c0_i32 : i32
    %1 = arith.extui %0 : i1 to i32
    %c0_i32_0 = arith.constant 0 : i32
    %2 = arith.cmpi ne, %1, %c0_i32_0 : i32
    scf.if %2 {
      %cst_9 = arith.constant 0.000000e+00 : f32
      %12 = vector.broadcast %cst_9 : f32 to vector<16x1280xf32>
      %c0_10 = arith.constant 0 : index
      %c0_11 = arith.constant 0 : index
      %13 = vector.load %arg7[%c0_10, %c0_11] : memref<16x1280xf32, #tpu.memory_space<vmem>>, vector<16x1280xf32>
      tpu.vector_store %arg7[%c0_10, %c0_11], %12 {strides = array<i32>} : memref<16x1280xf32, #tpu.memory_space<vmem>>, vector<16x1280xf32>,
    } else {
    }
    %c0 = arith.constant 0 : index
    %c0_1 = arith.constant 0 : index
    %3 = vector.load %arg7[%c0, %c0_1] : memref<16x1280xf32, #tpu.memory_space<vmem>>, vector<16x1280xf32>
    %c0_2 = arith.constant 0 : index
    %c0_3 = arith.constant 0 : index
    %4 = vector.load %arg2[%c0_2, %c0_3] : memref<16x128xbf16, #tpu.memory_space<vmem>>, vector<16x128xbf16>
    %c0_4 = arith.constant 0 : index
    %c0_5 = arith.constant 0 : index
    %5 = vector.load %arg3[%c0_4, %c0_5] : memref<128x1280xbf16, #tpu.memory_space<vmem>>, vector<128x1280xbf16>
    %cst = arith.constant dense<0.000000e+00> : vector<16x1280xf32>
    %6 = tpu.matmul %4, %5, %cst {dimension_numbers = #tpu.dot_dimension_numbers<[1], [0], [0], [1], [0, 0, 1, 1], [], []>} : vector<16x128xbf16>, vector<128x1280xbf16>, vector<16x1280xf32> -> vector<16x1280xf32>
    %7 = arith.addf %3, %6 : vector<16x1280xf32>
    %c0_6 = arith.constant 0 : index
    %c0_7 = arith.constant 0 : index
    %8 = vector.load %arg7[%c0_6, %c0_7] : memref<16x1280xf32, #tpu.memory_space<vmem>>, vector<16x1280xf32>
    tpu.vector_store %arg7[%c0_6, %c0_7], %7 {strides = array<i32>} : memref<16x1280xf32, #tpu.memory_space<vmem>>, vector<16x1280xf32>,
    %c3_i32 = arith.constant 3 : i32
    %9 = arith.cmpi eq, %arg1, %c3_i32 : i32
    %10 = arith.extui %9 : i1 to i32
    %c0_i32_8 = arith.constant 0 : i32
    %11 = arith.cmpi ne, %10, %c0_i32_8 : i32
    scf.if %11 {
      %c0_9 = arith.constant 0 : index
      %c0_10 = arith.constant 0 : index
      %12 = vector.load %arg7[%c0_9, %c0_10] : memref<16x1280xf32, #tpu.memory_space<vmem>>, vector<16x1280xf32>
      %cst_11 = arith.constant dense<0.000000e+00> : vector<16xf32>
      %13 = vector.multi_reduction <add>, %12, %cst_11 [1] : vector<16x1280xf32> to vector<16xf32>
      %14 = vector.shape_cast %13 : vector<16xf32> to vector<16x1xf32>
      %cst_12 = arith.constant 1.280000e+03 : f32
      %15 = vector.broadcast %cst_12 : f32 to vector<16x1xf32>
      %16 = arith.divf %14, %15 : vector<16x1xf32>
      %17 = vector.broadcast %16 : vector<16x1xf32> to vector<16x1280xf32>
      %18 = arith.subf %12, %17 : vector<16x1280xf32>
      %19 = arith.mulf %18, %18 : vector<16x1280xf32>
      %cst_13 = arith.constant dense<0.000000e+00> : vector<16xf32>
      %20 = vector.multi_reduction <add>, %19, %cst_13 [1] : vector<16x1280xf32> to vector<16xf32>
      %21 = vector.shape_cast %20 : vector<16xf32> to vector<16x1xf32>
      %cst_14 = arith.constant 1.280000e+03 : f32
      %22 = vector.broadcast %cst_14 : f32 to vector<16x1xf32>
      %23 = arith.divf %21, %22 : vector<16x1xf32>
      %24 = vector.broadcast %16 : vector<16x1xf32> to vector<16x1280xf32>
      %25 = arith.subf %12, %24 : vector<16x1280xf32>
      %cst_15 = arith.constant 9.99999974E-6 : f32
      %26 = vector.broadcast %cst_15 : f32 to vector<16x1xf32>
      %27 = arith.addf %23, %26 : vector<16x1xf32>
      %28 = math.rsqrt %27 : vector<16x1xf32>
      %29 = vector.broadcast %28 : vector<16x1xf32> to vector<16x1280xf32>
      %30 = arith.mulf %25, %29 : vector<16x1280xf32>
      %c0_16 = arith.constant 0 : index
      %c0_17 = arith.constant 0 : index
      %31 = vector.load %arg4[%c0_16, %c0_17] : memref<16x1xf32, #tpu.memory_space<vmem>>, vector<16x1xf32>
      %32 = vector.broadcast %31 : vector<16x1xf32> to vector<16x1280xf32>
      %33 = arith.mulf %30, %32 : vector<16x1280xf32>
      %c0_18 = arith.constant 0 : index
      %c0_19 = arith.constant 0 : index
      %34 = vector.load %arg5[%c0_18, %c0_19] : memref<16x1xf32, #tpu.memory_space<vmem>>, vector<16x1xf32>
      %35 = vector.broadcast %34 : vector<16x1xf32> to vector<16x1280xf32>
      %36 = arith.addf %33, %35 : vector<16x1280xf32>
      %cst_20 = arith.constant 0.000000e+00 : f32
      %37 = vector.broadcast %cst_20 : f32 to vector<16x1280xf32>
      %38 = arith.maximumf %36, %37 : vector<16x1280xf32>
      %39 = arith.truncf %38 : vector<16x1280xf32> to vector<16x1280xbf16>
      %c0_21 = arith.constant 0 : index
      %c0_22 = arith.constant 0 : index
      %40 = vector.load %arg6[%c0_21, %c0_22] : memref<16x1280xbf16, #tpu.memory_space<vmem>>, vector<16x1280xbf16>
      tpu.vector_store %arg6[%c0_21, %c0_22], %39 {strides = array<i32>} : memref<16x1280xbf16, #tpu.memory_space<vmem>>, vector<16x1280xbf16>,
    } else {
    }
    return
  }
  func.func @transform_0(%arg0: i32, %arg1: i32) -> (i32, i32) {
    %c0_i32 = arith.constant 0 : i32
    %c0_i32_0 = arith.constant 0 : i32
    return %c0_i32, %arg1 : i32, i32
  }
  func.func @transform_1(%arg0: i32, %arg1: i32) -> (i32, i32) {
    %c0_i32 = arith.constant 0 : i32
    return %arg1, %arg0 : i32, i32
  }
  func.func @transform_2(%arg0: i32, %arg1: i32) -> (i32, i32) {
    %c0_i32 = arith.constant 0 : i32
    %c0_i32_0 = arith.constant 0 : i32
    %c0_i32_1 = arith.constant 0 : i32
    return %c0_i32, %c0_i32_0 : i32, i32
  }
  func.func @transform_3(%arg0: i32, %arg1: i32) -> (i32, i32) {
    %c0_i32 = arith.constant 0 : i32
    %c0_i32_0 = arith.constant 0 : i32
    %c0_i32_1 = arith.constant 0 : i32
    return %c0_i32, %c0_i32_0 : i32, i32
  }
  func.func @transform_4(%arg0: i32, %arg1: i32) -> (i32, i32) {
    %c0_i32 = arith.constant 0 : i32
    %c0_i32_0 = arith.constant 0 : i32
    return %c0_i32, %arg0 : i32, i32
  }
}

module attributes {stable_mosaic.version = 11 : i64} {
  func.func @_fused_matmul_kernel(%arg0: i32, %arg1: i32, %arg2: memref<8x128xbf16, #tpu.memory_space<vmem>>, %arg3: memref<128x5120xbf16, #tpu.memory_space<vmem>>, %arg4: memref<8x1xf32, #tpu.memory_space<vmem>>, %arg5: memref<8x1xf32, #tpu.memory_space<vmem>>, %arg6: memref<8x5120xbf16, #tpu.memory_space<vmem>>, %arg7: memref<8x5120xf32, #tpu.memory_space<vmem>>) attributes {dimension_semantics = [#tpu.dimension_semantics<parallel>, #tpu.dimension_semantics<arbitrary>], iteration_bounds = array<i64: 1, 2>, scalar_prefetch = 0 : i64, scratch_operands = 1 : i64, tpu.core_type = #tpu.core_type<tc>, window_params = [{transform_indices = @transform_0, window_bounds = array<i64: 8, 128>}, {transform_indices = @transform_1, window_bounds = array<i64: 128, 5120>}, {pipeline_mode = #tpu.pipeline_mode<synchronous>, transform_indices = @transform_2, window_bounds = array<i64: 8, 1>}, {pipeline_mode = #tpu.pipeline_mode<synchronous>, transform_indices = @transform_3, window_bounds = array<i64: 8, 1>}, {transform_indices = @transform_4, window_bounds = array<i64: 8, 5120>}]} {
    %c0_i32 = arith.constant 0 : i32
    %0 = arith.cmpi eq, %arg1, %c0_i32 : i32
    %1 = arith.extui %0 : i1 to i32
    %c0_i32_0 = arith.constant 0 : i32
    %2 = arith.cmpi ne, %1, %c0_i32_0 : i32
    scf.if %2 {
      %cst_9 = arith.constant 0.000000e+00 : f32
      %12 = vector.broadcast %cst_9 : f32 to vector<8x5120xf32>
      %c0_10 = arith.constant 0 : index
      %c0_11 = arith.constant 0 : index
      %13 = vector.load %arg7[%c0_10, %c0_11] : memref<8x5120xf32, #tpu.memory_space<vmem>>, vector<8x5120xf32>
      tpu.vector_store %arg7[%c0_10, %c0_11], %12 {strides = array<i32>} : memref<8x5120xf32, #tpu.memory_space<vmem>>, vector<8x5120xf32>,
    } else {
    }
    %c0 = arith.constant 0 : index
    %c0_1 = arith.constant 0 : index
    %3 = vector.load %arg7[%c0, %c0_1] : memref<8x5120xf32, #tpu.memory_space<vmem>>, vector<8x5120xf32>
    %c0_2 = arith.constant 0 : index
    %c0_3 = arith.constant 0 : index
    %4 = vector.load %arg2[%c0_2, %c0_3] : memref<8x128xbf16, #tpu.memory_space<vmem>>, vector<8x128xbf16>
    %c0_4 = arith.constant 0 : index
    %c0_5 = arith.constant 0 : index
    %5 = vector.load %arg3[%c0_4, %c0_5] : memref<128x5120xbf16, #tpu.memory_space<vmem>>, vector<128x5120xbf16>
    %cst = arith.constant dense<0.000000e+00> : vector<8x5120xf32>
    %6 = tpu.matmul %4, %5, %cst {dimension_numbers = #tpu.dot_dimension_numbers<[1], [0], [0], [1], [0, 0, 1, 1], [], []>} : vector<8x128xbf16>, vector<128x5120xbf16>, vector<8x5120xf32> -> vector<8x5120xf32>
    %7 = arith.addf %3, %6 : vector<8x5120xf32>
    %c0_6 = arith.constant 0 : index
    %c0_7 = arith.constant 0 : index
    %8 = vector.load %arg7[%c0_6, %c0_7] : memref<8x5120xf32, #tpu.memory_space<vmem>>, vector<8x5120xf32>
    tpu.vector_store %arg7[%c0_6, %c0_7], %7 {strides = array<i32>} : memref<8x5120xf32, #tpu.memory_space<vmem>>, vector<8x5120xf32>,
    %c1_i32 = arith.constant 1 : i32
    %9 = arith.cmpi eq, %arg1, %c1_i32 : i32
    %10 = arith.extui %9 : i1 to i32
    %c0_i32_8 = arith.constant 0 : i32
    %11 = arith.cmpi ne, %10, %c0_i32_8 : i32
    scf.if %11 {
      %c0_9 = arith.constant 0 : index
      %c0_10 = arith.constant 0 : index
      %12 = vector.load %arg7[%c0_9, %c0_10] : memref<8x5120xf32, #tpu.memory_space<vmem>>, vector<8x5120xf32>
      %cst_11 = arith.constant dense<0.000000e+00> : vector<8xf32>
      %13 = vector.multi_reduction <add>, %12, %cst_11 [1] : vector<8x5120xf32> to vector<8xf32>
      %14 = vector.shape_cast %13 : vector<8xf32> to vector<8x1xf32>
      %cst_12 = arith.constant 5.120000e+03 : f32
      %15 = vector.broadcast %cst_12 : f32 to vector<8x1xf32>
      %16 = arith.divf %14, %15 : vector<8x1xf32>
      %17 = vector.broadcast %16 : vector<8x1xf32> to vector<8x5120xf32>
      %18 = arith.subf %12, %17 : vector<8x5120xf32>
      %19 = arith.mulf %18, %18 : vector<8x5120xf32>
      %cst_13 = arith.constant dense<0.000000e+00> : vector<8xf32>
      %20 = vector.multi_reduction <add>, %19, %cst_13 [1] : vector<8x5120xf32> to vector<8xf32>
      %21 = vector.shape_cast %20 : vector<8xf32> to vector<8x1xf32>
      %cst_14 = arith.constant 5.120000e+03 : f32
      %22 = vector.broadcast %cst_14 : f32 to vector<8x1xf32>
      %23 = arith.divf %21, %22 : vector<8x1xf32>
      %24 = vector.broadcast %16 : vector<8x1xf32> to vector<8x5120xf32>
      %25 = arith.subf %12, %24 : vector<8x5120xf32>
      %cst_15 = arith.constant 9.99999974E-6 : f32
      %26 = vector.broadcast %cst_15 : f32 to vector<8x1xf32>
      %27 = arith.addf %23, %26 : vector<8x1xf32>
      %28 = math.rsqrt %27 : vector<8x1xf32>
      %29 = vector.broadcast %28 : vector<8x1xf32> to vector<8x5120xf32>
      %30 = arith.mulf %25, %29 : vector<8x5120xf32>
      %c0_16 = arith.constant 0 : index
      %c0_17 = arith.constant 0 : index
      %31 = vector.load %arg4[%c0_16, %c0_17] : memref<8x1xf32, #tpu.memory_space<vmem>>, vector<8x1xf32>
      %32 = vector.broadcast %31 : vector<8x1xf32> to vector<8x5120xf32>
      %33 = arith.mulf %30, %32 : vector<8x5120xf32>
      %c0_18 = arith.constant 0 : index
      %c0_19 = arith.constant 0 : index
      %34 = vector.load %arg5[%c0_18, %c0_19] : memref<8x1xf32, #tpu.memory_space<vmem>>, vector<8x1xf32>
      %35 = vector.broadcast %34 : vector<8x1xf32> to vector<8x5120xf32>
      %36 = arith.addf %33, %35 : vector<8x5120xf32>
      %cst_20 = arith.constant 0.000000e+00 : f32
      %37 = vector.broadcast %cst_20 : f32 to vector<8x5120xf32>
      %38 = arith.maximumf %36, %37 : vector<8x5120xf32>
      %39 = arith.truncf %38 : vector<8x5120xf32> to vector<8x5120xbf16>
      %c0_21 = arith.constant 0 : index
      %c0_22 = arith.constant 0 : index
      %40 = vector.load %arg6[%c0_21, %c0_22] : memref<8x5120xbf16, #tpu.memory_space<vmem>>, vector<8x5120xbf16>
      tpu.vector_store %arg6[%c0_21, %c0_22], %39 {strides = array<i32>} : memref<8x5120xbf16, #tpu.memory_space<vmem>>, vector<8x5120xbf16>,
    } else {
    }
    return
  }
  func.func @transform_0(%arg0: i32, %arg1: i32) -> (i32, i32) {
    %c0_i32 = arith.constant 0 : i32
    %c0_i32_0 = arith.constant 0 : i32
    return %c0_i32, %arg1 : i32, i32
  }
  func.func @transform_1(%arg0: i32, %arg1: i32) -> (i32, i32) {
    %c0_i32 = arith.constant 0 : i32
    return %arg1, %arg0 : i32, i32
  }
  func.func @transform_2(%arg0: i32, %arg1: i32) -> (i32, i32) {
    %c0_i32 = arith.constant 0 : i32
    %c0_i32_0 = arith.constant 0 : i32
    %c0_i32_1 = arith.constant 0 : i32
    return %c0_i32, %c0_i32_0 : i32, i32
  }
  func.func @transform_3(%arg0: i32, %arg1: i32) -> (i32, i32) {
    %c0_i32 = arith.constant 0 : i32
    %c0_i32_0 = arith.constant 0 : i32
    %c0_i32_1 = arith.constant 0 : i32
    return %c0_i32, %c0_i32_0 : i32, i32
  }
  func.func @transform_4(%arg0: i32, %arg1: i32) -> (i32, i32) {
    %c0_i32 = arith.constant 0 : i32
    %c0_i32_0 = arith.constant 0 : i32
    return %c0_i32, %arg0 : i32, i32
  }
}

module attributes {stable_mosaic.version = 11 : i64} {
  func.func @_fused_matmul_kernel(%arg0: i32, %arg1: i32, %arg2: memref<8x128xbf16, #tpu.memory_space<vmem>>, %arg3: memref<128x4096xbf16, #tpu.memory_space<vmem>>, %arg4: memref<8x1xf32, #tpu.memory_space<vmem>>, %arg5: memref<8x1xf32, #tpu.memory_space<vmem>>, %arg6: memref<8x4096xf32, #tpu.memory_space<vmem>>, %arg7: memref<8x4096xf32, #tpu.memory_space<vmem>>) attributes {dimension_semantics = [#tpu.dimension_semantics<parallel>, #tpu.dimension_semantics<arbitrary>], iteration_bounds = array<i64: 5, 1>, scalar_prefetch = 0 : i64, scratch_operands = 1 : i64, tpu.core_type = #tpu.core_type<tc>, window_params = [{transform_indices = @transform_0, window_bounds = array<i64: 8, 128>}, {transform_indices = @transform_1, window_bounds = array<i64: 128, 4096>}, {pipeline_mode = #tpu.pipeline_mode<synchronous>, transform_indices = @transform_2, window_bounds = array<i64: 8, 1>}, {pipeline_mode = #tpu.pipeline_mode<synchronous>, transform_indices = @transform_3, window_bounds = array<i64: 8, 1>}, {transform_indices = @transform_4, window_bounds = array<i64: 8, 4096>}]} {
    %c0_i32 = arith.constant 0 : i32
    %0 = arith.cmpi eq, %arg1, %c0_i32 : i32
    %1 = arith.extui %0 : i1 to i32
    %c0_i32_0 = arith.constant 0 : i32
    %2 = arith.cmpi ne, %1, %c0_i32_0 : i32
    scf.if %2 {
      %cst_10 = arith.constant 0.000000e+00 : f32
      %12 = vector.broadcast %cst_10 : f32 to vector<8x4096xf32>
      %c0_11 = arith.constant 0 : index
      %c0_12 = arith.constant 0 : index
      %13 = vector.load %arg7[%c0_11, %c0_12] : memref<8x4096xf32, #tpu.memory_space<vmem>>, vector<8x4096xf32>
      tpu.vector_store %arg7[%c0_11, %c0_12], %12 {strides = array<i32>} : memref<8x4096xf32, #tpu.memory_space<vmem>>, vector<8x4096xf32>,
    } else {
    }
    %c0 = arith.constant 0 : index
    %c0_1 = arith.constant 0 : index
    %3 = vector.load %arg7[%c0, %c0_1] : memref<8x4096xf32, #tpu.memory_space<vmem>>, vector<8x4096xf32>
    %c0_2 = arith.constant 0 : index
    %c0_3 = arith.constant 0 : index
    %4 = vector.load %arg2[%c0_2, %c0_3] : memref<8x128xbf16, #tpu.memory_space<vmem>>, vector<8x128xbf16>
    %c0_4 = arith.constant 0 : index
    %c0_5 = arith.constant 0 : index
    %5 = vector.load %arg3[%c0_4, %c0_5] : memref<128x4096xbf16, #tpu.memory_space<vmem>>, vector<128x4096xbf16>
    %cst = arith.constant dense<0.000000e+00> : vector<8x4096xf32>
    %6 = tpu.matmul %4, %5, %cst {dimension_numbers = #tpu.dot_dimension_numbers<[1], [0], [0], [1], [0, 0, 1, 1], [], []>} : vector<8x128xbf16>, vector<128x4096xbf16>, vector<8x4096xf32> -> vector<8x4096xf32>
    %7 = arith.addf %3, %6 : vector<8x4096xf32>
    %c0_6 = arith.constant 0 : index
    %c0_7 = arith.constant 0 : index
    %8 = vector.load %arg7[%c0_6, %c0_7] : memref<8x4096xf32, #tpu.memory_space<vmem>>, vector<8x4096xf32>
    tpu.vector_store %arg7[%c0_6, %c0_7], %7 {strides = array<i32>} : memref<8x4096xf32, #tpu.memory_space<vmem>>, vector<8x4096xf32>,
    %c0_i32_8 = arith.constant 0 : i32
    %9 = arith.cmpi eq, %arg1, %c0_i32_8 : i32
    %10 = arith.extui %9 : i1 to i32
    %c0_i32_9 = arith.constant 0 : i32
    %11 = arith.cmpi ne, %10, %c0_i32_9 : i32
    scf.if %11 {
      %c0_10 = arith.constant 0 : index
      %c0_11 = arith.constant 0 : index
      %12 = vector.load %arg7[%c0_10, %c0_11] : memref<8x4096xf32, #tpu.memory_space<vmem>>, vector<8x4096xf32>
      %13 = math.tanh %12 : vector<8x4096xf32>
      %c0_12 = arith.constant 0 : index
      %c0_13 = arith.constant 0 : index
      %14 = vector.load %arg6[%c0_12, %c0_13] : memref<8x4096xf32, #tpu.memory_space<vmem>>, vector<8x4096xf32>
      tpu.vector_store %arg6[%c0_12, %c0_13], %13 {strides = array<i32>} : memref<8x4096xf32, #tpu.memory_space<vmem>>, vector<8x4096xf32>,
    } else {
    }
    return
  }
  func.func @transform_0(%arg0: i32, %arg1: i32) -> (i32, i32) {
    %c0_i32 = arith.constant 0 : i32
    %c0_i32_0 = arith.constant 0 : i32
    return %c0_i32, %arg1 : i32, i32
  }
  func.func @transform_1(%arg0: i32, %arg1: i32) -> (i32, i32) {
    %c0_i32 = arith.constant 0 : i32
    return %arg1, %arg0 : i32, i32
  }
  func.func @transform_2(%arg0: i32, %arg1: i32) -> (i32, i32) {
    %c0_i32 = arith.constant 0 : i32
    %c0_i32_0 = arith.constant 0 : i32
    %c0_i32_1 = arith.constant 0 : i32
    return %c0_i32, %c0_i32_0 : i32, i32
  }
  func.func @transform_3(%arg0: i32, %arg1: i32) -> (i32, i32) {
    %c0_i32 = arith.constant 0 : i32
    %c0_i32_0 = arith.constant 0 : i32
    %c0_i32_1 = arith.constant 0 : i32
    return %c0_i32, %c0_i32_0 : i32, i32
  }
  func.func @transform_4(%arg0: i32, %arg1: i32) -> (i32, i32) {
    %c0_i32 = arith.constant 0 : i32
    %c0_i32_0 = arith.constant 0 : i32
    return %c0_i32, %arg0 : i32, i32
  }
}

</mosaic_0001>

<bundles_post_ra>
// kernel: netg_forward.5
= control target key start
LH: loop header
LB: loop body
LE: loop exit
PB: predicated region body
PF: predicated region fallthrough
CT: control target
= control target key end

     0   :  { %9 = vsyncpa [#allocation4], 0  ;;  %s1425_s0 = inlined_call_operand.hbm [shape: bf16[64,512], index: 0, kind: input, shape index: {}]   ;;  %s1426_s1 = inlined_call_operand.vmem [shape: bf16[512,64], index: 1, kind: input, shape index: {}]   ;;  %s1427_s2 = inlined_call_operand.vmem [shape: f32[64,1], index: 2, kind: input, shape index: {}]   ;;  %s1428_s3 = inlined_call_operand.vmem [shape: f32[64,1], index: 3, kind: input, shape index: {}]   ;;  %s1429_s4 = inlined_call_operand.vmem [shape: bf16[64,64], index: 4, kind: output, shape index: {}]  }
   0x1   :  { %11 = vsyncpa [#allocation4 + $0x1], 0  ;;  %s1118_s15 = smov 0   ;;  %s1120_s16 = smov 0  }
   0x2   :  { %s1122_s17 = smov 0   ;;  %s1124_s18 = smov 0  }
   0x3   :  { %s1126_s19 = smov 0   ;;  %s1128_s20 = smov 0  }
   0x4 LB: > { %s823_s21 = sadd.s32 4294967295, %s1085_s20   ;;  %s26_s22 = sadd.s32 1, %s1081_s19  ;;  %s1085_s20 = sphi %s1128_s20, %s17_s20   ;;  %s1081_s19 = sphi %s1126_s19, %s1437_s19   ;;  %s1077_s18 = sphi %s1124_s18, %s1436_s18   ;;  %s1073_s17 = sphi %s1122_s17, %s1435_s17   ;;  %s1069_s16 = sphi %s1120_s16, %s1434_s16   ;;  %s1065_s15 = sphi %s1118_s15, %s1433_s15  }
   0x5   : > { %p27_p0 = scmp.ge.s32.totalorder %s26_s22, 4  ;;  %s36_s23 = sadd.s32 1, %s1073_s17 }
   0x6   : > { %p43_p1 = scmp.ne.s32.totalorder %s1073_s17, %s1069_s16  ;;  %p44_p2 = scmp.eq.s32.totalorder %s1085_s20, 0 }
   0x7   : > { %s1439_s22 = smov (%p27_p0, %s26_s22), 0  ;;  %p49_p4 = scmp.ne.s32.totalorder %s1069_s16, %s1065_s15 }
   0x8   : > { %p1154_p3 = por %p44_p2, %p43_p1  ;;  %s33_s25 = ssub.s32 %s1081_s19, %s1439_s22 }
   0x9   : > { %p50_p5 = scmp.eq.s32.totalorder %s823_s21, 0  ;;  %p34_p6 = scmp.eq.s32.totalorder %s33_s25, 0 }
   0xa   : > { %p923_p8 = scmp.lt.s32.totalorder %s1085_s20, 4  ;;  %s175_s28 = sand.u32 1, %s1073_s17  }
   0xb   : > { %p1161_p7 = por %p50_p5, %p49_p4  ;;  %s827_s29 = sshll.u32 %s1081_s19, 6 }
   0xc   : > { %s1167_s27 = scalar_select %p34_p6, %s1073_s17, %s36_s23  }
   0xd   : > { %s826_s30 = sshll.u32 %s175_s28, 5  ;;  %s184_s7 = scalar_lea.hbm %s1425_s0, %s827_s29 }
   0xe   : > { %s179_s8 = scalar_lea.vmem [#allocation3], %s826_s30  ;;  %p1176_p9 = pnand %p923_p8, %p1154_p3 }
   0xf   : > { %s185_s9 = sshll.u32 %s179_s8, 4  ;;  %p828_p10 = scmp.ge.s32.totalorder %s1085_s20, 1  ;;  %s186_s9 = int_to_ptr.vmem [resolvable:$true] %s185_s9 }
  0x10   : > { %s176_s11 = scalar_lea.sflag [#allocation4], %s175_s28  ;;  %p1009_p11 = pneg %p1176_p9 }
  0x11   : > { %s1020_s12 = scalar_lea.vmem %s186_s9, 512  ;;  %s1087_s13 = smov [#allocation3]  }
  0x12   : > { %p1021_p12 = scmp.ne.s32.totalorder %s186_s9, %s1020_s12  ;;  %s1025_s14 = sshll.u32 %s1087_s13, 4  ;;  %s1026_s14 = int_to_ptr.vmem [resolvable:$false] %s1025_s14 }
  0x13   : > { %s1027_s15 = scalar_lea.vmem %s1026_s14, 1024  ;;  %p1028_p1 = scmp.lt.s32.totalorder %s186_s9, %s1026_s14 }
  0x14   : > { %p1023_p13 = pnand %p1021_p12, %p1009_p11  ;;  %p1029_p2 = scmp.lt.s32.totalorder %s1027_s15, %s1020_s12 }
  0x16   : > { %p1024_p0 = pneg %p1023_p13  ;;  %p1030_p3 = por %p1029_p2, %p1028_p1 }
  0x18   : > { %p1031_p4 = pnand %p1030_p3, %p1024_p0 }
  0x1a   : > { %1034 = shalt.err (!%p1031_p4)
}
  0x1b   : > { %s1088_s21 = smov 256   ;;  %s1089_s23 = smov 64  }
  0x1c   : > { %s1090_s24 = smov 4   ;;  %p205_p5 = scmp.lt.s32.totalorder %s1085_s20, 5 }
  0x1d   : > { %922 = dma.hbm_to_vmem [thread:$0]  (!%p1176_p9), %s184_s7, 512, %s186_s9, %s176_s11, %s1088_s21, %s1089_s23, %s1090_s24  }
  0x1e   : > { %p206_p6 = pnand %p828_p10, %p205_p5 }
  0x1f   : > { %s211_s25 = sand.u32 (!%p206_p6), 1, %s1069_s16  }
  0x20   : > { %209 = sbr.rel (%p206_p6) target bundleno = 617 (0x269), region = 36  ;;  %s829_s28 = sshll.u32 (!%p206_p6), %s211_s25, 5 }
  0x21   : > { %s212_s29 = scalar_lea.sflag (!%p206_p6), [#allocation4], %s211_s25  ;;  %s1189_s30 = scalar_lea.vmem (!%p206_p6), [#allocation3], %s829_s28 }
  0x25   : > { %1060 = dma.done.wait (%p1161_p7), %s212_s29, 512  }
  0x26   : > { %1062 = vsyncadd (%p1161_p7), %s212_s29, 4294966784  ;;  %s830_s5 = sshll.u32 %s1077_s18, 4  ;;  %p832_p9 = scmp.ne.s32.totalorder %s1077_s18, 0 }
  0x27   : > { %p248_p8 = scmp.lt.s32.totalorder %s830_s5, 63 }
  0x28   : > { %264 = sbr.rel (%p832_p9) target bundleno = 50 (0x32), region = 44 }
  0x29   : > { %s1441_s5 = smov (!%p248_p8, %s830_s5), 63 }
  0x2a   : > { %s831_s6 = sshll.u32 %s1441_s5, 2 }
  0x2b   : > { %s1199_s9 = scalar_lea.vmem %s1426_s1, %s831_s6 }
  0x2d   : > { %vm265_vm0 = vcmask 523264   ;;  %v1091_v0 = vmov 0.0  }
  0x2e   : > { %266 = vst.msk [vmem:[#allocation2] sm:$0xff] %vm265_vm0, %v1091_v0  ;;  %267 = vst.msk [vmem:[#allocation2 + $0x8] sm:$0xff] %vm265_vm0, %v1091_v0 }
  0x2f   : > { %268 = vst.msk [vmem:[#allocation2 + $0x10] sm:$0xff] %vm265_vm0, %v1091_v0  ;;  %269 = vst.msk [vmem:[#allocation2 + $0x18] sm:$0xff] %vm265_vm0, %v1091_v0 }
  0x30   : > { %270 = vst.msk [vmem:[#allocation2 + $0x20] sm:$0xff] %vm265_vm0, %v1091_v0  ;;  %271 = vst.msk [vmem:[#allocation2 + $0x28] sm:$0xff] %vm265_vm0, %v1091_v0 }
  0x31   : > { %272 = vst.msk [vmem:[#allocation2 + $0x30] sm:$0xff] %vm265_vm0, %v1091_v0  ;;  %273 = vst.msk [vmem:[#allocation2 + $0x38] sm:$0xff] %vm265_vm0, %v1091_v0 }
  0x32 PF: > { %v977_v1 = vld [vmem:[%s1199_s9 + $0x38] sm:$0xff]   ;;  %v978_v2 = vld [vmem:[%s1199_s9 + $0x30] sm:$0xff]   ;;  %v979_v3 = vld [vmem:[%s1199_s9 + $0x28] sm:$0xff]   ;;  %vm451_vm1 = vcmask 523264   ;;  %p845_p7 = scmp.ne.s32.totalorder %s1077_s18, 3 }
  0x33   : > { %877 = vmatprep.subr.bf16.mxu0 %v977_v1  ;;  %901 = vmatprep.subr.bf16.mxu1 %v977_v1  ;;  %v980_v4 = vld [vmem:[%s1199_s9 + $0x20] sm:$0xff]   ;;  %v986_v6 = vld [vmem:[%s1189_s30 + $0x10] sm:$0xff]   ;;  %v981_v7 = vld [vmem:[%s1199_s9 + $0x18] sm:$0xff]  }
  0x34   : > { %878 = vmatpush3.bf16.msra.mxu0 %v977_v1  ;;  %909 = vmatpush3.bf16.msra.mxu1 %v977_v1  ;;  %v985_v5 = vld [vmem:[%s1189_s30] sm:$0xff]   ;;  %v982_v8 = vld [vmem:[%s1199_s9 + $0x10] sm:$0xff]   ;;  %v983_v9 = vld [vmem:[%s1199_s9 + $0x8] sm:$0xff]  }
  0x35   : > { %879 = vmatprep.subr.bf16.mxu0 %v978_v2  ;;  %902 = vmatprep.subr.bf16.mxu1 %v978_v2  ;;  %v984_v10 = vld [vmem:[%s1199_s9] sm:$0xff]   ;;  %v987_v11 = vld [vmem:[%s1189_s30 + $0x8] sm:$0xff]   ;;  %v988_v12 = vld [vmem:[%s1189_s30 + $0x18] sm:$0xff]  }
  0x36   : > { %893 = vmatprep.mubr.bf16.mxu0 %v985_v5  ;;  %897 = vmatprep.mubr.bf16.mxu1 %v986_v6  ;;  %v276_v13 = vld [vmem:[#allocation2 + $0x10] sm:$0xff]  ;;  %v274_v17 = vld [vmem:[#allocation2] sm:$0xff]  ;;  %v277_v23 = vld [vmem:[#allocation2 + $0x18] sm:$0xff] }
  0x37   : > { %v278_v18 = vld [vmem:[#allocation2 + $0x20] sm:$0xff]  ;;  %v275_v29 = vld [vmem:[#allocation2 + $0x8] sm:$0xff] }
  0x38   : > { %880 = vmatpush3.bf16.msra.mxu0 %v978_v2  ;;  %910 = vmatpush3.bf16.msra.mxu1 %v978_v2  ;;  %v280_v14 = vld [vmem:[#allocation2 + $0x30] sm:$0xff]  ;;  %v281_v24 = vld [vmem:[#allocation2 + $0x38] sm:$0xff]  ;;  %v279_v30 = vld [vmem:[#allocation2 + $0x28] sm:$0xff] }
  0x39   : > { %881 = vmatprep.subr.bf16.mxu0 %v979_v3  ;;  %903 = vmatprep.subr.bf16.mxu1 %v979_v3 }
  0x3c   : > { %882 = vmatpush3.bf16.msra.mxu0 %v979_v3  ;;  %911 = vmatpush3.bf16.msra.mxu1 %v979_v3 }
  0x3d   : > { %883 = vmatprep.subr.bf16.mxu0 %v980_v4  ;;  %904 = vmatprep.subr.bf16.mxu1 %v980_v4 }
  0x40   : > { %884 = vmatpush3.bf16.msra.mxu0 %v980_v4  ;;  %912 = vmatpush3.bf16.msra.mxu1 %v980_v4 }
  0x41   : > { %885 = vmatprep.subr.bf16.mxu0 %v981_v7  ;;  %905 = vmatprep.subr.bf16.mxu1 %v981_v7 }
  0x44   : > { %886 = vmatpush3.bf16.msra.mxu0 %v981_v7  ;;  %913 = vmatpush3.bf16.msra.mxu1 %v981_v7 }
  0x45   : > { %887 = vmatprep.subr.bf16.mxu0 %v982_v8  ;;  %906 = vmatprep.subr.bf16.mxu1 %v982_v8 }
  0x48   : > { %888 = vmatpush3.bf16.msra.mxu0 %v982_v8  ;;  %914 = vmatpush3.bf16.msra.mxu1 %v982_v8 }
  0x49   : > { %889 = vmatprep.subr.bf16.mxu0 %v983_v9  ;;  %907 = vmatprep.subr.bf16.mxu1 %v983_v9 }
  0x4c   : > { %890 = vmatpush3.bf16.msra.mxu0 %v983_v9  ;;  %915 = vmatpush3.bf16.msra.mxu1 %v983_v9 }
  0x4d   : > { %891 = vmatprep.subr.bf16.mxu0 %v984_v10  ;;  %908 = vmatprep.subr.bf16.mxu1 %v984_v10 }
  0x50   : > { %892 = vmatpush3.bf16.msra.mxu0 %v984_v10  ;;  %916 = vmatpush3.bf16.msra.mxu1 %v984_v10 }
  0x53   : > { %894 = vmatmul.mubr.bf16.vlgmr.msra.gmra.mxu0 %v987_v11  ;;  %898 = vmatmul.mubr.bf16.vlgmr.msra.gmra.mxu1 %v988_v12 }
 0x113   : > { %v895_v15 = vpop.f32.mrf.mxu0  ;;  %v899_v16 = vpop.f32.mrf.mxu1 }
 0x114   : > { %v445_v19 = vadd.f32 %v895_v15, %v276_v13  ;;  %v449_v20 = vadd.f32 %v899_v16, %v280_v14 }
 0x115   : > { %v412_v21 = vpop.f32.mrf.mxu0  ;;  %v428_v22 = vpop.f32.mrf.mxu1 }
 0x116   : > { %454 = vst.msk [vmem:[#allocation2 + $0x10] sm:$0xff] %vm451_vm1, %v445_v19  ;;  %458 = vst.msk [vmem:[#allocation2 + $0x30] sm:$0xff] %vm451_vm1, %v449_v20  ;;  %v443_v25 = vadd.f32 %v412_v21, %v274_v17  ;;  %v447_v26 = vadd.f32 %v428_v22, %v278_v18 }
 0x117   : > { %v896_v27 = vpop.f32.mrf.mxu0  ;;  %v900_v28 = vpop.f32.mrf.mxu1 }
 0x118   : > { %452 = vst.msk [vmem:[#allocation2] sm:$0xff] %vm451_vm1, %v443_v25  ;;  %456 = vst.msk [vmem:[#allocation2 + $0x20] sm:$0xff] %vm451_vm1, %v447_v26  ;;  %v446_v31 = vadd.f32 %v896_v27, %v277_v23  ;;  %v450_v32 = vadd.f32 %v900_v28, %v281_v24  ;;  %463 = sbr.rel (%p845_p7) target bundleno = 617 (0x269), region = 48 }
 0x119   : > { %v415_v33 = vpop.f32.mrf.mxu0  ;;  %v431_v34 = vpop.f32.mrf.mxu1 }
 0x11a   : > { %455 = vst.msk [vmem:[#allocation2 + $0x18] sm:$0xff] %vm451_vm1, %v446_v31  ;;  %459 = vst.msk [vmem:[#allocation2 + $0x38] sm:$0xff] %vm451_vm1, %v450_v32  ;;  %v444_v35 = vadd.f32 %v415_v33, %v275_v29  ;;  %v448_v36 = vadd.f32 %v431_v34, %v279_v30 }
 0x11c   : > { %453 = vst.msk [vmem:[#allocation2 + $0x8] sm:$0xff] %vm451_vm1, %v444_v35  ;;  %457 = vst.msk [vmem:[#allocation2 + $0x28] sm:$0xff] %vm451_vm1, %v448_v36 }
 0x11d   : > { %v466_v38 = vld [vmem:[#allocation2 + $0x10] sm:$0xff]  ;;  %v1092_v43 = vmov 0   ;;  %v578_v54 = vld [vmem:[%s1427_s2 + $0x8] sm:$0xff]  ;;  %v577_v56 = vld [vmem:[%s1427_s2] sm:$0xff]  ;;  %vm729_vm2 = vcmask 519168  }
 0x11e   : > { %v478_v41 = vsel %vm451_vm1, %v466_v38, 0.0  ;;  %990 = vset.pattern.permute.xlu1 %v1092_v43  ;;  %989 = vset.pattern.permute.xlu0 %v1092_v43  ;;  %v1241_v50 = vld [vmem:[#allocation2 + $0x30] sm:$0xff]  ;;  %v580_v57 = vld [vmem:[%s1427_s2 + $0x18] sm:$0xff]  ;;  %v634_v58 = vld [vmem:[%s1428_s3 + $0x8] sm:$0xff] }
 0x11f   : > { %v464_v37 = vld [vmem:[#allocation2] sm:$0xff]  ;;  %479 = vadd.xlane.f32.xlu1 %v478_v41  ;;  %v490_v52 = vsel %vm451_vm1, %v1241_v50, 0.0  ;;  %v579_v55 = vld [vmem:[%s1427_s2 + $0x10] sm:$0xff]  ;;  %v636_v60 = vld [vmem:[%s1428_s3 + $0x18] sm:$0xff] }
 0x120   : > { %v472_v40 = vsel %vm451_vm1, %v464_v37, 0.0  ;;  %v1233_v46 = vld [vmem:[#allocation2 + $0x20] sm:$0xff]  ;;  %v582_v61 = vld [vmem:[%s1427_s2 + $0x28] sm:$0xff]  ;;  %v583_v63 = vld [vmem:[%s1427_s2 + $0x30] sm:$0xff] }
 0x121   : > { %v1227_v42 = vld [vmem:[#allocation2 + $0x18] sm:$0xff]  ;;  %473 = vadd.xlane.f32.xlu0 %v472_v40  ;;  %v484_v48 = vsel %vm451_vm1, %v1233_v46, 0.0  ;;  %v581_v59 = vld [vmem:[%s1427_s2 + $0x20] sm:$0xff]  ;;  %v638_v62 = vld [vmem:[%s1428_s3 + $0x28] sm:$0xff] }
 0x122   : > { %v481_v45 = vsel %vm451_vm1, %v1227_v42, 0.0  ;;  %v1243_v51 = vld [vmem:[#allocation2 + $0x38] sm:$0xff]  ;;  %v633_v1 = vld [vmem:[%s1428_s3] sm:$0xff]  ;;  %v635_v2 = vld [vmem:[%s1428_s3 + $0x10] sm:$0xff] }
 0x123   : > { %v1223_v39 = vld [vmem:[#allocation2 + $0x8] sm:$0xff]  ;;  %482 = vadd.xlane.f32.xlu1 %v481_v45  ;;  %v493_v53 = vsel %vm451_vm1, %v1243_v51, 0.0  ;;  %v584_v0 = vld [vmem:[%s1427_s2 + $0x38] sm:$0xff]  ;;  %v637_v3 = vld [vmem:[%s1428_s3 + $0x20] sm:$0xff] }
 0x124   : > { %v475_v44 = vsel %vm451_vm1, %v1223_v39, 0.0  ;;  %v1235_v47 = vld [vmem:[#allocation2 + $0x28] sm:$0xff]  ;;  %v640_v45 = vld [vmem:[%s1428_s3 + $0x38] sm:$0xff] }
 0x125   : > { %476 = vadd.xlane.f32.xlu0 %v475_v44  ;;  %v487_v49 = vsel %vm451_vm1, %v1235_v47, 0.0  ;;  %v639_v44 = vld [vmem:[%s1428_s3 + $0x30] sm:$0xff] }
 0x127   : > { %488 = vadd.xlane.f32.xlu1 %v487_v49 }
 0x129   : > { %485 = vadd.xlane.f32.xlu0 %v484_v48 }
 0x12b   : > { %494 = vadd.xlane.f32.xlu1 %v493_v53 }
 0x12d   : > { %491 = vadd.xlane.f32.xlu0 %v490_v52 }
 0x13c   : > { %592 = vperm.xlu1 %990, %v578_v54  }
 0x140   : > { %597 = vperm.xlu1 %990, %v579_v55  }
 0x143   : > { %587 = vperm.xlu0 %989, %v577_v56  }
 0x144   : > { %602 = vperm.xlu1 %990, %v580_v57  }
 0x147   : > { %648 = vperm.xlu0 %989, %v634_v58  }
 0x148   : > { %607 = vperm.xlu1 %990, %v581_v59  }
 0x14b   : > { %658 = vperm.xlu0 %989, %v636_v60  }
 0x14c   : > { %612 = vperm.xlu1 %990, %v582_v61  }
 0x14f   : > { %668 = vperm.xlu0 %989, %v638_v62  }
 0x150   : > { %617 = vperm.xlu1 %990, %v583_v63  }
 0x154   : > { %622 = vperm.xlu1 %990, %v584_v0  }
 0x158   : > { %643 = vperm.xlu1 %990, %v633_v1  }
 0x15c   : > { %653 = vperm.xlu1 %990, %v635_v2  }
 0x160   : > { %663 = vperm.xlu1 %990, %v637_v3  }
 0x1a8   : > { %v480_v5 = vpop.xlane.xlu1 %479 }
 0x1a9   : > { %v499_v7 = vmul.f32 0.015625, %v480_v5 }
 0x1aa   : > { %v474_v4 = vpop.xlane.xlu0 %473 }
 0x1ab   : > { %v497_v6 = vmul.f32 0.015625, %v474_v4  ;;  %v1293_v9 = vsub.f32 %v466_v38, %v499_v7 }
 0x1ac   : > { %v483_v11 = vpop.xlane.xlu1 %482 }
 0x1ad   : > { %v1291_v8 = vsub.f32 %v464_v37, %v497_v6  ;;  %v500_v13 = vmul.f32 0.015625, %v483_v11  ;;  %v515_v15 = vmul.f32 %v1293_v9, %v1293_v9 }
 0x1ae   : > { %v477_v10 = vpop.xlane.xlu0 %476 }
 0x1af   : > { %v498_v12 = vmul.f32 0.015625, %v477_v10  ;;  %v513_v14 = vmul.f32 %v1291_v8, %v1291_v8  ;;  %v1303_v17 = vsub.f32 %v1227_v42, %v500_v13  ;;  %v527_v21 = vsel %vm451_vm1, %v515_v15, 0.0 }
 0x1b0   : > { %v489_v20 = vpop.xlane.xlu1 %488 }
 0x1b1   : > { %v1300_v16 = vsub.f32 %v1223_v39, %v498_v12  ;;  %v521_v18 = vsel %vm451_vm1, %v513_v14, 0.0  ;;  %v502_v23 = vmul.f32 0.015625, %v489_v20  ;;  %v516_v25 = vmul.f32 %v1303_v17, %v1303_v17 }
 0x1b2   : > { %522 = vadd.xlane.f32.xlu0 %v521_v18  ;;  %v486_v19 = vpop.xlane.xlu0 %485 }
 0x1b3   : > { %v501_v22 = vmul.f32 0.015625, %v486_v19  ;;  %v514_v24 = vmul.f32 %v1300_v16, %v1300_v16  ;;  %v1315_v27 = vsub.f32 %v1235_v47, %v502_v23  ;;  %v530_v31 = vsel %vm451_vm1, %v516_v25, 0.0 }
 0x1b4   : > { %v495_v30 = vpop.xlane.xlu1 %494 }
 0x1b5   : > { %v1312_v26 = vsub.f32 %v1233_v46, %v501_v22  ;;  %v524_v28 = vsel %vm451_vm1, %v514_v24, 0.0  ;;  %v504_v33 = vmul.f32 0.015625, %v495_v30  ;;  %v518_v35 = vmul.f32 %v1315_v27, %v1315_v27 }
 0x1b6   : > { %528 = vadd.xlane.f32.xlu0 %v527_v21  ;;  %525 = vadd.xlane.f32.xlu1 %v524_v28  ;;  %v492_v29 = vpop.xlane.xlu0 %491 }
 0x1b7   : > { %v503_v32 = vmul.f32 0.015625, %v492_v29  ;;  %v517_v34 = vmul.f32 %v1312_v26, %v1312_v26  ;;  %v1327_v37 = vsub.f32 %v1243_v51, %v504_v33  ;;  %v536_v39 = vsel %vm451_vm1, %v518_v35, 0.0 }
 0x1b8   : > { %v593_v46 = vpop.permute.xlu1 %592 }
 0x1b9   : > { %v1324_v36 = vsub.f32 %v1241_v50, %v503_v32  ;;  %v533_v38 = vsel %vm451_vm1, %v517_v34, 0.0  ;;  %v520_v41 = vmul.f32 %v1327_v37, %v1327_v37 }
 0x1ba   : > { %531 = vadd.xlane.f32.xlu1 %v530_v31  ;;  %534 = vadd.xlane.f32.xlu0 %v533_v38 }
 0x1bb   : > { %v519_v40 = vmul.f32 %v1324_v36, %v1324_v36  ;;  %v542_v43 = vsel %vm451_vm1, %v520_v41, 0.0 }
 0x1bc   : > { %v598_v47 = vpop.permute.xlu1 %597 }
 0x1bd   : > { %v539_v42 = vsel %vm451_vm1, %v519_v40, 0.0 }
 0x1be   : > { %537 = vadd.xlane.f32.xlu1 %v536_v39  ;;  %540 = vadd.xlane.f32.xlu0 %v539_v42  ;;  %v588_v52 = vpop.permute.xlu0 %587 }
 0x1c0   : > { %v1343_v48 = vpop.permute.xlu1 %602 }
 0x1c2   : > { %543 = vadd.xlane.f32.xlu1 %v542_v43  ;;  %v649_v54 = vpop.permute.xlu0 %648 }
 0x1c4   : > { %v1345_v49 = vpop.permute.xlu1 %607 }
 0x1c6   : > { %v1353_v56 = vpop.permute.xlu0 %658 }
 0x1c8   : > { %v1347_v50 = vpop.permute.xlu1 %612 }
 0x1ca   : > { %v1355_v58 = vpop.permute.xlu0 %668 }
 0x1cc   : > { %v1349_v51 = vpop.permute.xlu1 %617 }
 0x1d0   : > { %v1351_v53 = vpop.permute.xlu1 %622 }
 0x1d3   : > { %673 = vperm.xlu1 %990, %v639_v44  }
 0x1d4   : > { %678 = vperm.xlu0 %989, %v640_v45   ;;  %v644_v55 = vpop.permute.xlu1 %643 }
 0x1d8   : > { %v654_v57 = vpop.permute.xlu1 %653 }
 0x1dc   : > { %v1357_v59 = vpop.permute.xlu1 %663 }
 0x23b   : > { %v523_v60 = vpop.xlane.xlu0 %522 }
 0x23c   : > { %v545_v61 = vmul.f32 0.015625, %v523_v60 }
 0x23e   : > { %v553_v62 = vadd.f32 1e-05, %v545_v61 }
 0x23f   : > { %v526_v63 = vpop.xlane.xlu1 %525  ;;  %v529_v0 = vpop.xlane.xlu0 %528 }
 0x240   : > { %991 = vrsqrt.f32 %v553_v62  ;;  %v546_v1 = vmul.f32 0.015625, %v526_v63  ;;  %v547_v2 = vmul.f32 0.015625, %v529_v0 }
 0x242   : > { %v554_v3 = vadd.f32 1e-05, %v546_v1  ;;  %v555_v4 = vadd.f32 1e-05, %v547_v2 }
 0x243   : > { %v532_v5 = vpop.xlane.xlu1 %531  ;;  %v535_v6 = vpop.xlane.xlu0 %534 }
 0x244   : > { %993 = vrsqrt.f32 %v554_v3  ;;  %v548_v7 = vmul.f32 0.015625, %v532_v5  ;;  %v549_v10 = vmul.f32 0.015625, %v535_v6 }
 0x245   : > { %995 = vrsqrt.f32 %v555_v4 }
 0x246   : > { %v556_v11 = vadd.f32 1e-05, %v548_v7  ;;  %v557_v12 = vadd.f32 1e-05, %v549_v10 }
 0x247   : > { %v538_v13 = vpop.xlane.xlu1 %537  ;;  %v541_v14 = vpop.xlane.xlu0 %540 }
 0x248   : > { %997 = vrsqrt.f32 %v556_v11  ;;  %v550_v15 = vmul.f32 0.015625, %v538_v13  ;;  %v551_v18 = vmul.f32 0.015625, %v541_v14 }
 0x249   : > { %999 = vrsqrt.f32 %v557_v12 }
 0x24a   : > { %v558_v19 = vadd.f32 1e-05, %v550_v15  ;;  %v559_v20 = vadd.f32 1e-05, %v551_v18 }
 0x24b   : > { %v544_v21 = vpop.xlane.xlu1 %543 }
 0x24c   : > { %1001 = vrsqrt.f32 %v558_v19  ;;  %v552_v22 = vmul.f32 0.015625, %v544_v21 }
 0x24d   : > { %v992_v23 = vpop.eup %991  ;;  %1003 = vrsqrt.f32 %v559_v20 }
 0x24e   : > { %v569_v24 = vmul.f32 %v992_v23, %v1291_v8  ;;  %v560_v25 = vadd.f32 1e-05, %v552_v22 }
 0x250   : > { %v625_v28 = vmul.f32 %v588_v52, %v569_v24  ;;  %1005 = vrsqrt.f32 %v560_v25 }
 0x251   : > { %v994_v29 = vpop.eup %993 }
 0x252   : > { %v996_v30 = vpop.eup %995  ;;  %v681_v31 = vadd.f32 %v644_v55, %v625_v28  ;;  %v570_v32 = vmul.f32 %v994_v29, %v1300_v16 }
 0x253   : > { %v571_v33 = vmul.f32 %v996_v30, %v1293_v9 }
 0x254   : > { %v689_v34 = vmax.f32 %v681_v31, 0.0  ;;  %v626_v35 = vmul.f32 %v593_v46, %v570_v32 }
 0x255   : > { %v998_v38 = vpop.eup %997  ;;  %v627_v39 = vmul.f32 %v598_v47, %v571_v33 }
 0x256   : > { %v1000_v40 = vpop.eup %999  ;;  %v857_v41 = vpack.c.bf16 %v689_v34, %v689_v34  ;;  %v682_v42 = vadd.f32 %v649_v54, %v626_v35  ;;  %v572_v8 = vmul.f32 %v998_v38, %v1303_v17 }
 0x257   : > { %v683_v43 = vadd.f32 %v654_v57, %v627_v39  ;;  %v573_v44 = vmul.f32 %v1000_v40, %v1312_v26 }
 0x258   : > { %v690_v45 = vmax.f32 %v682_v42, 0.0  ;;  %v628_v52 = vmul.f32 %v1343_v48, %v572_v8  ;;  %730 = vst.msk [vmem:[%s1429_s4] sm:$0xf] %vm729_vm2, %v857_v41 }
 0x259   : > { %v1002_v9 = vpop.eup %1001  ;;  %v691_v16 = vmax.f32 %v683_v43, 0.0  ;;  %v629_v46 = vmul.f32 %v1345_v49, %v573_v44 }
 0x25a   : > { %v1004_v47 = vpop.eup %1003  ;;  %v858_v55 = vpack.c.bf16 %v690_v45, %v690_v45  ;;  %v684_v54 = vadd.f32 %v1353_v56, %v628_v52  ;;  %v574_v17 = vmul.f32 %v1002_v9, %v1315_v27  ;;  %v674_v56 = vpop.permute.xlu1 %673 }
 0x25b   : > { %v859_v57 = vpack.c.bf16 %v691_v16, %v691_v16  ;;  %v685_v26 = vadd.f32 %v1357_v59, %v629_v46  ;;  %v575_v48 = vmul.f32 %v1004_v47, %v1324_v36 }
 0x25c   : > { %v692_v60 = vmax.f32 %v684_v54, 0.0  ;;  %v630_v61 = vmul.f32 %v1347_v50, %v574_v17  ;;  %731 = vst.msk [vmem:[%s1429_s4 + $0x4] sm:$0xf] %vm729_vm2, %v858_v55 }
 0x25d   : > { %v1006_v49 = vpop.eup %1005  ;;  %v693_v62 = vmax.f32 %v685_v26, 0.0  ;;  %v631_v63 = vmul.f32 %v1349_v51, %v575_v48  ;;  %732 = vst.msk [vmem:[%s1429_s4 + $0x8] sm:$0xf] %vm729_vm2, %v859_v57 }
 0x25e   : > { %v860_v27 = vpack.c.bf16 %v692_v60, %v692_v60  ;;  %v686_v36 = vadd.f32 %v1355_v58, %v630_v61  ;;  %v576_v50 = vmul.f32 %v1006_v49, %v1327_v37  ;;  %v679_v58 = vpop.permute.xlu0 %678 }
 0x25f   : > { %v861_v59 = vpack.c.bf16 %v693_v62, %v693_v62  ;;  %v687_v0 = vadd.f32 %v674_v56, %v631_v63 }
 0x260   : > { %v694_v1 = vmax.f32 %v686_v36, 0.0  ;;  %733 = vst.msk [vmem:[%s1429_s4 + $0xc] sm:$0xf] %vm729_vm2, %v860_v27  ;;  %v632_v51 = vmul.f32 %v1351_v53, %v576_v50 }
 0x261   : > { %v695_v2 = vmax.f32 %v687_v0, 0.0  ;;  %734 = vst.msk [vmem:[%s1429_s4 + $0x10] sm:$0xf] %vm729_vm2, %v861_v59 }
 0x262   : > { %v862_v3 = vpack.c.bf16 %v694_v1, %v694_v1  ;;  %v688_v4 = vadd.f32 %v679_v58, %v632_v51 }
 0x263   : > { %v863_v37 = vpack.c.bf16 %v695_v2, %v695_v2 }
 0x264   : > { %735 = vst.msk [vmem:[%s1429_s4 + $0x14] sm:$0xf] %vm729_vm2, %v862_v3  ;;  %v696_v5 = vmax.f32 %v688_v4, 0.0 }
 0x265   : > { %736 = vst.msk [vmem:[%s1429_s4 + $0x18] sm:$0xf] %vm729_vm2, %v863_v37 }
 0x266   : > { %v864_v53 = vpack.c.bf16 %v696_v5, %v696_v5 }
 0x268   : > { %737 = vst.msk [vmem:[%s1429_s4 + $0x1c] sm:$0xf] %vm729_vm2, %v864_v53 }
 0x269 PF: > { %s17_s20 = sadd.s32 1, %s1085_s20   ;;  %s1433_s15 = smov %s1069_s16 }
 0x26a   : > { %p14_p10 = scmp.ge.s32.totalorder %s17_s20, 6   ;;  %s1434_s16 = smov %s1073_s17 }
 0x26b   : > { %s1435_s17 = smov %s1167_s27  ;;  %s1436_s18 = smov %s1081_s19 }
 0x26c   : > { %s1437_s19 = smov %s1439_s22  ;;  %16 = sbr.rel (!%p14_p10) target bundleno = 4 (0x4), region = 87 }
 0x271   :  { %757 = vsyncpa [#allocation4], 1 }
 0x272   :  { %759 = vsyncpa [#allocation4 + $0x1], 1 }

// kernel: netg_forward.6
= control target key start
LH: loop header
LB: loop body
LE: loop exit
PB: predicated region body
PF: predicated region fallthrough
CT: control target
= control target key end

     0   :  { %s1211_s15 = smov 0   ;;  %s1213_s16 = smov 0   ;;  %s1452_s0 = inlined_call_operand.vmem [shape: bf16[32,768], index: 0, kind: input, shape index: {}]   ;;  %s1453_s1 = inlined_call_operand.vmem [shape: bf16[768,320], index: 1, kind: input, shape index: {}]   ;;  %s1454_s2 = inlined_call_operand.vmem [shape: f32[32,1], index: 2, kind: input, shape index: {}]   ;;  %s1455_s3 = inlined_call_operand.vmem [shape: f32[32,1], index: 3, kind: input, shape index: {}]   ;;  %s1456_s4 = inlined_call_operand.vmem [shape: bf16[32,320], index: 4, kind: output, shape index: {}]  }
   0x1   :  { %s1215_s17 = smov 0   ;;  %s1217_s18 = smov 0  }
   0x2   :  { %s1219_s19 = smov 0  }
   0x3 LB: > { %s23_s20 = sadd.s32 1, %s1177_s18  ;;  %p40_p1 = scmp.ne.s32.totalorder %s1169_s16, %s1165_s15  ;;  %s1181_s19 = sphi %s1219_s19, %s14_s19   ;;  %s1177_s18 = sphi %s1217_s18, %s1460_s18   ;;  %s1173_s17 = sphi %s1215_s17, %s1459_s17   ;;  %s1169_s16 = sphi %s1213_s16, %s1458_s16   ;;  %s1165_s15 = sphi %s1211_s15, %s1457_s15  }
   0x4   : > { %p24_p0 = scmp.ge.s32.totalorder %s23_s20, 6  ;;  %p41_p2 = scmp.eq.s32.totalorder %s1181_s19, 0 }
   0x5   : > { %s33_s22 = sadd.s32 1, %s1169_s16  ;;  %p970_p5 = scmp.ge.s32.totalorder %s1181_s19, 6 }
   0x6   : > { %s1462_s20 = smov (%p24_p0, %s23_s20), 0  ;;  %p42_p3 = por %p41_p2, %p40_p1 }
   0x7   : > { %s30_s21 = ssub.s32 %s1177_s18, %s1462_s20  ;;  %168 = sbr.rel (%p970_p5) target bundleno = 18 (0x12), region = 24 }
   0x8   : > { %p31_p4 = scmp.eq.s32.totalorder %s30_s21, 0 }
   0xa   : > { %s1246_s23 = scalar_select %p31_p4, %s1169_s16, %s33_s22  }
   0xc   : > { %171 = sbr.rel (!%p42_p3) target bundleno = 18 (0x12), region = 28  ;;  %s173_s24 = sand.u32 (%p42_p3), 1, %s1169_s16  }
   0xd   : > { %s972_s25 = sshll.u32 (%p42_p3), %s1177_s18, 2  ;;  %s971_s26 = sshll.u32 (%p42_p3), %s173_s24, 4 }
   0xe   : > { %s177_s29 = scalar_lea.vmem (%p42_p3), %s1452_s0, %s972_s25  ;;  %s175_s30 = scalar_lea.vmem (%p42_p3), [#allocation3], %s971_s26 }
   0xf   : > { %v194_v0 = vld [vmem:[%s177_s29] sm:$0xf] (%p42_p3)  ;;  %v196_v1 = vld [vmem:[%s177_s29 + $0x18] sm:$0xf] (%p42_p3)  ;;  %v198_v2 = vld [vmem:[%s177_s29 + $0x30] sm:$0xf] (%p42_p3) }
  0x10   : > { %195 = vst [vmem:[%s175_s30] sm:$0xf] (%p42_p3), %v194_v0  ;;  %197 = vst [vmem:[%s175_s30 + $0x4] sm:$0xf] (%p42_p3), %v196_v1  ;;  %v200_v3 = vld [vmem:[%s177_s29 + $0x48] sm:$0xf] (%p42_p3) }
  0x11   : > { %199 = vst [vmem:[%s175_s30 + $0x8] sm:$0xf] %v198_v2  ;;  %201 = vst [vmem:[%s175_s30 + $0xc] sm:$0xf] %v200_v3 }
  0x12 PF: > { %p973_p6 = scmp.ge.s32.totalorder %s1181_s19, 1  ;;  %p247_p7 = scmp.lt.s32.totalorder %s1181_s19, 7 }
  0x14   : > { %p248_p8 = pnand %p973_p6, %p247_p7 }
  0x15   : > { %s254_s5 = sand.u32 (!%p248_p8), 1, %s1165_s15   ;;  %s975_s6 = sshll.u32 (!%p248_p8), %s1173_s17, 4 }
  0x16   : > { %251 = sbr.rel (%p248_p8) target bundleno = 680 (0x2a8), region = 73  ;;  %s1258_s7 = sshll.u32 (!%p248_p8), %s254_s5, 4 }
  0x17   : > { %p291_p9 = scmp.lt.s32.totalorder (!%p248_p8), %s975_s6, 95  ;;  %s256_s12 = scalar_lea.vmem (!%p248_p8), [#allocation3], %s1258_s7 }
  0x18   : > { %p977_p10 = scmp.ne.s32.totalorder (!%p248_p8), %s1173_s17, 0 }
  0x1b   : > { %s1464_s6 = smov (!%p291_p9, %s975_s6), 95  ;;  %311 = sbr.rel (%p977_p10) target bundleno = 39 (0x27), region = 81 }
  0x1c   : > { %s1055_s8 = smul.u32 12, %s1464_s6 }
  0x1e   : > { %s1263_s11 = scalar_lea.vmem %s1453_s1, %s1055_s8 }
  0x20   : > { %vm314_vm0 = vcmask 523264   ;;  %v1183_v4 = vmov 0.0  }
  0x21   : > { %312 = vst [vmem:[#allocation2] sm:$0xff] %v1183_v4  ;;  %313 = vst [vmem:[#allocation2 + $0x8] sm:$0xff] %v1183_v4 }
  0x22   : > { %316 = vst [vmem:[#allocation2 + $0x18] sm:$0xff] %v1183_v4  ;;  %317 = vst [vmem:[#allocation2 + $0x20] sm:$0xff] %v1183_v4 }
  0x23   : > { %319 = vst [vmem:[#allocation2 + $0x30] sm:$0xff] %v1183_v4  ;;  %320 = vst [vmem:[#allocation2 + $0x38] sm:$0xff] %v1183_v4 }
  0x24   : > { %322 = vst [vmem:[#allocation2 + $0x48] sm:$0xff] %v1183_v4  ;;  %323 = vst [vmem:[#allocation2 + $0x50] sm:$0xff] %v1183_v4 }
  0x25   : > { %315 = vst.msk [vmem:[#allocation2 + $0x10] sm:$0xff] %vm314_vm0, %v1183_v4  ;;  %318 = vst.msk [vmem:[#allocation2 + $0x28] sm:$0xff] %vm314_vm0, %v1183_v4 }
  0x26   : > { %321 = vst.msk [vmem:[#allocation2 + $0x40] sm:$0xff] %vm314_vm0, %v1183_v4  ;;  %324 = vst.msk [vmem:[#allocation2 + $0x58] sm:$0xff] %vm314_vm0, %v1183_v4 }
  0x27 PF: > { %v1099_v5 = vld [vmem:[%s1263_s11 + $0xac] ss:$12 sps:$4 sm:$0xff]   ;;  %v1101_v6 = vld [vmem:[%s1263_s11 + $0xa8] ss:$12 sps:$4 sm:$0xff]   ;;  %v1184_v7 = vmov 0   ;;  %vm629_vm1 = vcmask 523264  }
  0x28   : > { %545 = vmatprep.mubr.bf16.mxu0 %v1184_v7  ;;  %513 = vmatprep.subr.bf16.mxu0 %v1099_v5  ;;  %v1102_v8 = vld [vmem:[%s1263_s11 + $0xb0] ss:$12 sps:$4 sm:$0xff]   ;;  %v1103_v9 = vld [vmem:[%s1263_s11 + $0x94] ss:$12 sps:$4 sm:$0xff]   ;;  %v1106_v11 = vld [vmem:[%s1263_s11 + $0x98] ss:$12 sps:$4 sm:$0xff]  }
  0x29   : > { %514 = vmatpush1.bf16.msra.mxu0 %v1101_v6  ;;  %v1105_v10 = vld [vmem:[%s1263_s11 + $0x90] ss:$12 sps:$4 sm:$0xff]   ;;  %1035 = vmatprep.subr.bf16.mxu1 %v1102_v8  ;;  %v1110_v13 = vld [vmem:[%s1263_s11 + $0x80] ss:$12 sps:$4 sm:$0xff]   ;;  %v1109_v14 = vld [vmem:[%s1263_s11 + $0x78] ss:$12 sps:$4 sm:$0xff]  }
  0x2a   : > { %1036 = vmatpush3.bf16.msra.mxu1 %v1102_v8  ;;  %515 = vmatprep.subr.bf16.mxu0 %v1103_v9  ;;  %v1107_v12 = vld [vmem:[%s1263_s11 + $0x7c] ss:$12 sps:$4 sm:$0xff]   ;;  %v1111_v15 = vld [vmem:[%s1263_s11 + $0x64] ss:$12 sps:$4 sm:$0xff]   ;;  %v1113_v17 = vld [vmem:[%s1263_s11 + $0x60] ss:$12 sps:$4 sm:$0xff]  }
  0x2b   : > { %1037 = vmatprep.subr.bf16.mxu1 %v1106_v11  ;;  %v1114_v16 = vld [vmem:[%s1263_s11 + $0x68] ss:$12 sps:$4 sm:$0xff]   ;;  %v1115_v18 = vld [vmem:[%s1263_s11 + $0x4c] ss:$12 sps:$4 sm:$0xff]   ;;  %v1118_v19 = vld [vmem:[%s1263_s11 + $0x50] ss:$12 sps:$4 sm:$0xff]  }
  0x2c   : > { %v1117_v20 = vld [vmem:[%s1263_s11 + $0x48] ss:$12 sps:$4 sm:$0xff]   ;;  %v1121_v22 = vld [vmem:[%s1263_s11 + $0x30] ss:$12 sps:$4 sm:$0xff]   ;;  %v1122_v23 = vld [vmem:[%s1263_s11 + $0x38] ss:$12 sps:$4 sm:$0xff]  }
  0x2d   : > { %516 = vmatpush1.bf16.msra.mxu0 %v1105_v10  ;;  %v1119_v21 = vld [vmem:[%s1263_s11 + $0x34] ss:$12 sps:$4 sm:$0xff]   ;;  %v1123_v25 = vld [vmem:[%s1263_s11 + $0x1c] ss:$12 sps:$4 sm:$0xff]   ;;  %v1125_v27 = vld [vmem:[%s1263_s11 + $0x18] ss:$12 sps:$4 sm:$0xff]  }
  0x2e   : > { %517 = vmatprep.subr.bf16.mxu0 %v1107_v12  ;;  %1038 = vmatpush3.bf16.msra.mxu1 %v1106_v11  ;;  %v1131_v24 = vld [vmem:[%s256_s12] sm:$0xff]   ;;  %v1132_v31 = vld [vmem:[%s256_s12 + $0x8] sm:$0xff]   ;;  %p1004_p11 = scmp.ne.s32.totalorder %s1173_s17, 5 }
  0x2f   : > { %1039 = vmatprep.subr.bf16.mxu1 %v1110_v13  ;;  %1051 = vmatprep.mubr.bf16.mxu1 %v1131_v24  ;;  %v1126_v26 = vld [vmem:[%s1263_s11 + $0x20] ss:$12 sps:$4 sm:$0xff]   ;;  %v1127_v28 = vld [vmem:[%s1263_s11 + $0x4] ss:$12 sps:$4 sm:$0xff]   ;;  %v1130_v29 = vld [vmem:[%s1263_s11 + $0x8] ss:$12 sps:$4 sm:$0xff]  }
  0x30   : > { %v1129_v30 = vld [vmem:[%s1263_s11] ss:$12 sps:$4 sm:$0xff]   ;;  %v328_v39 = vld [vmem:[#allocation2 + $0x18] sm:$0xff]  ;;  %v327_v40 = vld [vmem:[#allocation2 + $0x10] sm:$0xff] }
  0x31   : > { %518 = vmatpush1.bf16.msra.mxu0 %v1109_v14  ;;  %v325_v32 = vld [vmem:[#allocation2] sm:$0xff]  ;;  %v326_v34 = vld [vmem:[#allocation2 + $0x8] sm:$0xff]  ;;  %v336_v46 = vld [vmem:[#allocation2 + $0x58] sm:$0xff] }
  0x32   : > { %519 = vmatprep.subr.bf16.mxu0 %v1111_v15  ;;  %1040 = vmatpush3.bf16.msra.mxu1 %v1110_v13  ;;  %v333_v35 = vld [vmem:[#allocation2 + $0x40] sm:$0xff]  ;;  %v331_v51 = vld [vmem:[#allocation2 + $0x30] sm:$0xff]  ;;  %v330_v52 = vld [vmem:[#allocation2 + $0x28] sm:$0xff] }
  0x33   : > { %1041 = vmatprep.subr.bf16.mxu1 %v1114_v16  ;;  %v329_v45 = vld [vmem:[#allocation2 + $0x20] sm:$0xff]  ;;  %v332_v57 = vld [vmem:[#allocation2 + $0x38] sm:$0xff]  ;;  %v334_v61 = vld [vmem:[#allocation2 + $0x48] sm:$0xff] }
  0x34   : > { %v335_v0 = vld [vmem:[#allocation2 + $0x50] sm:$0xff] }
  0x35   : > { %520 = vmatpush1.bf16.msra.mxu0 %v1113_v17 }
  0x36   : > { %521 = vmatprep.subr.bf16.mxu0 %v1115_v18  ;;  %1042 = vmatpush3.bf16.msra.mxu1 %v1114_v16 }
  0x37   : > { %1043 = vmatprep.subr.bf16.mxu1 %v1118_v19 }
  0x39   : > { %522 = vmatpush1.bf16.msra.mxu0 %v1117_v20 }
  0x3a   : > { %523 = vmatprep.subr.bf16.mxu0 %v1119_v21  ;;  %1044 = vmatpush3.bf16.msra.mxu1 %v1118_v19 }
  0x3b   : > { %1045 = vmatprep.subr.bf16.mxu1 %v1122_v23 }
  0x3d   : > { %524 = vmatpush1.bf16.msra.mxu0 %v1121_v22 }
  0x3e   : > { %525 = vmatprep.subr.bf16.mxu0 %v1123_v25  ;;  %1046 = vmatpush3.bf16.msra.mxu1 %v1122_v23 }
  0x3f   : > { %1047 = vmatprep.subr.bf16.mxu1 %v1126_v26 }
  0x41   : > { %526 = vmatpush1.bf16.msra.mxu0 %v1125_v27 }
  0x42   : > { %527 = vmatprep.subr.bf16.mxu0 %v1127_v28  ;;  %1048 = vmatpush3.bf16.msra.mxu1 %v1126_v26 }
  0x43   : > { %1049 = vmatprep.subr.bf16.mxu1 %v1130_v29 }
  0x45   : > { %528 = vmatpush1.bf16.msra.mxu0 %v1129_v30 }
  0x46   : > { %1050 = vmatpush3.bf16.msra.mxu1 %v1130_v29 }
  0x48   : > { %546 = vmatmul.mubr.bf16.vlgmr.msra.gmra.mxu0 %v1131_v24 }
  0x49   : > { %555 = vmatprep.mubr.bf16.mxu0 %v1184_v7  ;;  %1052 = vmatmul.mubr.bf16.vlgmr.msra.gmra.mxu1 %v1132_v31 }
  0x50   : > { %556 = vmatmul.mubr.bf16.gmra.mxu0 %v1132_v31 }
 0x108   : > { %v547_v33 = vpop.f32.mrf.mxu0 }
 0x109   : > { %v615_v36 = vadd.f32 %v547_v33, %v325_v32  ;;  %v1053_v38 = vpop.f32.mrf.mxu1 }
 0x10a   : > { %v549_v37 = vpop.f32.mrf.mxu0  ;;  %v623_v42 = vadd.f32 %v1053_v38, %v333_v35 }
 0x10b   : > { %627 = vst [vmem:[#allocation2] sm:$0xff] %v615_v36  ;;  %v616_v41 = vadd.f32 %v549_v37, %v326_v34  ;;  %v600_v44 = vpop.f32.mrf.mxu1 }
 0x10c   : > { %v551_v43 = vpop.f32.mrf.mxu0  ;;  %636 = vst.msk [vmem:[#allocation2 + $0x40] sm:$0xff] %vm629_vm1, %v623_v42  ;;  %v617_v48 = vadd.f32 %v600_v44, %v327_v40 }
 0x10d   : > { %628 = vst [vmem:[#allocation2 + $0x8] sm:$0xff] %v616_v41  ;;  %v618_v47 = vadd.f32 %v551_v43, %v328_v39  ;;  %v1054_v50 = vpop.f32.mrf.mxu1 }
 0x10e   : > { %v553_v49 = vpop.f32.mrf.mxu0  ;;  %630 = vst.msk [vmem:[#allocation2 + $0x10] sm:$0xff] %vm629_vm1, %v617_v48  ;;  %v626_v54 = vadd.f32 %v1054_v50, %v336_v46 }
 0x10f   : > { %631 = vst [vmem:[#allocation2 + $0x18] sm:$0xff] %v618_v47  ;;  %v619_v53 = vadd.f32 %v553_v49, %v329_v45  ;;  %v603_v56 = vpop.f32.mrf.mxu1 }
 0x110   : > { %v557_v55 = vpop.f32.mrf.mxu0  ;;  %639 = vst.msk [vmem:[#allocation2 + $0x58] sm:$0xff] %vm629_vm1, %v626_v54  ;;  %v620_v59 = vadd.f32 %v603_v56, %v330_v52 }
 0x111   : > { %632 = vst [vmem:[#allocation2 + $0x20] sm:$0xff] %v619_v53  ;;  %v621_v58 = vadd.f32 %v557_v55, %v331_v51 }
 0x112   : > { %v559_v60 = vpop.f32.mrf.mxu0  ;;  %633 = vst.msk [vmem:[#allocation2 + $0x28] sm:$0xff] %vm629_vm1, %v620_v59 }
 0x113   : > { %634 = vst [vmem:[#allocation2 + $0x30] sm:$0xff] %v621_v58  ;;  %v622_v62 = vadd.f32 %v559_v60, %v332_v57 }
 0x114   : > { %v561_v63 = vpop.f32.mrf.mxu0 }
 0x115   : > { %635 = vst [vmem:[#allocation2 + $0x38] sm:$0xff] %v622_v62  ;;  %v624_v1 = vadd.f32 %v561_v63, %v334_v61  ;;  %643 = sbr.rel (%p1004_p11) target bundleno = 680 (0x2a8), region = 85 }
 0x116   : > { %v563_v2 = vpop.f32.mrf.mxu0 }
 0x117   : > { %637 = vst [vmem:[#allocation2 + $0x48] sm:$0xff] %v624_v1  ;;  %v625_v3 = vadd.f32 %v563_v2, %v335_v0 }
 0x119   : > { %638 = vst [vmem:[#allocation2 + $0x50] sm:$0xff] %v625_v3 }
 0x11a   : > { %v644_v4 = vld [vmem:[#allocation2] sm:$0xff]  ;;  %v645_v5 = vld [vmem:[#allocation2 + $0x8] sm:$0xff]  ;;  %v646_v6 = vld [vmem:[#allocation2 + $0x10] sm:$0xff]  ;;  %v1185_v28 = vmov 0   ;;  %vm874_vm2 = vcmask 519168  }
 0x11b   : > { %v656_v7 = vadd.f32 %v645_v5, %v644_v4  ;;  %v657_v8 = vsel %vm629_vm1, %v646_v6, 0.0  ;;  %v650_v9 = vld [vmem:[#allocation2 + $0x30] sm:$0xff]  ;;  %v652_v11 = vld [vmem:[#allocation2 + $0x40] sm:$0xff]  ;;  %v647_v14 = vld [vmem:[#allocation2 + $0x18] sm:$0xff]  ;;  %1134 = vset.pattern.permute.xlu1 %v1185_v28  ;;  %1133 = vset.pattern.permute.xlu0 %v1185_v28 }
 0x11c   : > { %v651_v10 = vld [vmem:[#allocation2 + $0x38] sm:$0xff]  ;;  %v667_v13 = vsel %vm629_vm1, %v652_v11, 0.0  ;;  %v648_v15 = vld [vmem:[#allocation2 + $0x20] sm:$0xff]  ;;  %v649_v16 = vld [vmem:[#allocation2 + $0x28] sm:$0xff] }
 0x11d   : > { %v666_v12 = vadd.f32 %v651_v10, %v650_v9  ;;  %v658_v17 = vadd.f32 %v657_v8, %v656_v7  ;;  %v661_v18 = vadd.f32 %v648_v15, %v647_v14  ;;  %v662_v19 = vsel %vm629_vm1, %v649_v16, 0.0  ;;  %v1307_v22 = vld [vmem:[#allocation2 + $0x58] sm:$0xff]  ;;  %v750_v62 = vld [vmem:[%s1454_s2 + $0x8] sm:$0xff]  ;;  %v751_v63 = vld [vmem:[%s1454_s2 + $0x10] sm:$0xff] }
 0x11e   : > { %v1303_v20 = vld [vmem:[#allocation2 + $0x48] sm:$0xff]  ;;  %v672_v25 = vsel %vm629_vm1, %v1307_v22, 0.0  ;;  %v749_v0 = vld [vmem:[%s1454_s2] sm:$0xff]  ;;  %v752_v1 = vld [vmem:[%s1454_s2 + $0x18] sm:$0xff] }
 0x11f   : > { %v668_v23 = vadd.f32 %v667_v13, %v666_v12  ;;  %659 = vadd.xlane.f32.xlu0 %v658_v17  ;;  %v663_v26 = vadd.f32 %v662_v19, %v661_v18  ;;  %v785_v2 = vld [vmem:[%s1455_s3] sm:$0xff]  ;;  %v786_v3 = vld [vmem:[%s1455_s3 + $0x8] sm:$0xff] }
 0x120   : > { %v1305_v21 = vld [vmem:[#allocation2 + $0x50] sm:$0xff] }
 0x121   : > { %v671_v24 = vadd.f32 %v1305_v21, %v1303_v20  ;;  %669 = vadd.xlane.f32.xlu1 %v668_v23 }
 0x123   : > { %v673_v27 = vadd.f32 %v672_v25, %v671_v24  ;;  %664 = vadd.xlane.f32.xlu0 %v663_v26 }
 0x125   : > { %674 = vadd.xlane.f32.xlu1 %v673_v27 }
 0x1a8   : > { %v660_v29 = vpop.xlane.xlu0 %659 }
 0x1a9   : > { %v677_v30 = vmul.f32 0.003125, %v660_v29 }
 0x1aa   : > { %v670_v31 = vpop.xlane.xlu1 %669 }
 0x1ab   : > { %v679_v32 = vmul.f32 0.003125, %v670_v31  ;;  %v1313_v33 = vsub.f32 %v644_v4, %v677_v30  ;;  %v1315_v34 = vsub.f32 %v645_v5, %v677_v30  ;;  %v1317_v35 = vsub.f32 %v646_v6, %v677_v30  ;;  %v787_v4 = vld [vmem:[%s1455_s3 + $0x10] sm:$0xff] }
 0x1ac   : > { %v665_v38 = vpop.xlane.xlu0 %664 }
 0x1ad   : > { %v1319_v36 = vsub.f32 %v650_v9, %v679_v32  ;;  %v1321_v37 = vsub.f32 %v651_v10, %v679_v32  ;;  %v1323_v39 = vsub.f32 %v652_v11, %v679_v32  ;;  %v678_v40 = vmul.f32 0.003125, %v665_v38 }
 0x1ae   : > { %v693_v41 = vmul.f32 %v1313_v33, %v1313_v33  ;;  %v694_v42 = vmul.f32 %v1315_v34, %v1315_v34  ;;  %v695_v43 = vmul.f32 %v1317_v35, %v1317_v35  ;;  %v675_v5 = vpop.xlane.xlu1 %674 }
 0x1af   : > { %v699_v44 = vmul.f32 %v1319_v36, %v1319_v36  ;;  %v700_v45 = vmul.f32 %v1321_v37, %v1321_v37  ;;  %v701_v46 = vmul.f32 %v1323_v39, %v1323_v39  ;;  %v1337_v47 = vsub.f32 %v647_v14, %v678_v40 }
 0x1b0   : > { %v1339_v48 = vsub.f32 %v648_v15, %v678_v40  ;;  %v705_v49 = vadd.f32 %v694_v42, %v693_v41  ;;  %v706_v50 = vsel %vm629_vm1, %v695_v43, 0.0  ;;  %v1343_v53 = vsub.f32 %v649_v16, %v678_v40  ;;  %v788_v16 = vld [vmem:[%s1455_s3 + $0x18] sm:$0xff] }
 0x1b1   : > { %v715_v51 = vadd.f32 %v700_v45, %v699_v44  ;;  %v716_v52 = vsel %vm629_vm1, %v701_v46, 0.0  ;;  %v696_v55 = vmul.f32 %v1337_v47, %v1337_v47  ;;  %v680_v6 = vmul.f32 0.003125, %v675_v5 }
 0x1b2   : > { %v707_v54 = vadd.f32 %v706_v50, %v705_v49  ;;  %v697_v56 = vmul.f32 %v1339_v48, %v1339_v48  ;;  %v698_v57 = vmul.f32 %v1343_v53, %v1343_v53 }
 0x1b3   : > { %v717_v58 = vadd.f32 %v716_v52, %v715_v51  ;;  %v1374_v7 = vsub.f32 %v1303_v20, %v680_v6  ;;  %v1377_v8 = vsub.f32 %v1305_v21, %v680_v6  ;;  %v1380_v9 = vsub.f32 %v1307_v22, %v680_v6 }
 0x1b4   : > { %708 = vadd.xlane.f32.xlu0 %v707_v54  ;;  %v710_v59 = vadd.f32 %v697_v56, %v696_v55  ;;  %v711_v60 = vsel %vm629_vm1, %v698_v57, 0.0 }
 0x1b5   : > { %v702_v10 = vmul.f32 %v1374_v7, %v1374_v7  ;;  %v703_v11 = vmul.f32 %v1377_v8, %v1377_v8  ;;  %v704_v12 = vmul.f32 %v1380_v9, %v1380_v9 }
 0x1b6   : > { %v712_v61 = vadd.f32 %v711_v60, %v710_v59 }
 0x1b7   : > { %v720_v13 = vadd.f32 %v703_v11, %v702_v10  ;;  %v721_v14 = vsel %vm629_vm1, %v704_v12, 0.0 }
 0x1b8   : > { %718 = vadd.xlane.f32.xlu0 %v717_v58  ;;  %713 = vadd.xlane.f32.xlu1 %v712_v61 }
 0x1b9   : > { %v722_v15 = vadd.f32 %v721_v14, %v720_v13 }
 0x1c9   : > { %760 = vperm.xlu1 %1134, %v750_v62  }
 0x1cd   : > { %765 = vperm.xlu1 %1134, %v751_v63  }
 0x1ce   : > { %755 = vperm.xlu0 %1133, %v749_v0  }
 0x1d1   : > { %770 = vperm.xlu1 %1134, %v752_v1  }
 0x1d5   : > { %791 = vperm.xlu1 %1134, %v785_v2  }
 0x1d9   : > { %796 = vperm.xlu1 %1134, %v786_v3  }
 0x1dd   : > { %801 = vperm.xlu1 %1134, %v787_v4  }
 0x201   : > { %723 = vadd.xlane.f32.xlu1 %v722_v15 }
 0x212   : > { %806 = vperm.xlu1 %1134, %v788_v16  }
 0x23d   : > { %v709_v17 = vpop.xlane.xlu0 %708 }
 0x23e   : > { %v725_v18 = vmul.f32 0.003125, %v709_v17 }
 0x240   : > { %v729_v19 = vadd.f32 1e-05, %v725_v18 }
 0x241   : > { %v714_v20 = vpop.xlane.xlu1 %713  ;;  %v719_v21 = vpop.xlane.xlu0 %718 }
 0x242   : > { %1135 = vrsqrt.f32 %v729_v19  ;;  %v726_v22 = vmul.f32 0.003125, %v714_v20  ;;  %v727_v23 = vmul.f32 0.003125, %v719_v21 }
 0x244   : > { %v730_v24 = vadd.f32 1e-05, %v726_v22  ;;  %v731_v25 = vadd.f32 1e-05, %v727_v23 }
 0x245   : > { %v761_v26 = vpop.permute.xlu1 %760 }
 0x246   : > { %1137 = vrsqrt.f32 %v730_v24 }
 0x247   : > { %1139 = vrsqrt.f32 %v731_v25 }
 0x249   : > { %v766_v27 = vpop.permute.xlu1 %765  ;;  %v756_v30 = vpop.permute.xlu0 %755 }
 0x24d   : > { %v1392_v28 = vpop.permute.xlu1 %770 }
 0x24f   : > { %v1136_v29 = vpop.eup %1135 }
 0x250   : > { %v737_v31 = vmul.f32 %v1136_v29, %v1313_v33  ;;  %v738_v32 = vmul.f32 %v1136_v29, %v1315_v34  ;;  %v739_v38 = vmul.f32 %v1136_v29, %v1317_v35 }
 0x251   : > { %v792_v40 = vpop.permute.xlu1 %791 }
 0x252   : > { %v773_v41 = vmul.f32 %v756_v30, %v737_v31  ;;  %v774_v42 = vmul.f32 %v756_v30, %v738_v32  ;;  %v775_v43 = vmul.f32 %v756_v30, %v739_v38 }
 0x253   : > { %v1138_v44 = vpop.eup %1137 }
 0x254   : > { %v1140_v45 = vpop.eup %1139  ;;  %v740_v46 = vmul.f32 %v1138_v44, %v1337_v47  ;;  %v741_v49 = vmul.f32 %v1138_v44, %v1339_v48  ;;  %v742_v50 = vmul.f32 %v1138_v44, %v1343_v53  ;;  %v809_v51 = vadd.f32 %v792_v40, %v773_v41 }
 0x255   : > { %v743_v52 = vmul.f32 %v1140_v45, %v1319_v36  ;;  %v744_v33 = vmul.f32 %v1140_v45, %v1321_v37  ;;  %v745_v34 = vmul.f32 %v1140_v45, %v1323_v39  ;;  %v810_v35 = vadd.f32 %v792_v40, %v774_v42  ;;  %v797_v54 = vpop.permute.xlu1 %796 }
 0x256   : > { %v776_v55 = vmul.f32 %v761_v26, %v740_v46  ;;  %v777_v56 = vmul.f32 %v761_v26, %v741_v49  ;;  %v778_v57 = vmul.f32 %v761_v26, %v742_v50  ;;  %v811_v58 = vadd.f32 %v792_v40, %v775_v43 }
 0x257   : > { %v821_v59 = vmax.f32 %v809_v51, 0.0  ;;  %v822_v47 = vmax.f32 %v810_v35, 0.0  ;;  %v779_v53 = vmul.f32 %v766_v27, %v743_v52  ;;  %v780_v62 = vmul.f32 %v766_v27, %v744_v33 }
 0x258   : > { %v823_v60 = vmax.f32 %v811_v58, 0.0  ;;  %v812_v48 = vadd.f32 %v797_v54, %v776_v55  ;;  %v813_v61 = vadd.f32 %v797_v54, %v777_v56  ;;  %v781_v63 = vmul.f32 %v766_v27, %v745_v34 }
 0x259   : > { %v814_v36 = vadd.f32 %v797_v54, %v778_v57  ;;  %v802_v0 = vpop.permute.xlu1 %801  ;;  %v1017_v37 = vpack.c.bf16 %v822_v47, %v821_v59 }
 0x25a   : > { %v1018_v1 = vpack.c.bf16 %v823_v60, %v823_v60  ;;  %v824_v39 = vmax.f32 %v812_v48, 0.0  ;;  %v825_v2 = vmax.f32 %v813_v61, 0.0  ;;  %v815_v4 = vadd.f32 %v802_v0, %v779_v53 }
 0x25b   : > { %v826_v3 = vmax.f32 %v814_v36, 0.0  ;;  %v816_v5 = vadd.f32 %v802_v0, %v780_v62  ;;  %v817_v6 = vadd.f32 %v802_v0, %v781_v63  ;;  %873 = vst [vmem:[%s1456_s4] sm:$0xff] %v1017_v37 }
 0x25c   : > { %875 = vst.msk [vmem:[%s1456_s4 + $0x8] sm:$0xf] %vm874_vm2, %v1018_v1  ;;  %v1019_v10 = vpack.c.bf16 %v825_v2, %v824_v39  ;;  %v827_v12 = vmax.f32 %v815_v4, 0.0 }
 0x25d   : > { %v1020_v11 = vpack.c.bf16 %v826_v3, %v826_v3  ;;  %v828_v13 = vmax.f32 %v816_v5, 0.0  ;;  %v829_v14 = vmax.f32 %v817_v6, 0.0 }
 0x25e   : > { %876 = vst [vmem:[%s1456_s4 + $0xc] sm:$0xff] %v1019_v10 }
 0x25f   : > { %877 = vst.msk [vmem:[%s1456_s4 + $0x14] sm:$0xf] %vm874_vm2, %v1020_v11  ;;  %v1021_v15 = vpack.c.bf16 %v828_v13, %v827_v12  ;;  %v1022_v16 = vpack.c.bf16 %v829_v14, %v829_v14 }
 0x261   : > { %878 = vst [vmem:[%s1456_s4 + $0x18] sm:$0xff] %v1021_v15  ;;  %879 = vst.msk [vmem:[%s1456_s4 + $0x20] sm:$0xf] %vm874_vm2, %v1022_v16 }
 0x28a   : > { %v724_v17 = vpop.xlane.xlu1 %723 }
 0x28b   : > { %v728_v18 = vmul.f32 0.003125, %v724_v17 }
 0x28d   : > { %v732_v19 = vadd.f32 1e-05, %v728_v18 }
 0x28e   : > { %v807_v27 = vpop.permute.xlu1 %806 }
 0x28f   : > { %1141 = vrsqrt.f32 %v732_v19 }
 0x29c   : > { %v1142_v20 = vpop.eup %1141 }
 0x29d   : > { %v746_v21 = vmul.f32 %v1142_v20, %v1374_v7  ;;  %v747_v22 = vmul.f32 %v1142_v20, %v1377_v8  ;;  %v748_v23 = vmul.f32 %v1142_v20, %v1380_v9 }
 0x29f   : > { %v782_v24 = vmul.f32 %v1392_v28, %v746_v21  ;;  %v783_v25 = vmul.f32 %v1392_v28, %v747_v22  ;;  %v784_v26 = vmul.f32 %v1392_v28, %v748_v23 }
 0x2a1   : > { %v818_v29 = vadd.f32 %v807_v27, %v782_v24  ;;  %v819_v30 = vadd.f32 %v807_v27, %v783_v25  ;;  %v820_v31 = vadd.f32 %v807_v27, %v784_v26 }
 0x2a3   : > { %v830_v32 = vmax.f32 %v818_v29, 0.0  ;;  %v831_v38 = vmax.f32 %v819_v30, 0.0  ;;  %v832_v40 = vmax.f32 %v820_v31, 0.0 }
 0x2a5   : > { %v1023_v41 = vpack.c.bf16 %v831_v38, %v830_v32  ;;  %v1024_v42 = vpack.c.bf16 %v832_v40, %v832_v40 }
 0x2a7   : > { %880 = vst [vmem:[%s1456_s4 + $0x24] sm:$0xff] %v1023_v41  ;;  %881 = vst.msk [vmem:[%s1456_s4 + $0x2c] sm:$0xf] %vm874_vm2, %v1024_v42 }
 0x2a8 PF: > { %s14_s19 = sadd.s32 1, %s1181_s19   ;;  %s1457_s15 = smov %s1169_s16 }
 0x2a9   : > { %p11_p12 = scmp.ge.s32.totalorder %s14_s19, 8   ;;  %s1458_s16 = smov %s1246_s23 }
 0x2aa   : > { %s1459_s17 = smov %s1177_s18  ;;  %s1460_s18 = smov %s1462_s20 }
 0x2ab   :  { %13 = sbr.rel (!%p11_p12) target bundleno = 3 (0x3), region = 123 }

// kernel: netg_forward.7
= control target key start
LH: loop header
LB: loop body
LE: loop exit
PB: predicated region body
PF: predicated region fallthrough
CT: control target
= control target key end

     0   :  { %s1819_s15 = smov 0   ;;  %s1821_s16 = smov 0   ;;  %s2126_s0 = inlined_call_operand.vmem [shape: bf16[16,512], index: 0, kind: input, shape index: {}]   ;;  %s2127_s1 = inlined_call_operand.vmem [shape: bf16[512,1280], index: 1, kind: input, shape index: {}]   ;;  %s2128_s2 = inlined_call_operand.vmem [shape: f32[16,1], index: 2, kind: input, shape index: {}]   ;;  %s2129_s3 = inlined_call_operand.vmem [shape: f32[16,1], index: 3, kind: input, shape index: {}]   ;;  %s2130_s4 = inlined_call_operand.vmem [shape: bf16[16,1280], index: 4, kind: output, shape index: {}]  }
   0x1   :  { %s1823_s17 = smov 0   ;;  %s1825_s18 = smov 0  }
   0x2   :  { %s1827_s19 = smov 0  }
   0x3 LB: > { %s23_s20 = sadd.s32 1, %s1785_s18  ;;  %p40_p1 = scmp.ne.s32.totalorder %s1777_s16, %s1773_s15  ;;  %s1789_s19 = sphi %s1827_s19, %s14_s19   ;;  %s1785_s18 = sphi %s1825_s18, %s2134_s18   ;;  %s1781_s17 = sphi %s1823_s17, %s2133_s17   ;;  %s1777_s16 = sphi %s1821_s16, %s2132_s16   ;;  %s1773_s15 = sphi %s1819_s15, %s2131_s15  }
   0x4   : > { %p24_p0 = scmp.ge.s32.totalorder %s23_s20, 4  ;;  %p41_p2 = scmp.eq.s32.totalorder %s1789_s19, 0 }
   0x5   : > { %s33_s22 = sadd.s32 1, %s1777_s16  ;;  %p1466_p5 = scmp.ge.s32.totalorder %s1789_s19, 4 }
   0x6   : > { %s2136_s20 = smov (%p24_p0, %s23_s20), 0  ;;  %p42_p3 = por %p41_p2, %p40_p1 }
   0x7   : > { %s30_s21 = ssub.s32 %s1785_s18, %s2136_s20  ;;  %168 = sbr.rel (%p1466_p5) target bundleno = 17 (0x11), region = 24 }
   0x8   : > { %p31_p4 = scmp.eq.s32.totalorder %s30_s21, 0 }
   0xa   : > { %s1854_s23 = scalar_select %p31_p4, %s1777_s16, %s33_s22  }
   0xc   : > { %171 = sbr.rel (!%p42_p3) target bundleno = 17 (0x11), region = 28  ;;  %s173_s24 = sand.u32 (%p42_p3), 1, %s1777_s16  }
   0xd   : > { %s1468_s25 = sshll.u32 (%p42_p3), %s1785_s18, 2  ;;  %s1467_s26 = sshll.u32 (%p42_p3), %s173_s24, 3 }
   0xe   : > { %s177_s29 = scalar_lea.vmem (%p42_p3), %s2126_s0, %s1468_s25  ;;  %s175_s30 = scalar_lea.vmem (%p42_p3), [#allocation3], %s1467_s26 }
   0xf   : > { %v194_v0 = vld [vmem:[%s177_s29] sm:$0xf] (%p42_p3)  ;;  %v196_v1 = vld [vmem:[%s177_s29 + $0x10] sm:$0xf] (%p42_p3) }
  0x10   : > { %195 = vst [vmem:[%s175_s30] sm:$0xf] (%p42_p3), %v194_v0  ;;  %197 = vst [vmem:[%s175_s30 + $0x4] sm:$0xf] (%p42_p3), %v196_v1 }
  0x11 PF: > { %p1469_p6 = scmp.ge.s32.totalorder %s1789_s19, 1  ;;  %p239_p7 = scmp.lt.s32.totalorder %s1789_s19, 5 }
  0x13   : > { %p240_p8 = pnand %p1469_p6, %p239_p7 }
  0x14   : > { %s246_s5 = sand.u32 (!%p240_p8), 1, %s1773_s15   ;;  %s1471_s6 = sshll.u32 (!%p240_p8), %s1781_s17, 4 }
  0x15   : > { %243 = sbr.rel (%p240_p8) target bundleno = 705 (0x2c1), region = 73  ;;  %s1866_s7 = sshll.u32 (!%p240_p8), %s246_s5, 3 }
  0x16   : > { %p283_p9 = scmp.lt.s32.totalorder (!%p240_p8), %s1471_s6, 63  ;;  %s248_s12 = scalar_lea.vmem (!%p240_p8), [#allocation3], %s1866_s7 }
  0x17   : > { %p1473_p10 = scmp.ne.s32.totalorder (!%p240_p8), %s1781_s17, 0 }
  0x1a   : > { %s2138_s6 = smov (!%p283_p9, %s1471_s6), 63  ;;  %303 = sbr.rel (%p1473_p10) target bundleno = 42 (0x2a), region = 81 }
  0x1b   : > { %s1580_s8 = smul.u32 40, %s2138_s6 }
  0x1d   : > { %s1871_s11 = scalar_lea.vmem %s2127_s1, %s1580_s8 }
  0x1f   : > { %v1791_v2 = vmov 0.0  }
  0x20   : > { %304 = vst [vmem:[#allocation2] sm:$0xff] %v1791_v2  ;;  %305 = vst [vmem:[#allocation2 + $0x38] sm:$0xff] %v1791_v2 }
  0x21   : > { %306 = vst [vmem:[#allocation2 + $0x50] sm:$0xff] %v1791_v2  ;;  %307 = vst [vmem:[#allocation2 + $0x18] sm:$0xff] %v1791_v2 }
  0x22   : > { %308 = vst [vmem:[#allocation2 + $0x30] sm:$0xff] %v1791_v2  ;;  %309 = vst [vmem:[#allocation2 + $0x68] sm:$0xff] %v1791_v2 }
  0x23   : > { %310 = vst [vmem:[#allocation2 + $0x78] sm:$0xff] %v1791_v2  ;;  %311 = vst [vmem:[#allocation2 + $0x80] sm:$0xff] %v1791_v2 }
  0x24   : > { %312 = vst [vmem:[#allocation2 + $0x8] sm:$0xff] %v1791_v2  ;;  %313 = vst [vmem:[#allocation2 + $0x88] sm:$0xff] %v1791_v2 }
  0x25   : > { %314 = vst [vmem:[#allocation2 + $0x28] sm:$0xff] %v1791_v2  ;;  %315 = vst [vmem:[#allocation2 + $0x40] sm:$0xff] %v1791_v2 }
  0x26   : > { %316 = vst [vmem:[#allocation2 + $0x58] sm:$0xff] %v1791_v2  ;;  %317 = vst [vmem:[#allocation2 + $0x10] sm:$0xff] %v1791_v2 }
  0x27   : > { %318 = vst [vmem:[#allocation2 + $0x98] sm:$0xff] %v1791_v2  ;;  %319 = vst [vmem:[#allocation2 + $0x60] sm:$0xff] %v1791_v2 }
  0x28   : > { %320 = vst [vmem:[#allocation2 + $0x20] sm:$0xff] %v1791_v2  ;;  %321 = vst [vmem:[#allocation2 + $0x48] sm:$0xff] %v1791_v2 }
  0x29   : > { %322 = vst [vmem:[#allocation2 + $0x70] sm:$0xff] %v1791_v2  ;;  %323 = vst [vmem:[#allocation2 + $0x90] sm:$0xff] %v1791_v2 }
  0x2a PF: > { %v1624_v3 = vld [vmem:[%s1871_s11 + $0x234] ss:$40 sps:$4 sm:$0xff]   ;;  %v1626_v4 = vld [vmem:[%s1871_s11 + $0x230] ss:$40 sps:$4 sm:$0xff]   ;;  %v1792_v5 = vmov 0   ;;  %v1906_v31 = vld [vmem:[%s248_s12] sm:$0xff]  }
  0x2b   : > { %864 = vmatprep.mubr.bf16.mxu0 %v1792_v5  ;;  %907 = vmatprep.mubr.bf16.mxu1 %v1792_v5  ;;  %v1627_v6 = vld [vmem:[%s1871_s11 + $0x1e4] ss:$40 sps:$4 sm:$0xff]   ;;  %v1629_v7 = vld [vmem:[%s1871_s11 + $0x1e0] ss:$40 sps:$4 sm:$0xff]   ;;  %v1630_v8 = vld [vmem:[%s1871_s11 + $0x194] ss:$40 sps:$4 sm:$0xff]  }
  0x2c   : > { %832 = vmatprep.subr.bf16.mxu0 %v1624_v3  ;;  %v1632_v9 = vld [vmem:[%s1871_s11 + $0x190] ss:$40 sps:$4 sm:$0xff]   ;;  %v1633_v10 = vld [vmem:[%s1871_s11 + $0x144] ss:$40 sps:$4 sm:$0xff]   ;;  %v1635_v13 = vld [vmem:[%s1871_s11 + $0x140] ss:$40 sps:$4 sm:$0xff]  }
  0x2d   : > { %833 = vmatpush1.bf16.msra.mxu0 %v1626_v4  ;;  %v1645_v11 = vld [vmem:[%s1871_s11 + $0x23c] ss:$40 sps:$4 sm:$0xff]   ;;  %v1647_v12 = vld [vmem:[%s1871_s11 + $0x238] ss:$40 sps:$4 sm:$0xff]   ;;  %v1651_v15 = vld [vmem:[%s1871_s11 + $0x1ec] ss:$40 sps:$4 sm:$0xff]  }
  0x2e   : > { %834 = vmatprep.subr.bf16.mxu0 %v1627_v6  ;;  %v1636_v14 = vld [vmem:[%s1871_s11 + $0xf4] ss:$40 sps:$4 sm:$0xff]   ;;  %875 = vmatprep.subr.bf16.mxu1 %v1645_v11  ;;  %v1653_v16 = vld [vmem:[%s1871_s11 + $0x1e8] ss:$40 sps:$4 sm:$0xff]   ;;  %v1639_v18 = vld [vmem:[%s1871_s11 + $0xa4] ss:$40 sps:$4 sm:$0xff]  }
  0x2f   : > { %876 = vmatpush1.bf16.msra.mxu1 %v1647_v12  ;;  %v1638_v17 = vld [vmem:[%s1871_s11 + $0xf0] ss:$40 sps:$4 sm:$0xff]   ;;  %v1658_v19 = vld [vmem:[%s1871_s11 + $0x19c] ss:$40 sps:$4 sm:$0xff]   ;;  %v1641_v21 = vld [vmem:[%s1871_s11 + $0xa0] ss:$40 sps:$4 sm:$0xff]  }
  0x30   : > { %877 = vmatprep.subr.bf16.mxu1 %v1651_v15  ;;  %v1660_v20 = vld [vmem:[%s1871_s11 + $0x198] ss:$40 sps:$4 sm:$0xff]   ;;  %v1664_v22 = vld [vmem:[%s1871_s11 + $0x14c] ss:$40 sps:$4 sm:$0xff]   ;;  %v1666_v24 = vld [vmem:[%s1871_s11 + $0x148] ss:$40 sps:$4 sm:$0xff]  }
  0x31   : > { %835 = vmatpush1.bf16.msra.mxu0 %v1629_v7  ;;  %v1642_v23 = vld [vmem:[%s1871_s11 + $0x54] ss:$40 sps:$4 sm:$0xff]   ;;  %v1644_v26 = vld [vmem:[%s1871_s11 + $0x50] ss:$40 sps:$4 sm:$0xff]   ;;  %v1648_v27 = vld [vmem:[%s1871_s11 + $0x4] ss:$40 sps:$4 sm:$0xff]  }
  0x32   : > { %836 = vmatprep.subr.bf16.mxu0 %v1630_v8  ;;  %v1670_v25 = vld [vmem:[%s1871_s11 + $0xfc] ss:$40 sps:$4 sm:$0xff]   ;;  %v1672_v28 = vld [vmem:[%s1871_s11 + $0xf8] ss:$40 sps:$4 sm:$0xff]   ;;  %v1676_v29 = vld [vmem:[%s1871_s11 + $0xac] ss:$40 sps:$4 sm:$0xff]  }
  0x33   : > { %878 = vmatpush1.bf16.msra.mxu1 %v1653_v16  ;;  %v1650_v30 = vld [vmem:[%s1871_s11] ss:$40 sps:$4 sm:$0xff]   ;;  %v1657_v32 = vld [vmem:[%s1871_s11 + $0x244] ss:$40 sps:$4 sm:$0xff]   ;;  %v1663_v36 = vld [vmem:[%s1871_s11 + $0x1f4] ss:$40 sps:$4 sm:$0xff]  }
  0x34   : > { %879 = vmatprep.subr.bf16.mxu1 %v1658_v19  ;;  %v1678_v33 = vld [vmem:[%s1871_s11 + $0xa8] ss:$40 sps:$4 sm:$0xff]   ;;  %v1682_v34 = vld [vmem:[%s1871_s11 + $0x5c] ss:$40 sps:$4 sm:$0xff]   ;;  %v1684_v37 = vld [vmem:[%s1871_s11 + $0x58] ss:$40 sps:$4 sm:$0xff]  }
  0x35   : > { %837 = vmatpush1.bf16.msra.mxu0 %v1632_v9  ;;  %v1655_v35 = vld [vmem:[%s1871_s11 + $0x240] ss:$40 sps:$4 sm:$0xff]   ;;  %v1688_v38 = vld [vmem:[%s1871_s11 + $0xc] ss:$40 sps:$4 sm:$0xff]   ;;  %v1661_v39 = vld [vmem:[%s1871_s11 + $0x1f0] ss:$40 sps:$4 sm:$0xff]  }
  0x36   : > { %838 = vmatprep.subr.bf16.mxu0 %v1633_v10  ;;  %v1669_v40 = vld [vmem:[%s1871_s11 + $0x1a4] ss:$40 sps:$4 sm:$0xff]   ;;  %v1690_v41 = vld [vmem:[%s1871_s11 + $0x8] ss:$40 sps:$4 sm:$0xff]   ;;  %v1675_v44 = vld [vmem:[%s1871_s11 + $0x154] ss:$40 sps:$4 sm:$0xff]  }
  0x37   : > { %880 = vmatpush1.bf16.msra.mxu1 %v1660_v20  ;;  %v1696_v42 = vld [vmem:[%s1871_s11 + $0x24c] ss:$40 sps:$4 sm:$0xff]   ;;  %v1667_v43 = vld [vmem:[%s1871_s11 + $0x1a0] ss:$40 sps:$4 sm:$0xff]   ;;  %v1702_v46 = vld [vmem:[%s1871_s11 + $0x1fc] ss:$40 sps:$4 sm:$0xff]  }
  0x38   : > { %881 = vmatprep.subr.bf16.mxu1 %v1664_v22  ;;  %v1694_v45 = vld [vmem:[%s1871_s11 + $0x248] ss:$40 sps:$4 sm:$0xff]   ;;  %v1681_v48 = vld [vmem:[%s1871_s11 + $0x104] ss:$40 sps:$4 sm:$0xff]   ;;  %v1700_v49 = vld [vmem:[%s1871_s11 + $0x1f8] ss:$40 sps:$4 sm:$0xff]  }
  0x39   : > { %839 = vmatpush1.bf16.msra.mxu0 %v1635_v13  ;;  %v1673_v47 = vld [vmem:[%s1871_s11 + $0x150] ss:$40 sps:$4 sm:$0xff]   ;;  %v1708_v50 = vld [vmem:[%s1871_s11 + $0x1ac] ss:$40 sps:$4 sm:$0xff]   ;;  %v1679_v51 = vld [vmem:[%s1871_s11 + $0x100] ss:$40 sps:$4 sm:$0xff]  }
  0x3a   : > { %840 = vmatprep.subr.bf16.mxu0 %v1636_v14  ;;  %v1687_v52 = vld [vmem:[%s1871_s11 + $0xb4] ss:$40 sps:$4 sm:$0xff]   ;;  %v1706_v53 = vld [vmem:[%s1871_s11 + $0x1a8] ss:$40 sps:$4 sm:$0xff]   ;;  %v1693_v56 = vld [vmem:[%s1871_s11 + $0x64] ss:$40 sps:$4 sm:$0xff]  }
  0x3b   : > { %882 = vmatpush1.bf16.msra.mxu1 %v1666_v24  ;;  %v1714_v54 = vld [vmem:[%s1871_s11 + $0x15c] ss:$40 sps:$4 sm:$0xff]   ;;  %v1685_v55 = vld [vmem:[%s1871_s11 + $0xb0] ss:$40 sps:$4 sm:$0xff]   ;;  %v1720_v58 = vld [vmem:[%s1871_s11 + $0x10c] ss:$40 sps:$4 sm:$0xff]  }
  0x3c   : > { %883 = vmatprep.subr.bf16.mxu1 %v1670_v25  ;;  %v1712_v57 = vld [vmem:[%s1871_s11 + $0x158] ss:$40 sps:$4 sm:$0xff]   ;;  %v1699_v60 = vld [vmem:[%s1871_s11 + $0x14] ss:$40 sps:$4 sm:$0xff]   ;;  %v1718_v61 = vld [vmem:[%s1871_s11 + $0x108] ss:$40 sps:$4 sm:$0xff]  }
  0x3d   : > { %841 = vmatpush1.bf16.msra.mxu0 %v1638_v17  ;;  %v1691_v59 = vld [vmem:[%s1871_s11 + $0x60] ss:$40 sps:$4 sm:$0xff]   ;;  %v1726_v62 = vld [vmem:[%s1871_s11 + $0xbc] ss:$40 sps:$4 sm:$0xff]   ;;  %v1697_v63 = vld [vmem:[%s1871_s11 + $0x10] ss:$40 sps:$4 sm:$0xff]  }
  0x3e   : > { %842 = vmatprep.subr.bf16.mxu0 %v1639_v18  ;;  %v1705_v0 = vld [vmem:[%s1871_s11 + $0x254] ss:$40 sps:$4 sm:$0xff]   ;;  %v1724_v1 = vld [vmem:[%s1871_s11 + $0xb8] ss:$40 sps:$4 sm:$0xff]   ;;  %v1711_v4 = vld [vmem:[%s1871_s11 + $0x204] ss:$40 sps:$4 sm:$0xff]  }
  0x3f   : > { %884 = vmatpush1.bf16.msra.mxu1 %v1672_v28  ;;  %v1732_v2 = vld [vmem:[%s1871_s11 + $0x6c] ss:$40 sps:$4 sm:$0xff]   ;;  %v1703_v3 = vld [vmem:[%s1871_s11 + $0x250] ss:$40 sps:$4 sm:$0xff]   ;;  %v1738_v7 = vld [vmem:[%s1871_s11 + $0x1c] ss:$40 sps:$4 sm:$0xff]  }
  0x40   : > { %885 = vmatprep.subr.bf16.mxu1 %v1676_v29  ;;  %v1730_v6 = vld [vmem:[%s1871_s11 + $0x68] ss:$40 sps:$4 sm:$0xff]   ;;  %v1717_v9 = vld [vmem:[%s1871_s11 + $0x1b4] ss:$40 sps:$4 sm:$0xff]   ;;  %v1736_v10 = vld [vmem:[%s1871_s11 + $0x18] ss:$40 sps:$4 sm:$0xff]  }
  0x41   : > { %843 = vmatpush1.bf16.msra.mxu0 %v1641_v21  ;;  %v1709_v8 = vld [vmem:[%s1871_s11 + $0x200] ss:$40 sps:$4 sm:$0xff]   ;;  %v1715_v11 = vld [vmem:[%s1871_s11 + $0x1b0] ss:$40 sps:$4 sm:$0xff]   ;;  %v1723_v12 = vld [vmem:[%s1871_s11 + $0x164] ss:$40 sps:$4 sm:$0xff]  }
  0x42   : > { %844 = vmatprep.subr.bf16.mxu0 %v1642_v23  ;;  %v1721_v13 = vld [vmem:[%s1871_s11 + $0x160] ss:$40 sps:$4 sm:$0xff]   ;;  %v1727_v14 = vld [vmem:[%s1871_s11 + $0x110] ss:$40 sps:$4 sm:$0xff]   ;;  %v1735_v15 = vld [vmem:[%s1871_s11 + $0xc4] ss:$40 sps:$4 sm:$0xff]  }
  0x43   : > { %886 = vmatpush1.bf16.msra.mxu1 %v1678_v33  ;;  %v1733_v16 = vld [vmem:[%s1871_s11 + $0xc0] ss:$40 sps:$4 sm:$0xff]   ;;  %v1741_v17 = vld [vmem:[%s1871_s11 + $0x74] ss:$40 sps:$4 sm:$0xff]   ;;  %v1739_v18 = vld [vmem:[%s1871_s11 + $0x70] ss:$40 sps:$4 sm:$0xff]  }
  0x44   : > { %887 = vmatprep.subr.bf16.mxu1 %v1682_v34  ;;  %v1744_v19 = vld [vmem:[%s1871_s11 + $0x24] ss:$40 sps:$4 sm:$0xff]   ;;  %v1742_v20 = vld [vmem:[%s1871_s11 + $0x20] ss:$40 sps:$4 sm:$0xff]   ;;  %v325_v23 = vld [vmem:[#allocation2 + $0x38] sm:$0xff]  ;;  %p1555_p11 = scmp.ne.s32.totalorder %s1781_s17, 3 }
  0x45   : > { %845 = vmatpush1.bf16.msra.mxu0 %v1644_v26  ;;  %v324_v21 = vld [vmem:[#allocation2] sm:$0xff]  ;;  %v334_v26 = vld [vmem:[#allocation2 + $0x28] sm:$0xff]  ;;  %v326_v34 = vld [vmem:[#allocation2 + $0x50] sm:$0xff] }
  0x46   : > { %846 = vmatprep.subr.bf16.mxu0 %v1648_v27  ;;  %v335_v29 = vld [vmem:[#allocation2 + $0x40] sm:$0xff] }
  0x47   : > { %888 = vmatpush1.bf16.msra.mxu1 %v1684_v37 }
  0x48   : > { %889 = vmatprep.subr.bf16.mxu1 %v1688_v38  ;;  %v336_v38 = vld [vmem:[#allocation2 + $0x58] sm:$0xff] }
  0x49   : > { %847 = vmatpush1.bf16.msra.mxu0 %v1650_v30 }
  0x4a   : > { %918 = vmatprep.subr.bf16.mxu0 %v1657_v32 }
  0x4b   : > { %890 = vmatpush1.bf16.msra.mxu1 %v1690_v41  ;;  %v337_v41 = vld [vmem:[#allocation2 + $0x10] sm:$0xff] }
  0x4c   : > { %865 = vmatmul.mubr.bf16.vlgmr.msra.gmra.mxu0 %v1906_v31  ;;  %961 = vmatprep.subr.bf16.mxu1 %v1696_v42 }
  0x4d   : > { %919 = vmatpush1.bf16.msra.mxu0 %v1655_v35  ;;  %950 = vmatprep.mubr.bf16.mxu0 %v1792_v5 }
  0x4e   : > { %920 = vmatprep.subr.bf16.mxu0 %v1663_v36  ;;  %908 = vmatmul.mubr.bf16.vlgmr.msra.gmra.mxu1 %v1906_v31  ;;  %v327_v36 = vld [vmem:[#allocation2 + $0x18] sm:$0xff] }
  0x4f   : > { %962 = vmatpush1.bf16.msra.mxu1 %v1694_v45  ;;  %993 = vmatprep.mubr.bf16.mxu1 %v1792_v5  ;;  %v328_v45 = vld [vmem:[#allocation2 + $0x30] sm:$0xff] }
  0x50   : > { %963 = vmatprep.subr.bf16.mxu1 %v1702_v46 }
  0x51   : > { %921 = vmatpush1.bf16.msra.mxu0 %v1661_v39 }
  0x52   : > { %922 = vmatprep.subr.bf16.mxu0 %v1669_v40 }
  0x53   : > { %964 = vmatpush1.bf16.msra.mxu1 %v1700_v49 }
  0x54   : > { %965 = vmatprep.subr.bf16.mxu1 %v1708_v50  ;;  %v338_v50 = vld [vmem:[#allocation2 + $0x98] sm:$0xff] }
  0x55   : > { %923 = vmatpush1.bf16.msra.mxu0 %v1667_v43 }
  0x56   : > { %924 = vmatprep.subr.bf16.mxu0 %v1675_v44 }
  0x57   : > { %966 = vmatpush1.bf16.msra.mxu1 %v1706_v53  ;;  %v339_v53 = vld [vmem:[#allocation2 + $0x60] sm:$0xff] }
  0x58   : > { %967 = vmatprep.subr.bf16.mxu1 %v1714_v54 }
  0x59   : > { %925 = vmatpush1.bf16.msra.mxu0 %v1673_v47  ;;  %v329_v47 = vld [vmem:[#allocation2 + $0x68] sm:$0xff] }
  0x5a   : > { %926 = vmatprep.subr.bf16.mxu0 %v1681_v48 }
  0x5b   : > { %968 = vmatpush1.bf16.msra.mxu1 %v1712_v57  ;;  %v330_v57 = vld [vmem:[#allocation2 + $0x78] sm:$0xff] }
  0x5c   : > { %969 = vmatprep.subr.bf16.mxu1 %v1720_v58 }
  0x5d   : > { %927 = vmatpush1.bf16.msra.mxu0 %v1679_v51 }
  0x5e   : > { %928 = vmatprep.subr.bf16.mxu0 %v1687_v52 }
  0x5f   : > { %970 = vmatpush1.bf16.msra.mxu1 %v1718_v61 }
  0x60   : > { %971 = vmatprep.subr.bf16.mxu1 %v1726_v62  ;;  %v340_v62 = vld [vmem:[#allocation2 + $0x20] sm:$0xff] }
  0x61   : > { %929 = vmatpush1.bf16.msra.mxu0 %v1685_v55 }
  0x62   : > { %930 = vmatprep.subr.bf16.mxu0 %v1693_v56 }
  0x63   : > { %972 = vmatpush1.bf16.msra.mxu1 %v1724_v1  ;;  %v341_v1 = vld [vmem:[#allocation2 + $0x48] sm:$0xff] }
  0x64   : > { %973 = vmatprep.subr.bf16.mxu1 %v1732_v2 }
  0x65   : > { %931 = vmatpush1.bf16.msra.mxu0 %v1691_v59  ;;  %v331_v59 = vld [vmem:[#allocation2 + $0x80] sm:$0xff] }
  0x66   : > { %932 = vmatprep.subr.bf16.mxu0 %v1699_v60 }
  0x67   : > { %974 = vmatpush1.bf16.msra.mxu1 %v1730_v6  ;;  %v332_v6 = vld [vmem:[#allocation2 + $0x8] sm:$0xff] }
  0x68   : > { %975 = vmatprep.subr.bf16.mxu1 %v1738_v7 }
  0x69   : > { %933 = vmatpush1.bf16.msra.mxu0 %v1697_v63 }
  0x6a   : > { %1004 = vmatprep.subr.bf16.mxu0 %v1705_v0 }
  0x6b   : > { %976 = vmatpush1.bf16.msra.mxu1 %v1736_v10 }
  0x6c   : > { %951 = vmatmul.mubr.bf16.vlgmr.msra.gmra.mxu0 %v1906_v31 }
  0x6d   : > { %1005 = vmatpush1.bf16.msra.mxu0 %v1703_v3  ;;  %1036 = vmatprep.mubr.bf16.mxu0 %v1792_v5  ;;  %v1729_v5 = vld [vmem:[%s1871_s11 + $0x114] ss:$40 sps:$4 sm:$0xff]  }
  0x6e   : > { %1006 = vmatprep.subr.bf16.mxu0 %v1711_v4  ;;  %994 = vmatmul.mubr.bf16.vlgmr.msra.gmra.mxu1 %v1906_v31 }
  0x71   : > { %1007 = vmatpush1.bf16.msra.mxu0 %v1709_v8  ;;  %v333_v8 = vld [vmem:[#allocation2 + $0x88] sm:$0xff] }
  0x72   : > { %1008 = vmatprep.subr.bf16.mxu0 %v1717_v9 }
  0x75   : > { %1009 = vmatpush1.bf16.msra.mxu0 %v1715_v11  ;;  %v342_v11 = vld [vmem:[#allocation2 + $0x70] sm:$0xff] }
  0x76   : > { %1010 = vmatprep.subr.bf16.mxu0 %v1723_v12 }
  0x79   : > { %1011 = vmatpush1.bf16.msra.mxu0 %v1721_v13 }
  0x7a   : > { %1012 = vmatprep.subr.bf16.mxu0 %v1729_v5  ;;  %v343_v5 = vld [vmem:[#allocation2 + $0x90] sm:$0xff] }
  0x7d   : > { %1013 = vmatpush1.bf16.msra.mxu0 %v1727_v14 }
  0x7e   : > { %1014 = vmatprep.subr.bf16.mxu0 %v1735_v15 }
  0x81   : > { %1015 = vmatpush1.bf16.msra.mxu0 %v1733_v16 }
  0x82   : > { %1016 = vmatprep.subr.bf16.mxu0 %v1741_v17 }
  0x85   : > { %1017 = vmatpush1.bf16.msra.mxu0 %v1739_v18 }
  0x86   : > { %1018 = vmatprep.subr.bf16.mxu0 %v1744_v19 }
  0x89   : > { %1019 = vmatpush1.bf16.msra.mxu0 %v1742_v20 }
  0x8c   : > { %1037 = vmatmul.mubr.bf16.vlgmr.msra.gmra.mxu0 %v1906_v31 }
 0x10c   : > { %v866_v22 = vpop.f32.mrf.mxu0 }
 0x10d   : > { %v1047_v24 = vadd.f32 %v866_v22, %v324_v21 }
 0x10e   : > { %v868_v25 = vpop.f32.mrf.mxu0  ;;  %v909_v35 = vpop.f32.mrf.mxu1 }
 0x10f   : > { %1067 = vst [vmem:[#allocation2] sm:$0xff] %v1047_v24  ;;  %v1048_v27 = vadd.f32 %v868_v25, %v325_v23  ;;  %v1049_v31 = vadd.f32 %v909_v35, %v326_v34 }
 0x110   : > { %v870_v28 = vpop.f32.mrf.mxu0  ;;  %v911_v37 = vpop.f32.mrf.mxu1 }
 0x111   : > { %1068 = vst [vmem:[#allocation2 + $0x38] sm:$0xff] %v1048_v27  ;;  %v1057_v30 = vadd.f32 %v870_v28, %v334_v26  ;;  %1069 = vst [vmem:[#allocation2 + $0x50] sm:$0xff] %v1049_v31  ;;  %v1050_v39 = vadd.f32 %v911_v37, %v327_v36 }
 0x112   : > { %v872_v32 = vpop.f32.mrf.mxu0  ;;  %v913_v40 = vpop.f32.mrf.mxu1 }
 0x113   : > { %1077 = vst [vmem:[#allocation2 + $0x28] sm:$0xff] %v1057_v30  ;;  %v1058_v33 = vadd.f32 %v872_v32, %v335_v29  ;;  %1070 = vst [vmem:[#allocation2 + $0x18] sm:$0xff] %v1050_v39  ;;  %v1059_v42 = vadd.f32 %v913_v40, %v336_v38 }
 0x114   : > { %v915_v43 = vpop.f32.mrf.mxu1 }
 0x115   : > { %1078 = vst [vmem:[#allocation2 + $0x40] sm:$0xff] %v1058_v33  ;;  %1079 = vst [vmem:[#allocation2 + $0x58] sm:$0xff] %v1059_v42  ;;  %v1060_v44 = vadd.f32 %v915_v43, %v337_v41 }
 0x117   : > { %1080 = vst [vmem:[#allocation2 + $0x10] sm:$0xff] %v1060_v44 }
 0x12c   : > { %v952_v46 = vpop.f32.mrf.mxu0 }
 0x12d   : > { %v1051_v48 = vadd.f32 %v952_v46, %v328_v45 }
 0x12e   : > { %v954_v49 = vpop.f32.mrf.mxu0  ;;  %v995_v58 = vpop.f32.mrf.mxu1 }
 0x12f   : > { %1071 = vst [vmem:[#allocation2 + $0x30] sm:$0xff] %v1051_v48  ;;  %v1052_v51 = vadd.f32 %v954_v49, %v329_v47  ;;  %v1053_v60 = vadd.f32 %v995_v58, %v330_v57 }
 0x130   : > { %v956_v52 = vpop.f32.mrf.mxu0  ;;  %v997_v61 = vpop.f32.mrf.mxu1 }
 0x131   : > { %1072 = vst [vmem:[#allocation2 + $0x68] sm:$0xff] %v1052_v51  ;;  %v1061_v54 = vadd.f32 %v956_v52, %v338_v50  ;;  %1073 = vst [vmem:[#allocation2 + $0x78] sm:$0xff] %v1053_v60  ;;  %v1054_v63 = vadd.f32 %v997_v61, %v331_v59 }
 0x132   : > { %v958_v55 = vpop.f32.mrf.mxu0  ;;  %v999_v0 = vpop.f32.mrf.mxu1 }
 0x133   : > { %1081 = vst [vmem:[#allocation2 + $0x98] sm:$0xff] %v1061_v54  ;;  %v1062_v56 = vadd.f32 %v958_v55, %v339_v53  ;;  %1074 = vst [vmem:[#allocation2 + $0x80] sm:$0xff] %v1054_v63  ;;  %v1063_v2 = vadd.f32 %v999_v0, %v340_v62 }
 0x134   : > { %v1001_v3 = vpop.f32.mrf.mxu1 }
 0x135   : > { %1082 = vst [vmem:[#allocation2 + $0x60] sm:$0xff] %v1062_v56  ;;  %1083 = vst [vmem:[#allocation2 + $0x20] sm:$0xff] %v1063_v2  ;;  %v1064_v4 = vadd.f32 %v1001_v3, %v341_v1 }
 0x137   : > { %1084 = vst [vmem:[#allocation2 + $0x48] sm:$0xff] %v1064_v4 }
 0x14c   : > { %v1038_v7 = vpop.f32.mrf.mxu0 }
 0x14d   : > { %v1055_v9 = vadd.f32 %v1038_v7, %v332_v6 }
 0x14e   : > { %v1040_v10 = vpop.f32.mrf.mxu0 }
 0x14f   : > { %1075 = vst [vmem:[#allocation2 + $0x8] sm:$0xff] %v1055_v9  ;;  %v1056_v12 = vadd.f32 %v1040_v10, %v333_v8 }
 0x150   : > { %v1042_v13 = vpop.f32.mrf.mxu0 }
 0x151   : > { %1076 = vst [vmem:[#allocation2 + $0x88] sm:$0xff] %v1056_v12  ;;  %v1065_v14 = vadd.f32 %v1042_v13, %v342_v11  ;;  %1090 = sbr.rel (%p1555_p11) target bundleno = 705 (0x2c1), region = 85 }
 0x152   : > { %v1044_v15 = vpop.f32.mrf.mxu0 }
 0x153   : > { %1085 = vst [vmem:[#allocation2 + $0x70] sm:$0xff] %v1065_v14  ;;  %v1066_v16 = vadd.f32 %v1044_v15, %v343_v5 }
 0x155   : > { %1086 = vst [vmem:[#allocation2 + $0x90] sm:$0xff] %v1066_v16 }
 0x156   : > { %v1091_v17 = vld [vmem:[#allocation2] sm:$0xff]  ;;  %v1092_v18 = vld [vmem:[#allocation2 + $0x38] sm:$0xff]  ;;  %v1093_v19 = vld [vmem:[#allocation2 + $0x50] sm:$0xff]  ;;  %v1793_v21 = vmov 0  }
 0x157   : > { %v1111_v20 = vadd.f32 %v1092_v18, %v1091_v17  ;;  %1746 = vset.pattern.permute.xlu1 %v1793_v21  ;;  %1745 = vset.pattern.permute.xlu0 %v1793_v21  ;;  %v1094_v22 = vld [vmem:[#allocation2 + $0x18] sm:$0xff]  ;;  %v1101_v24 = vld [vmem:[#allocation2 + $0x28] sm:$0xff]  ;;  %v1102_v25 = vld [vmem:[#allocation2 + $0x40] sm:$0xff] }
 0x158   : > { %v1095_v26 = vld [vmem:[#allocation2 + $0x30] sm:$0xff]  ;;  %v1103_v27 = vld [vmem:[#allocation2 + $0x58] sm:$0xff]  ;;  %v1122_v28 = vadd.f32 %v1102_v25, %v1101_v24  ;;  %v1096_v32 = vld [vmem:[#allocation2 + $0x68] sm:$0xff] }
 0x159   : > { %v1112_v23 = vadd.f32 %v1111_v20, %v1093_v19  ;;  %v1104_v30 = vld [vmem:[#allocation2 + $0x10] sm:$0xff]  ;;  %v1225_v34 = vld [vmem:[%s2128_s2 + $0x8] sm:$0xff]  ;;  %v1105_v36 = vld [vmem:[#allocation2 + $0x98] sm:$0xff] }
 0x15a   : > { %v1123_v33 = vadd.f32 %v1122_v28, %v1103_v27  ;;  %1233 = vperm.xlu1 %1746, %v1225_v34   ;;  %v1097_v31 = vld [vmem:[#allocation2 + $0x78] sm:$0xff]  ;;  %v1256_v38 = vld [vmem:[%s2129_s3] sm:$0xff]  ;;  %v1099_v45 = vld [vmem:[#allocation2 + $0x8] sm:$0xff] }
 0x15b   : > { %v1113_v29 = vadd.f32 %v1112_v23, %v1094_v22  ;;  %v1106_v40 = vld [vmem:[#allocation2 + $0x60] sm:$0xff]  ;;  %v1108_v48 = vld [vmem:[#allocation2 + $0x48] sm:$0xff]  ;;  %v1109_v52 = vld [vmem:[#allocation2 + $0x70] sm:$0xff] }
 0x15c   : > { %v1124_v37 = vadd.f32 %v1123_v33, %v1104_v30  ;;  %v1098_v41 = vld [vmem:[#allocation2 + $0x80] sm:$0xff]  ;;  %v1100_v49 = vld [vmem:[#allocation2 + $0x88] sm:$0xff]  ;;  %v1110_v55 = vld [vmem:[#allocation2 + $0x90] sm:$0xff] }
 0x15d   : > { %v1114_v35 = vadd.f32 %v1113_v29, %v1095_v26  ;;  %v1107_v44 = vld [vmem:[#allocation2 + $0x20] sm:$0xff] }
 0x15e   : > { %v1125_v42 = vadd.f32 %v1124_v37, %v1105_v36  ;;  %1260 = vperm.xlu1 %1746, %v1256_v38   ;;  %v1224_v58 = vld [vmem:[%s2128_s2] sm:$0xff] }
 0x15f   : > { %v1115_v39 = vadd.f32 %v1114_v35, %v1096_v32 }
 0x160   : > { %v1126_v46 = vadd.f32 %v1125_v42, %v1106_v40 }
 0x161   : > { %v1116_v43 = vadd.f32 %v1115_v39, %v1097_v31 }
 0x162   : > { %v1127_v50 = vadd.f32 %v1126_v46, %v1107_v44 }
 0x163   : > { %v1117_v47 = vadd.f32 %v1116_v43, %v1098_v41 }
 0x164   : > { %v1128_v53 = vadd.f32 %v1127_v50, %v1108_v48 }
 0x165   : > { %v1118_v51 = vadd.f32 %v1117_v47, %v1099_v45 }
 0x166   : > { %v1129_v56 = vadd.f32 %v1128_v53, %v1109_v52 }
 0x167   : > { %v1119_v54 = vadd.f32 %v1118_v51, %v1100_v49 }
 0x168   : > { %v1130_v57 = vadd.f32 %v1129_v56, %v1110_v55 }
 0x169   : > { %1120 = vadd.xlane.f32.xlu0 %v1119_v54 }
 0x16d   : > { %1131 = vadd.xlane.f32.xlu0 %v1130_v57 }
 0x183   : > { %1228 = vperm.xlu0 %1745, %v1224_v58  }
 0x1f2   : > { %v1121_v59 = vpop.xlane.xlu0 %1120 }
 0x1f3   : > { %v1134_v60 = vmul.f32 0.00078125, %v1121_v59  ;;  %v1234_v59 = vpop.permute.xlu1 %1233 }
 0x1f5   : > { %v1979_v61 = vsub.f32 %v1091_v17, %v1134_v60  ;;  %v1981_v62 = vsub.f32 %v1092_v18, %v1134_v60  ;;  %v1983_v0 = vsub.f32 %v1093_v19, %v1134_v60  ;;  %v1987_v3 = vsub.f32 %v1094_v22, %v1134_v60 }
 0x1f6   : > { %v1132_v63 = vpop.xlane.xlu0 %1131  ;;  %v1991_v6 = vsub.f32 %v1095_v26, %v1134_v60  ;;  %v1999_v11 = vsub.f32 %v1096_v32, %v1134_v60  ;;  %v2005_v14 = vsub.f32 %v1097_v31, %v1134_v60  ;;  %v1143_v20 = vsub.f32 %v1098_v41, %v1134_v60 }
 0x1f7   : > { %v1135_v1 = vmul.f32 0.00078125, %v1132_v63  ;;  %v1156_v2 = vmul.f32 %v1979_v61, %v1979_v61  ;;  %v1157_v4 = vmul.f32 %v1981_v62, %v1981_v62  ;;  %v1158_v7 = vmul.f32 %v1983_v0, %v1983_v0 }
 0x1f8   : > { %v1159_v12 = vmul.f32 %v1987_v3, %v1987_v3  ;;  %v1160_v17 = vmul.f32 %v1991_v6, %v1991_v6  ;;  %v1161_v21 = vmul.f32 %v1999_v11, %v1999_v11  ;;  %v1144_v26 = vsub.f32 %v1099_v45, %v1134_v60 }
 0x1f9   : > { %v1176_v8 = vadd.f32 %v1157_v4, %v1156_v2  ;;  %v1995_v9 = vsub.f32 %v1101_v24, %v1135_v1  ;;  %v1997_v10 = vsub.f32 %v1102_v25, %v1135_v1  ;;  %v2003_v5 = vsub.f32 %v1103_v27, %v1135_v1 }
 0x1fa   : > { %v2013_v19 = vsub.f32 %v1104_v30, %v1135_v1  ;;  %v2017_v23 = vsub.f32 %v1105_v36, %v1135_v1  ;;  %v1162_v27 = vmul.f32 %v2005_v14, %v2005_v14  ;;  %v2023_v29 = vsub.f32 %v1106_v40, %v1135_v1 }
 0x1fb   : > { %v1177_v13 = vadd.f32 %v1176_v8, %v1158_v7  ;;  %v1166_v15 = vmul.f32 %v1995_v9, %v1995_v9  ;;  %v1167_v16 = vmul.f32 %v1997_v10, %v1997_v10  ;;  %v1168_v24 = vmul.f32 %v2003_v5, %v2003_v5 }
 0x1fc   : > { %v1169_v30 = vmul.f32 %v2013_v19, %v2013_v19  ;;  %v1145_v33 = vsub.f32 %v1100_v49, %v1134_v60  ;;  %v1163_v34 = vmul.f32 %v1143_v20, %v1143_v20  ;;  %v2027_v36 = vsub.f32 %v1107_v44, %v1135_v1  ;;  %v2042_v60 = vpop.permute.xlu1 %1260 }
 0x1fd   : > { %v1178_v18 = vadd.f32 %v1177_v13, %v1159_v12  ;;  %v1187_v25 = vadd.f32 %v1167_v16, %v1166_v15  ;;  %v1170_v31 = vmul.f32 %v2017_v23, %v2017_v23  ;;  %v1164_v38 = vmul.f32 %v1144_v26, %v1144_v26 }
 0x1fe   : > { %v2031_v41 = vsub.f32 %v1108_v48, %v1135_v1  ;;  %v1171_v40 = vmul.f32 %v2023_v29, %v2023_v29  ;;  %v1165_v43 = vmul.f32 %v1145_v33, %v1145_v33  ;;  %v1154_v46 = vsub.f32 %v1109_v52, %v1135_v1  ;;  %v1257_v52 = vld [vmem:[%s2129_s3 + $0x8] sm:$0xff]  ;;  %v1229_v12 = vpop.permute.xlu0 %1228 }
 0x1ff   : > { %v1179_v22 = vadd.f32 %v1178_v18, %v1160_v17  ;;  %v1188_v32 = vadd.f32 %v1187_v25, %v1168_v24  ;;  %v1172_v47 = vmul.f32 %v2027_v36, %v2027_v36  ;;  %v1155_v50 = vsub.f32 %v1110_v55, %v1135_v1 }
 0x200   : > { %v1173_v51 = vmul.f32 %v2031_v41, %v2031_v41  ;;  %v1174_v48 = vmul.f32 %v1154_v46, %v1154_v46 }
 0x201   : > { %v1180_v28 = vadd.f32 %v1179_v22, %v1161_v21  ;;  %v1189_v37 = vadd.f32 %v1188_v32, %v1169_v30  ;;  %v1175_v56 = vmul.f32 %v1155_v50, %v1155_v50 }
 0x203   : > { %v1181_v35 = vadd.f32 %v1180_v28, %v1162_v27  ;;  %v1190_v42 = vadd.f32 %v1189_v37, %v1170_v31 }
 0x205   : > { %v1182_v39 = vadd.f32 %v1181_v35, %v1163_v34  ;;  %v1191_v44 = vadd.f32 %v1190_v42, %v1171_v40 }
 0x207   : > { %v1183_v45 = vadd.f32 %v1182_v39, %v1164_v38  ;;  %v1192_v53 = vadd.f32 %v1191_v44, %v1172_v47 }
 0x209   : > { %v1184_v49 = vadd.f32 %v1183_v45, %v1165_v43  ;;  %v1193_v54 = vadd.f32 %v1192_v53, %v1173_v51 }
 0x20b   : > { %1185 = vadd.xlane.f32.xlu1 %v1184_v49  ;;  %v1194_v57 = vadd.f32 %v1193_v54, %v1174_v48 }
 0x20d   : > { %v1195_v58 = vadd.f32 %v1194_v57, %v1175_v56 }
 0x20f   : > { %1196 = vadd.xlane.f32.xlu1 %v1195_v58 }
 0x220   : > { %1265 = vperm.xlu1 %1746, %v1257_v52  }
 0x294   : > { %v1186_v55 = vpop.xlane.xlu1 %1185 }
 0x295   : > { %v1198_v63 = vmul.f32 0.00078125, %v1186_v55 }
 0x297   : > { %v1200_v1 = vadd.f32 1e-05, %v1198_v63 }
 0x298   : > { %v1197_v2 = vpop.xlane.xlu1 %1196 }
 0x299   : > { %1747 = vrsqrt.f32 %v1200_v1  ;;  %v1199_v4 = vmul.f32 0.00078125, %v1197_v2 }
 0x29b   : > { %v1201_v7 = vadd.f32 1e-05, %v1199_v4 }
 0x29c   : > { %v1266_v57 = vpop.permute.xlu1 %1265 }
 0x29d   : > { %1749 = vrsqrt.f32 %v1201_v7 }
 0x2a6   : > { %v1748_v8 = vpop.eup %1747 }
 0x2a7   : > { %v1204_v13 = vmul.f32 %v1748_v8, %v1979_v61  ;;  %v1205_v15 = vmul.f32 %v1748_v8, %v1981_v62  ;;  %v1206_v16 = vmul.f32 %v1748_v8, %v1983_v0  ;;  %v1207_v17 = vmul.f32 %v1748_v8, %v1987_v3 }
 0x2a8   : > { %v1208_v18 = vmul.f32 %v1748_v8, %v1991_v6  ;;  %v1209_v21 = vmul.f32 %v1748_v8, %v1999_v11  ;;  %v1210_v22 = vmul.f32 %v1748_v8, %v2005_v14  ;;  %v1211_v24 = vmul.f32 %v1748_v8, %v1143_v20 }
 0x2a9   : > { %v1212_v25 = vmul.f32 %v1748_v8, %v1144_v26  ;;  %v1213_v27 = vmul.f32 %v1748_v8, %v1145_v33  ;;  %v1236_v28 = vmul.f32 %v1229_v12, %v1204_v13  ;;  %v1237_v30 = vmul.f32 %v1229_v12, %v1205_v15 }
 0x2aa   : > { %v1238_v32 = vmul.f32 %v1229_v12, %v1206_v16  ;;  %v1239_v34 = vmul.f32 %v1229_v12, %v1207_v17  ;;  %v1240_v61 = vmul.f32 %v1229_v12, %v1208_v18  ;;  %v1241_v35 = vmul.f32 %v1229_v12, %v1209_v21  ;;  %v1750_v3 = vpop.eup %1749 }
 0x2ab   : > { %v1242_v62 = vmul.f32 %v1229_v12, %v1210_v22  ;;  %v1243_v31 = vmul.f32 %v1229_v12, %v1211_v24  ;;  %v1244_v0 = vmul.f32 %v1229_v12, %v1212_v25  ;;  %v1245_v37 = vmul.f32 %v1229_v12, %v1213_v27 }
 0x2ac   : > { %v2052_v6 = vadd.f32 %v2042_v60, %v1236_v28  ;;  %v2055_v11 = vadd.f32 %v2042_v60, %v1237_v30  ;;  %v2058_v14 = vadd.f32 %v2042_v60, %v1238_v32  ;;  %v2061_v20 = vadd.f32 %v2042_v60, %v1239_v34 }
 0x2ad   : > { %v1214_v26 = vmul.f32 %v1750_v3, %v1995_v9  ;;  %v1215_v33 = vmul.f32 %v1750_v3, %v1997_v10  ;;  %v1216_v38 = vmul.f32 %v1750_v3, %v2003_v5  ;;  %v1217_v39 = vmul.f32 %v1750_v3, %v2013_v19 }
 0x2ae   : > { %v1218_v40 = vmul.f32 %v1750_v3, %v2017_v23  ;;  %v1219_v42 = vmul.f32 %v1750_v3, %v2023_v29  ;;  %v1220_v43 = vmul.f32 %v1750_v3, %v2027_v36  ;;  %v1221_v45 = vmul.f32 %v1750_v3, %v2031_v41 }
 0x2af   : > { %v1222_v47 = vmul.f32 %v1750_v3, %v1154_v46  ;;  %v1223_v44 = vmul.f32 %v1750_v3, %v1155_v50  ;;  %v1246_v49 = vmul.f32 %v1234_v59, %v1214_v26  ;;  %v1247_v51 = vmul.f32 %v1234_v59, %v1215_v33 }
 0x2b0   : > { %v1248_v53 = vmul.f32 %v1234_v59, %v1216_v38  ;;  %v1249_v9 = vmul.f32 %v1234_v59, %v1217_v39  ;;  %v1250_v48 = vmul.f32 %v1234_v59, %v1218_v40  ;;  %v1251_v10 = vmul.f32 %v1234_v59, %v1219_v42 }
 0x2b1   : > { %v1252_v54 = vmul.f32 %v1234_v59, %v1220_v43  ;;  %v1253_v5 = vmul.f32 %v1234_v59, %v1221_v45  ;;  %v1254_v56 = vmul.f32 %v1234_v59, %v1222_v47  ;;  %v1255_v19 = vmul.f32 %v1234_v59, %v1223_v44 }
 0x2b2   : > { %v1278_v23 = vadd.f32 %v1266_v57, %v1246_v49  ;;  %v1279_v58 = vadd.f32 %v1266_v57, %v1247_v51  ;;  %v1280_v29 = vadd.f32 %v1266_v57, %v1248_v53  ;;  %v1281_v52 = vadd.f32 %v1266_v57, %v1249_v9 }
 0x2b3   : > { %v1282_v36 = vadd.f32 %v1266_v57, %v1250_v48  ;;  %v1283_v55 = vadd.f32 %v1266_v57, %v1251_v10  ;;  %v1284_v41 = vadd.f32 %v1266_v57, %v1252_v54  ;;  %v1285_v46 = vadd.f32 %v1266_v57, %v1253_v5 }
 0x2b4   : > { %v1286_v50 = vadd.f32 %v1266_v57, %v1254_v56  ;;  %v1287_v63 = vadd.f32 %v1266_v57, %v1255_v19  ;;  %v1298_v1 = vmax.f32 %v1278_v23, 0.0  ;;  %v1299_v2 = vmax.f32 %v1279_v58, 0.0 }
 0x2b5   : > { %v1300_v4 = vmax.f32 %v1280_v29, 0.0  ;;  %v1301_v7 = vmax.f32 %v1281_v52, 0.0  ;;  %v1302_v8 = vmax.f32 %v1282_v36, 0.0  ;;  %v1303_v12 = vmax.f32 %v1283_v55, 0.0 }
 0x2b6   : > { %v1304_v13 = vmax.f32 %v1284_v41, 0.0  ;;  %v1305_v15 = vmax.f32 %v1285_v46, 0.0  ;;  %v1306_v59 = vmax.f32 %v1286_v50, 0.0  ;;  %v1307_v16 = vmax.f32 %v1287_v63, 0.0 }
 0x2b7   : > { %v1575_v17 = vpack.c.bf16 %v1299_v2, %v1298_v1  ;;  %v1576_v18 = vpack.c.bf16 %v1301_v7, %v1300_v4  ;;  %v1577_v21 = vpack.c.bf16 %v1303_v12, %v1302_v8  ;;  %v1272_v22 = vadd.f32 %v2042_v60, %v1240_v61 }
 0x2b8   : > { %v1578_v24 = vpack.c.bf16 %v1305_v15, %v1304_v13  ;;  %v1579_v25 = vpack.c.bf16 %v1307_v16, %v1306_v59  ;;  %v1273_v27 = vadd.f32 %v2042_v60, %v1241_v35  ;;  %v1274_v28 = vadd.f32 %v2042_v60, %v1242_v62 }
 0x2b9   : > { %1373 = vst [vmem:[%s2130_s4 + $0x28] sm:$0xff] %v1575_v17  ;;  %1374 = vst [vmem:[%s2130_s4 + $0x30] sm:$0xff] %v1576_v18  ;;  %v1275_v30 = vadd.f32 %v2042_v60, %v1243_v31  ;;  %v1276_v32 = vadd.f32 %v2042_v60, %v1244_v0  ;;  %v1277_v34 = vadd.f32 %v2042_v60, %v1245_v37  ;;  %v1288_v61 = vmax.f32 %v2052_v6, 0.0 }
 0x2ba   : > { %1375 = vst [vmem:[%s2130_s4 + $0x38] sm:$0xff] %v1577_v21  ;;  %1376 = vst [vmem:[%s2130_s4 + $0x40] sm:$0xff] %v1578_v24  ;;  %v1289_v35 = vmax.f32 %v2055_v11, 0.0  ;;  %v1290_v62 = vmax.f32 %v2058_v14, 0.0  ;;  %v1291_v31 = vmax.f32 %v2061_v20, 0.0  ;;  %v1292_v3 = vmax.f32 %v1272_v22, 0.0 }
 0x2bb   : > { %1377 = vst [vmem:[%s2130_s4 + $0x48] sm:$0xff] %v1579_v25  ;;  %v1293_v0 = vmax.f32 %v1273_v27, 0.0  ;;  %v1294_v26 = vmax.f32 %v1274_v28, 0.0  ;;  %v1295_v60 = vmax.f32 %v1275_v30, 0.0  ;;  %v1296_v37 = vmax.f32 %v1276_v32, 0.0 }
 0x2bc   : > { %v1297_v6 = vmax.f32 %v1277_v34, 0.0  ;;  %v1570_v33 = vpack.c.bf16 %v1289_v35, %v1288_v61  ;;  %v1571_v38 = vpack.c.bf16 %v1291_v31, %v1290_v62 }
 0x2bd   : > { %v1572_v39 = vpack.c.bf16 %v1293_v0, %v1292_v3  ;;  %v1573_v40 = vpack.c.bf16 %v1295_v60, %v1294_v26 }
 0x2be   : > { %v1574_v42 = vpack.c.bf16 %v1297_v6, %v1296_v37  ;;  %1368 = vst [vmem:[%s2130_s4] sm:$0xff] %v1570_v33  ;;  %1369 = vst [vmem:[%s2130_s4 + $0x8] sm:$0xff] %v1571_v38 }
 0x2bf   : > { %1370 = vst [vmem:[%s2130_s4 + $0x10] sm:$0xff] %v1572_v39  ;;  %1371 = vst [vmem:[%s2130_s4 + $0x18] sm:$0xff] %v1573_v40 }
 0x2c0   : > { %1372 = vst [vmem:[%s2130_s4 + $0x20] sm:$0xff] %v1574_v42 }
 0x2c1 PF: > { %s14_s19 = sadd.s32 1, %s1789_s19   ;;  %s2131_s15 = smov %s1777_s16 }
 0x2c2   : > { %p11_p12 = scmp.ge.s32.totalorder %s14_s19, 6   ;;  %s2132_s16 = smov %s1854_s23 }
 0x2c3   : > { %s2133_s17 = smov %s1785_s18  ;;  %s2134_s18 = smov %s2136_s20 }
 0x2c4   :  { %13 = sbr.rel (!%p11_p12) target bundleno = 3 (0x3), region = 123 }

// kernel: netg_forward.8
= control target key start
LH: loop header
LB: loop body
LE: loop exit
PB: predicated region body
PF: predicated region fallthrough
CT: control target
= control target key end

     0   :  { %s4256_s15 = smov 0   ;;  %s4258_s16 = smov 0   ;;  %s5229_s0 = inlined_call_operand.vmem [shape: bf16[8,256], index: 0, kind: input, shape index: {}]   ;;  %s5230_s1 = inlined_call_operand.vmem [shape: bf16[256,5120], index: 1, kind: input, shape index: {}]   ;;  %s5231_s2 = inlined_call_operand.vmem [shape: f32[8,1], index: 2, kind: input, shape index: {}]   ;;  %s5232_s3 = inlined_call_operand.vmem [shape: f32[8,1], index: 3, kind: input, shape index: {}]   ;;  %s5233_s4 = inlined_call_operand.vmem [shape: bf16[8,5120], index: 4, kind: output, shape index: {}]  }
   0x1   :  { %s4260_s17 = smov 0  }
   0x2 LB: > { %s23_s18 = sadd.s32 1, %s4222_s16  ;;  %p3801_p0 = scmp.ge.s32.totalorder %s4226_s17, 1  ;;  %s4226_s17 = sphi %s4260_s17, %s14_s17   ;;  %s4222_s16 = sphi %s4258_s16, %s5235_s16   ;;  %s4218_s15 = sphi %s4256_s15, %s5234_s15  }
   0x3   : > { %p24_p1 = scmp.ge.s32.totalorder %s23_s18, 2  ;;  %p192_p2 = scmp.lt.s32.totalorder %s4226_s17, 3 }
   0x5   : > { %s5237_s18 = smov (%p24_p1, %s23_s18), 0  ;;  %p193_p3 = pnand %p3801_p0, %p192_p2 }
   0x6   : > { %p227_p4 = scmp.lt.s32.totalorder (!%p193_p3), %s4218_s15, 1  ;;  %s3803_s19 = sshll.u32 (!%p193_p3), %s4218_s15, 4 }
   0x7   : > { %196 = sbr.rel (%p193_p3) target bundleno = 1073 (0x431), region = 36  ;;  %p233_p5 = scmp.lt.s32.totalorder (!%p193_p3), %s3803_s19, 31 }
   0x8   : > { %p3805_p6 = scmp.ne.s32.totalorder (!%p193_p3), %s4218_s15, 0 }
   0xc   : > { %s228_s20 = scalar_select %p227_p4, %s4218_s15, 1 }
   0xd   : > { %s5239_s19 = smov (!%p233_p5, %s3803_s19), 31  ;;  %253 = sbr.rel (%p3805_p6) target bundleno = 39 (0x27), region = 40 }
   0xe   : > { %s3802_s21 = sshll.u32 %s228_s20, 2  ;;  %s4171_s25 = smul.u32 160, %s5239_s19 }
   0xf   : > { %s4282_s24 = scalar_lea.vmem %s5229_s0, %s3802_s21 }
  0x10   : > { %s4287_s28 = scalar_lea.vmem %s5230_s1, %s4171_s25 }
  0x12   : > { %v4228_v0 = vmov 0.0  }
  0x13   : > { %254 = vst [vmem:[#allocation2 + $0xb0] sm:$0xff] %v4228_v0  ;;  %255 = vst [vmem:[#allocation2 + $0xd0] sm:$0xff] %v4228_v0 }
  0x14   : > { %256 = vst [vmem:[#allocation2 + $0x10] sm:$0xff] %v4228_v0  ;;  %257 = vst [vmem:[#allocation2 + $0x48] sm:$0xff] %v4228_v0 }
  0x15   : > { %258 = vst [vmem:[#allocation2 + $0x120] sm:$0xff] %v4228_v0  ;;  %259 = vst [vmem:[#allocation2 + $0x38] sm:$0xff] %v4228_v0 }
  0x16   : > { %260 = vst [vmem:[#allocation2 + $0xf8] sm:$0xff] %v4228_v0  ;;  %261 = vst [vmem:[#allocation2 + $0x100] sm:$0xff] %v4228_v0 }
  0x17   : > { %262 = vst [vmem:[#allocation2 + $0x80] sm:$0xff] %v4228_v0  ;;  %263 = vst [vmem:[#allocation2 + $0x108] sm:$0xff] %v4228_v0 }
  0x18   : > { %264 = vst [vmem:[#allocation2 + $0x138] sm:$0xff] %v4228_v0  ;;  %265 = vst [vmem:[#allocation2 + $0xf0] sm:$0xff] %v4228_v0 }
  0x19   : > { %266 = vst [vmem:[#allocation2 + $0x18] sm:$0xff] %v4228_v0  ;;  %267 = vst [vmem:[#allocation2 + $0xc8] sm:$0xff] %v4228_v0 }
  0x1a   : > { %268 = vst [vmem:[#allocation2 + $0x70] sm:$0xff] %v4228_v0  ;;  %269 = vst [vmem:[#allocation2 + $0x20] sm:$0xff] %v4228_v0 }
  0x1b   : > { %270 = vst [vmem:[#allocation2 + $0x128] sm:$0xff] %v4228_v0  ;;  %271 = vst [vmem:[#allocation2 + $0x110] sm:$0xff] %v4228_v0 }
  0x1c   : > { %272 = vst [vmem:[#allocation2 + $0x8] sm:$0xff] %v4228_v0  ;;  %273 = vst [vmem:[#allocation2 + $0x98] sm:$0xff] %v4228_v0 }
  0x1d   : > { %274 = vst [vmem:[#allocation2 + $0xa8] sm:$0xff] %v4228_v0  ;;  %275 = vst [vmem:[#allocation2 + $0x90] sm:$0xff] %v4228_v0 }
  0x1e   : > { %276 = vst [vmem:[#allocation2 + $0xe0] sm:$0xff] %v4228_v0  ;;  %277 = vst [vmem:[#allocation2 + $0x88] sm:$0xff] %v4228_v0 }
  0x1f   : > { %278 = vst [vmem:[#allocation2 + $0xc0] sm:$0xff] %v4228_v0  ;;  %279 = vst [vmem:[#allocation2 + $0x118] sm:$0xff] %v4228_v0 }
  0x20   : > { %280 = vst [vmem:[#allocation2 + $0xd8] sm:$0xff] %v4228_v0  ;;  %281 = vst [vmem:[#allocation2 + $0xa0] sm:$0xff] %v4228_v0 }
  0x21   : > { %282 = vst [vmem:[#allocation2 + $0x68] sm:$0xff] %v4228_v0  ;;  %283 = vst [vmem:[#allocation2 + $0x130] sm:$0xff] %v4228_v0 }
  0x22   : > { %284 = vst [vmem:[#allocation2 + $0x50] sm:$0xff] %v4228_v0  ;;  %285 = vst [vmem:[#allocation2 + $0xe8] sm:$0xff] %v4228_v0 }
  0x23   : > { %286 = vst [vmem:[#allocation2 + $0x58] sm:$0xff] %v4228_v0  ;;  %287 = vst [vmem:[#allocation2 + $0x78] sm:$0xff] %v4228_v0 }
  0x24   : > { %288 = vst [vmem:[#allocation2 + $0x30] sm:$0xff] %v4228_v0  ;;  %289 = vst [vmem:[#allocation2 + $0x40] sm:$0xff] %v4228_v0 }
  0x25   : > { %290 = vst [vmem:[#allocation2 + $0x28] sm:$0xff] %v4228_v0  ;;  %291 = vst [vmem:[#allocation2] sm:$0xff] %v4228_v0 }
  0x26   : > { %292 = vst [vmem:[#allocation2 + $0xb8] sm:$0xff] %v4228_v0  ;;  %293 = vst [vmem:[#allocation2 + $0x60] sm:$0xff] %v4228_v0 }
  0x27 PF: > { %v615_v1 = vld [vmem:[%s4287_s28 + $0x8c0] sm:$0xff]  ;;  %v616_v3 = vld [vmem:[%s4287_s28 + $0x8c8] sm:$0xff]  ;;  %v4229_v9 = vmov 0   ;;  %v617_v0 = vld [vmem:[%s4287_s28 + $0x8d0] sm:$0xff]  ;;  %p4126_p7 = scmp.ne.s32.totalorder %s4218_s15, 1 }
  0x28   : > { %v635_v2 = vld [vmem:[%s4287_s28 + $0x960] sm:$0xff]  ;;  %v636_v5 = vld [vmem:[%s4287_s28 + $0x968] sm:$0xff]  ;;  %2287 = vmatprep.mubr.bf16.mxu0 %v4229_v9  ;;  %2328 = vmatprep.mubr.bf16.mxu1 %v4229_v9 }
  0x29   : > { %v4087_v4 = vcombine.high %v615_v1, %v635_v2  ;;  %v4086_v6 = vcombine.low %v615_v1, %v635_v2  ;;  %v575_v7 = vld [vmem:[%s4287_s28 + $0x780] sm:$0xff]  ;;  %v4089_v10 = vcombine.high %v616_v3, %v636_v5  ;;  %v4088_v11 = vcombine.low %v616_v3, %v636_v5  ;;  %v576_v13 = vld [vmem:[%s4287_s28 + $0x788] sm:$0xff]  ;;  %v637_v1 = vld [vmem:[%s4287_s28 + $0x970] sm:$0xff] }
  0x2a   : > { %v595_v8 = vld [vmem:[%s4287_s28 + $0x820] sm:$0xff]  ;;  %v596_v14 = vld [vmem:[%s4287_s28 + $0x828] sm:$0xff]  ;;  %v618_v2 = vld [vmem:[%s4287_s28 + $0x8d8] sm:$0xff] }
  0x2b   : > { %v4047_v12 = vcombine.high %v575_v7, %v595_v8  ;;  %v535_v15 = vld [vmem:[%s4287_s28 + $0x640] sm:$0xff]  ;;  %2255 = vmatprep.subr.bf16.mxu0 %v4087_v4  ;;  %v4049_v16 = vcombine.high %v576_v13, %v596_v14  ;;  %v536_v18 = vld [vmem:[%s4287_s28 + $0x648] sm:$0xff]  ;;  %2296 = vmatprep.subr.bf16.mxu1 %v4089_v10  ;;  %v4046_v20 = vcombine.low %v575_v7, %v595_v8  ;;  %v638_v3 = vld [vmem:[%s4287_s28 + $0x978] sm:$0xff] }
  0x2c   : > { %v555_v17 = vld [vmem:[%s4287_s28 + $0x6e0] sm:$0xff]  ;;  %v556_v19 = vld [vmem:[%s4287_s28 + $0x6e8] sm:$0xff]  ;;  %2256 = vmatpush1.bf16.msra.mxu0 %v4086_v6  ;;  %2297 = vmatpush1.bf16.msra.mxu1 %v4088_v11  ;;  %v4048_v21 = vcombine.low %v576_v13, %v596_v14  ;;  %v4091_v6 = vcombine.high %v617_v0, %v637_v1  ;;  %v4093_v7 = vcombine.high %v618_v2, %v638_v3  ;;  %v577_v8 = vld [vmem:[%s4287_s28 + $0x790] sm:$0xff] }
  0x2d   : > { %2257 = vmatprep.subr.bf16.mxu0 %v4047_v12  ;;  %v4007_v22 = vcombine.high %v535_v15, %v555_v17  ;;  %2298 = vmatprep.subr.bf16.mxu1 %v4049_v16  ;;  %v4009_v23 = vcombine.high %v536_v18, %v556_v19  ;;  %v495_v24 = vld [vmem:[%s4287_s28 + $0x500] sm:$0xff]  ;;  %v496_v26 = vld [vmem:[%s4287_s28 + $0x508] sm:$0xff]  ;;  %v4006_v28 = vcombine.low %v535_v15, %v555_v17  ;;  %v597_v10 = vld [vmem:[%s4287_s28 + $0x830] sm:$0xff] }
  0x2e   : > { %v515_v25 = vld [vmem:[%s4287_s28 + $0x5a0] sm:$0xff]  ;;  %v516_v27 = vld [vmem:[%s4287_s28 + $0x5a8] sm:$0xff]  ;;  %v4008_v29 = vcombine.low %v536_v18, %v556_v19  ;;  %v578_v11 = vld [vmem:[%s4287_s28 + $0x798] sm:$0xff]  ;;  %v4090_v14 = vcombine.low %v617_v0, %v637_v1  ;;  %v4092_v15 = vcombine.low %v618_v2, %v638_v3  ;;  %v4051_v16 = vcombine.high %v577_v8, %v597_v10 }
  0x2f   : > { %v3967_v30 = vcombine.high %v495_v24, %v515_v25  ;;  %v3969_v31 = vcombine.high %v496_v26, %v516_v27  ;;  %v455_v32 = vld [vmem:[%s4287_s28 + $0x3c0] sm:$0xff]  ;;  %v456_v34 = vld [vmem:[%s4287_s28 + $0x3c8] sm:$0xff]  ;;  %v3966_v36 = vcombine.low %v495_v24, %v515_v25  ;;  %v3968_v37 = vcombine.low %v496_v26, %v516_v27  ;;  %v598_v12 = vld [vmem:[%s4287_s28 + $0x838] sm:$0xff] }
  0x30   : > { %2258 = vmatpush1.bf16.msra.mxu0 %v4046_v20  ;;  %2299 = vmatpush1.bf16.msra.mxu1 %v4048_v21  ;;  %v475_v33 = vld [vmem:[%s4287_s28 + $0x460] sm:$0xff]  ;;  %v476_v35 = vld [vmem:[%s4287_s28 + $0x468] sm:$0xff]  ;;  %v4053_v17 = vcombine.high %v578_v11, %v598_v12  ;;  %v537_v18 = vld [vmem:[%s4287_s28 + $0x650] sm:$0xff] }
  0x31   : > { %2259 = vmatprep.subr.bf16.mxu0 %v4007_v22  ;;  %2300 = vmatprep.subr.bf16.mxu1 %v4009_v23  ;;  %v3927_v38 = vcombine.high %v455_v32, %v475_v33  ;;  %v3929_v39 = vcombine.high %v456_v34, %v476_v35  ;;  %v415_v40 = vld [vmem:[%s4287_s28 + $0x280] sm:$0xff]  ;;  %v416_v42 = vld [vmem:[%s4287_s28 + $0x288] sm:$0xff]  ;;  %v3926_v44 = vcombine.low %v455_v32, %v475_v33  ;;  %v557_v19 = vld [vmem:[%s4287_s28 + $0x6f0] sm:$0xff] }
  0x32   : > { %v435_v41 = vld [vmem:[%s4287_s28 + $0x320] sm:$0xff]  ;;  %v436_v43 = vld [vmem:[%s4287_s28 + $0x328] sm:$0xff]  ;;  %v3928_v45 = vcombine.low %v456_v34, %v476_v35  ;;  %v538_v20 = vld [vmem:[%s4287_s28 + $0x658] sm:$0xff]  ;;  %v4050_v22 = vcombine.low %v577_v8, %v597_v10  ;;  %v4052_v23 = vcombine.low %v578_v11, %v598_v12  ;;  %v4011_v24 = vcombine.high %v537_v18, %v557_v19 }
  0x33   : > { %v3887_v46 = vcombine.high %v415_v40, %v435_v41  ;;  %v3889_v47 = vcombine.high %v416_v42, %v436_v43  ;;  %v375_v48 = vld [vmem:[%s4287_s28 + $0x140] sm:$0xff]  ;;  %v376_v50 = vld [vmem:[%s4287_s28 + $0x148] sm:$0xff]  ;;  %v3886_v52 = vcombine.low %v415_v40, %v435_v41  ;;  %v3888_v53 = vcombine.low %v416_v42, %v436_v43  ;;  %v558_v21 = vld [vmem:[%s4287_s28 + $0x6f8] sm:$0xff] }
  0x34   : > { %2260 = vmatpush1.bf16.msra.mxu0 %v4006_v28  ;;  %2301 = vmatpush1.bf16.msra.mxu1 %v4008_v29  ;;  %v395_v49 = vld [vmem:[%s4287_s28 + $0x1e0] sm:$0xff]  ;;  %v396_v51 = vld [vmem:[%s4287_s28 + $0x1e8] sm:$0xff]  ;;  %v4013_v25 = vcombine.high %v538_v20, %v558_v21  ;;  %v497_v26 = vld [vmem:[%s4287_s28 + $0x510] sm:$0xff] }
  0x35   : > { %2261 = vmatprep.subr.bf16.mxu0 %v3967_v30  ;;  %2302 = vmatprep.subr.bf16.mxu1 %v3969_v31  ;;  %v3847_v54 = vcombine.high %v375_v48, %v395_v49  ;;  %v3849_v55 = vcombine.high %v376_v50, %v396_v51  ;;  %v335_v56 = vld [vmem:[%s4287_s28] sm:$0xff]  ;;  %v336_v58 = vld [vmem:[%s4287_s28 + $0x8] sm:$0xff]  ;;  %v3846_v60 = vcombine.low %v375_v48, %v395_v49  ;;  %v517_v27 = vld [vmem:[%s4287_s28 + $0x5b0] sm:$0xff] }
  0x36   : > { %v355_v57 = vld [vmem:[%s4287_s28 + $0xa0] sm:$0xff]  ;;  %v356_v59 = vld [vmem:[%s4287_s28 + $0xa8] sm:$0xff]  ;;  %v3848_v61 = vcombine.low %v376_v50, %v396_v51  ;;  %v498_v28 = vld [vmem:[%s4287_s28 + $0x518] sm:$0xff]  ;;  %v4010_v30 = vcombine.low %v537_v18, %v557_v19  ;;  %v4012_v31 = vcombine.low %v538_v20, %v558_v21  ;;  %v3971_v32 = vcombine.high %v497_v26, %v517_v27 }
  0x37   : > { %v3807_v62 = vcombine.high %v335_v56, %v355_v57  ;;  %v3809_v63 = vcombine.high %v336_v58, %v356_v59  ;;  %v3806_v4 = vcombine.low %v335_v56, %v355_v57  ;;  %v3808_v5 = vcombine.low %v336_v58, %v356_v59  ;;  %v4333_v13 = vld [vmem:[%s4282_s24] sm:$0xf]  ;;  %v518_v29 = vld [vmem:[%s4287_s28 + $0x5b8] sm:$0xff]  ;;  %v457_v34 = vld [vmem:[%s4287_s28 + $0x3d0] sm:$0xff] }
  0x38   : > { %2262 = vmatpush1.bf16.msra.mxu0 %v3966_v36  ;;  %2303 = vmatpush1.bf16.msra.mxu1 %v3968_v37  ;;  %v3973_v33 = vcombine.high %v498_v28, %v518_v29  ;;  %v477_v35 = vld [vmem:[%s4287_s28 + $0x470] sm:$0xff]  ;;  %v458_v36 = vld [vmem:[%s4287_s28 + $0x3d8] sm:$0xff]  ;;  %v619_v2 = vld [vmem:[%s4287_s28 + $0x8e0] sm:$0xff] }
  0x39   : > { %2263 = vmatprep.subr.bf16.mxu0 %v3927_v38  ;;  %2304 = vmatprep.subr.bf16.mxu1 %v3929_v39  ;;  %v478_v37 = vld [vmem:[%s4287_s28 + $0x478] sm:$0xff]  ;;  %v3970_v38 = vcombine.low %v497_v26, %v517_v27  ;;  %v3972_v39 = vcombine.low %v498_v28, %v518_v29  ;;  %v3931_v40 = vcombine.high %v457_v34, %v477_v35  ;;  %v417_v42 = vld [vmem:[%s4287_s28 + $0x290] sm:$0xff]  ;;  %v639_v3 = vld [vmem:[%s4287_s28 + $0x980] sm:$0xff] }
  0x3a   : > { %v3933_v41 = vcombine.high %v458_v36, %v478_v37  ;;  %v437_v43 = vld [vmem:[%s4287_s28 + $0x330] sm:$0xff]  ;;  %v4095_v8 = vcombine.high %v619_v2, %v639_v3  ;;  %v579_v11 = vld [vmem:[%s4287_s28 + $0x7a0] sm:$0xff] }
  0x3b   : > { %v3891_v48 = vcombine.high %v417_v42, %v437_v43  ;;  %v377_v50 = vld [vmem:[%s4287_s28 + $0x150] sm:$0xff]  ;;  %v599_v12 = vld [vmem:[%s4287_s28 + $0x840] sm:$0xff] }
  0x3c   : > { %2264 = vmatpush1.bf16.msra.mxu0 %v3926_v44  ;;  %2305 = vmatpush1.bf16.msra.mxu1 %v3928_v45  ;;  %v418_v44 = vld [vmem:[%s4287_s28 + $0x298] sm:$0xff]  ;;  %v397_v51 = vld [vmem:[%s4287_s28 + $0x1f0] sm:$0xff]  ;;  %v4055_v18 = vcombine.high %v579_v11, %v599_v12  ;;  %v539_v20 = vld [vmem:[%s4287_s28 + $0x660] sm:$0xff] }
  0x3d   : > { %2265 = vmatprep.subr.bf16.mxu0 %v3887_v46  ;;  %2306 = vmatprep.subr.bf16.mxu1 %v3889_v47  ;;  %v438_v45 = vld [vmem:[%s4287_s28 + $0x338] sm:$0xff]  ;;  %v3930_v46 = vcombine.low %v457_v34, %v477_v35  ;;  %v3932_v47 = vcombine.low %v458_v36, %v478_v37  ;;  %v3851_v56 = vcombine.high %v377_v50, %v397_v51  ;;  %v337_v58 = vld [vmem:[%s4287_s28 + $0x10] sm:$0xff]  ;;  %v559_v21 = vld [vmem:[%s4287_s28 + $0x700] sm:$0xff] }
  0x3e   : > { %v3893_v49 = vcombine.high %v418_v44, %v438_v45  ;;  %v357_v59 = vld [vmem:[%s4287_s28 + $0xb0] sm:$0xff]  ;;  %v4015_v26 = vcombine.high %v539_v20, %v559_v21  ;;  %v499_v28 = vld [vmem:[%s4287_s28 + $0x520] sm:$0xff] }
  0x3f   : > { %v3811_v0 = vcombine.high %v337_v58, %v357_v59  ;;  %v519_v29 = vld [vmem:[%s4287_s28 + $0x5c0] sm:$0xff] }
  0x40   : > { %2266 = vmatpush1.bf16.msra.mxu0 %v3886_v52  ;;  %2307 = vmatpush1.bf16.msra.mxu1 %v3888_v53  ;;  %v378_v52 = vld [vmem:[%s4287_s28 + $0x158] sm:$0xff]  ;;  %v3975_v34 = vcombine.high %v499_v28, %v519_v29  ;;  %v459_v36 = vld [vmem:[%s4287_s28 + $0x3e0] sm:$0xff] }
  0x41   : > { %2267 = vmatprep.subr.bf16.mxu0 %v3847_v54  ;;  %2308 = vmatprep.subr.bf16.mxu1 %v3849_v55  ;;  %v398_v53 = vld [vmem:[%s4287_s28 + $0x1f8] sm:$0xff]  ;;  %v3890_v54 = vcombine.low %v417_v42, %v437_v43  ;;  %v3892_v55 = vcombine.low %v418_v44, %v438_v45  ;;  %v479_v37 = vld [vmem:[%s4287_s28 + $0x480] sm:$0xff] }
  0x42   : > { %v3853_v57 = vcombine.high %v378_v52, %v398_v53  ;;  %v3935_v42 = vcombine.high %v459_v36, %v479_v37  ;;  %v419_v44 = vld [vmem:[%s4287_s28 + $0x2a0] sm:$0xff] }
  0x43   : > { %v439_v45 = vld [vmem:[%s4287_s28 + $0x340] sm:$0xff] }
  0x44   : > { %2268 = vmatpush1.bf16.msra.mxu0 %v3846_v60  ;;  %2309 = vmatpush1.bf16.msra.mxu1 %v3848_v61  ;;  %v338_v60 = vld [vmem:[%s4287_s28 + $0x18] sm:$0xff] }
  0x45   : > { %2269 = vmatprep.subr.bf16.mxu0 %v3807_v62  ;;  %2310 = vmatprep.subr.bf16.mxu1 %v3809_v63  ;;  %v358_v61 = vld [vmem:[%s4287_s28 + $0xb8] sm:$0xff]  ;;  %v3850_v62 = vcombine.low %v377_v50, %v397_v51  ;;  %v3852_v63 = vcombine.low %v378_v52, %v398_v53  ;;  %v3895_v50 = vcombine.high %v419_v44, %v439_v45  ;;  %v379_v52 = vld [vmem:[%s4287_s28 + $0x160] sm:$0xff] }
  0x46   : > { %v3813_v1 = vcombine.high %v338_v60, %v358_v61  ;;  %v399_v53 = vld [vmem:[%s4287_s28 + $0x200] sm:$0xff] }
  0x48   : > { %2270 = vmatpush1.bf16.msra.mxu0 %v3806_v4  ;;  %2311 = vmatpush1.bf16.msra.mxu1 %v3808_v5  ;;  %v620_v4 = vld [vmem:[%s4287_s28 + $0x8e8] sm:$0xff] }
  0x49   : > { %2337 = vmatprep.subr.bf16.mxu0 %v4091_v6  ;;  %2378 = vmatprep.subr.bf16.mxu1 %v4093_v7  ;;  %v640_v5 = vld [vmem:[%s4287_s28 + $0x988] sm:$0xff]  ;;  %v3810_v6 = vcombine.low %v337_v58, %v357_v59  ;;  %v3812_v7 = vcombine.low %v338_v60, %v358_v61  ;;  %v3855_v58 = vcombine.high %v379_v52, %v399_v53  ;;  %v339_v60 = vld [vmem:[%s4287_s28 + $0x20] sm:$0xff] }
  0x4a   : > { %v4097_v10 = vcombine.high %v620_v4, %v640_v5  ;;  %v359_v61 = vld [vmem:[%s4287_s28 + $0xc0] sm:$0xff] }
  0x4b   : > { %2288 = vmatmul.mubr.bf16.vlgmr.msra.gmra.mxu0 %v4333_v13  ;;  %2329 = vmatmul.mubr.bf16.vlgmr.msra.gmra.mxu1 %v4333_v13 }
  0x4c   : > { %2338 = vmatpush1.bf16.msra.mxu0 %v4090_v14  ;;  %2379 = vmatpush1.bf16.msra.mxu1 %v4092_v15  ;;  %v580_v14 = vld [vmem:[%s4287_s28 + $0x7a8] sm:$0xff] }
  0x4d   : > { %2339 = vmatprep.subr.bf16.mxu0 %v4051_v16  ;;  %2380 = vmatprep.subr.bf16.mxu1 %v4053_v17  ;;  %v600_v15 = vld [vmem:[%s4287_s28 + $0x848] sm:$0xff]  ;;  %v4094_v16 = vcombine.low %v619_v2, %v639_v3  ;;  %v4096_v17 = vcombine.low %v620_v4, %v640_v5  ;;  %v3815_v2 = vcombine.high %v339_v60, %v359_v61  ;;  %v621_v4 = vld [vmem:[%s4287_s28 + $0x8f0] sm:$0xff] }
  0x4e   : > { %2369 = vmatprep.mubr.bf16.mxu0 %v4229_v9  ;;  %2410 = vmatprep.mubr.bf16.mxu1 %v4229_v9  ;;  %v4057_v19 = vcombine.high %v580_v14, %v600_v15  ;;  %v641_v5 = vld [vmem:[%s4287_s28 + $0x990] sm:$0xff] }
  0x50   : > { %2340 = vmatpush1.bf16.msra.mxu0 %v4050_v22  ;;  %2381 = vmatpush1.bf16.msra.mxu1 %v4052_v23  ;;  %v540_v22 = vld [vmem:[%s4287_s28 + $0x668] sm:$0xff] }
  0x51   : > { %2341 = vmatprep.subr.bf16.mxu0 %v4011_v24  ;;  %2382 = vmatprep.subr.bf16.mxu1 %v4013_v25  ;;  %v560_v23 = vld [vmem:[%s4287_s28 + $0x708] sm:$0xff]  ;;  %v4054_v24 = vcombine.low %v579_v11, %v599_v12  ;;  %v4056_v25 = vcombine.low %v580_v14, %v600_v15  ;;  %v4099_v11 = vcombine.high %v621_v4, %v641_v5  ;;  %v581_v14 = vld [vmem:[%s4287_s28 + $0x7b0] sm:$0xff] }
  0x52   : > { %v4017_v27 = vcombine.high %v540_v22, %v560_v23  ;;  %v601_v15 = vld [vmem:[%s4287_s28 + $0x850] sm:$0xff] }
  0x54   : > { %2342 = vmatpush1.bf16.msra.mxu0 %v4010_v30  ;;  %2383 = vmatpush1.bf16.msra.mxu1 %v4012_v31  ;;  %v500_v30 = vld [vmem:[%s4287_s28 + $0x528] sm:$0xff] }
  0x55   : > { %2343 = vmatprep.subr.bf16.mxu0 %v3971_v32  ;;  %2384 = vmatprep.subr.bf16.mxu1 %v3973_v33  ;;  %v520_v31 = vld [vmem:[%s4287_s28 + $0x5c8] sm:$0xff]  ;;  %v4014_v32 = vcombine.low %v539_v20, %v559_v21  ;;  %v4016_v33 = vcombine.low %v540_v22, %v560_v23  ;;  %v4059_v20 = vcombine.high %v581_v14, %v601_v15  ;;  %v541_v22 = vld [vmem:[%s4287_s28 + $0x670] sm:$0xff] }
  0x56   : > { %v3977_v35 = vcombine.high %v500_v30, %v520_v31  ;;  %v561_v23 = vld [vmem:[%s4287_s28 + $0x710] sm:$0xff] }
  0x58   : > { %2344 = vmatpush1.bf16.msra.mxu0 %v3970_v38  ;;  %2385 = vmatpush1.bf16.msra.mxu1 %v3972_v39  ;;  %v460_v38 = vld [vmem:[%s4287_s28 + $0x3e8] sm:$0xff] }
  0x59   : > { %2345 = vmatprep.subr.bf16.mxu0 %v3931_v40  ;;  %2386 = vmatprep.subr.bf16.mxu1 %v3933_v41  ;;  %v480_v39 = vld [vmem:[%s4287_s28 + $0x488] sm:$0xff]  ;;  %v3974_v40 = vcombine.low %v499_v28, %v519_v29  ;;  %v3976_v41 = vcombine.low %v500_v30, %v520_v31  ;;  %v4019_v28 = vcombine.high %v541_v22, %v561_v23  ;;  %v501_v30 = vld [vmem:[%s4287_s28 + $0x530] sm:$0xff] }
  0x5a   : > { %v3937_v43 = vcombine.high %v460_v38, %v480_v39  ;;  %v521_v31 = vld [vmem:[%s4287_s28 + $0x5d0] sm:$0xff] }
  0x5c   : > { %2346 = vmatpush1.bf16.msra.mxu0 %v3930_v46  ;;  %2387 = vmatpush1.bf16.msra.mxu1 %v3932_v47  ;;  %v420_v46 = vld [vmem:[%s4287_s28 + $0x2a8] sm:$0xff] }
  0x5d   : > { %2347 = vmatprep.subr.bf16.mxu0 %v3891_v48  ;;  %2388 = vmatprep.subr.bf16.mxu1 %v3893_v49  ;;  %v440_v47 = vld [vmem:[%s4287_s28 + $0x348] sm:$0xff]  ;;  %v3934_v48 = vcombine.low %v459_v36, %v479_v37  ;;  %v3936_v49 = vcombine.low %v460_v38, %v480_v39  ;;  %v3979_v36 = vcombine.high %v501_v30, %v521_v31  ;;  %v461_v38 = vld [vmem:[%s4287_s28 + $0x3f0] sm:$0xff] }
  0x5e   : > { %v3897_v51 = vcombine.high %v420_v46, %v440_v47  ;;  %v481_v39 = vld [vmem:[%s4287_s28 + $0x490] sm:$0xff] }
  0x60   : > { %2348 = vmatpush1.bf16.msra.mxu0 %v3890_v54  ;;  %2389 = vmatpush1.bf16.msra.mxu1 %v3892_v55  ;;  %v380_v54 = vld [vmem:[%s4287_s28 + $0x168] sm:$0xff] }
  0x61   : > { %2349 = vmatprep.subr.bf16.mxu0 %v3851_v56  ;;  %2390 = vmatprep.subr.bf16.mxu1 %v3853_v57  ;;  %v400_v55 = vld [vmem:[%s4287_s28 + $0x208] sm:$0xff]  ;;  %v3894_v56 = vcombine.low %v419_v44, %v439_v45  ;;  %v3896_v57 = vcombine.low %v420_v46, %v440_v47  ;;  %v3939_v44 = vcombine.high %v461_v38, %v481_v39  ;;  %v421_v46 = vld [vmem:[%s4287_s28 + $0x2b0] sm:$0xff] }
  0x62   : > { %v3857_v59 = vcombine.high %v380_v54, %v400_v55  ;;  %v441_v47 = vld [vmem:[%s4287_s28 + $0x350] sm:$0xff] }
  0x64   : > { %2350 = vmatpush1.bf16.msra.mxu0 %v3850_v62  ;;  %2391 = vmatpush1.bf16.msra.mxu1 %v3852_v63  ;;  %v340_v62 = vld [vmem:[%s4287_s28 + $0x28] sm:$0xff] }
  0x65   : > { %2351 = vmatprep.subr.bf16.mxu0 %v3811_v0  ;;  %2392 = vmatprep.subr.bf16.mxu1 %v3813_v1  ;;  %v360_v63 = vld [vmem:[%s4287_s28 + $0xc8] sm:$0xff]  ;;  %v3854_v0 = vcombine.low %v379_v52, %v399_v53  ;;  %v3856_v1 = vcombine.low %v380_v54, %v400_v55  ;;  %v3899_v52 = vcombine.high %v421_v46, %v441_v47  ;;  %v381_v54 = vld [vmem:[%s4287_s28 + $0x170] sm:$0xff] }
  0x66   : > { %v3817_v3 = vcombine.high %v340_v62, %v360_v63  ;;  %v401_v55 = vld [vmem:[%s4287_s28 + $0x210] sm:$0xff] }
  0x68   : > { %2352 = vmatpush1.bf16.msra.mxu0 %v3810_v6  ;;  %2393 = vmatpush1.bf16.msra.mxu1 %v3812_v7  ;;  %v622_v6 = vld [vmem:[%s4287_s28 + $0x8f8] sm:$0xff] }
  0x69   : > { %2419 = vmatprep.subr.bf16.mxu0 %v4095_v8  ;;  %2460 = vmatprep.subr.bf16.mxu1 %v4097_v10  ;;  %v642_v7 = vld [vmem:[%s4287_s28 + $0x998] sm:$0xff]  ;;  %v3814_v8 = vcombine.low %v339_v60, %v359_v61  ;;  %v3816_v10 = vcombine.low %v340_v62, %v360_v63  ;;  %v3859_v60 = vcombine.high %v381_v54, %v401_v55  ;;  %v341_v62 = vld [vmem:[%s4287_s28 + $0x30] sm:$0xff] }
  0x6a   : > { %v4101_v12 = vcombine.high %v622_v6, %v642_v7  ;;  %v361_v63 = vld [vmem:[%s4287_s28 + $0xd0] sm:$0xff] }
  0x6b   : > { %2370 = vmatmul.mubr.bf16.vlgmr.msra.gmra.mxu0 %v4333_v13  ;;  %2411 = vmatmul.mubr.bf16.vlgmr.msra.gmra.mxu1 %v4333_v13 }
  0x6c   : > { %2420 = vmatpush1.bf16.msra.mxu0 %v4094_v16  ;;  %2461 = vmatpush1.bf16.msra.mxu1 %v4096_v17  ;;  %v582_v16 = vld [vmem:[%s4287_s28 + $0x7b8] sm:$0xff] }
  0x6d   : > { %2421 = vmatprep.subr.bf16.mxu0 %v4055_v18  ;;  %2462 = vmatprep.subr.bf16.mxu1 %v4057_v19  ;;  %v602_v17 = vld [vmem:[%s4287_s28 + $0x858] sm:$0xff]  ;;  %v4098_v18 = vcombine.low %v621_v4, %v641_v5  ;;  %v4100_v19 = vcombine.low %v622_v6, %v642_v7  ;;  %v3819_v4 = vcombine.high %v341_v62, %v361_v63  ;;  %v623_v6 = vld [vmem:[%s4287_s28 + $0x900] sm:$0xff] }
  0x6e   : > { %2451 = vmatprep.mubr.bf16.mxu0 %v4229_v9  ;;  %2492 = vmatprep.mubr.bf16.mxu1 %v4229_v9  ;;  %v4061_v21 = vcombine.high %v582_v16, %v602_v17  ;;  %v643_v7 = vld [vmem:[%s4287_s28 + $0x9a0] sm:$0xff] }
  0x70   : > { %2422 = vmatpush1.bf16.msra.mxu0 %v4054_v24  ;;  %2463 = vmatpush1.bf16.msra.mxu1 %v4056_v25  ;;  %v542_v24 = vld [vmem:[%s4287_s28 + $0x678] sm:$0xff] }
  0x71   : > { %2423 = vmatprep.subr.bf16.mxu0 %v4015_v26  ;;  %2464 = vmatprep.subr.bf16.mxu1 %v4017_v27  ;;  %v562_v25 = vld [vmem:[%s4287_s28 + $0x718] sm:$0xff]  ;;  %v4058_v26 = vcombine.low %v581_v14, %v601_v15  ;;  %v4060_v27 = vcombine.low %v582_v16, %v602_v17  ;;  %v4103_v14 = vcombine.high %v623_v6, %v643_v7  ;;  %v583_v16 = vld [vmem:[%s4287_s28 + $0x7c0] sm:$0xff] }
  0x72   : > { %v4021_v29 = vcombine.high %v542_v24, %v562_v25  ;;  %v603_v17 = vld [vmem:[%s4287_s28 + $0x860] sm:$0xff] }
  0x74   : > { %2424 = vmatpush1.bf16.msra.mxu0 %v4014_v32  ;;  %2465 = vmatpush1.bf16.msra.mxu1 %v4016_v33  ;;  %v502_v32 = vld [vmem:[%s4287_s28 + $0x538] sm:$0xff] }
  0x75   : > { %2425 = vmatprep.subr.bf16.mxu0 %v3975_v34  ;;  %2466 = vmatprep.subr.bf16.mxu1 %v3977_v35  ;;  %v522_v33 = vld [vmem:[%s4287_s28 + $0x5d8] sm:$0xff]  ;;  %v4018_v34 = vcombine.low %v541_v22, %v561_v23  ;;  %v4020_v35 = vcombine.low %v542_v24, %v562_v25  ;;  %v4063_v22 = vcombine.high %v583_v16, %v603_v17  ;;  %v543_v24 = vld [vmem:[%s4287_s28 + $0x680] sm:$0xff] }
  0x76   : > { %v3981_v37 = vcombine.high %v502_v32, %v522_v33  ;;  %v563_v25 = vld [vmem:[%s4287_s28 + $0x720] sm:$0xff] }
  0x78   : > { %2426 = vmatpush1.bf16.msra.mxu0 %v3974_v40  ;;  %2467 = vmatpush1.bf16.msra.mxu1 %v3976_v41  ;;  %v462_v40 = vld [vmem:[%s4287_s28 + $0x3f8] sm:$0xff] }
  0x79   : > { %2427 = vmatprep.subr.bf16.mxu0 %v3935_v42  ;;  %2468 = vmatprep.subr.bf16.mxu1 %v3937_v43  ;;  %v482_v41 = vld [vmem:[%s4287_s28 + $0x498] sm:$0xff]  ;;  %v3978_v42 = vcombine.low %v501_v30, %v521_v31  ;;  %v3980_v43 = vcombine.low %v502_v32, %v522_v33  ;;  %v4023_v30 = vcombine.high %v543_v24, %v563_v25  ;;  %v503_v32 = vld [vmem:[%s4287_s28 + $0x540] sm:$0xff] }
  0x7a   : > { %v3941_v45 = vcombine.high %v462_v40, %v482_v41  ;;  %v523_v33 = vld [vmem:[%s4287_s28 + $0x5e0] sm:$0xff] }
  0x7c   : > { %2428 = vmatpush1.bf16.msra.mxu0 %v3934_v48  ;;  %2469 = vmatpush1.bf16.msra.mxu1 %v3936_v49  ;;  %v422_v48 = vld [vmem:[%s4287_s28 + $0x2b8] sm:$0xff] }
  0x7d   : > { %2429 = vmatprep.subr.bf16.mxu0 %v3895_v50  ;;  %2470 = vmatprep.subr.bf16.mxu1 %v3897_v51  ;;  %v442_v49 = vld [vmem:[%s4287_s28 + $0x358] sm:$0xff]  ;;  %v3938_v50 = vcombine.low %v461_v38, %v481_v39  ;;  %v3940_v51 = vcombine.low %v462_v40, %v482_v41  ;;  %v3983_v38 = vcombine.high %v503_v32, %v523_v33  ;;  %v463_v40 = vld [vmem:[%s4287_s28 + $0x400] sm:$0xff] }
  0x7e   : > { %v3901_v53 = vcombine.high %v422_v48, %v442_v49  ;;  %v483_v41 = vld [vmem:[%s4287_s28 + $0x4a0] sm:$0xff] }
  0x80   : > { %2430 = vmatpush1.bf16.msra.mxu0 %v3894_v56  ;;  %2471 = vmatpush1.bf16.msra.mxu1 %v3896_v57  ;;  %v382_v56 = vld [vmem:[%s4287_s28 + $0x178] sm:$0xff] }
  0x81   : > { %2431 = vmatprep.subr.bf16.mxu0 %v3855_v58  ;;  %2472 = vmatprep.subr.bf16.mxu1 %v3857_v59  ;;  %v402_v57 = vld [vmem:[%s4287_s28 + $0x218] sm:$0xff]  ;;  %v3898_v58 = vcombine.low %v421_v46, %v441_v47  ;;  %v3900_v59 = vcombine.low %v422_v48, %v442_v49  ;;  %v3943_v46 = vcombine.high %v463_v40, %v483_v41  ;;  %v423_v48 = vld [vmem:[%s4287_s28 + $0x2c0] sm:$0xff] }
  0x82   : > { %v3861_v61 = vcombine.high %v382_v56, %v402_v57  ;;  %v443_v49 = vld [vmem:[%s4287_s28 + $0x360] sm:$0xff] }
  0x84   : > { %2432 = vmatpush1.bf16.msra.mxu0 %v3854_v0  ;;  %2473 = vmatpush1.bf16.msra.mxu1 %v3856_v1  ;;  %v342_v0 = vld [vmem:[%s4287_s28 + $0x38] sm:$0xff] }
  0x85   : > { %2433 = vmatprep.subr.bf16.mxu0 %v3815_v2  ;;  %2474 = vmatprep.subr.bf16.mxu1 %v3817_v3  ;;  %v362_v1 = vld [vmem:[%s4287_s28 + $0xd8] sm:$0xff]  ;;  %v3858_v2 = vcombine.low %v381_v54, %v401_v55  ;;  %v3860_v3 = vcombine.low %v382_v56, %v402_v57  ;;  %v3903_v54 = vcombine.high %v423_v48, %v443_v49  ;;  %v383_v56 = vld [vmem:[%s4287_s28 + $0x180] sm:$0xff] }
  0x86   : > { %v3821_v5 = vcombine.high %v342_v0, %v362_v1  ;;  %v403_v57 = vld [vmem:[%s4287_s28 + $0x220] sm:$0xff] }
  0x88   : > { %2434 = vmatpush1.bf16.msra.mxu0 %v3814_v8  ;;  %2475 = vmatpush1.bf16.msra.mxu1 %v3816_v10  ;;  %v624_v8 = vld [vmem:[%s4287_s28 + $0x908] sm:$0xff] }
  0x89   : > { %2501 = vmatprep.subr.bf16.mxu0 %v4099_v11  ;;  %2542 = vmatprep.subr.bf16.mxu1 %v4101_v12  ;;  %v644_v10 = vld [vmem:[%s4287_s28 + $0x9a8] sm:$0xff]  ;;  %v3818_v11 = vcombine.low %v341_v62, %v361_v63  ;;  %v3820_v12 = vcombine.low %v342_v0, %v362_v1  ;;  %v3863_v62 = vcombine.high %v383_v56, %v403_v57  ;;  %v343_v0 = vld [vmem:[%s4287_s28 + $0x40] sm:$0xff] }
  0x8a   : > { %v4105_v15 = vcombine.high %v624_v8, %v644_v10  ;;  %v363_v1 = vld [vmem:[%s4287_s28 + $0xe0] sm:$0xff] }
  0x8b   : > { %2452 = vmatmul.mubr.bf16.vlgmr.msra.gmra.mxu0 %v4333_v13  ;;  %2493 = vmatmul.mubr.bf16.vlgmr.msra.gmra.mxu1 %v4333_v13 }
  0x8c   : > { %2502 = vmatpush1.bf16.msra.mxu0 %v4098_v18  ;;  %2543 = vmatpush1.bf16.msra.mxu1 %v4100_v19  ;;  %v584_v18 = vld [vmem:[%s4287_s28 + $0x7c8] sm:$0xff] }
  0x8d   : > { %2503 = vmatprep.subr.bf16.mxu0 %v4059_v20  ;;  %2544 = vmatprep.subr.bf16.mxu1 %v4061_v21  ;;  %v604_v19 = vld [vmem:[%s4287_s28 + $0x868] sm:$0xff]  ;;  %v4102_v20 = vcombine.low %v623_v6, %v643_v7  ;;  %v4104_v21 = vcombine.low %v624_v8, %v644_v10  ;;  %v3823_v6 = vcombine.high %v343_v0, %v363_v1  ;;  %v625_v8 = vld [vmem:[%s4287_s28 + $0x910] sm:$0xff] }
  0x8e   : > { %2533 = vmatprep.mubr.bf16.mxu0 %v4229_v9  ;;  %2574 = vmatprep.mubr.bf16.mxu1 %v4229_v9  ;;  %v4065_v23 = vcombine.high %v584_v18, %v604_v19  ;;  %v645_v10 = vld [vmem:[%s4287_s28 + $0x9b0] sm:$0xff] }
  0x90   : > { %2504 = vmatpush1.bf16.msra.mxu0 %v4058_v26  ;;  %2545 = vmatpush1.bf16.msra.mxu1 %v4060_v27  ;;  %v544_v26 = vld [vmem:[%s4287_s28 + $0x688] sm:$0xff] }
  0x91   : > { %2505 = vmatprep.subr.bf16.mxu0 %v4019_v28  ;;  %2546 = vmatprep.subr.bf16.mxu1 %v4021_v29  ;;  %v564_v27 = vld [vmem:[%s4287_s28 + $0x728] sm:$0xff]  ;;  %v4062_v28 = vcombine.low %v583_v16, %v603_v17  ;;  %v4064_v29 = vcombine.low %v584_v18, %v604_v19  ;;  %v4107_v16 = vcombine.high %v625_v8, %v645_v10  ;;  %v585_v18 = vld [vmem:[%s4287_s28 + $0x7d0] sm:$0xff] }
  0x92   : > { %v4025_v31 = vcombine.high %v544_v26, %v564_v27  ;;  %v605_v19 = vld [vmem:[%s4287_s28 + $0x870] sm:$0xff] }
  0x94   : > { %2506 = vmatpush1.bf16.msra.mxu0 %v4018_v34  ;;  %2547 = vmatpush1.bf16.msra.mxu1 %v4020_v35  ;;  %v504_v34 = vld [vmem:[%s4287_s28 + $0x548] sm:$0xff] }
  0x95   : > { %2507 = vmatprep.subr.bf16.mxu0 %v3979_v36  ;;  %2548 = vmatprep.subr.bf16.mxu1 %v3981_v37  ;;  %v524_v35 = vld [vmem:[%s4287_s28 + $0x5e8] sm:$0xff]  ;;  %v4022_v36 = vcombine.low %v543_v24, %v563_v25  ;;  %v4024_v37 = vcombine.low %v544_v26, %v564_v27  ;;  %v4067_v24 = vcombine.high %v585_v18, %v605_v19  ;;  %v545_v26 = vld [vmem:[%s4287_s28 + $0x690] sm:$0xff] }
  0x96   : > { %v3985_v39 = vcombine.high %v504_v34, %v524_v35  ;;  %v565_v27 = vld [vmem:[%s4287_s28 + $0x730] sm:$0xff] }
  0x98   : > { %2508 = vmatpush1.bf16.msra.mxu0 %v3978_v42  ;;  %2549 = vmatpush1.bf16.msra.mxu1 %v3980_v43  ;;  %v464_v42 = vld [vmem:[%s4287_s28 + $0x408] sm:$0xff] }
  0x99   : > { %2509 = vmatprep.subr.bf16.mxu0 %v3939_v44  ;;  %2550 = vmatprep.subr.bf16.mxu1 %v3941_v45  ;;  %v484_v43 = vld [vmem:[%s4287_s28 + $0x4a8] sm:$0xff]  ;;  %v3982_v44 = vcombine.low %v503_v32, %v523_v33  ;;  %v3984_v45 = vcombine.low %v504_v34, %v524_v35  ;;  %v4027_v32 = vcombine.high %v545_v26, %v565_v27  ;;  %v505_v34 = vld [vmem:[%s4287_s28 + $0x550] sm:$0xff] }
  0x9a   : > { %v3945_v47 = vcombine.high %v464_v42, %v484_v43  ;;  %v525_v35 = vld [vmem:[%s4287_s28 + $0x5f0] sm:$0xff] }
  0x9c   : > { %2510 = vmatpush1.bf16.msra.mxu0 %v3938_v50  ;;  %2551 = vmatpush1.bf16.msra.mxu1 %v3940_v51  ;;  %v424_v50 = vld [vmem:[%s4287_s28 + $0x2c8] sm:$0xff] }
  0x9d   : > { %2511 = vmatprep.subr.bf16.mxu0 %v3899_v52  ;;  %2552 = vmatprep.subr.bf16.mxu1 %v3901_v53  ;;  %v444_v51 = vld [vmem:[%s4287_s28 + $0x368] sm:$0xff]  ;;  %v3942_v52 = vcombine.low %v463_v40, %v483_v41  ;;  %v3944_v53 = vcombine.low %v464_v42, %v484_v43  ;;  %v3987_v40 = vcombine.high %v505_v34, %v525_v35  ;;  %v465_v42 = vld [vmem:[%s4287_s28 + $0x410] sm:$0xff] }
  0x9e   : > { %v3905_v55 = vcombine.high %v424_v50, %v444_v51  ;;  %v485_v43 = vld [vmem:[%s4287_s28 + $0x4b0] sm:$0xff] }
  0xa0   : > { %2512 = vmatpush1.bf16.msra.mxu0 %v3898_v58  ;;  %2553 = vmatpush1.bf16.msra.mxu1 %v3900_v59  ;;  %v384_v58 = vld [vmem:[%s4287_s28 + $0x188] sm:$0xff] }
  0xa1   : > { %2513 = vmatprep.subr.bf16.mxu0 %v3859_v60  ;;  %2554 = vmatprep.subr.bf16.mxu1 %v3861_v61  ;;  %v404_v59 = vld [vmem:[%s4287_s28 + $0x228] sm:$0xff]  ;;  %v3902_v60 = vcombine.low %v423_v48, %v443_v49  ;;  %v3904_v61 = vcombine.low %v424_v50, %v444_v51  ;;  %v3947_v48 = vcombine.high %v465_v42, %v485_v43  ;;  %v425_v50 = vld [vmem:[%s4287_s28 + $0x2d0] sm:$0xff] }
  0xa2   : > { %v3865_v63 = vcombine.high %v384_v58, %v404_v59  ;;  %v445_v51 = vld [vmem:[%s4287_s28 + $0x370] sm:$0xff] }
  0xa4   : > { %2514 = vmatpush1.bf16.msra.mxu0 %v3858_v2  ;;  %2555 = vmatpush1.bf16.msra.mxu1 %v3860_v3  ;;  %v344_v2 = vld [vmem:[%s4287_s28 + $0x48] sm:$0xff] }
  0xa5   : > { %2515 = vmatprep.subr.bf16.mxu0 %v3819_v4  ;;  %2556 = vmatprep.subr.bf16.mxu1 %v3821_v5  ;;  %v364_v3 = vld [vmem:[%s4287_s28 + $0xe8] sm:$0xff]  ;;  %v3862_v4 = vcombine.low %v383_v56, %v403_v57  ;;  %v3864_v5 = vcombine.low %v384_v58, %v404_v59  ;;  %v3907_v56 = vcombine.high %v425_v50, %v445_v51  ;;  %v385_v58 = vld [vmem:[%s4287_s28 + $0x190] sm:$0xff] }
  0xa6   : > { %v3825_v7 = vcombine.high %v344_v2, %v364_v3  ;;  %v405_v59 = vld [vmem:[%s4287_s28 + $0x230] sm:$0xff] }
  0xa8   : > { %2516 = vmatpush1.bf16.msra.mxu0 %v3818_v11  ;;  %2557 = vmatpush1.bf16.msra.mxu1 %v3820_v12  ;;  %v626_v11 = vld [vmem:[%s4287_s28 + $0x918] sm:$0xff] }
  0xa9   : > { %2583 = vmatprep.subr.bf16.mxu0 %v4103_v14  ;;  %2624 = vmatprep.subr.bf16.mxu1 %v4105_v15  ;;  %v646_v12 = vld [vmem:[%s4287_s28 + $0x9b8] sm:$0xff]  ;;  %v3822_v14 = vcombine.low %v343_v0, %v363_v1  ;;  %v3824_v15 = vcombine.low %v344_v2, %v364_v3  ;;  %v3867_v0 = vcombine.high %v385_v58, %v405_v59  ;;  %v345_v2 = vld [vmem:[%s4287_s28 + $0x50] sm:$0xff] }
  0xaa   : > { %v4109_v17 = vcombine.high %v626_v11, %v646_v12  ;;  %v365_v3 = vld [vmem:[%s4287_s28 + $0xf0] sm:$0xff] }
  0xab   : > { %2534 = vmatmul.mubr.bf16.vlgmr.msra.gmra.mxu0 %v4333_v13  ;;  %2575 = vmatmul.mubr.bf16.vlgmr.msra.gmra.mxu1 %v4333_v13 }
  0xac   : > { %2584 = vmatpush1.bf16.msra.mxu0 %v4102_v20  ;;  %2625 = vmatpush1.bf16.msra.mxu1 %v4104_v21  ;;  %v586_v20 = vld [vmem:[%s4287_s28 + $0x7d8] sm:$0xff] }
  0xad   : > { %2585 = vmatprep.subr.bf16.mxu0 %v4063_v22  ;;  %2626 = vmatprep.subr.bf16.mxu1 %v4065_v23  ;;  %v606_v21 = vld [vmem:[%s4287_s28 + $0x878] sm:$0xff]  ;;  %v4106_v22 = vcombine.low %v625_v8, %v645_v10  ;;  %v4108_v23 = vcombine.low %v626_v11, %v646_v12  ;;  %v3827_v8 = vcombine.high %v345_v2, %v365_v3  ;;  %v627_v11 = vld [vmem:[%s4287_s28 + $0x920] sm:$0xff] }
  0xae   : > { %2615 = vmatprep.mubr.bf16.mxu0 %v4229_v9  ;;  %2656 = vmatprep.mubr.bf16.mxu1 %v4229_v9  ;;  %v4069_v25 = vcombine.high %v586_v20, %v606_v21  ;;  %v647_v12 = vld [vmem:[%s4287_s28 + $0x9c0] sm:$0xff] }
  0xb0   : > { %2586 = vmatpush1.bf16.msra.mxu0 %v4062_v28  ;;  %2627 = vmatpush1.bf16.msra.mxu1 %v4064_v29  ;;  %v546_v28 = vld [vmem:[%s4287_s28 + $0x698] sm:$0xff] }
  0xb1   : > { %2587 = vmatprep.subr.bf16.mxu0 %v4023_v30  ;;  %2628 = vmatprep.subr.bf16.mxu1 %v4025_v31  ;;  %v566_v29 = vld [vmem:[%s4287_s28 + $0x738] sm:$0xff]  ;;  %v4066_v30 = vcombine.low %v585_v18, %v605_v19  ;;  %v4068_v31 = vcombine.low %v586_v20, %v606_v21  ;;  %v4111_v18 = vcombine.high %v627_v11, %v647_v12  ;;  %v587_v20 = vld [vmem:[%s4287_s28 + $0x7e0] sm:$0xff] }
  0xb2   : > { %v4029_v33 = vcombine.high %v546_v28, %v566_v29  ;;  %v607_v21 = vld [vmem:[%s4287_s28 + $0x880] sm:$0xff] }
  0xb4   : > { %2588 = vmatpush1.bf16.msra.mxu0 %v4022_v36  ;;  %2629 = vmatpush1.bf16.msra.mxu1 %v4024_v37  ;;  %v506_v36 = vld [vmem:[%s4287_s28 + $0x558] sm:$0xff] }
  0xb5   : > { %2589 = vmatprep.subr.bf16.mxu0 %v3983_v38  ;;  %2630 = vmatprep.subr.bf16.mxu1 %v3985_v39  ;;  %v526_v37 = vld [vmem:[%s4287_s28 + $0x5f8] sm:$0xff]  ;;  %v4026_v38 = vcombine.low %v545_v26, %v565_v27  ;;  %v4028_v39 = vcombine.low %v546_v28, %v566_v29  ;;  %v4071_v26 = vcombine.high %v587_v20, %v607_v21  ;;  %v547_v28 = vld [vmem:[%s4287_s28 + $0x6a0] sm:$0xff] }
  0xb6   : > { %v3989_v41 = vcombine.high %v506_v36, %v526_v37  ;;  %v567_v29 = vld [vmem:[%s4287_s28 + $0x740] sm:$0xff] }
  0xb8   : > { %2590 = vmatpush1.bf16.msra.mxu0 %v3982_v44  ;;  %2631 = vmatpush1.bf16.msra.mxu1 %v3984_v45  ;;  %v466_v44 = vld [vmem:[%s4287_s28 + $0x418] sm:$0xff] }
  0xb9   : > { %2591 = vmatprep.subr.bf16.mxu0 %v3943_v46  ;;  %2632 = vmatprep.subr.bf16.mxu1 %v3945_v47  ;;  %v486_v45 = vld [vmem:[%s4287_s28 + $0x4b8] sm:$0xff]  ;;  %v3986_v46 = vcombine.low %v505_v34, %v525_v35  ;;  %v3988_v47 = vcombine.low %v506_v36, %v526_v37  ;;  %v4031_v35 = vcombine.high %v547_v28, %v567_v29  ;;  %v507_v37 = vld [vmem:[%s4287_s28 + $0x560] sm:$0xff] }
  0xba   : > { %v3949_v49 = vcombine.high %v466_v44, %v486_v45 }
  0xbc   : > { %2592 = vmatpush1.bf16.msra.mxu0 %v3942_v52  ;;  %2633 = vmatpush1.bf16.msra.mxu1 %v3944_v53  ;;  %v426_v52 = vld [vmem:[%s4287_s28 + $0x2d8] sm:$0xff] }
  0xbd   : > { %2593 = vmatprep.subr.bf16.mxu0 %v3903_v54  ;;  %2634 = vmatprep.subr.bf16.mxu1 %v3905_v55  ;;  %v446_v53 = vld [vmem:[%s4287_s28 + $0x378] sm:$0xff]  ;;  %v3946_v54 = vcombine.low %v465_v42, %v485_v43  ;;  %v3948_v55 = vcombine.low %v466_v44, %v486_v45  ;;  %v467_v44 = vld [vmem:[%s4287_s28 + $0x420] sm:$0xff] }
  0xbe   : > { %v3909_v57 = vcombine.high %v426_v52, %v446_v53  ;;  %v487_v45 = vld [vmem:[%s4287_s28 + $0x4c0] sm:$0xff] }
  0xc0   : > { %2594 = vmatpush1.bf16.msra.mxu0 %v3902_v60  ;;  %2635 = vmatpush1.bf16.msra.mxu1 %v3904_v61  ;;  %v386_v60 = vld [vmem:[%s4287_s28 + $0x198] sm:$0xff] }
  0xc1   : > { %2595 = vmatprep.subr.bf16.mxu0 %v3863_v62  ;;  %2636 = vmatprep.subr.bf16.mxu1 %v3865_v63  ;;  %v406_v61 = vld [vmem:[%s4287_s28 + $0x238] sm:$0xff]  ;;  %v3906_v62 = vcombine.low %v425_v50, %v445_v51  ;;  %v3908_v63 = vcombine.low %v426_v52, %v446_v53  ;;  %v3951_v50 = vcombine.high %v467_v44, %v487_v45  ;;  %v427_v52 = vld [vmem:[%s4287_s28 + $0x2e0] sm:$0xff] }
  0xc2   : > { %v3869_v1 = vcombine.high %v386_v60, %v406_v61  ;;  %v447_v53 = vld [vmem:[%s4287_s28 + $0x380] sm:$0xff] }
  0xc4   : > { %2596 = vmatpush1.bf16.msra.mxu0 %v3862_v4  ;;  %2637 = vmatpush1.bf16.msra.mxu1 %v3864_v5  ;;  %v346_v4 = vld [vmem:[%s4287_s28 + $0x58] sm:$0xff] }
  0xc5   : > { %2597 = vmatprep.subr.bf16.mxu0 %v3823_v6  ;;  %2638 = vmatprep.subr.bf16.mxu1 %v3825_v7  ;;  %v366_v5 = vld [vmem:[%s4287_s28 + $0xf8] sm:$0xff]  ;;  %v3866_v6 = vcombine.low %v385_v58, %v405_v59  ;;  %v3868_v7 = vcombine.low %v386_v60, %v406_v61  ;;  %v3911_v58 = vcombine.high %v427_v52, %v447_v53  ;;  %v387_v60 = vld [vmem:[%s4287_s28 + $0x1a0] sm:$0xff] }
  0xc6   : > { %v3829_v10 = vcombine.high %v346_v4, %v366_v5  ;;  %v407_v61 = vld [vmem:[%s4287_s28 + $0x240] sm:$0xff] }
  0xc8   : > { %2598 = vmatpush1.bf16.msra.mxu0 %v3822_v14  ;;  %2639 = vmatpush1.bf16.msra.mxu1 %v3824_v15  ;;  %v628_v14 = vld [vmem:[%s4287_s28 + $0x928] sm:$0xff] }
  0xc9   : > { %2665 = vmatprep.subr.bf16.mxu0 %v4107_v16  ;;  %2706 = vmatprep.subr.bf16.mxu1 %v4109_v17  ;;  %v648_v15 = vld [vmem:[%s4287_s28 + $0x9c8] sm:$0xff]  ;;  %v3826_v16 = vcombine.low %v345_v2, %v365_v3  ;;  %v3828_v17 = vcombine.low %v346_v4, %v366_v5  ;;  %v3871_v2 = vcombine.high %v387_v60, %v407_v61  ;;  %v347_v4 = vld [vmem:[%s4287_s28 + $0x60] sm:$0xff] }
  0xca   : > { %v4113_v19 = vcombine.high %v628_v14, %v648_v15  ;;  %v367_v5 = vld [vmem:[%s4287_s28 + $0x100] sm:$0xff] }
  0xcb   : > { %2616 = vmatmul.mubr.bf16.vlgmr.msra.gmra.mxu0 %v4333_v13  ;;  %2657 = vmatmul.mubr.bf16.vlgmr.msra.gmra.mxu1 %v4333_v13 }
  0xcc   : > { %2666 = vmatpush1.bf16.msra.mxu0 %v4106_v22  ;;  %2707 = vmatpush1.bf16.msra.mxu1 %v4108_v23  ;;  %v588_v22 = vld [vmem:[%s4287_s28 + $0x7e8] sm:$0xff] }
  0xcd   : > { %2667 = vmatprep.subr.bf16.mxu0 %v4067_v24  ;;  %2708 = vmatprep.subr.bf16.mxu1 %v4069_v25  ;;  %v608_v23 = vld [vmem:[%s4287_s28 + $0x888] sm:$0xff]  ;;  %v4110_v24 = vcombine.low %v627_v11, %v647_v12  ;;  %v4112_v25 = vcombine.low %v628_v14, %v648_v15  ;;  %v3831_v11 = vcombine.high %v347_v4, %v367_v5  ;;  %v629_v14 = vld [vmem:[%s4287_s28 + $0x930] sm:$0xff] }
  0xce   : > { %2697 = vmatprep.mubr.bf16.mxu0 %v4229_v9  ;;  %2738 = vmatprep.mubr.bf16.mxu1 %v4229_v9  ;;  %v4073_v27 = vcombine.high %v588_v22, %v608_v23  ;;  %v4072_v34 = vcombine.low %v588_v22, %v608_v23  ;;  %v649_v15 = vld [vmem:[%s4287_s28 + $0x9d0] sm:$0xff] }
  0xcf   : > { %v589_v22 = vld [vmem:[%s4287_s28 + $0x7f0] sm:$0xff] }
  0xd0   : > { %2668 = vmatpush1.bf16.msra.mxu0 %v4066_v30  ;;  %2709 = vmatpush1.bf16.msra.mxu1 %v4068_v31  ;;  %v548_v30 = vld [vmem:[%s4287_s28 + $0x6a8] sm:$0xff]  ;;  %v609_v23 = vld [vmem:[%s4287_s28 + $0x890] sm:$0xff] }
  0xd1   : > { %2669 = vmatprep.subr.bf16.mxu0 %v4027_v32  ;;  %2710 = vmatprep.subr.bf16.mxu1 %v4029_v33  ;;  %v568_v31 = vld [vmem:[%s4287_s28 + $0x748] sm:$0xff]  ;;  %v4521_v32 = vld [vmem:[%s4282_s24] sm:$0xf]  ;;  %v4070_v33 = vcombine.low %v587_v20, %v607_v21  ;;  %v4115_v20 = vcombine.high %v629_v14, %v649_v15 }
  0xd2   : > { %v4033_v36 = vcombine.high %v548_v30, %v568_v31 }
  0xd4   : > { %2670 = vmatpush1.bf16.msra.mxu0 %v4026_v38  ;;  %2711 = vmatpush1.bf16.msra.mxu1 %v4028_v39  ;;  %v508_v38 = vld [vmem:[%s4287_s28 + $0x568] sm:$0xff] }
  0xd5   : > { %2671 = vmatprep.subr.bf16.mxu0 %v3987_v40  ;;  %2712 = vmatprep.subr.bf16.mxu1 %v3989_v41  ;;  %v528_v39 = vld [vmem:[%s4287_s28 + $0x608] sm:$0xff]  ;;  %v4030_v40 = vcombine.low %v547_v28, %v567_v29  ;;  %v4032_v41 = vcombine.low %v548_v30, %v568_v31  ;;  %v4075_v29 = vcombine.high %v589_v22, %v609_v23  ;;  %v296_v30 = vld [vmem:[#allocation2 + $0x10] sm:$0xff] }
  0xd6   : > { %v3993_v43 = vcombine.high %v508_v38, %v528_v39 }
  0xd8   : > { %2672 = vmatpush1.bf16.msra.mxu0 %v3986_v46  ;;  %2713 = vmatpush1.bf16.msra.mxu1 %v3988_v47  ;;  %v468_v46 = vld [vmem:[%s4287_s28 + $0x428] sm:$0xff] }
  0xd9   : > { %2673 = vmatprep.subr.bf16.mxu0 %v3947_v48  ;;  %2714 = vmatprep.subr.bf16.mxu1 %v3949_v49  ;;  %v488_v47 = vld [vmem:[%s4287_s28 + $0x4c8] sm:$0xff]  ;;  %v3992_v49 = vcombine.low %v508_v38, %v528_v39 }
  0xda   : > { %v3953_v51 = vcombine.high %v468_v46, %v488_v47 }
  0xdc   : > { %2674 = vmatpush1.bf16.msra.mxu0 %v3946_v54  ;;  %2715 = vmatpush1.bf16.msra.mxu1 %v3948_v55  ;;  %v428_v54 = vld [vmem:[%s4287_s28 + $0x2e8] sm:$0xff] }
  0xdd   : > { %2675 = vmatprep.subr.bf16.mxu0 %v3907_v56  ;;  %2716 = vmatprep.subr.bf16.mxu1 %v3909_v57  ;;  %v448_v55 = vld [vmem:[%s4287_s28 + $0x388] sm:$0xff]  ;;  %v3950_v56 = vcombine.low %v467_v44, %v487_v45  ;;  %v3952_v57 = vcombine.low %v468_v46, %v488_v47 }
  0xde   : > { %v3913_v59 = vcombine.high %v428_v54, %v448_v55 }
  0xe0   : > { %2676 = vmatpush1.bf16.msra.mxu0 %v3906_v62  ;;  %2717 = vmatpush1.bf16.msra.mxu1 %v3908_v63  ;;  %v388_v62 = vld [vmem:[%s4287_s28 + $0x1a8] sm:$0xff] }
  0xe1   : > { %2677 = vmatprep.subr.bf16.mxu0 %v3867_v0  ;;  %2718 = vmatprep.subr.bf16.mxu1 %v3869_v1  ;;  %v408_v63 = vld [vmem:[%s4287_s28 + $0x248] sm:$0xff]  ;;  %v3910_v0 = vcombine.low %v427_v52, %v447_v53  ;;  %v3912_v1 = vcombine.low %v428_v54, %v448_v55  ;;  %v510_v53 = vld [vmem:[%s4287_s28 + $0x578] sm:$0xff] }
  0xe2   : > { %v3873_v3 = vcombine.high %v388_v62, %v408_v63  ;;  %v530_v54 = vld [vmem:[%s4287_s28 + $0x618] sm:$0xff] }
  0xe4   : > { %2678 = vmatpush1.bf16.msra.mxu0 %v3866_v6  ;;  %2719 = vmatpush1.bf16.msra.mxu1 %v3868_v7  ;;  %v348_v6 = vld [vmem:[%s4287_s28 + $0x68] sm:$0xff] }
  0xe5   : > { %2679 = vmatprep.subr.bf16.mxu0 %v3827_v8  ;;  %2720 = vmatprep.subr.bf16.mxu1 %v3829_v10  ;;  %v368_v7 = vld [vmem:[%s4287_s28 + $0x108] sm:$0xff]  ;;  %v3870_v8 = vcombine.low %v387_v60, %v407_v61  ;;  %v3872_v10 = vcombine.low %v388_v62, %v408_v63  ;;  %v3997_v61 = vcombine.high %v510_v53, %v530_v54  ;;  %v469_v62 = vld [vmem:[%s4287_s28 + $0x430] sm:$0xff] }
  0xe6   : > { %v3833_v12 = vcombine.high %v348_v6, %v368_v7  ;;  %v489_v63 = vld [vmem:[%s4287_s28 + $0x4d0] sm:$0xff] }
  0xe8   : > { %2680 = vmatpush1.bf16.msra.mxu0 %v3826_v16  ;;  %2721 = vmatpush1.bf16.msra.mxu1 %v3828_v17  ;;  %v630_v16 = vld [vmem:[%s4287_s28 + $0x938] sm:$0xff] }
  0xe9   : > { %2747 = vmatprep.subr.bf16.mxu0 %v4111_v18  ;;  %2788 = vmatprep.subr.bf16.mxu1 %v4113_v19  ;;  %v650_v17 = vld [vmem:[%s4287_s28 + $0x9d8] sm:$0xff]  ;;  %v3830_v18 = vcombine.low %v347_v4, %v367_v5  ;;  %v3832_v19 = vcombine.low %v348_v6, %v368_v7  ;;  %v3955_v4 = vcombine.high %v469_v62, %v489_v63  ;;  %v429_v6 = vld [vmem:[%s4287_s28 + $0x2f0] sm:$0xff] }
  0xea   : > { %v4117_v21 = vcombine.high %v630_v16, %v650_v17  ;;  %v4116_v28 = vcombine.low %v630_v16, %v650_v17  ;;  %v449_v7 = vld [vmem:[%s4287_s28 + $0x390] sm:$0xff] }
  0xeb   : > { %2698 = vmatmul.mubr.bf16.vlgmr.msra.gmra.mxu0 %v4333_v13  ;;  %2739 = vmatmul.mubr.bf16.vlgmr.msra.gmra.mxu1 %v4521_v32  ;;  %v527_v13 = vld [vmem:[%s4287_s28 + $0x600] sm:$0xff]  ;;  %v389_v16 = vld [vmem:[%s4287_s28 + $0x1b0] sm:$0xff] }
  0xec   : > { %2748 = vmatpush1.bf16.msra.mxu0 %v4110_v24  ;;  %2789 = vmatpush1.bf16.msra.mxu1 %v4112_v25  ;;  %v3991_v42 = vcombine.high %v507_v37, %v527_v13  ;;  %v3990_v48 = vcombine.low %v507_v37, %v527_v13  ;;  %v590_v24 = vld [vmem:[%s4287_s28 + $0x7f8] sm:$0xff]  ;;  %v409_v17 = vld [vmem:[%s4287_s28 + $0x250] sm:$0xff] }
  0xed   : > { %2749 = vmatprep.subr.bf16.mxu0 %v4071_v26  ;;  %2790 = vmatprep.subr.bf16.mxu1 %v4073_v27  ;;  %v610_v25 = vld [vmem:[%s4287_s28 + $0x898] sm:$0xff]  ;;  %v4114_v26 = vcombine.low %v629_v14, %v649_v15  ;;  %v294_v27 = vld [vmem:[#allocation2 + $0xb0] sm:$0xff]  ;;  %v3915_v14 = vcombine.high %v429_v6, %v449_v7 }
  0xee   : > { %2779 = vmatprep.mubr.bf16.mxu0 %v4229_v9  ;;  %2820 = vmatprep.mubr.bf16.mxu1 %v4229_v9  ;;  %v4077_v31 = vcombine.high %v590_v24, %v610_v25  ;;  %v550_v37 = vld [vmem:[%s4287_s28 + $0x6b8] sm:$0xff]  ;;  %v4076_v44 = vcombine.low %v590_v24, %v610_v25  ;;  %v349_v24 = vld [vmem:[%s4287_s28 + $0x70] sm:$0xff] }
  0xef   : > { %v570_v13 = vld [vmem:[%s4287_s28 + $0x758] sm:$0xff]  ;;  %v369_v25 = vld [vmem:[%s4287_s28 + $0x110] sm:$0xff] }
  0xf0   : > { %2750 = vmatpush1.bf16.msra.mxu0 %v4070_v33  ;;  %2791 = vmatpush1.bf16.msra.mxu1 %v4072_v34  ;;  %v549_v33 = vld [vmem:[%s4287_s28 + $0x6b0] sm:$0xff] }
  0xf1   : > { %2751 = vmatprep.subr.bf16.mxu0 %v4031_v35  ;;  %2792 = vmatprep.subr.bf16.mxu1 %v4033_v36  ;;  %v569_v34 = vld [vmem:[%s4287_s28 + $0x750] sm:$0xff] }
  0xf2   : > { %v295_v36 = vld [vmem:[#allocation2 + $0xd0] sm:$0xff]  ;;  %v4035_v45 = vcombine.high %v549_v33, %v569_v34 }
  0xf4   : > { %2752 = vmatpush1.bf16.msra.mxu0 %v4030_v40  ;;  %2793 = vmatpush1.bf16.msra.mxu1 %v4032_v41  ;;  %v297_v40 = vld [vmem:[#allocation2 + $0x48] sm:$0xff]  ;;  %v4074_v41 = vcombine.low %v589_v22, %v609_v23  ;;  %v3875_v22 = vcombine.high %v389_v16, %v409_v17 }
  0xf5   : > { %2753 = vmatprep.subr.bf16.mxu0 %v3991_v42  ;;  %2794 = vmatprep.subr.bf16.mxu1 %v3993_v43 }
  0xf8   : > { %2754 = vmatpush1.bf16.msra.mxu0 %v3990_v48  ;;  %2795 = vmatpush1.bf16.msra.mxu1 %v3992_v49  ;;  %v4037_v48 = vcombine.high %v550_v37, %v570_v13  ;;  %v509_v49 = vld [vmem:[%s4287_s28 + $0x570] sm:$0xff] }
  0xf9   : > { %2755 = vmatprep.subr.bf16.mxu0 %v3951_v50  ;;  %2796 = vmatprep.subr.bf16.mxu1 %v3953_v51  ;;  %v529_v50 = vld [vmem:[%s4287_s28 + $0x610] sm:$0xff] }
  0xfc   : > { %2756 = vmatpush1.bf16.msra.mxu0 %v3950_v56  ;;  %2797 = vmatpush1.bf16.msra.mxu1 %v3952_v57  ;;  %v4034_v56 = vcombine.low %v549_v33, %v569_v34  ;;  %v631_v33 = vld [vmem:[%s4287_s28 + $0x940] sm:$0xff] }
  0xfd   : > { %2757 = vmatprep.subr.bf16.mxu0 %v3911_v58  ;;  %2798 = vmatprep.subr.bf16.mxu1 %v3913_v59  ;;  %v4036_v58 = vcombine.low %v550_v37, %v570_v13  ;;  %v3995_v59 = vcombine.high %v509_v49, %v529_v50  ;;  %v651_v34 = vld [vmem:[%s4287_s28 + $0x9e0] sm:$0xff]  ;;  %v3834_v37 = vcombine.low %v349_v24, %v369_v25 }
 0x100   : > { %2758 = vmatpush1.bf16.msra.mxu0 %v3910_v0  ;;  %2799 = vmatpush1.bf16.msra.mxu1 %v3912_v1  ;;  %v470_v0 = vld [vmem:[%s4287_s28 + $0x438] sm:$0xff] }
 0x101   : > { %2759 = vmatprep.subr.bf16.mxu0 %v3871_v2  ;;  %2800 = vmatprep.subr.bf16.mxu1 %v3873_v3  ;;  %v490_v1 = vld [vmem:[%s4287_s28 + $0x4d8] sm:$0xff]  ;;  %v3994_v2 = vcombine.low %v509_v49, %v529_v50  ;;  %v3996_v3 = vcombine.low %v510_v53, %v530_v54  ;;  %v551_v50 = vld [vmem:[%s4287_s28 + $0x6c0] sm:$0xff]  ;;  %v552_v54 = vld [vmem:[%s4287_s28 + $0x6c8] sm:$0xff] }
 0x102   : > { %v3957_v5 = vcombine.high %v470_v0, %v490_v1  ;;  %v299_v53 = vld [vmem:[#allocation2 + $0x38] sm:$0xff] }
 0x104   : > { %2760 = vmatpush1.bf16.msra.mxu0 %v3870_v8  ;;  %2801 = vmatpush1.bf16.msra.mxu1 %v3872_v10  ;;  %v430_v8 = vld [vmem:[%s4287_s28 + $0x2f8] sm:$0xff] }
 0x105   : > { %2761 = vmatprep.subr.bf16.mxu0 %v3831_v11  ;;  %2802 = vmatprep.subr.bf16.mxu1 %v3833_v12  ;;  %v450_v10 = vld [vmem:[%s4287_s28 + $0x398] sm:$0xff]  ;;  %v3954_v11 = vcombine.low %v469_v62, %v489_v63  ;;  %v3956_v12 = vcombine.low %v470_v0, %v490_v1 }
 0x106   : > { %v3917_v15 = vcombine.high %v430_v8, %v450_v10 }
 0x108   : > { %2762 = vmatpush1.bf16.msra.mxu0 %v3830_v18  ;;  %2803 = vmatpush1.bf16.msra.mxu1 %v3832_v19  ;;  %v390_v18 = vld [vmem:[%s4287_s28 + $0x1b8] sm:$0xff] }
 0x109   : > { %2829 = vmatprep.subr.bf16.mxu0 %v4115_v20  ;;  %2870 = vmatprep.subr.bf16.mxu1 %v4117_v21  ;;  %v410_v19 = vld [vmem:[%s4287_s28 + $0x258] sm:$0xff]  ;;  %v3914_v20 = vcombine.low %v429_v6, %v449_v7  ;;  %v3916_v21 = vcombine.low %v430_v8, %v450_v10  ;;  %v512_v7 = vld [vmem:[%s4287_s28 + $0x588] sm:$0xff] }
 0x10a   : > { %v3877_v23 = vcombine.high %v390_v18, %v410_v19  ;;  %v532_v8 = vld [vmem:[%s4287_s28 + $0x628] sm:$0xff] }
 0x10b   : > { %v2289_v35 = vpop.f32.mrf.mxu0  ;;  %2780 = vmatmul.mubr.bf16.vlgmr.msra.gmra.mxu0 %v4521_v32  ;;  %v2330_v39 = vpop.f32.mrf.mxu1  ;;  %2821 = vmatmul.mubr.bf16.vlgmr.msra.gmra.mxu1 %v4521_v32 }
 0x10c   : > { %v3075_v38 = vadd.f32 %v2289_v35, %v294_v27  ;;  %2830 = vmatpush1.bf16.msra.mxu0 %v4114_v26  ;;  %v3077_v42 = vadd.f32 %v2330_v39, %v296_v30  ;;  %2871 = vmatpush1.bf16.msra.mxu1 %v4116_v28  ;;  %v350_v26 = vld [vmem:[%s4287_s28 + $0x78] sm:$0xff]  ;;  %v3874_v28 = vcombine.low %v389_v16, %v409_v17  ;;  %v632_v35 = vld [vmem:[%s4287_s28 + $0x948] sm:$0xff] }
 0x10d   : > { %v2291_v43 = vpop.f32.mrf.mxu0  ;;  %2831 = vmatprep.subr.bf16.mxu0 %v4075_v29  ;;  %v2332_v47 = vpop.f32.mrf.mxu1  ;;  %2872 = vmatprep.subr.bf16.mxu1 %v4077_v31  ;;  %v370_v27 = vld [vmem:[%s4287_s28 + $0x118] sm:$0xff]  ;;  %v3876_v29 = vcombine.low %v390_v18, %v410_v19  ;;  %v3835_v30 = vcombine.high %v349_v24, %v369_v25  ;;  %v4001_v17 = vcombine.high %v512_v7, %v532_v8  ;;  %v471_v18 = vld [vmem:[%s4287_s28 + $0x440] sm:$0xff] }
 0x10e   : > { %3115 = vst [vmem:[#allocation2 + $0xb0] sm:$0xff] %v3075_v38  ;;  %v3076_v46 = vadd.f32 %v2291_v43, %v295_v36  ;;  %2861 = vmatprep.mubr.bf16.mxu0 %v4229_v9  ;;  %3117 = vst [vmem:[#allocation2 + $0x10] sm:$0xff] %v3077_v42  ;;  %v3078_v51 = vadd.f32 %v2332_v47, %v297_v40  ;;  %2902 = vmatprep.mubr.bf16.mxu1 %v4229_v9  ;;  %v652_v36 = vld [vmem:[%s4287_s28 + $0x9e8] sm:$0xff]  ;;  %v591_v40 = vld [vmem:[%s4287_s28 + $0x800] sm:$0xff] }
 0x10f   : > { %v2293_v52 = vpop.f32.mrf.mxu0  ;;  %v2334_v55 = vpop.f32.mrf.mxu1  ;;  %v3837_v31 = vcombine.high %v350_v26, %v370_v27  ;;  %v3836_v13 = vcombine.low %v350_v26, %v370_v27  ;;  %v4119_v38 = vcombine.high %v631_v33, %v651_v34  ;;  %v4121_v39 = vcombine.high %v632_v35, %v652_v36  ;;  %v592_v42 = vld [vmem:[%s4287_s28 + $0x808] sm:$0xff]  ;;  %v491_v19 = vld [vmem:[%s4287_s28 + $0x4e0] sm:$0xff] }
 0x110   : > { %3116 = vst [vmem:[#allocation2 + $0xd0] sm:$0xff] %v3076_v46  ;;  %2832 = vmatpush1.bf16.msra.mxu0 %v4074_v41  ;;  %3118 = vst [vmem:[#allocation2 + $0x48] sm:$0xff] %v3078_v51  ;;  %2873 = vmatpush1.bf16.msra.mxu1 %v4076_v44  ;;  %v611_v41 = vld [vmem:[%s4287_s28 + $0x8a0] sm:$0xff]  ;;  %v612_v43 = vld [vmem:[%s4287_s28 + $0x8a8] sm:$0xff]  ;;  %v4118_v44 = vcombine.low %v631_v33, %v651_v34  ;;  %v4120_v46 = vcombine.low %v632_v35, %v652_v36 }
 0x111   : > { %v2294_v57 = vpop.f32.mrf.mxu0  ;;  %2833 = vmatprep.subr.bf16.mxu0 %v4035_v45  ;;  %v2335_v60 = vpop.f32.mrf.mxu1  ;;  %2874 = vmatprep.subr.bf16.mxu1 %v4037_v48  ;;  %v298_v45 = vld [vmem:[#allocation2 + $0x120] sm:$0xff]  ;;  %v4079_v47 = vcombine.high %v591_v40, %v611_v41  ;;  %v300_v48 = vld [vmem:[#allocation2 + $0xf8] sm:$0xff]  ;;  %v4081_v49 = vcombine.high %v592_v42, %v612_v43  ;;  %v572_v55 = vld [vmem:[%s4287_s28 + $0x768] sm:$0xff]  ;;  %v4080_v62 = vcombine.low %v592_v42, %v612_v43 }
 0x112   : > { %v571_v51 = vld [vmem:[%s4287_s28 + $0x760] sm:$0xff]  ;;  %v3959_v24 = vcombine.high %v471_v18, %v491_v19 }
 0x113   : > { %v4039_v63 = vcombine.high %v551_v50, %v571_v51  ;;  %v431_v26 = vld [vmem:[%s4287_s28 + $0x300] sm:$0xff] }
 0x114   : > { %2834 = vmatpush1.bf16.msra.mxu0 %v4034_v56  ;;  %2875 = vmatpush1.bf16.msra.mxu1 %v4036_v58  ;;  %v301_v58 = vld [vmem:[#allocation2 + $0x100] sm:$0xff] }
 0x115   : > { %2835 = vmatprep.subr.bf16.mxu0 %v3995_v59  ;;  %2876 = vmatprep.subr.bf16.mxu1 %v3997_v61  ;;  %v4078_v59 = vcombine.low %v591_v40, %v611_v41  ;;  %v451_v27 = vld [vmem:[%s4287_s28 + $0x3a0] sm:$0xff] }
 0x116   : > { %v3919_v33 = vcombine.high %v431_v26, %v451_v27  ;;  %v391_v35 = vld [vmem:[%s4287_s28 + $0x1c0] sm:$0xff] }
 0x117   : > { %v411_v36 = vld [vmem:[%s4287_s28 + $0x260] sm:$0xff] }
 0x118   : > { %2836 = vmatpush1.bf16.msra.mxu0 %v3994_v2  ;;  %2877 = vmatpush1.bf16.msra.mxu1 %v3996_v3  ;;  %v4041_v2 = vcombine.high %v552_v54, %v572_v55  ;;  %v511_v3 = vld [vmem:[%s4287_s28 + $0x580] sm:$0xff]  ;;  %v3879_v40 = vcombine.high %v391_v35, %v411_v36 }
 0x119   : > { %2837 = vmatprep.subr.bf16.mxu0 %v3955_v4  ;;  %2878 = vmatprep.subr.bf16.mxu1 %v3957_v5  ;;  %v531_v4 = vld [vmem:[%s4287_s28 + $0x620] sm:$0xff] }
 0x11a   : > { %v351_v42 = vld [vmem:[%s4287_s28 + $0x80] sm:$0xff] }
 0x11b   : > { %v371_v43 = vld [vmem:[%s4287_s28 + $0x120] sm:$0xff] }
 0x11c   : > { %2838 = vmatpush1.bf16.msra.mxu0 %v3954_v11  ;;  %2879 = vmatpush1.bf16.msra.mxu1 %v3956_v12  ;;  %v4038_v11 = vcombine.low %v551_v50, %v571_v51  ;;  %v633_v50 = vld [vmem:[%s4287_s28 + $0x950] sm:$0xff] }
 0x11d   : > { %2839 = vmatprep.subr.bf16.mxu0 %v3915_v14  ;;  %2880 = vmatprep.subr.bf16.mxu1 %v3917_v15  ;;  %v4040_v14 = vcombine.low %v552_v54, %v572_v55  ;;  %v3999_v15 = vcombine.high %v511_v3, %v531_v4  ;;  %v653_v51 = vld [vmem:[%s4287_s28 + $0x9f0] sm:$0xff]  ;;  %v3838_v54 = vcombine.low %v351_v42, %v371_v43 }
 0x120   : > { %2840 = vmatpush1.bf16.msra.mxu0 %v3914_v20  ;;  %2881 = vmatpush1.bf16.msra.mxu1 %v3916_v21  ;;  %v472_v20 = vld [vmem:[%s4287_s28 + $0x448] sm:$0xff] }
 0x121   : > { %2841 = vmatprep.subr.bf16.mxu0 %v3875_v22  ;;  %2882 = vmatprep.subr.bf16.mxu1 %v3877_v23  ;;  %v492_v21 = vld [vmem:[%s4287_s28 + $0x4e8] sm:$0xff]  ;;  %v3998_v22 = vcombine.low %v511_v3, %v531_v4  ;;  %v4000_v23 = vcombine.low %v512_v7, %v532_v8  ;;  %v553_v4 = vld [vmem:[%s4287_s28 + $0x6d0] sm:$0xff]  ;;  %v554_v8 = vld [vmem:[%s4287_s28 + $0x6d8] sm:$0xff] }
 0x122   : > { %v3961_v25 = vcombine.high %v472_v20, %v492_v21  ;;  %v303_v7 = vld [vmem:[#allocation2 + $0x108] sm:$0xff] }
 0x124   : > { %2842 = vmatpush1.bf16.msra.mxu0 %v3874_v28  ;;  %2883 = vmatpush1.bf16.msra.mxu1 %v3876_v29  ;;  %v432_v28 = vld [vmem:[%s4287_s28 + $0x308] sm:$0xff] }
 0x125   : > { %2843 = vmatprep.subr.bf16.mxu0 %v3835_v30  ;;  %2884 = vmatprep.subr.bf16.mxu1 %v3837_v31  ;;  %v452_v29 = vld [vmem:[%s4287_s28 + $0x3a8] sm:$0xff]  ;;  %v3958_v30 = vcombine.low %v471_v18, %v491_v19  ;;  %v3960_v31 = vcombine.low %v472_v20, %v492_v21 }
 0x126   : > { %v3921_v34 = vcombine.high %v432_v28, %v452_v29 }
 0x128   : > { %2844 = vmatpush1.bf16.msra.mxu0 %v3834_v37  ;;  %2885 = vmatpush1.bf16.msra.mxu1 %v3836_v13  ;;  %v392_v37 = vld [vmem:[%s4287_s28 + $0x1c8] sm:$0xff] }
 0x129   : > { %2911 = vmatprep.subr.bf16.mxu0 %v4119_v38  ;;  %2952 = vmatprep.subr.bf16.mxu1 %v4121_v39  ;;  %v412_v13 = vld [vmem:[%s4287_s28 + $0x268] sm:$0xff]  ;;  %v3918_v38 = vcombine.low %v431_v26, %v451_v27  ;;  %v3920_v39 = vcombine.low %v432_v28, %v452_v29  ;;  %v514_v27 = vld [vmem:[%s4287_s28 + $0x598] sm:$0xff] }
 0x12a   : > { %v3881_v41 = vcombine.high %v392_v37, %v412_v13  ;;  %v534_v28 = vld [vmem:[%s4287_s28 + $0x638] sm:$0xff] }
 0x12b   : > { %v2371_v52 = vpop.f32.mrf.mxu0  ;;  %2862 = vmatmul.mubr.bf16.vlgmr.msra.gmra.mxu0 %v4521_v32  ;;  %v2412_v57 = vpop.f32.mrf.mxu1  ;;  %2903 = vmatmul.mubr.bf16.vlgmr.msra.gmra.mxu1 %v4521_v32 }
 0x12c   : > { %v3079_v56 = vadd.f32 %v2371_v52, %v298_v45  ;;  %2912 = vmatpush1.bf16.msra.mxu0 %v4118_v44  ;;  %v3081_v60 = vadd.f32 %v2412_v57, %v300_v48  ;;  %2953 = vmatpush1.bf16.msra.mxu1 %v4120_v46  ;;  %v352_v44 = vld [vmem:[%s4287_s28 + $0x88] sm:$0xff]  ;;  %v3878_v46 = vcombine.low %v391_v35, %v411_v36  ;;  %v634_v52 = vld [vmem:[%s4287_s28 + $0x958] sm:$0xff] }
 0x12d   : > { %v2373_v61 = vpop.f32.mrf.mxu0  ;;  %2913 = vmatprep.subr.bf16.mxu0 %v4079_v47  ;;  %v2414_v1 = vpop.f32.mrf.mxu1  ;;  %2954 = vmatprep.subr.bf16.mxu1 %v4081_v49  ;;  %v372_v45 = vld [vmem:[%s4287_s28 + $0x128] sm:$0xff]  ;;  %v3880_v47 = vcombine.low %v392_v37, %v412_v13  ;;  %v3839_v48 = vcombine.high %v351_v42, %v371_v43  ;;  %v4005_v36 = vcombine.high %v514_v27, %v534_v28  ;;  %v493_v37 = vld [vmem:[%s4287_s28 + $0x4f0] sm:$0xff]  ;;  %v474_v13 = vld [vmem:[%s4287_s28 + $0x458] sm:$0xff] }
 0x12e   : > { %3119 = vst [vmem:[#allocation2 + $0x120] sm:$0xff] %v3079_v56  ;;  %v3080_v0 = vadd.f32 %v2373_v61, %v299_v53  ;;  %2943 = vmatprep.mubr.bf16.mxu0 %v4229_v9  ;;  %3121 = vst [vmem:[#allocation2 + $0xf8] sm:$0xff] %v3081_v60  ;;  %v3082_v5 = vadd.f32 %v2414_v1, %v301_v58  ;;  %2984 = vmatprep.mubr.bf16.mxu1 %v4229_v9  ;;  %v654_v53 = vld [vmem:[%s4287_s28 + $0x9f8] sm:$0xff]  ;;  %v593_v58 = vld [vmem:[%s4287_s28 + $0x810] sm:$0xff] }
 0x12f   : > { %v2375_v6 = vpop.f32.mrf.mxu0  ;;  %v2416_v10 = vpop.f32.mrf.mxu1  ;;  %v3841_v49 = vcombine.high %v352_v44, %v372_v45  ;;  %v3840_v55 = vcombine.low %v352_v44, %v372_v45  ;;  %v4123_v56 = vcombine.high %v633_v50, %v653_v51  ;;  %v4125_v57 = vcombine.high %v634_v52, %v654_v53  ;;  %v594_v60 = vld [vmem:[%s4287_s28 + $0x818] sm:$0xff]  ;;  %v433_v43 = vld [vmem:[%s4287_s28 + $0x310] sm:$0xff] }
 0x130   : > { %3120 = vst [vmem:[#allocation2 + $0x38] sm:$0xff] %v3080_v0  ;;  %2914 = vmatpush1.bf16.msra.mxu0 %v4078_v59  ;;  %3122 = vst [vmem:[#allocation2 + $0x100] sm:$0xff] %v3082_v5  ;;  %2955 = vmatpush1.bf16.msra.mxu1 %v4080_v62  ;;  %v613_v59 = vld [vmem:[%s4287_s28 + $0x8b0] sm:$0xff]  ;;  %v614_v61 = vld [vmem:[%s4287_s28 + $0x8b8] sm:$0xff]  ;;  %v4122_v62 = vcombine.low %v633_v50, %v653_v51  ;;  %v4124_v0 = vcombine.low %v634_v52, %v654_v53 }
 0x131   : > { %v2376_v12 = vpop.f32.mrf.mxu0  ;;  %2915 = vmatprep.subr.bf16.mxu0 %v4039_v63  ;;  %v2417_v16 = vpop.f32.mrf.mxu1  ;;  %2956 = vmatprep.subr.bf16.mxu1 %v4041_v2  ;;  %v302_v63 = vld [vmem:[#allocation2 + $0x80] sm:$0xff]  ;;  %v4083_v1 = vcombine.high %v593_v58, %v613_v59  ;;  %v304_v2 = vld [vmem:[#allocation2 + $0x138] sm:$0xff]  ;;  %v4085_v3 = vcombine.high %v594_v60, %v614_v61  ;;  %v573_v5 = vld [vmem:[%s4287_s28 + $0x770] sm:$0xff]  ;;  %v4084_v18 = vcombine.low %v594_v60, %v614_v61 }
 0x132   : > { %v574_v10 = vld [vmem:[%s4287_s28 + $0x778] sm:$0xff]  ;;  %v4043_v19 = vcombine.high %v553_v4, %v573_v5  ;;  %v453_v44 = vld [vmem:[%s4287_s28 + $0x3b0] sm:$0xff] }
 0x133   : > { %v434_v45 = vld [vmem:[%s4287_s28 + $0x318] sm:$0xff]  ;;  %v393_v51 = vld [vmem:[%s4287_s28 + $0x1d0] sm:$0xff] }
 0x134   : > { %2916 = vmatpush1.bf16.msra.mxu0 %v4038_v11  ;;  %2957 = vmatpush1.bf16.msra.mxu1 %v4040_v14  ;;  %v305_v14 = vld [vmem:[#allocation2 + $0xf0] sm:$0xff]  ;;  %v394_v53 = vld [vmem:[%s4287_s28 + $0x1d8] sm:$0xff] }
 0x135   : > { %2917 = vmatprep.subr.bf16.mxu0 %v3999_v15  ;;  %2958 = vmatprep.subr.bf16.mxu1 %v4001_v17  ;;  %v4082_v15 = vcombine.low %v593_v58, %v613_v59  ;;  %v413_v52 = vld [vmem:[%s4287_s28 + $0x270] sm:$0xff]  ;;  %v354_v61 = vld [vmem:[%s4287_s28 + $0x98] sm:$0xff] }
 0x136   : > { %v353_v59 = vld [vmem:[%s4287_s28 + $0x90] sm:$0xff] }
 0x137   : > { %v373_v60 = vld [vmem:[%s4287_s28 + $0x130] sm:$0xff] }
 0x138   : > { %2918 = vmatpush1.bf16.msra.mxu0 %v3998_v22  ;;  %2959 = vmatpush1.bf16.msra.mxu1 %v4000_v23  ;;  %v4045_v22 = vcombine.high %v554_v8, %v574_v10  ;;  %v513_v23 = vld [vmem:[%s4287_s28 + $0x590] sm:$0xff] }
 0x139   : > { %2919 = vmatprep.subr.bf16.mxu0 %v3959_v24  ;;  %2960 = vmatprep.subr.bf16.mxu1 %v3961_v25  ;;  %v533_v24 = vld [vmem:[%s4287_s28 + $0x630] sm:$0xff] }
 0x13c   : > { %2920 = vmatpush1.bf16.msra.mxu0 %v3958_v30  ;;  %2961 = vmatpush1.bf16.msra.mxu1 %v3960_v31  ;;  %v4042_v30 = vcombine.low %v553_v4, %v573_v5  ;;  %v306_v5 = vld [vmem:[#allocation2 + $0x18] sm:$0xff] }
 0x13d   : > { %2921 = vmatprep.subr.bf16.mxu0 %v3919_v33  ;;  %2962 = vmatprep.subr.bf16.mxu1 %v3921_v34  ;;  %v4044_v33 = vcombine.low %v554_v8, %v574_v10  ;;  %v4003_v34 = vcombine.high %v513_v23, %v533_v24  ;;  %v307_v8 = vld [vmem:[#allocation2 + $0xc8] sm:$0xff] }
 0x140   : > { %2922 = vmatpush1.bf16.msra.mxu0 %v3918_v38  ;;  %2963 = vmatpush1.bf16.msra.mxu1 %v3920_v39  ;;  %v494_v38 = vld [vmem:[%s4287_s28 + $0x4f8] sm:$0xff]  ;;  %v4002_v39 = vcombine.low %v513_v23, %v533_v24  ;;  %v310_v23 = vld [vmem:[#allocation2 + $0x128] sm:$0xff] }
 0x141   : > { %2923 = vmatprep.subr.bf16.mxu0 %v3879_v40  ;;  %2964 = vmatprep.subr.bf16.mxu1 %v3881_v41  ;;  %v4004_v40 = vcombine.low %v514_v27, %v534_v28  ;;  %v3965_v42 = vcombine.high %v474_v13, %v494_v38  ;;  %v312_v24 = vld [vmem:[#allocation2 + $0x8] sm:$0xff]  ;;  %v313_v28 = vld [vmem:[#allocation2 + $0x98] sm:$0xff] }
 0x144   : > { %2924 = vmatpush1.bf16.msra.mxu0 %v3878_v46  ;;  %2965 = vmatpush1.bf16.msra.mxu1 %v3880_v47  ;;  %v454_v46 = vld [vmem:[%s4287_s28 + $0x3b8] sm:$0xff] }
 0x145   : > { %2925 = vmatprep.subr.bf16.mxu0 %v3839_v48  ;;  %2966 = vmatprep.subr.bf16.mxu1 %v3841_v49  ;;  %v3964_v48 = vcombine.low %v474_v13, %v494_v38  ;;  %v3923_v49 = vcombine.high %v433_v43, %v453_v44  ;;  %v3925_v50 = vcombine.high %v434_v45, %v454_v46  ;;  %v314_v13 = vld [vmem:[#allocation2 + $0xa8] sm:$0xff]  ;;  %v316_v38 = vld [vmem:[#allocation2 + $0xe0] sm:$0xff] }
 0x148   : > { %2926 = vmatpush1.bf16.msra.mxu0 %v3838_v54  ;;  %2967 = vmatpush1.bf16.msra.mxu1 %v3840_v55  ;;  %v414_v54 = vld [vmem:[%s4287_s28 + $0x278] sm:$0xff]  ;;  %v3922_v55 = vcombine.low %v433_v43, %v453_v44  ;;  %v317_v43 = vld [vmem:[#allocation2 + $0x88] sm:$0xff] }
 0x149   : > { %2993 = vmatprep.subr.bf16.mxu0 %v4123_v56  ;;  %3034 = vmatprep.subr.bf16.mxu1 %v4125_v57  ;;  %v3924_v56 = vcombine.low %v434_v45, %v454_v46  ;;  %v3883_v57 = vcombine.high %v393_v51, %v413_v52  ;;  %v3885_v58 = vcombine.high %v394_v53, %v414_v54 }
 0x14b   : > { %v2453_v6 = vpop.f32.mrf.mxu0  ;;  %2944 = vmatmul.mubr.bf16.vlgmr.msra.gmra.mxu0 %v4521_v32  ;;  %v2494_v12 = vpop.f32.mrf.mxu1  ;;  %2985 = vmatmul.mubr.bf16.vlgmr.msra.gmra.mxu1 %v4521_v32 }
 0x14c   : > { %v3083_v11 = vadd.f32 %v2453_v6, %v302_v63  ;;  %2994 = vmatpush1.bf16.msra.mxu0 %v4122_v62  ;;  %v3085_v16 = vadd.f32 %v2494_v12, %v304_v2  ;;  %3035 = vmatpush1.bf16.msra.mxu1 %v4124_v0  ;;  %v374_v62 = vld [vmem:[%s4287_s28 + $0x138] sm:$0xff]  ;;  %v3882_v63 = vcombine.low %v393_v51, %v413_v52  ;;  %v308_v6 = vld [vmem:[#allocation2 + $0x70] sm:$0xff]  ;;  %v309_v12 = vld [vmem:[#allocation2 + $0x20] sm:$0xff] }
 0x14d   : > { %v2455_v17 = vpop.f32.mrf.mxu0  ;;  %2995 = vmatprep.subr.bf16.mxu0 %v4083_v1  ;;  %v2496_v21 = vpop.f32.mrf.mxu1  ;;  %3036 = vmatprep.subr.bf16.mxu1 %v4085_v3  ;;  %v3884_v0 = vcombine.low %v394_v53, %v414_v54  ;;  %v3843_v1 = vcombine.high %v353_v59, %v373_v60  ;;  %v3845_v2 = vcombine.high %v354_v61, %v374_v62  ;;  %v318_v53 = vld [vmem:[#allocation2 + $0xc0] sm:$0xff]  ;;  %v320_v54 = vld [vmem:[#allocation2 + $0xd8] sm:$0xff] }
 0x14e   : > { %3123 = vst [vmem:[#allocation2 + $0x80] sm:$0xff] %v3083_v11  ;;  %v3084_v20 = vadd.f32 %v2455_v17, %v303_v7  ;;  %3025 = vmatprep.mubr.bf16.mxu0 %v4229_v9  ;;  %3125 = vst [vmem:[#allocation2 + $0x138] sm:$0xff] %v3085_v16  ;;  %v3086_v25 = vadd.f32 %v2496_v21, %v305_v14  ;;  %3066 = vmatprep.mubr.bf16.mxu1 %v4229_v9  ;;  %v473_v9 = vld [vmem:[%s4287_s28 + $0x450] sm:$0xff] }
 0x14f   : > { %v2457_v26 = vpop.f32.mrf.mxu0  ;;  %v2498_v29 = vpop.f32.mrf.mxu1  ;;  %v3963_v41 = vcombine.high %v473_v9, %v493_v37  ;;  %v3962_v47 = vcombine.low %v473_v9, %v493_v37  ;;  %v3842_v3 = vcombine.low %v353_v59, %v373_v60  ;;  %v3844_v4 = vcombine.low %v354_v61, %v374_v62  ;;  %v321_v59 = vld [vmem:[#allocation2 + $0xa0] sm:$0xff] }
 0x150   : > { %3124 = vst [vmem:[#allocation2 + $0x108] sm:$0xff] %v3084_v20  ;;  %2996 = vmatpush1.bf16.msra.mxu0 %v4082_v15  ;;  %3126 = vst [vmem:[#allocation2 + $0xf0] sm:$0xff] %v3086_v25  ;;  %3037 = vmatpush1.bf16.msra.mxu1 %v4084_v18  ;;  %v311_v26 = vld [vmem:[#allocation2 + $0x110] sm:$0xff] }
 0x151   : > { %v2458_v31 = vpop.f32.mrf.mxu0  ;;  %2997 = vmatprep.subr.bf16.mxu0 %v4043_v19  ;;  %v2499_v35 = vpop.f32.mrf.mxu1  ;;  %3038 = vmatprep.subr.bf16.mxu1 %v4045_v22 }
 0x154   : > { %2998 = vmatpush1.bf16.msra.mxu0 %v4042_v30  ;;  %3039 = vmatpush1.bf16.msra.mxu1 %v4044_v33 }
 0x155   : > { %2999 = vmatprep.subr.bf16.mxu0 %v4003_v34  ;;  %3040 = vmatprep.subr.bf16.mxu1 %v4005_v36 }
 0x158   : > { %3000 = vmatpush1.bf16.msra.mxu0 %v4002_v39  ;;  %3041 = vmatpush1.bf16.msra.mxu1 %v4004_v40  ;;  %v315_v40 = vld [vmem:[#allocation2 + $0x90] sm:$0xff] }
 0x159   : > { %3001 = vmatprep.subr.bf16.mxu0 %v3963_v41  ;;  %3042 = vmatprep.subr.bf16.mxu1 %v3965_v42 }
 0x15c   : > { %3002 = vmatpush1.bf16.msra.mxu0 %v3962_v47  ;;  %3043 = vmatpush1.bf16.msra.mxu1 %v3964_v48 }
 0x15d   : > { %3003 = vmatprep.subr.bf16.mxu0 %v3923_v49  ;;  %3044 = vmatprep.subr.bf16.mxu1 %v3925_v50 }
 0x160   : > { %3004 = vmatpush1.bf16.msra.mxu0 %v3922_v55  ;;  %3045 = vmatpush1.bf16.msra.mxu1 %v3924_v56  ;;  %v319_v56 = vld [vmem:[#allocation2 + $0x118] sm:$0xff] }
 0x161   : > { %3005 = vmatprep.subr.bf16.mxu0 %v3883_v57  ;;  %3046 = vmatprep.subr.bf16.mxu1 %v3885_v58 }
 0x164   : > { %3006 = vmatpush1.bf16.msra.mxu0 %v3882_v63  ;;  %3047 = vmatpush1.bf16.msra.mxu1 %v3884_v0 }
 0x165   : > { %3007 = vmatprep.subr.bf16.mxu0 %v3843_v1  ;;  %3048 = vmatprep.subr.bf16.mxu1 %v3845_v2 }
 0x168   : > { %3008 = vmatpush1.bf16.msra.mxu0 %v3842_v3  ;;  %3049 = vmatpush1.bf16.msra.mxu1 %v3844_v4 }
 0x16b   : > { %v2535_v7 = vpop.f32.mrf.mxu0  ;;  %3026 = vmatmul.mubr.bf16.vlgmr.msra.gmra.mxu0 %v4521_v32  ;;  %v2576_v11 = vpop.f32.mrf.mxu1  ;;  %3067 = vmatmul.mubr.bf16.vlgmr.msra.gmra.mxu1 %v4521_v32 }
 0x16c   : > { %v3087_v10 = vadd.f32 %v2535_v7, %v306_v5  ;;  %v3089_v14 = vadd.f32 %v2576_v11, %v308_v6  ;;  %v322_v5 = vld [vmem:[#allocation2 + $0x68] sm:$0xff]  ;;  %v324_v6 = vld [vmem:[#allocation2 + $0x50] sm:$0xff] }
 0x16d   : > { %v2537_v15 = vpop.f32.mrf.mxu0  ;;  %v2578_v17 = vpop.f32.mrf.mxu1 }
 0x16e   : > { %3127 = vst [vmem:[#allocation2 + $0x18] sm:$0xff] %v3087_v10  ;;  %v3088_v16 = vadd.f32 %v2537_v15, %v307_v8  ;;  %3129 = vst [vmem:[#allocation2 + $0x70] sm:$0xff] %v3089_v14  ;;  %v3090_v18 = vadd.f32 %v2578_v17, %v309_v12  ;;  %v323_v8 = vld [vmem:[#allocation2 + $0x130] sm:$0xff]  ;;  %v325_v12 = vld [vmem:[#allocation2 + $0xe8] sm:$0xff] }
 0x16f   : > { %v2539_v19 = vpop.f32.mrf.mxu0  ;;  %v2580_v20 = vpop.f32.mrf.mxu1 }
 0x170   : > { %3128 = vst [vmem:[#allocation2 + $0xc8] sm:$0xff] %v3088_v16  ;;  %3130 = vst [vmem:[#allocation2 + $0x20] sm:$0xff] %v3090_v18 }
 0x171   : > { %v2540_v21 = vpop.f32.mrf.mxu0  ;;  %v2581_v22 = vpop.f32.mrf.mxu1 }
 0x18b   : > { %v2617_v25 = vpop.f32.mrf.mxu0  ;;  %v2658_v32 = vpop.f32.mrf.mxu1 }
 0x18c   : > { %v3091_v27 = vadd.f32 %v2617_v25, %v310_v23  ;;  %v3093_v29 = vadd.f32 %v2658_v32, %v312_v24  ;;  %v326_v23 = vld [vmem:[#allocation2 + $0x58] sm:$0xff]  ;;  %v328_v24 = vld [vmem:[#allocation2 + $0x30] sm:$0xff] }
 0x18d   : > { %v2619_v30 = vpop.f32.mrf.mxu0  ;;  %v2660_v33 = vpop.f32.mrf.mxu1 }
 0x18e   : > { %3131 = vst [vmem:[#allocation2 + $0x128] sm:$0xff] %v3091_v27  ;;  %v3092_v31 = vadd.f32 %v2619_v30, %v311_v26  ;;  %3133 = vst [vmem:[#allocation2 + $0x8] sm:$0xff] %v3093_v29  ;;  %v3094_v34 = vadd.f32 %v2660_v33, %v313_v28  ;;  %v327_v26 = vld [vmem:[#allocation2 + $0x78] sm:$0xff]  ;;  %v329_v28 = vld [vmem:[#allocation2 + $0x40] sm:$0xff] }
 0x18f   : > { %v2621_v35 = vpop.f32.mrf.mxu0  ;;  %v2662_v36 = vpop.f32.mrf.mxu1 }
 0x190   : > { %3132 = vst [vmem:[#allocation2 + $0x110] sm:$0xff] %v3092_v31  ;;  %3134 = vst [vmem:[#allocation2 + $0x98] sm:$0xff] %v3094_v34 }
 0x191   : > { %v2622_v9 = vpop.f32.mrf.mxu0  ;;  %v2663_v37 = vpop.f32.mrf.mxu1 }
 0x1ab   : > { %v2699_v39 = vpop.f32.mrf.mxu0  ;;  %v2740_v42 = vpop.f32.mrf.mxu1 }
 0x1ac   : > { %v3095_v41 = vadd.f32 %v2699_v39, %v314_v13  ;;  %v3097_v44 = vadd.f32 %v2740_v42, %v316_v38  ;;  %v330_v13 = vld [vmem:[#allocation2 + $0x28] sm:$0xff]  ;;  %v332_v38 = vld [vmem:[#allocation2 + $0xb8] sm:$0xff] }
 0x1ad   : > { %v2701_v45 = vpop.f32.mrf.mxu0  ;;  %v2742_v47 = vpop.f32.mrf.mxu1 }
 0x1ae   : > { %3135 = vst [vmem:[#allocation2 + $0xa8] sm:$0xff] %v3095_v41  ;;  %v3096_v46 = vadd.f32 %v2701_v45, %v315_v40  ;;  %3137 = vst [vmem:[#allocation2 + $0xe0] sm:$0xff] %v3097_v44  ;;  %v3098_v48 = vadd.f32 %v2742_v47, %v317_v43  ;;  %v331_v40 = vld [vmem:[#allocation2] sm:$0xff] }
 0x1af   : > { %v2703_v49 = vpop.f32.mrf.mxu0  ;;  %v2744_v50 = vpop.f32.mrf.mxu1  ;;  %v333_v43 = vld [vmem:[#allocation2 + $0x60] sm:$0xff] }
 0x1b0   : > { %3136 = vst [vmem:[#allocation2 + $0x90] sm:$0xff] %v3096_v46  ;;  %3138 = vst [vmem:[#allocation2 + $0x88] sm:$0xff] %v3098_v48 }
 0x1b1   : > { %v2704_v51 = vpop.f32.mrf.mxu0  ;;  %v2745_v52 = vpop.f32.mrf.mxu1 }
 0x1cb   : > { %v2781_v55 = vpop.f32.mrf.mxu0  ;;  %v2822_v58 = vpop.f32.mrf.mxu1 }
 0x1cc   : > { %v3099_v57 = vadd.f32 %v2781_v55, %v318_v53  ;;  %v3101_v60 = vadd.f32 %v2822_v58, %v320_v54 }
 0x1cd   : > { %v2783_v61 = vpop.f32.mrf.mxu0  ;;  %v2824_v63 = vpop.f32.mrf.mxu1 }
 0x1ce   : > { %3139 = vst [vmem:[#allocation2 + $0xc0] sm:$0xff] %v3099_v57  ;;  %v3100_v62 = vadd.f32 %v2783_v61, %v319_v56  ;;  %3141 = vst [vmem:[#allocation2 + $0xd8] sm:$0xff] %v3101_v60  ;;  %v3102_v0 = vadd.f32 %v2824_v63, %v321_v59 }
 0x1cf   : > { %v2785_v1 = vpop.f32.mrf.mxu0  ;;  %v2826_v2 = vpop.f32.mrf.mxu1 }
 0x1d0   : > { %3140 = vst [vmem:[#allocation2 + $0x118] sm:$0xff] %v3100_v62  ;;  %3142 = vst [vmem:[#allocation2 + $0xa0] sm:$0xff] %v3102_v0 }
 0x1d1   : > { %v2786_v3 = vpop.f32.mrf.mxu0  ;;  %v2827_v4 = vpop.f32.mrf.mxu1 }
 0x1eb   : > { %v2863_v7 = vpop.f32.mrf.mxu0  ;;  %v2904_v11 = vpop.f32.mrf.mxu1 }
 0x1ec   : > { %v3103_v10 = vadd.f32 %v2863_v7, %v322_v5  ;;  %v3105_v14 = vadd.f32 %v2904_v11, %v324_v6 }
 0x1ed   : > { %v2865_v15 = vpop.f32.mrf.mxu0  ;;  %v2906_v17 = vpop.f32.mrf.mxu1 }
 0x1ee   : > { %3143 = vst [vmem:[#allocation2 + $0x68] sm:$0xff] %v3103_v10  ;;  %v3104_v16 = vadd.f32 %v2865_v15, %v323_v8  ;;  %3145 = vst [vmem:[#allocation2 + $0x50] sm:$0xff] %v3105_v14  ;;  %v3106_v18 = vadd.f32 %v2906_v17, %v325_v12 }
 0x1ef   : > { %v2867_v19 = vpop.f32.mrf.mxu0  ;;  %v2908_v20 = vpop.f32.mrf.mxu1 }
 0x1f0   : > { %3144 = vst [vmem:[#allocation2 + $0x130] sm:$0xff] %v3104_v16  ;;  %3146 = vst [vmem:[#allocation2 + $0xe8] sm:$0xff] %v3106_v18 }
 0x1f1   : > { %v2868_v21 = vpop.f32.mrf.mxu0  ;;  %v2909_v22 = vpop.f32.mrf.mxu1 }
 0x20b   : > { %v2945_v25 = vpop.f32.mrf.mxu0  ;;  %v2986_v32 = vpop.f32.mrf.mxu1 }
 0x20c   : > { %v3107_v27 = vadd.f32 %v2945_v25, %v326_v23  ;;  %v3109_v29 = vadd.f32 %v2986_v32, %v328_v24 }
 0x20d   : > { %v2947_v30 = vpop.f32.mrf.mxu0  ;;  %v2988_v33 = vpop.f32.mrf.mxu1 }
 0x20e   : > { %3147 = vst [vmem:[#allocation2 + $0x58] sm:$0xff] %v3107_v27  ;;  %v3108_v31 = vadd.f32 %v2947_v30, %v327_v26  ;;  %3149 = vst [vmem:[#allocation2 + $0x30] sm:$0xff] %v3109_v29  ;;  %v3110_v34 = vadd.f32 %v2988_v33, %v329_v28 }
 0x20f   : > { %v2949_v35 = vpop.f32.mrf.mxu0  ;;  %v2990_v36 = vpop.f32.mrf.mxu1 }
 0x210   : > { %3148 = vst [vmem:[#allocation2 + $0x78] sm:$0xff] %v3108_v31  ;;  %3150 = vst [vmem:[#allocation2 + $0x40] sm:$0xff] %v3110_v34 }
 0x211   : > { %v2950_v9 = vpop.f32.mrf.mxu0  ;;  %v2991_v37 = vpop.f32.mrf.mxu1 }
 0x22b   : > { %v3027_v39 = vpop.f32.mrf.mxu0  ;;  %v3068_v42 = vpop.f32.mrf.mxu1 }
 0x22c   : > { %v3111_v41 = vadd.f32 %v3027_v39, %v330_v13  ;;  %v3113_v44 = vadd.f32 %v3068_v42, %v332_v38 }
 0x22d   : > { %v3029_v45 = vpop.f32.mrf.mxu0  ;;  %v3070_v47 = vpop.f32.mrf.mxu1  ;;  %3158 = sbr.rel (%p4126_p7) target bundleno = 1073 (0x431), region = 44 }
 0x22e   : > { %3151 = vst [vmem:[#allocation2 + $0x28] sm:$0xff] %v3111_v41  ;;  %v3112_v46 = vadd.f32 %v3029_v45, %v331_v40  ;;  %3153 = vst [vmem:[#allocation2 + $0xb8] sm:$0xff] %v3113_v44  ;;  %v3114_v48 = vadd.f32 %v3070_v47, %v333_v43 }
 0x22f   : > { %v3031_v49 = vpop.f32.mrf.mxu0  ;;  %v3072_v50 = vpop.f32.mrf.mxu1 }
 0x230   : > { %3152 = vst [vmem:[#allocation2] sm:$0xff] %v3112_v46  ;;  %3154 = vst [vmem:[#allocation2 + $0x60] sm:$0xff] %v3114_v48 }
 0x231   : > { %v3032_v51 = vpop.f32.mrf.mxu0  ;;  %v3073_v52 = vpop.f32.mrf.mxu1 }
 0x232   : > { %v4657_v53 = vld [vmem:[#allocation2 + $0xb0] sm:$0xff]  ;;  %v4665_v57 = vld [vmem:[#allocation2 + $0x48] sm:$0xff]  ;;  %v4668_v59 = vld [vmem:[#allocation2 + $0x120] sm:$0xff] }
 0x233   : > { %v4659_v54 = vld [vmem:[#allocation2 + $0xd0] sm:$0xff]  ;;  %v4671_v61 = vld [vmem:[#allocation2 + $0x38] sm:$0xff]  ;;  %v4677_v1 = vld [vmem:[#allocation2 + $0x100] sm:$0xff] }
 0x234   : > { %v4661_v55 = vld [vmem:[#allocation2 + $0x10] sm:$0xff]  ;;  %v3199_v56 = vadd.f32 %v4659_v54, %v4657_v53  ;;  %v4674_v63 = vld [vmem:[#allocation2 + $0xf8] sm:$0xff]  ;;  %v4680_v3 = vld [vmem:[#allocation2 + $0x80] sm:$0xff] }
 0x235   : > { %v4683_v5 = vld [vmem:[#allocation2 + $0x108] sm:$0xff]  ;;  %v4686_v7 = vld [vmem:[#allocation2 + $0x138] sm:$0xff]  ;;  %v4689_v10 = vld [vmem:[#allocation2 + $0xf0] sm:$0xff] }
 0x236   : > { %v3200_v58 = vadd.f32 %v3199_v56, %v4661_v55  ;;  %v4692_v12 = vld [vmem:[#allocation2 + $0x18] sm:$0xff]  ;;  %v4695_v15 = vld [vmem:[#allocation2 + $0xc8] sm:$0xff]  ;;  %v4698_v17 = vld [vmem:[#allocation2 + $0x70] sm:$0xff] }
 0x237   : > { %v4701_v19 = vld [vmem:[#allocation2 + $0x20] sm:$0xff]  ;;  %v4704_v21 = vld [vmem:[#allocation2 + $0x128] sm:$0xff]  ;;  %v4707_v23 = vld [vmem:[#allocation2 + $0x110] sm:$0xff] }
 0x238   : > { %v3201_v60 = vadd.f32 %v3200_v58, %v4665_v57  ;;  %v4710_v25 = vld [vmem:[#allocation2 + $0x8] sm:$0xff]  ;;  %v4713_v27 = vld [vmem:[#allocation2 + $0x98] sm:$0xff]  ;;  %v4719_v30 = vld [vmem:[#allocation2 + $0x90] sm:$0xff] }
 0x239   : > { %v4716_v28 = vld [vmem:[#allocation2 + $0xa8] sm:$0xff]  ;;  %v4722_v33 = vld [vmem:[#allocation2 + $0xe0] sm:$0xff]  ;;  %v4731_v13 = vld [vmem:[#allocation2 + $0x118] sm:$0xff] }
 0x23a   : > { %v3202_v62 = vadd.f32 %v3201_v60, %v4668_v59  ;;  %v4725_v35 = vld [vmem:[#allocation2 + $0x88] sm:$0xff]  ;;  %v4728_v9 = vld [vmem:[#allocation2 + $0xc0] sm:$0xff]  ;;  %v4734_v39 = vld [vmem:[#allocation2 + $0xd8] sm:$0xff] }
 0x23b   : > { %v4737_v41 = vld [vmem:[#allocation2 + $0xa0] sm:$0xff]  ;;  %v4740_v43 = vld [vmem:[#allocation2 + $0x68] sm:$0xff]  ;;  %v4743_v45 = vld [vmem:[#allocation2 + $0x130] sm:$0xff] }
 0x23c   : > { %v3203_v0 = vadd.f32 %v3202_v62, %v4671_v61  ;;  %v4746_v47 = vld [vmem:[#allocation2 + $0x50] sm:$0xff]  ;;  %v4749_v49 = vld [vmem:[#allocation2 + $0xe8] sm:$0xff]  ;;  %v4752_v51 = vld [vmem:[#allocation2 + $0x58] sm:$0xff] }
 0x23d   : > { %v4755_v56 = vld [vmem:[#allocation2 + $0x78] sm:$0xff]  ;;  %v4758_v60 = vld [vmem:[#allocation2 + $0x30] sm:$0xff] }
 0x23e   : > { %v3204_v2 = vadd.f32 %v3203_v0, %v4674_v63  ;;  %v4761_v0 = vld [vmem:[#allocation2 + $0x40] sm:$0xff] }
 0x240   : > { %v3205_v4 = vadd.f32 %v3204_v2, %v4677_v1 }
 0x242   : > { %v3206_v6 = vadd.f32 %v3205_v4, %v4680_v3  ;;  %v4764_v4 = vld [vmem:[#allocation2 + $0x28] sm:$0xff] }
 0x244   : > { %v3207_v8 = vadd.f32 %v3206_v6, %v4683_v5 }
 0x246   : > { %v3208_v11 = vadd.f32 %v3207_v8, %v4686_v7  ;;  %v4767_v8 = vld [vmem:[#allocation2] sm:$0xff] }
 0x248   : > { %v3209_v14 = vadd.f32 %v3208_v11, %v4689_v10 }
 0x24a   : > { %v3210_v16 = vadd.f32 %v3209_v14, %v4692_v12  ;;  %v4770_v14 = vld [vmem:[#allocation2 + $0xb8] sm:$0xff] }
 0x24c   : > { %v3211_v18 = vadd.f32 %v3210_v16, %v4695_v15 }
 0x24e   : > { %v3212_v20 = vadd.f32 %v3211_v18, %v4698_v17  ;;  %v4773_v18 = vld [vmem:[#allocation2 + $0x60] sm:$0xff] }
 0x250   : > { %v3213_v22 = vadd.f32 %v3212_v20, %v4701_v19 }
 0x252   : > { %v3214_v24 = vadd.f32 %v3213_v22, %v4704_v21 }
 0x254   : > { %v3215_v26 = vadd.f32 %v3214_v24, %v4707_v23  ;;  %v3406_v24 = vld [vmem:[%s5231_s2] sm:$0xff] }
 0x256   : > { %v3216_v32 = vadd.f32 %v3215_v26, %v4710_v25  ;;  %v4230_v26 = vmov 0  }
 0x257   : > { %4200 = vset.pattern.permute.xlu1 %v4230_v26  ;;  %4201 = vset.pattern.permute.xlu0 %v4230_v26 }
 0x258   : > { %v3217_v29 = vadd.f32 %v3216_v32, %v4713_v27  ;;  %3409 = vperm.xlu1 %4200, %v3406_v24   ;;  %v3452_v32 = vld [vmem:[%s5232_s3] sm:$0xff] }
 0x25a   : > { %v3218_v31 = vadd.f32 %v3217_v29, %v4716_v28 }
 0x25c   : > { %v3219_v34 = vadd.f32 %v3218_v31, %v4719_v30  ;;  %3455 = vperm.xlu1 %4200, %v3452_v32  }
 0x25e   : > { %v3220_v36 = vadd.f32 %v3219_v34, %v4722_v33 }
 0x260   : > { %v3221_v37 = vadd.f32 %v3220_v36, %v4725_v35 }
 0x262   : > { %v3222_v38 = vadd.f32 %v3221_v37, %v4728_v9 }
 0x264   : > { %v3223_v40 = vadd.f32 %v3222_v38, %v4731_v13 }
 0x266   : > { %v3224_v42 = vadd.f32 %v3223_v40, %v4734_v39 }
 0x268   : > { %v3225_v44 = vadd.f32 %v3224_v42, %v4737_v41 }
 0x26a   : > { %v3226_v46 = vadd.f32 %v3225_v44, %v4740_v43 }
 0x26c   : > { %v3227_v48 = vadd.f32 %v3226_v46, %v4743_v45 }
 0x26e   : > { %v3228_v50 = vadd.f32 %v3227_v48, %v4746_v47 }
 0x270   : > { %v3229_v52 = vadd.f32 %v3228_v50, %v4749_v49 }
 0x272   : > { %v3230_v58 = vadd.f32 %v3229_v52, %v4752_v51 }
 0x274   : > { %v3231_v62 = vadd.f32 %v3230_v58, %v4755_v56 }
 0x276   : > { %v3232_v2 = vadd.f32 %v3231_v62, %v4758_v60 }
 0x278   : > { %v3233_v6 = vadd.f32 %v3232_v2, %v4761_v0 }
 0x27a   : > { %v3234_v11 = vadd.f32 %v3233_v6, %v4764_v4 }
 0x27c   : > { %v3235_v16 = vadd.f32 %v3234_v11, %v4767_v8 }
 0x27e   : > { %v3236_v20 = vadd.f32 %v3235_v16, %v4770_v14 }
 0x280   : > { %v3237_v22 = vadd.f32 %v3236_v20, %v4773_v18 }
 0x282   : > { %3238 = vadd.xlane.f32.xlu0 %v3237_v22 }
 0x30b   : > { %v3239_v29 = vpop.xlane.xlu0 %3238 }
 0x30c   : > { %v4783_v31 = vmul.f32 0.0001953125, %v3239_v29 }
 0x30e   : > { %v4787_v34 = vsub.f32 %v4657_v53, %v4783_v31  ;;  %v4791_v36 = vsub.f32 %v4659_v54, %v4783_v31  ;;  %v4795_v37 = vsub.f32 %v4661_v55, %v4783_v31  ;;  %v4803_v42 = vsub.f32 %v4665_v57, %v4783_v31 }
 0x30f   : > { %v4807_v53 = vsub.f32 %v4668_v59, %v4783_v31  ;;  %v4813_v55 = vsub.f32 %v4671_v61, %v4783_v31  ;;  %v4819_v57 = vsub.f32 %v4674_v63, %v4783_v31  ;;  %v4825_v52 = vsub.f32 %v4677_v1, %v4783_v31 }
 0x310   : > { %v3282_v38 = vmul.f32 %v4787_v34, %v4787_v34  ;;  %v3283_v40 = vmul.f32 %v4791_v36, %v4791_v36  ;;  %v3284_v54 = vmul.f32 %v4795_v37, %v4795_v37  ;;  %v3285_v46 = vmul.f32 %v4803_v42, %v4803_v42 }
 0x311   : > { %v3286_v59 = vmul.f32 %v4807_v53, %v4807_v53  ;;  %v3287_v61 = vmul.f32 %v4813_v55, %v4813_v55  ;;  %v4831_v62 = vsub.f32 %v4680_v3, %v4783_v31  ;;  %v3288_v63 = vmul.f32 %v4819_v57, %v4819_v57 }
 0x312   : > { %v3322_v44 = vadd.f32 %v3283_v40, %v3282_v38  ;;  %v4837_v6 = vsub.f32 %v4683_v5, %v4783_v31  ;;  %v3289_v1 = vmul.f32 %v4825_v52, %v4825_v52  ;;  %v4843_v16 = vsub.f32 %v4686_v7, %v4783_v31 }
 0x313   : > { %v3290_v3 = vmul.f32 %v4831_v62, %v4831_v62  ;;  %v4849_v22 = vsub.f32 %v4689_v10, %v4783_v31  ;;  %v4855_v26 = vsub.f32 %v4692_v12, %v4783_v31  ;;  %v4861_v29 = vsub.f32 %v4695_v15, %v4783_v31 }
 0x314   : > { %v3323_v48 = vadd.f32 %v3322_v44, %v3284_v54  ;;  %v3291_v5 = vmul.f32 %v4837_v6, %v4837_v6  ;;  %v3292_v7 = vmul.f32 %v4843_v16, %v4843_v16  ;;  %v4867_v40 = vsub.f32 %v4698_v17, %v4783_v31 }
 0x315   : > { %v3293_v10 = vmul.f32 %v4849_v22, %v4849_v22  ;;  %v3294_v12 = vmul.f32 %v4855_v26, %v4855_v26  ;;  %v4873_v44 = vsub.f32 %v4701_v19, %v4783_v31  ;;  %v3295_v15 = vmul.f32 %v4861_v29, %v4861_v29 }
 0x316   : > { %v3324_v50 = vadd.f32 %v3323_v48, %v3285_v46  ;;  %v4879_v48 = vsub.f32 %v4704_v21, %v4783_v31  ;;  %v3296_v17 = vmul.f32 %v4867_v40, %v4867_v40 }
 0x317   : > { %v3297_v19 = vmul.f32 %v4873_v44, %v4873_v44 }
 0x318   : > { %v3325_v58 = vadd.f32 %v3324_v50, %v3286_v59  ;;  %v4885_v50 = vsub.f32 %v4707_v23, %v4783_v31  ;;  %v3298_v21 = vmul.f32 %v4879_v48, %v4879_v48 }
 0x31a   : > { %v3326_v2 = vadd.f32 %v3325_v58, %v3287_v61  ;;  %v4891_v58 = vsub.f32 %v4710_v25, %v4783_v31  ;;  %v3299_v23 = vmul.f32 %v4885_v50, %v4885_v50 }
 0x31c   : > { %v3327_v11 = vadd.f32 %v3326_v2, %v3288_v63  ;;  %v4897_v2 = vsub.f32 %v4713_v27, %v4783_v31  ;;  %v3300_v25 = vmul.f32 %v4891_v58, %v4891_v58 }
 0x31e   : > { %v3328_v20 = vadd.f32 %v3327_v11, %v3289_v1  ;;  %v4903_v11 = vsub.f32 %v4716_v28, %v4783_v31  ;;  %v3301_v27 = vmul.f32 %v4897_v2, %v4897_v2 }
 0x320   : > { %v3329_v24 = vadd.f32 %v3328_v20, %v3290_v3  ;;  %v4909_v20 = vsub.f32 %v4719_v30, %v4783_v31  ;;  %v3302_v28 = vmul.f32 %v4903_v11, %v4903_v11 }
 0x322   : > { %v3330_v32 = vadd.f32 %v3329_v24, %v3291_v5  ;;  %v4915_v24 = vsub.f32 %v4722_v33, %v4783_v31  ;;  %v3303_v30 = vmul.f32 %v4909_v20, %v4909_v20 }
 0x324   : > { %v3331_v38 = vadd.f32 %v3330_v32, %v3292_v7  ;;  %v4921_v32 = vsub.f32 %v4725_v35, %v4783_v31  ;;  %v3304_v33 = vmul.f32 %v4915_v24, %v4915_v24 }
 0x326   : > { %v3332_v54 = vadd.f32 %v3331_v38, %v3293_v10  ;;  %v4927_v38 = vsub.f32 %v4728_v9, %v4783_v31  ;;  %v3305_v35 = vmul.f32 %v4921_v32, %v4921_v32 }
 0x328   : > { %v3333_v46 = vadd.f32 %v3332_v54, %v3294_v12  ;;  %v4933_v54 = vsub.f32 %v4731_v13, %v4783_v31  ;;  %v3306_v9 = vmul.f32 %v4927_v38, %v4927_v38 }
 0x32a   : > { %v3334_v59 = vadd.f32 %v3333_v46, %v3295_v15  ;;  %v4939_v46 = vsub.f32 %v4734_v39, %v4783_v31  ;;  %v3307_v13 = vmul.f32 %v4933_v54, %v4933_v54 }
 0x32c   : > { %v3335_v61 = vadd.f32 %v3334_v59, %v3296_v17  ;;  %v4945_v59 = vsub.f32 %v4737_v41, %v4783_v31  ;;  %v3308_v39 = vmul.f32 %v4939_v46, %v4939_v46 }
 0x32e   : > { %v3336_v63 = vadd.f32 %v3335_v61, %v3297_v19  ;;  %v4951_v61 = vsub.f32 %v4740_v43, %v4783_v31  ;;  %v3309_v41 = vmul.f32 %v4945_v59, %v4945_v59 }
 0x330   : > { %v3337_v1 = vadd.f32 %v3336_v63, %v3298_v21  ;;  %v4957_v63 = vsub.f32 %v4743_v45, %v4783_v31  ;;  %v3310_v43 = vmul.f32 %v4951_v61, %v4951_v61 }
 0x332   : > { %v3338_v3 = vadd.f32 %v3337_v1, %v3299_v23  ;;  %v4963_v1 = vsub.f32 %v4746_v47, %v4783_v31  ;;  %v3311_v45 = vmul.f32 %v4957_v63, %v4957_v63 }
 0x334   : > { %v3339_v5 = vadd.f32 %v3338_v3, %v3300_v25  ;;  %v4969_v3 = vsub.f32 %v4749_v49, %v4783_v31  ;;  %v3312_v47 = vmul.f32 %v4963_v1, %v4963_v1 }
 0x336   : > { %v3340_v7 = vadd.f32 %v3339_v5, %v3301_v27  ;;  %v4975_v5 = vsub.f32 %v4752_v51, %v4783_v31  ;;  %v3313_v49 = vmul.f32 %v4969_v3, %v4969_v3 }
 0x338   : > { %v3341_v10 = vadd.f32 %v3340_v7, %v3302_v28  ;;  %v4981_v7 = vsub.f32 %v4755_v56, %v4783_v31  ;;  %v3314_v51 = vmul.f32 %v4975_v5, %v4975_v5 }
 0x33a   : > { %v3342_v12 = vadd.f32 %v3341_v10, %v3303_v30  ;;  %v4987_v10 = vsub.f32 %v4758_v60, %v4783_v31  ;;  %v3279_v60 = vsub.f32 %v4767_v8, %v4783_v31 }
 0x33c   : > { %v3343_v15 = vadd.f32 %v3342_v12, %v3304_v33  ;;  %v3277_v12 = vsub.f32 %v4761_v0, %v4783_v31 }
 0x33e   : > { %v3344_v17 = vadd.f32 %v3343_v15, %v3305_v35  ;;  %v3315_v35 = vmul.f32 %v4981_v7, %v4981_v7  ;;  %v3278_v15 = vsub.f32 %v4764_v4, %v4783_v31 }
 0x340   : > { %v3345_v19 = vadd.f32 %v3344_v17, %v3306_v9  ;;  %v3316_v9 = vmul.f32 %v4987_v10, %v4987_v10  ;;  %v3318_v0 = vmul.f32 %v3278_v15, %v3278_v15 }
 0x342   : > { %v3346_v21 = vadd.f32 %v3345_v19, %v3307_v13  ;;  %v3317_v13 = vmul.f32 %v3277_v12, %v3277_v12 }
 0x344   : > { %v3347_v23 = vadd.f32 %v3346_v21, %v3308_v39  ;;  %v3280_v39 = vsub.f32 %v4770_v14, %v4783_v31 }
 0x346   : > { %v3348_v25 = vadd.f32 %v3347_v23, %v3309_v41  ;;  %v3281_v41 = vsub.f32 %v4773_v18, %v4783_v31  ;;  %v3319_v23 = vmul.f32 %v3279_v60, %v3279_v60  ;;  %v3320_v4 = vmul.f32 %v3280_v39, %v3280_v39 }
 0x348   : > { %v3349_v27 = vadd.f32 %v3348_v25, %v3310_v43 }
 0x34a   : > { %v3350_v28 = vadd.f32 %v3349_v27, %v3311_v45  ;;  %v3321_v45 = vmul.f32 %v3281_v41, %v3281_v41 }
 0x34c   : > { %v3351_v30 = vadd.f32 %v3350_v28, %v3312_v47 }
 0x34e   : > { %v3352_v33 = vadd.f32 %v3351_v30, %v3313_v49 }
 0x350   : > { %v3353_v56 = vadd.f32 %v3352_v33, %v3314_v51 }
 0x352   : > { %v3354_v17 = vadd.f32 %v3353_v56, %v3315_v35 }
 0x354   : > { %v3355_v19 = vadd.f32 %v3354_v17, %v3316_v9 }
 0x356   : > { %v3356_v21 = vadd.f32 %v3355_v19, %v3317_v13 }
 0x358   : > { %v3357_v43 = vadd.f32 %v3356_v21, %v3318_v0 }
 0x35a   : > { %v3358_v25 = vadd.f32 %v3357_v43, %v3319_v23 }
 0x35c   : > { %v3359_v27 = vadd.f32 %v3358_v25, %v3320_v4 }
 0x35e   : > { %v3360_v47 = vadd.f32 %v3359_v27, %v3321_v45 }
 0x360   : > { %3361 = vadd.xlane.f32.xlu0 %v3360_v47 }
 0x3e9   : > { %v3362_v28 = vpop.xlane.xlu0 %3361 }
 0x3ea   : > { %v3363_v8 = vmul.f32 0.0001953125, %v3362_v28 }
 0x3ec   : > { %v3364_v49 = vadd.f32 1e-05, %v3363_v8 }
 0x3ee   : > { %4202 = vrsqrt.f32 %v3364_v49 }
 0x3fb   : > { %v4203_v30 = vpop.eup %4202 }
 0x3fc   : > { %v3366_v14 = vmul.f32 %v4203_v30, %v4787_v34  ;;  %v3367_v51 = vmul.f32 %v4203_v30, %v4791_v36  ;;  %v3368_v33 = vmul.f32 %v4203_v30, %v4795_v37  ;;  %v3369_v18 = vmul.f32 %v4203_v30, %v4803_v42 }
 0x3fd   : > { %v3370_v31 = vmul.f32 %v4203_v30, %v4807_v53  ;;  %v3371_v35 = vmul.f32 %v4203_v30, %v4813_v55  ;;  %v3372_v56 = vmul.f32 %v4203_v30, %v4819_v57  ;;  %v3373_v9 = vmul.f32 %v4203_v30, %v4825_v52 }
 0x3fe   : > { %v3374_v17 = vmul.f32 %v4203_v30, %v4831_v62  ;;  %v3375_v13 = vmul.f32 %v4203_v30, %v4837_v6  ;;  %v3376_v34 = vmul.f32 %v4203_v30, %v4843_v16  ;;  %v3377_v36 = vmul.f32 %v4203_v30, %v4849_v22 }
 0x3ff   : > { %v3378_v37 = vmul.f32 %v4203_v30, %v4855_v26  ;;  %v3379_v42 = vmul.f32 %v4203_v30, %v4861_v29  ;;  %v3380_v53 = vmul.f32 %v4203_v30, %v4867_v40  ;;  %v3381_v55 = vmul.f32 %v4203_v30, %v4873_v44 }
 0x400   : > { %v3382_v57 = vmul.f32 %v4203_v30, %v4879_v48  ;;  %v3383_v52 = vmul.f32 %v4203_v30, %v4885_v50  ;;  %v3384_v62 = vmul.f32 %v4203_v30, %v4891_v58  ;;  %v3385_v6 = vmul.f32 %v4203_v30, %v4897_v2 }
 0x401   : > { %v3386_v16 = vmul.f32 %v4203_v30, %v4903_v11  ;;  %v3387_v22 = vmul.f32 %v4203_v30, %v4909_v20  ;;  %v3388_v26 = vmul.f32 %v4203_v30, %v4915_v24  ;;  %v3389_v29 = vmul.f32 %v4203_v30, %v4921_v32 }
 0x402   : > { %v3390_v40 = vmul.f32 %v4203_v30, %v4927_v38  ;;  %v3391_v44 = vmul.f32 %v4203_v30, %v4933_v54  ;;  %v3392_v48 = vmul.f32 %v4203_v30, %v4939_v46  ;;  %v3393_v50 = vmul.f32 %v4203_v30, %v4945_v59  ;;  %v3410_v54 = vpop.permute.xlu1 %3409 }
 0x403   : > { %v3394_v58 = vmul.f32 %v4203_v30, %v4951_v61  ;;  %v3395_v2 = vmul.f32 %v4203_v30, %v4957_v63  ;;  %v3396_v11 = vmul.f32 %v4203_v30, %v4963_v1  ;;  %v3397_v20 = vmul.f32 %v4203_v30, %v4969_v3 }
 0x404   : > { %v3398_v24 = vmul.f32 %v4203_v30, %v4975_v5  ;;  %v3399_v32 = vmul.f32 %v4203_v30, %v4981_v7  ;;  %v3400_v38 = vmul.f32 %v4203_v30, %v4987_v10  ;;  %v3401_v19 = vmul.f32 %v4203_v30, %v3277_v12 }
 0x405   : > { %v3402_v0 = vmul.f32 %v4203_v30, %v3278_v15  ;;  %v3403_v46 = vmul.f32 %v4203_v30, %v3279_v60  ;;  %v3404_v21 = vmul.f32 %v4203_v30, %v3280_v39  ;;  %v3405_v59 = vmul.f32 %v4203_v30, %v3281_v41 }
 0x406   : > { %v3412_v23 = vmul.f32 %v3410_v54, %v3366_v14  ;;  %v3413_v61 = vmul.f32 %v3410_v54, %v3367_v51  ;;  %v3414_v43 = vmul.f32 %v3410_v54, %v3368_v33  ;;  %v3415_v63 = vmul.f32 %v3410_v54, %v3369_v18 }
 0x407   : > { %v3416_v4 = vmul.f32 %v3410_v54, %v3370_v31  ;;  %v3417_v1 = vmul.f32 %v3410_v54, %v3371_v35  ;;  %v3418_v25 = vmul.f32 %v3410_v54, %v3372_v56  ;;  %v3419_v3 = vmul.f32 %v3410_v54, %v3373_v9 }
 0x408   : > { %v3420_v45 = vmul.f32 %v3410_v54, %v3374_v17  ;;  %v3421_v5 = vmul.f32 %v3410_v54, %v3375_v13  ;;  %v3422_v27 = vmul.f32 %v3410_v54, %v3376_v34  ;;  %v3423_v7 = vmul.f32 %v3410_v54, %v3377_v36 }
 0x409   : > { %v3424_v47 = vmul.f32 %v3410_v54, %v3378_v37  ;;  %v3425_v10 = vmul.f32 %v3410_v54, %v3379_v42  ;;  %v3426_v12 = vmul.f32 %v3410_v54, %v3380_v53  ;;  %v3427_v28 = vmul.f32 %v3410_v54, %v3381_v55  ;;  %v3456_v42 = vpop.permute.xlu1 %3455 }
 0x40a   : > { %v3428_v15 = vmul.f32 %v3410_v54, %v3382_v57  ;;  %v3429_v60 = vmul.f32 %v3410_v54, %v3383_v52  ;;  %v3430_v39 = vmul.f32 %v3410_v54, %v3384_v62  ;;  %v3431_v41 = vmul.f32 %v3410_v54, %v3385_v6 }
 0x40b   : > { %v3432_v8 = vmul.f32 %v3410_v54, %v3386_v16  ;;  %v3433_v49 = vmul.f32 %v3410_v54, %v3387_v22  ;;  %v3434_v30 = vmul.f32 %v3410_v54, %v3388_v26  ;;  %v3435_v14 = vmul.f32 %v3410_v54, %v3389_v29 }
 0x40c   : > { %v3436_v51 = vmul.f32 %v3410_v54, %v3390_v40  ;;  %v3437_v33 = vmul.f32 %v3410_v54, %v3391_v44  ;;  %v3438_v18 = vmul.f32 %v3410_v54, %v3392_v48  ;;  %v3439_v31 = vmul.f32 %v3410_v54, %v3393_v50 }
 0x40d   : > { %v3440_v35 = vmul.f32 %v3410_v54, %v3394_v58  ;;  %v3441_v56 = vmul.f32 %v3410_v54, %v3395_v2  ;;  %v3442_v9 = vmul.f32 %v3410_v54, %v3396_v11  ;;  %v3443_v17 = vmul.f32 %v3410_v54, %v3397_v20 }
 0x40e   : > { %v3444_v13 = vmul.f32 %v3410_v54, %v3398_v24  ;;  %v3445_v34 = vmul.f32 %v3410_v54, %v3399_v32  ;;  %v3446_v36 = vmul.f32 %v3410_v54, %v3400_v38  ;;  %v3447_v37 = vmul.f32 %v3410_v54, %v3401_v19 }
 0x40f   : > { %v3448_v53 = vmul.f32 %v3410_v54, %v3402_v0  ;;  %v3449_v55 = vmul.f32 %v3410_v54, %v3403_v46  ;;  %v3450_v57 = vmul.f32 %v3410_v54, %v3404_v21  ;;  %v3451_v52 = vmul.f32 %v3410_v54, %v3405_v59 }
 0x410   : > { %v5040_v62 = vadd.f32 %v3456_v42, %v3412_v23  ;;  %v5042_v6 = vadd.f32 %v3456_v42, %v3413_v61  ;;  %v5044_v16 = vadd.f32 %v3456_v42, %v3414_v43  ;;  %v5046_v22 = vadd.f32 %v3456_v42, %v3415_v63 }
 0x411   : > { %v5048_v26 = vadd.f32 %v3456_v42, %v3416_v4  ;;  %v5050_v29 = vadd.f32 %v3456_v42, %v3417_v1  ;;  %v5052_v40 = vadd.f32 %v3456_v42, %v3418_v25  ;;  %v5054_v44 = vadd.f32 %v3456_v42, %v3419_v3 }
 0x412   : > { %v5056_v48 = vadd.f32 %v3456_v42, %v3420_v45  ;;  %v5058_v50 = vadd.f32 %v3456_v42, %v3421_v5  ;;  %v5060_v58 = vadd.f32 %v3456_v42, %v3422_v27  ;;  %v5062_v2 = vadd.f32 %v3456_v42, %v3423_v7 }
 0x413   : > { %v5064_v11 = vadd.f32 %v3456_v42, %v3424_v47  ;;  %v5066_v20 = vadd.f32 %v3456_v42, %v3425_v10  ;;  %v5068_v24 = vadd.f32 %v3456_v42, %v3426_v12  ;;  %v5070_v32 = vadd.f32 %v3456_v42, %v3427_v28 }
 0x414   : > { %v5072_v38 = vadd.f32 %v3456_v42, %v3428_v15  ;;  %v5074_v19 = vadd.f32 %v3456_v42, %v3429_v60  ;;  %v5076_v54 = vadd.f32 %v3456_v42, %v3430_v39  ;;  %v5078_v0 = vadd.f32 %v3456_v42, %v3431_v41 }
 0x415   : > { %v5080_v46 = vadd.f32 %v3456_v42, %v3432_v8  ;;  %v5082_v21 = vadd.f32 %v3456_v42, %v3433_v49  ;;  %v5084_v59 = vadd.f32 %v3456_v42, %v3434_v30  ;;  %v5086_v23 = vadd.f32 %v3456_v42, %v3435_v14 }
 0x416   : > { %v5088_v61 = vadd.f32 %v3456_v42, %v3436_v51  ;;  %v5090_v43 = vadd.f32 %v3456_v42, %v3437_v33  ;;  %v5092_v63 = vadd.f32 %v3456_v42, %v3438_v18  ;;  %v5094_v4 = vadd.f32 %v3456_v42, %v3439_v31 }
 0x417   : > { %v5096_v1 = vadd.f32 %v3456_v42, %v3440_v35  ;;  %v5098_v25 = vadd.f32 %v3456_v42, %v3441_v56  ;;  %v5100_v3 = vadd.f32 %v3456_v42, %v3442_v9  ;;  %v5102_v45 = vadd.f32 %v3456_v42, %v3443_v17 }
 0x418   : > { %v5104_v5 = vadd.f32 %v3456_v42, %v3444_v13  ;;  %v5106_v27 = vadd.f32 %v3456_v42, %v3445_v34  ;;  %v5108_v7 = vadd.f32 %v3456_v42, %v3446_v36  ;;  %v5110_v47 = vadd.f32 %v3456_v42, %v3447_v37 }
 0x419   : > { %v5112_v10 = vadd.f32 %v3456_v42, %v3448_v53  ;;  %v5114_v12 = vadd.f32 %v3456_v42, %v3449_v55  ;;  %v5116_v28 = vadd.f32 %v3456_v42, %v3450_v57  ;;  %v5118_v15 = vadd.f32 %v3456_v42, %v3451_v52 }
 0x41a   : > { %v3498_v60 = vmax.f32 %v5040_v62, 0.0  ;;  %v3499_v39 = vmax.f32 %v5042_v6, 0.0  ;;  %v3500_v41 = vmax.f32 %v5044_v16, 0.0  ;;  %v3501_v8 = vmax.f32 %v5046_v22, 0.0 }
 0x41b   : > { %v3502_v49 = vmax.f32 %v5048_v26, 0.0  ;;  %v3503_v30 = vmax.f32 %v5050_v29, 0.0  ;;  %v3504_v14 = vmax.f32 %v5052_v40, 0.0  ;;  %v3505_v51 = vmax.f32 %v5054_v44, 0.0 }
 0x41c   : > { %v3506_v33 = vmax.f32 %v5056_v48, 0.0  ;;  %v3507_v18 = vmax.f32 %v5058_v50, 0.0  ;;  %v3508_v31 = vmax.f32 %v5060_v58, 0.0  ;;  %v3509_v35 = vmax.f32 %v5062_v2, 0.0 }
 0x41d   : > { %v3510_v56 = vmax.f32 %v5064_v11, 0.0  ;;  %v3511_v9 = vmax.f32 %v5066_v20, 0.0  ;;  %v3512_v17 = vmax.f32 %v5068_v24, 0.0  ;;  %v3513_v13 = vmax.f32 %v5070_v32, 0.0 }
 0x41e   : > { %v3514_v34 = vmax.f32 %v5072_v38, 0.0  ;;  %v3515_v36 = vmax.f32 %v5074_v19, 0.0  ;;  %v3516_v37 = vmax.f32 %v5076_v54, 0.0  ;;  %v3517_v42 = vmax.f32 %v5078_v0, 0.0 }
 0x41f   : > { %v3518_v53 = vmax.f32 %v5080_v46, 0.0  ;;  %v3519_v55 = vmax.f32 %v5082_v21, 0.0  ;;  %v3520_v57 = vmax.f32 %v5084_v59, 0.0  ;;  %v3521_v52 = vmax.f32 %v5086_v23, 0.0 }
 0x420   : > { %v3522_v62 = vmax.f32 %v5088_v61, 0.0  ;;  %v3523_v6 = vmax.f32 %v5090_v43, 0.0  ;;  %v3524_v16 = vmax.f32 %v5092_v63, 0.0  ;;  %v3525_v22 = vmax.f32 %v5094_v4, 0.0 }
 0x421   : > { %v3526_v26 = vmax.f32 %v5096_v1, 0.0  ;;  %v3527_v29 = vmax.f32 %v5098_v25, 0.0  ;;  %v3528_v40 = vmax.f32 %v5100_v3, 0.0  ;;  %v3529_v44 = vmax.f32 %v5102_v45, 0.0 }
 0x422   : > { %v3530_v48 = vmax.f32 %v5104_v5, 0.0  ;;  %v3531_v50 = vmax.f32 %v5106_v27, 0.0  ;;  %v3532_v58 = vmax.f32 %v5108_v7, 0.0  ;;  %v3533_v2 = vmax.f32 %v5110_v47, 0.0 }
 0x423   : > { %v3534_v11 = vmax.f32 %v5112_v10, 0.0  ;;  %v3535_v20 = vmax.f32 %v5114_v12, 0.0  ;;  %v3536_v24 = vmax.f32 %v5116_v28, 0.0  ;;  %v3537_v32 = vmax.f32 %v5118_v15, 0.0 }
 0x424   : > { %v4151_v38 = vpack.c.bf16 %v3499_v39, %v3498_v60  ;;  %v4152_v19 = vpack.c.bf16 %v3501_v8, %v3500_v41  ;;  %v4153_v54 = vpack.c.bf16 %v3503_v30, %v3502_v49  ;;  %v4154_v0 = vpack.c.bf16 %v3505_v51, %v3504_v14 }
 0x425   : > { %v4155_v46 = vpack.c.bf16 %v3507_v18, %v3506_v33  ;;  %v4156_v21 = vpack.c.bf16 %v3509_v35, %v3508_v31  ;;  %v4157_v59 = vpack.c.bf16 %v3511_v9, %v3510_v56  ;;  %v4158_v23 = vpack.c.bf16 %v3513_v13, %v3512_v17 }
 0x426   : > { %v4159_v61 = vpack.c.bf16 %v3515_v36, %v3514_v34  ;;  %v4160_v43 = vpack.c.bf16 %v3517_v42, %v3516_v37  ;;  %v4161_v63 = vpack.c.bf16 %v3519_v55, %v3518_v53  ;;  %v4162_v4 = vpack.c.bf16 %v3521_v52, %v3520_v57  ;;  %3698 = vst [vmem:[%s5233_s4] sm:$0xff] %v4151_v38 }
 0x427   : > { %3699 = vst [vmem:[%s5233_s4 + $0x8] sm:$0xff] %v4152_v19  ;;  %3700 = vst [vmem:[%s5233_s4 + $0x10] sm:$0xff] %v4153_v54  ;;  %v4163_v1 = vpack.c.bf16 %v3523_v6, %v3522_v62  ;;  %v4164_v25 = vpack.c.bf16 %v3525_v22, %v3524_v16  ;;  %v4165_v3 = vpack.c.bf16 %v3527_v29, %v3526_v26 }
 0x428   : > { %3701 = vst [vmem:[%s5233_s4 + $0x18] sm:$0xff] %v4154_v0  ;;  %v4166_v45 = vpack.c.bf16 %v3529_v44, %v3528_v40  ;;  %3702 = vst [vmem:[%s5233_s4 + $0x20] sm:$0xff] %v4155_v46  ;;  %v4167_v5 = vpack.c.bf16 %v3531_v50, %v3530_v48  ;;  %v4168_v27 = vpack.c.bf16 %v3533_v2, %v3532_v58 }
 0x429   : > { %3703 = vst [vmem:[%s5233_s4 + $0x28] sm:$0xff] %v4156_v21  ;;  %3704 = vst [vmem:[%s5233_s4 + $0x30] sm:$0xff] %v4157_v59  ;;  %v4169_v7 = vpack.c.bf16 %v3535_v20, %v3534_v11  ;;  %v4170_v47 = vpack.c.bf16 %v3537_v32, %v3536_v24 }
 0x42a   : > { %3705 = vst [vmem:[%s5233_s4 + $0x38] sm:$0xff] %v4158_v23  ;;  %3706 = vst [vmem:[%s5233_s4 + $0x40] sm:$0xff] %v4159_v61 }
 0x42b   : > { %3707 = vst [vmem:[%s5233_s4 + $0x48] sm:$0xff] %v4160_v43  ;;  %3708 = vst [vmem:[%s5233_s4 + $0x50] sm:$0xff] %v4161_v63 }
 0x42c   : > { %3709 = vst [vmem:[%s5233_s4 + $0x58] sm:$0xff] %v4162_v4  ;;  %3710 = vst [vmem:[%s5233_s4 + $0x60] sm:$0xff] %v4163_v1 }
 0x42d   : > { %3711 = vst [vmem:[%s5233_s4 + $0x68] sm:$0xff] %v4164_v25  ;;  %3712 = vst [vmem:[%s5233_s4 + $0x70] sm:$0xff] %v4165_v3 }
 0x42e   : > { %3713 = vst [vmem:[%s5233_s4 + $0x78] sm:$0xff] %v4166_v45  ;;  %3714 = vst [vmem:[%s5233_s4 + $0x80] sm:$0xff] %v4167_v5 }
 0x42f   : > { %3715 = vst [vmem:[%s5233_s4 + $0x88] sm:$0xff] %v4168_v27  ;;  %3716 = vst [vmem:[%s5233_s4 + $0x90] sm:$0xff] %v4169_v7 }
 0x430   : > { %3717 = vst [vmem:[%s5233_s4 + $0x98] sm:$0xff] %v4170_v47 }
 0x431 PF: > { %s14_s17 = sadd.s32 1, %s4226_s17   ;;  %s5234_s15 = smov %s4222_s16 }
 0x432   : > { %p11_p8 = scmp.ge.s32.totalorder %s14_s17, 4   ;;  %s5235_s16 = smov %s5237_s18 }
 0x434   :  { %13 = sbr.rel (!%p11_p8) target bundleno = 2 (0x2), region = 77 }

// kernel: netg_forward.9
= control target key start
LH: loop header
LB: loop body
LE: loop exit
PB: predicated region body
PF: predicated region fallthrough
CT: control target
= control target key end

     0   :  { %s3722_s15 = smov 0   ;;  %s3724_s16 = smov 0   ;;  %s4647_s0 = inlined_call_operand.vmem [shape: bf16[8,128], index: 0, kind: input, shape index: {}]   ;;  %s4648_s1 = inlined_call_operand.vmem [shape: bf16[128,20480], index: 1, kind: input, shape index: {}]   ;;  %s4649_s2 = inlined_call_operand.vmem [shape: f32[8,1], index: 2, kind: input, shape index: {}]   ;;  %s4650_s3 = inlined_call_operand.vmem [shape: f32[8,1], index: 3, kind: input, shape index: {}]   ;;  %s4651_s4 = inlined_call_operand.vmem [shape: f32[8,20480], index: 4, kind: output, shape index: {}]  }
   0x1   :  { %s3726_s17 = smov 0   ;;  %s3728_s18 = smov 0  }
   0x2   :  { %s3730_s19 = smov 0  }
   0x3 LB: > { %s26_s2 = sadd.s32 1, %s3690_s18  ;;  %p68_p1 = scmp.ne.s32.totalorder %s3682_s16, %s3678_s15  ;;  %s3694_s19 = sphi %s3730_s19, %s14_s19   ;;  %s3690_s18 = sphi %s3728_s18, %s4656_s18   ;;  %s3686_s17 = sphi %s3726_s17, %s4655_s17   ;;  %s3682_s16 = sphi %s3724_s16, %s4654_s16   ;;  %s3678_s15 = sphi %s3722_s15, %s4653_s15  }
   0x4   : > { %p28_p0 = scmp.ge.s32.totalorder %s26_s2, 5  ;;  %p69_p2 = scmp.eq.s32.totalorder %s3694_s19, 0 }
   0x5   : > { %s61_s20 = sadd.s32 1, %s3682_s16  ;;  %p3283_p5 = scmp.ge.s32.totalorder %s3694_s19, 5 }
   0x6   : > { %s4658_s2 = smov (%p28_p0, %s26_s2), 0  ;;  %p70_p3 = por %p69_p2, %p68_p1 }
   0x7   : > { %s57_s3 = ssub.s32 %s3690_s18, %s4658_s2  ;;  %175 = sbr.rel (%p3283_p5) target bundleno = 144 (0x90), region = 28 }
   0x8   : > { %p59_p4 = scmp.eq.s32.totalorder %s57_s3, 0 }
   0xa   : > { %s3757_s21 = scalar_select %p59_p4, %s3682_s16, %s61_s20  }
   0xc   : > { %178 = sbr.rel (!%p70_p3) target bundleno = 144 (0x90), region = 32  ;;  %s180_s22 = sand.u32 (%p70_p3), 1, %s3682_s16  }
   0xd   : > { %s3549_s23 = sshll.u32 (%p70_p3), %s3690_s18, 7  ;;  %s3284_s24 = sshll.u32 (%p70_p3), %s180_s22, 11 }
   0xe   : > { %s3765_s27 = scalar_lea.vmem (%p70_p3), %s4648_s1, %s3549_s23  ;;  %s3770_s28 = scalar_lea.vmem (%p70_p3), [#allocation3], %s3284_s24 }
   0xf   : > { %v201_v0 = vld [vmem:[%s3765_s27] sm:$0xff] (%p70_p3)  ;;  %v203_v1 = vld [vmem:[%s3765_s27 + $0x8] sm:$0xff] (%p70_p3)  ;;  %v205_v2 = vld [vmem:[%s3765_s27 + $0x10] sm:$0xff] (%p70_p3) }
  0x10   : > { %202 = vst [vmem:[%s3770_s28] sm:$0xff] (%p70_p3), %v201_v0  ;;  %204 = vst [vmem:[%s3770_s28 + $0x8] sm:$0xff] (%p70_p3), %v203_v1  ;;  %v207_v3 = vld [vmem:[%s3765_s27 + $0x18] sm:$0xff] (%p70_p3)  ;;  %v209_v4 = vld [vmem:[%s3765_s27 + $0x20] sm:$0xff] (%p70_p3) }
  0x11   : > { %206 = vst [vmem:[%s3770_s28 + $0x10] sm:$0xff] %v205_v2  ;;  %v211_v5 = vld [vmem:[%s3765_s27 + $0x28] sm:$0xff]  ;;  %208 = vst [vmem:[%s3770_s28 + $0x18] sm:$0xff] %v207_v3  ;;  %v213_v6 = vld [vmem:[%s3765_s27 + $0x30] sm:$0xff] }
  0x12   : > { %210 = vst [vmem:[%s3770_s28 + $0x20] sm:$0xff] %v209_v4  ;;  %212 = vst [vmem:[%s3770_s28 + $0x28] sm:$0xff] %v211_v5  ;;  %v215_v7 = vld [vmem:[%s3765_s27 + $0x38] sm:$0xff]  ;;  %v217_v8 = vld [vmem:[%s3765_s27 + $0x40] sm:$0xff] }
  0x13   : > { %214 = vst [vmem:[%s3770_s28 + $0x30] sm:$0xff] %v213_v6  ;;  %216 = vst [vmem:[%s3770_s28 + $0x38] sm:$0xff] %v215_v7  ;;  %v219_v9 = vld [vmem:[%s3765_s27 + $0x48] sm:$0xff]  ;;  %v221_v10 = vld [vmem:[%s3765_s27 + $0x50] sm:$0xff] }
  0x14   : > { %218 = vst [vmem:[%s3770_s28 + $0x40] sm:$0xff] %v217_v8  ;;  %v223_v11 = vld [vmem:[%s3765_s27 + $0x58] sm:$0xff]  ;;  %220 = vst [vmem:[%s3770_s28 + $0x48] sm:$0xff] %v219_v9  ;;  %v225_v12 = vld [vmem:[%s3765_s27 + $0x60] sm:$0xff] }
  0x15   : > { %222 = vst [vmem:[%s3770_s28 + $0x50] sm:$0xff] %v221_v10  ;;  %224 = vst [vmem:[%s3770_s28 + $0x58] sm:$0xff] %v223_v11  ;;  %v227_v13 = vld [vmem:[%s3765_s27 + $0x68] sm:$0xff]  ;;  %v229_v14 = vld [vmem:[%s3765_s27 + $0x70] sm:$0xff] }
  0x16   : > { %226 = vst [vmem:[%s3770_s28 + $0x60] sm:$0xff] %v225_v12  ;;  %228 = vst [vmem:[%s3770_s28 + $0x68] sm:$0xff] %v227_v13  ;;  %v231_v15 = vld [vmem:[%s3765_s27 + $0x78] sm:$0xff]  ;;  %v233_v16 = vld [vmem:[%s3765_s27 + $0x280] sm:$0xff] }
  0x17   : > { %230 = vst [vmem:[%s3770_s28 + $0x70] sm:$0xff] %v229_v14  ;;  %v235_v17 = vld [vmem:[%s3765_s27 + $0x288] sm:$0xff]  ;;  %232 = vst [vmem:[%s3770_s28 + $0x78] sm:$0xff] %v231_v15  ;;  %v237_v18 = vld [vmem:[%s3765_s27 + $0x290] sm:$0xff] }
  0x18   : > { %234 = vst [vmem:[%s3770_s28 + $0x80] sm:$0xff] %v233_v16  ;;  %236 = vst [vmem:[%s3770_s28 + $0x88] sm:$0xff] %v235_v17  ;;  %v239_v19 = vld [vmem:[%s3765_s27 + $0x298] sm:$0xff]  ;;  %v241_v20 = vld [vmem:[%s3765_s27 + $0x2a0] sm:$0xff] }
  0x19   : > { %238 = vst [vmem:[%s3770_s28 + $0x90] sm:$0xff] %v237_v18  ;;  %240 = vst [vmem:[%s3770_s28 + $0x98] sm:$0xff] %v239_v19  ;;  %v243_v21 = vld [vmem:[%s3765_s27 + $0x2a8] sm:$0xff]  ;;  %v245_v22 = vld [vmem:[%s3765_s27 + $0x2b0] sm:$0xff] }
  0x1a   : > { %242 = vst [vmem:[%s3770_s28 + $0xa0] sm:$0xff] %v241_v20  ;;  %v247_v23 = vld [vmem:[%s3765_s27 + $0x2b8] sm:$0xff]  ;;  %244 = vst [vmem:[%s3770_s28 + $0xa8] sm:$0xff] %v243_v21  ;;  %v249_v24 = vld [vmem:[%s3765_s27 + $0x2c0] sm:$0xff] }
  0x1b   : > { %246 = vst [vmem:[%s3770_s28 + $0xb0] sm:$0xff] %v245_v22  ;;  %248 = vst [vmem:[%s3770_s28 + $0xb8] sm:$0xff] %v247_v23  ;;  %v251_v25 = vld [vmem:[%s3765_s27 + $0x2c8] sm:$0xff]  ;;  %v253_v26 = vld [vmem:[%s3765_s27 + $0x2d0] sm:$0xff] }
  0x1c   : > { %250 = vst [vmem:[%s3770_s28 + $0xc0] sm:$0xff] %v249_v24  ;;  %252 = vst [vmem:[%s3770_s28 + $0xc8] sm:$0xff] %v251_v25  ;;  %v255_v27 = vld [vmem:[%s3765_s27 + $0x2d8] sm:$0xff]  ;;  %v257_v28 = vld [vmem:[%s3765_s27 + $0x2e0] sm:$0xff] }
  0x1d   : > { %254 = vst [vmem:[%s3770_s28 + $0xd0] sm:$0xff] %v253_v26  ;;  %v259_v29 = vld [vmem:[%s3765_s27 + $0x2e8] sm:$0xff]  ;;  %256 = vst [vmem:[%s3770_s28 + $0xd8] sm:$0xff] %v255_v27  ;;  %v261_v30 = vld [vmem:[%s3765_s27 + $0x2f0] sm:$0xff] }
  0x1e   : > { %258 = vst [vmem:[%s3770_s28 + $0xe0] sm:$0xff] %v257_v28  ;;  %260 = vst [vmem:[%s3770_s28 + $0xe8] sm:$0xff] %v259_v29  ;;  %v263_v31 = vld [vmem:[%s3765_s27 + $0x2f8] sm:$0xff]  ;;  %v265_v32 = vld [vmem:[%s3765_s27 + $0x500] sm:$0xff] }
  0x1f   : > { %262 = vst [vmem:[%s3770_s28 + $0xf0] sm:$0xff] %v261_v30  ;;  %264 = vst [vmem:[%s3770_s28 + $0xf8] sm:$0xff] %v263_v31  ;;  %v267_v33 = vld [vmem:[%s3765_s27 + $0x508] sm:$0xff]  ;;  %v269_v34 = vld [vmem:[%s3765_s27 + $0x510] sm:$0xff] }
  0x20   : > { %266 = vst [vmem:[%s3770_s28 + $0x100] sm:$0xff] %v265_v32  ;;  %v271_v35 = vld [vmem:[%s3765_s27 + $0x518] sm:$0xff]  ;;  %268 = vst [vmem:[%s3770_s28 + $0x108] sm:$0xff] %v267_v33  ;;  %v273_v36 = vld [vmem:[%s3765_s27 + $0x520] sm:$0xff] }
  0x21   : > { %270 = vst [vmem:[%s3770_s28 + $0x110] sm:$0xff] %v269_v34  ;;  %272 = vst [vmem:[%s3770_s28 + $0x118] sm:$0xff] %v271_v35  ;;  %v275_v37 = vld [vmem:[%s3765_s27 + $0x528] sm:$0xff]  ;;  %v277_v38 = vld [vmem:[%s3765_s27 + $0x530] sm:$0xff] }
  0x22   : > { %274 = vst [vmem:[%s3770_s28 + $0x120] sm:$0xff] %v273_v36  ;;  %276 = vst [vmem:[%s3770_s28 + $0x128] sm:$0xff] %v275_v37  ;;  %v279_v39 = vld [vmem:[%s3765_s27 + $0x538] sm:$0xff]  ;;  %v281_v40 = vld [vmem:[%s3765_s27 + $0x540] sm:$0xff] }
  0x23   : > { %278 = vst [vmem:[%s3770_s28 + $0x130] sm:$0xff] %v277_v38  ;;  %v283_v41 = vld [vmem:[%s3765_s27 + $0x548] sm:$0xff]  ;;  %280 = vst [vmem:[%s3770_s28 + $0x138] sm:$0xff] %v279_v39  ;;  %v285_v42 = vld [vmem:[%s3765_s27 + $0x550] sm:$0xff] }
  0x24   : > { %282 = vst [vmem:[%s3770_s28 + $0x140] sm:$0xff] %v281_v40  ;;  %284 = vst [vmem:[%s3770_s28 + $0x148] sm:$0xff] %v283_v41  ;;  %v287_v43 = vld [vmem:[%s3765_s27 + $0x558] sm:$0xff]  ;;  %v289_v44 = vld [vmem:[%s3765_s27 + $0x560] sm:$0xff] }
  0x25   : > { %286 = vst [vmem:[%s3770_s28 + $0x150] sm:$0xff] %v285_v42  ;;  %288 = vst [vmem:[%s3770_s28 + $0x158] sm:$0xff] %v287_v43  ;;  %v291_v45 = vld [vmem:[%s3765_s27 + $0x568] sm:$0xff]  ;;  %v293_v46 = vld [vmem:[%s3765_s27 + $0x570] sm:$0xff] }
  0x26   : > { %290 = vst [vmem:[%s3770_s28 + $0x160] sm:$0xff] %v289_v44  ;;  %v295_v47 = vld [vmem:[%s3765_s27 + $0x578] sm:$0xff]  ;;  %292 = vst [vmem:[%s3770_s28 + $0x168] sm:$0xff] %v291_v45  ;;  %v297_v48 = vld [vmem:[%s3765_s27 + $0x780] sm:$0xff] }
  0x27   : > { %294 = vst [vmem:[%s3770_s28 + $0x170] sm:$0xff] %v293_v46  ;;  %296 = vst [vmem:[%s3770_s28 + $0x178] sm:$0xff] %v295_v47  ;;  %v299_v49 = vld [vmem:[%s3765_s27 + $0x788] sm:$0xff]  ;;  %v301_v50 = vld [vmem:[%s3765_s27 + $0x790] sm:$0xff] }
  0x28   : > { %298 = vst [vmem:[%s3770_s28 + $0x180] sm:$0xff] %v297_v48  ;;  %300 = vst [vmem:[%s3770_s28 + $0x188] sm:$0xff] %v299_v49  ;;  %v303_v51 = vld [vmem:[%s3765_s27 + $0x798] sm:$0xff]  ;;  %v305_v52 = vld [vmem:[%s3765_s27 + $0x7a0] sm:$0xff] }
  0x29   : > { %302 = vst [vmem:[%s3770_s28 + $0x190] sm:$0xff] %v301_v50  ;;  %v307_v53 = vld [vmem:[%s3765_s27 + $0x7a8] sm:$0xff]  ;;  %304 = vst [vmem:[%s3770_s28 + $0x198] sm:$0xff] %v303_v51  ;;  %v309_v54 = vld [vmem:[%s3765_s27 + $0x7b0] sm:$0xff] }
  0x2a   : > { %306 = vst [vmem:[%s3770_s28 + $0x1a0] sm:$0xff] %v305_v52  ;;  %308 = vst [vmem:[%s3770_s28 + $0x1a8] sm:$0xff] %v307_v53  ;;  %v311_v55 = vld [vmem:[%s3765_s27 + $0x7b8] sm:$0xff]  ;;  %v313_v56 = vld [vmem:[%s3765_s27 + $0x7c0] sm:$0xff] }
  0x2b   : > { %310 = vst [vmem:[%s3770_s28 + $0x1b0] sm:$0xff] %v309_v54  ;;  %312 = vst [vmem:[%s3770_s28 + $0x1b8] sm:$0xff] %v311_v55  ;;  %v315_v57 = vld [vmem:[%s3765_s27 + $0x7c8] sm:$0xff]  ;;  %v317_v58 = vld [vmem:[%s3765_s27 + $0x7d0] sm:$0xff] }
  0x2c   : > { %314 = vst [vmem:[%s3770_s28 + $0x1c0] sm:$0xff] %v313_v56  ;;  %v319_v59 = vld [vmem:[%s3765_s27 + $0x7d8] sm:$0xff]  ;;  %316 = vst [vmem:[%s3770_s28 + $0x1c8] sm:$0xff] %v315_v57  ;;  %v321_v60 = vld [vmem:[%s3765_s27 + $0x7e0] sm:$0xff] }
  0x2d   : > { %318 = vst [vmem:[%s3770_s28 + $0x1d0] sm:$0xff] %v317_v58  ;;  %320 = vst [vmem:[%s3770_s28 + $0x1d8] sm:$0xff] %v319_v59  ;;  %v323_v61 = vld [vmem:[%s3765_s27 + $0x7e8] sm:$0xff]  ;;  %v325_v62 = vld [vmem:[%s3765_s27 + $0x7f0] sm:$0xff] }
  0x2e   : > { %322 = vst [vmem:[%s3770_s28 + $0x1e0] sm:$0xff] %v321_v60  ;;  %324 = vst [vmem:[%s3770_s28 + $0x1e8] sm:$0xff] %v323_v61  ;;  %v327_v63 = vld [vmem:[%s3765_s27 + $0x7f8] sm:$0xff]  ;;  %v329_v0 = vld [vmem:[%s3765_s27 + $0xa00] sm:$0xff] }
  0x2f   : > { %326 = vst [vmem:[%s3770_s28 + $0x1f0] sm:$0xff] %v325_v62  ;;  %v331_v1 = vld [vmem:[%s3765_s27 + $0xa08] sm:$0xff]  ;;  %328 = vst [vmem:[%s3770_s28 + $0x1f8] sm:$0xff] %v327_v63  ;;  %v333_v2 = vld [vmem:[%s3765_s27 + $0xa10] sm:$0xff] }
  0x30   : > { %330 = vst [vmem:[%s3770_s28 + $0x200] sm:$0xff] %v329_v0  ;;  %332 = vst [vmem:[%s3770_s28 + $0x208] sm:$0xff] %v331_v1  ;;  %v335_v3 = vld [vmem:[%s3765_s27 + $0xa18] sm:$0xff]  ;;  %v337_v4 = vld [vmem:[%s3765_s27 + $0xa20] sm:$0xff] }
  0x31   : > { %334 = vst [vmem:[%s3770_s28 + $0x210] sm:$0xff] %v333_v2  ;;  %336 = vst [vmem:[%s3770_s28 + $0x218] sm:$0xff] %v335_v3  ;;  %v339_v5 = vld [vmem:[%s3765_s27 + $0xa28] sm:$0xff]  ;;  %v341_v6 = vld [vmem:[%s3765_s27 + $0xa30] sm:$0xff] }
  0x32   : > { %338 = vst [vmem:[%s3770_s28 + $0x220] sm:$0xff] %v337_v4  ;;  %v343_v7 = vld [vmem:[%s3765_s27 + $0xa38] sm:$0xff]  ;;  %340 = vst [vmem:[%s3770_s28 + $0x228] sm:$0xff] %v339_v5  ;;  %v345_v8 = vld [vmem:[%s3765_s27 + $0xa40] sm:$0xff] }
  0x33   : > { %342 = vst [vmem:[%s3770_s28 + $0x230] sm:$0xff] %v341_v6  ;;  %344 = vst [vmem:[%s3770_s28 + $0x238] sm:$0xff] %v343_v7  ;;  %v347_v9 = vld [vmem:[%s3765_s27 + $0xa48] sm:$0xff]  ;;  %v349_v10 = vld [vmem:[%s3765_s27 + $0xa50] sm:$0xff] }
  0x34   : > { %346 = vst [vmem:[%s3770_s28 + $0x240] sm:$0xff] %v345_v8  ;;  %348 = vst [vmem:[%s3770_s28 + $0x248] sm:$0xff] %v347_v9  ;;  %v351_v11 = vld [vmem:[%s3765_s27 + $0xa58] sm:$0xff]  ;;  %v353_v12 = vld [vmem:[%s3765_s27 + $0xa60] sm:$0xff] }
  0x35   : > { %350 = vst [vmem:[%s3770_s28 + $0x250] sm:$0xff] %v349_v10  ;;  %v355_v13 = vld [vmem:[%s3765_s27 + $0xa68] sm:$0xff]  ;;  %352 = vst [vmem:[%s3770_s28 + $0x258] sm:$0xff] %v351_v11  ;;  %v357_v14 = vld [vmem:[%s3765_s27 + $0xa70] sm:$0xff] }
  0x36   : > { %354 = vst [vmem:[%s3770_s28 + $0x260] sm:$0xff] %v353_v12  ;;  %356 = vst [vmem:[%s3770_s28 + $0x268] sm:$0xff] %v355_v13  ;;  %v359_v15 = vld [vmem:[%s3765_s27 + $0xa78] sm:$0xff]  ;;  %v361_v16 = vld [vmem:[%s3765_s27 + $0xc80] sm:$0xff] }
  0x37   : > { %358 = vst [vmem:[%s3770_s28 + $0x270] sm:$0xff] %v357_v14  ;;  %360 = vst [vmem:[%s3770_s28 + $0x278] sm:$0xff] %v359_v15  ;;  %v363_v17 = vld [vmem:[%s3765_s27 + $0xc88] sm:$0xff]  ;;  %v365_v18 = vld [vmem:[%s3765_s27 + $0xc90] sm:$0xff] }
  0x38   : > { %362 = vst [vmem:[%s3770_s28 + $0x280] sm:$0xff] %v361_v16  ;;  %v367_v19 = vld [vmem:[%s3765_s27 + $0xc98] sm:$0xff]  ;;  %364 = vst [vmem:[%s3770_s28 + $0x288] sm:$0xff] %v363_v17  ;;  %v369_v20 = vld [vmem:[%s3765_s27 + $0xca0] sm:$0xff] }
  0x39   : > { %366 = vst [vmem:[%s3770_s28 + $0x290] sm:$0xff] %v365_v18  ;;  %368 = vst [vmem:[%s3770_s28 + $0x298] sm:$0xff] %v367_v19  ;;  %v371_v21 = vld [vmem:[%s3765_s27 + $0xca8] sm:$0xff]  ;;  %v373_v22 = vld [vmem:[%s3765_s27 + $0xcb0] sm:$0xff] }
  0x3a   : > { %370 = vst [vmem:[%s3770_s28 + $0x2a0] sm:$0xff] %v369_v20  ;;  %372 = vst [vmem:[%s3770_s28 + $0x2a8] sm:$0xff] %v371_v21  ;;  %v375_v23 = vld [vmem:[%s3765_s27 + $0xcb8] sm:$0xff]  ;;  %v377_v24 = vld [vmem:[%s3765_s27 + $0xcc0] sm:$0xff] }
  0x3b   : > { %374 = vst [vmem:[%s3770_s28 + $0x2b0] sm:$0xff] %v373_v22  ;;  %v379_v25 = vld [vmem:[%s3765_s27 + $0xcc8] sm:$0xff]  ;;  %376 = vst [vmem:[%s3770_s28 + $0x2b8] sm:$0xff] %v375_v23  ;;  %v381_v26 = vld [vmem:[%s3765_s27 + $0xcd0] sm:$0xff] }
  0x3c   : > { %378 = vst [vmem:[%s3770_s28 + $0x2c0] sm:$0xff] %v377_v24  ;;  %380 = vst [vmem:[%s3770_s28 + $0x2c8] sm:$0xff] %v379_v25  ;;  %v383_v27 = vld [vmem:[%s3765_s27 + $0xcd8] sm:$0xff]  ;;  %v385_v28 = vld [vmem:[%s3765_s27 + $0xce0] sm:$0xff] }
  0x3d   : > { %382 = vst [vmem:[%s3770_s28 + $0x2d0] sm:$0xff] %v381_v26  ;;  %384 = vst [vmem:[%s3770_s28 + $0x2d8] sm:$0xff] %v383_v27  ;;  %v387_v29 = vld [vmem:[%s3765_s27 + $0xce8] sm:$0xff]  ;;  %v389_v30 = vld [vmem:[%s3765_s27 + $0xcf0] sm:$0xff] }
  0x3e   : > { %386 = vst [vmem:[%s3770_s28 + $0x2e0] sm:$0xff] %v385_v28  ;;  %v391_v31 = vld [vmem:[%s3765_s27 + $0xcf8] sm:$0xff]  ;;  %388 = vst [vmem:[%s3770_s28 + $0x2e8] sm:$0xff] %v387_v29  ;;  %v393_v32 = vld [vmem:[%s3765_s27 + $0xf00] sm:$0xff] }
  0x3f   : > { %390 = vst [vmem:[%s3770_s28 + $0x2f0] sm:$0xff] %v389_v30  ;;  %392 = vst [vmem:[%s3770_s28 + $0x2f8] sm:$0xff] %v391_v31  ;;  %v395_v33 = vld [vmem:[%s3765_s27 + $0xf08] sm:$0xff]  ;;  %v397_v34 = vld [vmem:[%s3765_s27 + $0xf10] sm:$0xff] }
  0x40   : > { %394 = vst [vmem:[%s3770_s28 + $0x300] sm:$0xff] %v393_v32  ;;  %396 = vst [vmem:[%s3770_s28 + $0x308] sm:$0xff] %v395_v33  ;;  %v399_v35 = vld [vmem:[%s3765_s27 + $0xf18] sm:$0xff]  ;;  %v401_v36 = vld [vmem:[%s3765_s27 + $0xf20] sm:$0xff] }
  0x41   : > { %398 = vst [vmem:[%s3770_s28 + $0x310] sm:$0xff] %v397_v34  ;;  %v403_v37 = vld [vmem:[%s3765_s27 + $0xf28] sm:$0xff]  ;;  %400 = vst [vmem:[%s3770_s28 + $0x318] sm:$0xff] %v399_v35  ;;  %v405_v38 = vld [vmem:[%s3765_s27 + $0xf30] sm:$0xff] }
  0x42   : > { %402 = vst [vmem:[%s3770_s28 + $0x320] sm:$0xff] %v401_v36  ;;  %404 = vst [vmem:[%s3770_s28 + $0x328] sm:$0xff] %v403_v37  ;;  %v407_v39 = vld [vmem:[%s3765_s27 + $0xf38] sm:$0xff]  ;;  %v409_v40 = vld [vmem:[%s3765_s27 + $0xf40] sm:$0xff] }
  0x43   : > { %406 = vst [vmem:[%s3770_s28 + $0x330] sm:$0xff] %v405_v38  ;;  %408 = vst [vmem:[%s3770_s28 + $0x338] sm:$0xff] %v407_v39  ;;  %v411_v41 = vld [vmem:[%s3765_s27 + $0xf48] sm:$0xff]  ;;  %v413_v42 = vld [vmem:[%s3765_s27 + $0xf50] sm:$0xff] }
  0x44   : > { %410 = vst [vmem:[%s3770_s28 + $0x340] sm:$0xff] %v409_v40  ;;  %v415_v43 = vld [vmem:[%s3765_s27 + $0xf58] sm:$0xff]  ;;  %412 = vst [vmem:[%s3770_s28 + $0x348] sm:$0xff] %v411_v41  ;;  %v417_v44 = vld [vmem:[%s3765_s27 + $0xf60] sm:$0xff] }
  0x45   : > { %414 = vst [vmem:[%s3770_s28 + $0x350] sm:$0xff] %v413_v42  ;;  %416 = vst [vmem:[%s3770_s28 + $0x358] sm:$0xff] %v415_v43  ;;  %v419_v45 = vld [vmem:[%s3765_s27 + $0xf68] sm:$0xff]  ;;  %v421_v46 = vld [vmem:[%s3765_s27 + $0xf70] sm:$0xff] }
  0x46   : > { %418 = vst [vmem:[%s3770_s28 + $0x360] sm:$0xff] %v417_v44  ;;  %420 = vst [vmem:[%s3770_s28 + $0x368] sm:$0xff] %v419_v45  ;;  %v423_v47 = vld [vmem:[%s3765_s27 + $0xf78] sm:$0xff]  ;;  %v425_v48 = vld [vmem:[%s3765_s27 + $0x1180] sm:$0xff] }
  0x47   : > { %422 = vst [vmem:[%s3770_s28 + $0x370] sm:$0xff] %v421_v46  ;;  %v427_v49 = vld [vmem:[%s3765_s27 + $0x1188] sm:$0xff]  ;;  %424 = vst [vmem:[%s3770_s28 + $0x378] sm:$0xff] %v423_v47  ;;  %v429_v50 = vld [vmem:[%s3765_s27 + $0x1190] sm:$0xff] }
  0x48   : > { %426 = vst [vmem:[%s3770_s28 + $0x380] sm:$0xff] %v425_v48  ;;  %428 = vst [vmem:[%s3770_s28 + $0x388] sm:$0xff] %v427_v49  ;;  %v431_v51 = vld [vmem:[%s3765_s27 + $0x1198] sm:$0xff]  ;;  %v433_v52 = vld [vmem:[%s3765_s27 + $0x11a0] sm:$0xff] }
  0x49   : > { %430 = vst [vmem:[%s3770_s28 + $0x390] sm:$0xff] %v429_v50  ;;  %432 = vst [vmem:[%s3770_s28 + $0x398] sm:$0xff] %v431_v51  ;;  %v435_v53 = vld [vmem:[%s3765_s27 + $0x11a8] sm:$0xff]  ;;  %v437_v54 = vld [vmem:[%s3765_s27 + $0x11b0] sm:$0xff] }
  0x4a   : > { %434 = vst [vmem:[%s3770_s28 + $0x3a0] sm:$0xff] %v433_v52  ;;  %v439_v55 = vld [vmem:[%s3765_s27 + $0x11b8] sm:$0xff]  ;;  %436 = vst [vmem:[%s3770_s28 + $0x3a8] sm:$0xff] %v435_v53  ;;  %v441_v56 = vld [vmem:[%s3765_s27 + $0x11c0] sm:$0xff] }
  0x4b   : > { %438 = vst [vmem:[%s3770_s28 + $0x3b0] sm:$0xff] %v437_v54  ;;  %440 = vst [vmem:[%s3770_s28 + $0x3b8] sm:$0xff] %v439_v55  ;;  %v443_v57 = vld [vmem:[%s3765_s27 + $0x11c8] sm:$0xff]  ;;  %v445_v58 = vld [vmem:[%s3765_s27 + $0x11d0] sm:$0xff] }
  0x4c   : > { %442 = vst [vmem:[%s3770_s28 + $0x3c0] sm:$0xff] %v441_v56  ;;  %444 = vst [vmem:[%s3770_s28 + $0x3c8] sm:$0xff] %v443_v57  ;;  %v447_v59 = vld [vmem:[%s3765_s27 + $0x11d8] sm:$0xff]  ;;  %v449_v60 = vld [vmem:[%s3765_s27 + $0x11e0] sm:$0xff] }
  0x4d   : > { %446 = vst [vmem:[%s3770_s28 + $0x3d0] sm:$0xff] %v445_v58  ;;  %v451_v61 = vld [vmem:[%s3765_s27 + $0x11e8] sm:$0xff]  ;;  %448 = vst [vmem:[%s3770_s28 + $0x3d8] sm:$0xff] %v447_v59  ;;  %v453_v62 = vld [vmem:[%s3765_s27 + $0x11f0] sm:$0xff] }
  0x4e   : > { %450 = vst [vmem:[%s3770_s28 + $0x3e0] sm:$0xff] %v449_v60  ;;  %452 = vst [vmem:[%s3770_s28 + $0x3e8] sm:$0xff] %v451_v61  ;;  %v455_v63 = vld [vmem:[%s3765_s27 + $0x11f8] sm:$0xff]  ;;  %v457_v0 = vld [vmem:[%s3765_s27 + $0x1400] sm:$0xff] }
  0x4f   : > { %454 = vst [vmem:[%s3770_s28 + $0x3f0] sm:$0xff] %v453_v62  ;;  %456 = vst [vmem:[%s3770_s28 + $0x3f8] sm:$0xff] %v455_v63  ;;  %v459_v1 = vld [vmem:[%s3765_s27 + $0x1408] sm:$0xff]  ;;  %v461_v2 = vld [vmem:[%s3765_s27 + $0x1410] sm:$0xff] }
  0x50   : > { %458 = vst [vmem:[%s3770_s28 + $0x400] sm:$0xff] %v457_v0  ;;  %v463_v3 = vld [vmem:[%s3765_s27 + $0x1418] sm:$0xff]  ;;  %460 = vst [vmem:[%s3770_s28 + $0x408] sm:$0xff] %v459_v1  ;;  %v465_v4 = vld [vmem:[%s3765_s27 + $0x1420] sm:$0xff] }
  0x51   : > { %462 = vst [vmem:[%s3770_s28 + $0x410] sm:$0xff] %v461_v2  ;;  %464 = vst [vmem:[%s3770_s28 + $0x418] sm:$0xff] %v463_v3  ;;  %v467_v5 = vld [vmem:[%s3765_s27 + $0x1428] sm:$0xff]  ;;  %v469_v6 = vld [vmem:[%s3765_s27 + $0x1430] sm:$0xff] }
  0x52   : > { %466 = vst [vmem:[%s3770_s28 + $0x420] sm:$0xff] %v465_v4  ;;  %468 = vst [vmem:[%s3770_s28 + $0x428] sm:$0xff] %v467_v5  ;;  %v471_v7 = vld [vmem:[%s3765_s27 + $0x1438] sm:$0xff]  ;;  %v473_v8 = vld [vmem:[%s3765_s27 + $0x1440] sm:$0xff] }
  0x53   : > { %470 = vst [vmem:[%s3770_s28 + $0x430] sm:$0xff] %v469_v6  ;;  %v475_v9 = vld [vmem:[%s3765_s27 + $0x1448] sm:$0xff]  ;;  %472 = vst [vmem:[%s3770_s28 + $0x438] sm:$0xff] %v471_v7  ;;  %v477_v10 = vld [vmem:[%s3765_s27 + $0x1450] sm:$0xff] }
  0x54   : > { %474 = vst [vmem:[%s3770_s28 + $0x440] sm:$0xff] %v473_v8  ;;  %476 = vst [vmem:[%s3770_s28 + $0x448] sm:$0xff] %v475_v9  ;;  %v479_v11 = vld [vmem:[%s3765_s27 + $0x1458] sm:$0xff]  ;;  %v481_v12 = vld [vmem:[%s3765_s27 + $0x1460] sm:$0xff] }
  0x55   : > { %478 = vst [vmem:[%s3770_s28 + $0x450] sm:$0xff] %v477_v10  ;;  %480 = vst [vmem:[%s3770_s28 + $0x458] sm:$0xff] %v479_v11  ;;  %v483_v13 = vld [vmem:[%s3765_s27 + $0x1468] sm:$0xff]  ;;  %v485_v14 = vld [vmem:[%s3765_s27 + $0x1470] sm:$0xff] }
  0x56   : > { %482 = vst [vmem:[%s3770_s28 + $0x460] sm:$0xff] %v481_v12  ;;  %v487_v15 = vld [vmem:[%s3765_s27 + $0x1478] sm:$0xff]  ;;  %484 = vst [vmem:[%s3770_s28 + $0x468] sm:$0xff] %v483_v13  ;;  %v489_v16 = vld [vmem:[%s3765_s27 + $0x1680] sm:$0xff] }
  0x57   : > { %486 = vst [vmem:[%s3770_s28 + $0x470] sm:$0xff] %v485_v14  ;;  %488 = vst [vmem:[%s3770_s28 + $0x478] sm:$0xff] %v487_v15  ;;  %v491_v17 = vld [vmem:[%s3765_s27 + $0x1688] sm:$0xff]  ;;  %v493_v18 = vld [vmem:[%s3765_s27 + $0x1690] sm:$0xff] }
  0x58   : > { %490 = vst [vmem:[%s3770_s28 + $0x480] sm:$0xff] %v489_v16  ;;  %492 = vst [vmem:[%s3770_s28 + $0x488] sm:$0xff] %v491_v17  ;;  %v495_v19 = vld [vmem:[%s3765_s27 + $0x1698] sm:$0xff]  ;;  %v497_v20 = vld [vmem:[%s3765_s27 + $0x16a0] sm:$0xff] }
  0x59   : > { %494 = vst [vmem:[%s3770_s28 + $0x490] sm:$0xff] %v493_v18  ;;  %v499_v21 = vld [vmem:[%s3765_s27 + $0x16a8] sm:$0xff]  ;;  %496 = vst [vmem:[%s3770_s28 + $0x498] sm:$0xff] %v495_v19  ;;  %v501_v22 = vld [vmem:[%s3765_s27 + $0x16b0] sm:$0xff] }
  0x5a   : > { %498 = vst [vmem:[%s3770_s28 + $0x4a0] sm:$0xff] %v497_v20  ;;  %500 = vst [vmem:[%s3770_s28 + $0x4a8] sm:$0xff] %v499_v21  ;;  %v503_v23 = vld [vmem:[%s3765_s27 + $0x16b8] sm:$0xff]  ;;  %v505_v24 = vld [vmem:[%s3765_s27 + $0x16c0] sm:$0xff] }
  0x5b   : > { %502 = vst [vmem:[%s3770_s28 + $0x4b0] sm:$0xff] %v501_v22  ;;  %504 = vst [vmem:[%s3770_s28 + $0x4b8] sm:$0xff] %v503_v23  ;;  %v507_v25 = vld [vmem:[%s3765_s27 + $0x16c8] sm:$0xff]  ;;  %v509_v26 = vld [vmem:[%s3765_s27 + $0x16d0] sm:$0xff] }
  0x5c   : > { %506 = vst [vmem:[%s3770_s28 + $0x4c0] sm:$0xff] %v505_v24  ;;  %v511_v27 = vld [vmem:[%s3765_s27 + $0x16d8] sm:$0xff]  ;;  %508 = vst [vmem:[%s3770_s28 + $0x4c8] sm:$0xff] %v507_v25  ;;  %v513_v28 = vld [vmem:[%s3765_s27 + $0x16e0] sm:$0xff] }
  0x5d   : > { %510 = vst [vmem:[%s3770_s28 + $0x4d0] sm:$0xff] %v509_v26  ;;  %512 = vst [vmem:[%s3770_s28 + $0x4d8] sm:$0xff] %v511_v27  ;;  %v515_v29 = vld [vmem:[%s3765_s27 + $0x16e8] sm:$0xff]  ;;  %v517_v30 = vld [vmem:[%s3765_s27 + $0x16f0] sm:$0xff] }
  0x5e   : > { %514 = vst [vmem:[%s3770_s28 + $0x4e0] sm:$0xff] %v513_v28  ;;  %516 = vst [vmem:[%s3770_s28 + $0x4e8] sm:$0xff] %v515_v29  ;;  %v519_v31 = vld [vmem:[%s3765_s27 + $0x16f8] sm:$0xff]  ;;  %v521_v32 = vld [vmem:[%s3765_s27 + $0x1900] sm:$0xff] }
  0x5f   : > { %518 = vst [vmem:[%s3770_s28 + $0x4f0] sm:$0xff] %v517_v30  ;;  %v523_v33 = vld [vmem:[%s3765_s27 + $0x1908] sm:$0xff]  ;;  %520 = vst [vmem:[%s3770_s28 + $0x4f8] sm:$0xff] %v519_v31  ;;  %v525_v34 = vld [vmem:[%s3765_s27 + $0x1910] sm:$0xff] }
  0x60   : > { %522 = vst [vmem:[%s3770_s28 + $0x500] sm:$0xff] %v521_v32  ;;  %524 = vst [vmem:[%s3770_s28 + $0x508] sm:$0xff] %v523_v33  ;;  %v527_v35 = vld [vmem:[%s3765_s27 + $0x1918] sm:$0xff]  ;;  %v529_v36 = vld [vmem:[%s3765_s27 + $0x1920] sm:$0xff] }
  0x61   : > { %526 = vst [vmem:[%s3770_s28 + $0x510] sm:$0xff] %v525_v34  ;;  %528 = vst [vmem:[%s3770_s28 + $0x518] sm:$0xff] %v527_v35  ;;  %v531_v37 = vld [vmem:[%s3765_s27 + $0x1928] sm:$0xff]  ;;  %v533_v38 = vld [vmem:[%s3765_s27 + $0x1930] sm:$0xff] }
  0x62   : > { %530 = vst [vmem:[%s3770_s28 + $0x520] sm:$0xff] %v529_v36  ;;  %v535_v39 = vld [vmem:[%s3765_s27 + $0x1938] sm:$0xff]  ;;  %532 = vst [vmem:[%s3770_s28 + $0x528] sm:$0xff] %v531_v37  ;;  %v537_v40 = vld [vmem:[%s3765_s27 + $0x1940] sm:$0xff] }
  0x63   : > { %534 = vst [vmem:[%s3770_s28 + $0x530] sm:$0xff] %v533_v38  ;;  %536 = vst [vmem:[%s3770_s28 + $0x538] sm:$0xff] %v535_v39  ;;  %v539_v41 = vld [vmem:[%s3765_s27 + $0x1948] sm:$0xff]  ;;  %v541_v42 = vld [vmem:[%s3765_s27 + $0x1950] sm:$0xff] }
  0x64   : > { %538 = vst [vmem:[%s3770_s28 + $0x540] sm:$0xff] %v537_v40  ;;  %540 = vst [vmem:[%s3770_s28 + $0x548] sm:$0xff] %v539_v41  ;;  %v543_v43 = vld [vmem:[%s3765_s27 + $0x1958] sm:$0xff]  ;;  %v545_v44 = vld [vmem:[%s3765_s27 + $0x1960] sm:$0xff] }
  0x65   : > { %542 = vst [vmem:[%s3770_s28 + $0x550] sm:$0xff] %v541_v42  ;;  %v547_v45 = vld [vmem:[%s3765_s27 + $0x1968] sm:$0xff]  ;;  %544 = vst [vmem:[%s3770_s28 + $0x558] sm:$0xff] %v543_v43  ;;  %v549_v46 = vld [vmem:[%s3765_s27 + $0x1970] sm:$0xff] }
  0x66   : > { %546 = vst [vmem:[%s3770_s28 + $0x560] sm:$0xff] %v545_v44  ;;  %548 = vst [vmem:[%s3770_s28 + $0x568] sm:$0xff] %v547_v45  ;;  %v551_v47 = vld [vmem:[%s3765_s27 + $0x1978] sm:$0xff]  ;;  %v553_v48 = vld [vmem:[%s3765_s27 + $0x1b80] sm:$0xff] }
  0x67   : > { %550 = vst [vmem:[%s3770_s28 + $0x570] sm:$0xff] %v549_v46  ;;  %552 = vst [vmem:[%s3770_s28 + $0x578] sm:$0xff] %v551_v47  ;;  %v555_v49 = vld [vmem:[%s3765_s27 + $0x1b88] sm:$0xff]  ;;  %v557_v50 = vld [vmem:[%s3765_s27 + $0x1b90] sm:$0xff] }
  0x68   : > { %554 = vst [vmem:[%s3770_s28 + $0x580] sm:$0xff] %v553_v48  ;;  %v559_v51 = vld [vmem:[%s3765_s27 + $0x1b98] sm:$0xff]  ;;  %556 = vst [vmem:[%s3770_s28 + $0x588] sm:$0xff] %v555_v49  ;;  %v561_v52 = vld [vmem:[%s3765_s27 + $0x1ba0] sm:$0xff] }
  0x69   : > { %558 = vst [vmem:[%s3770_s28 + $0x590] sm:$0xff] %v557_v50  ;;  %560 = vst [vmem:[%s3770_s28 + $0x598] sm:$0xff] %v559_v51  ;;  %v563_v53 = vld [vmem:[%s3765_s27 + $0x1ba8] sm:$0xff]  ;;  %v565_v54 = vld [vmem:[%s3765_s27 + $0x1bb0] sm:$0xff] }
  0x6a   : > { %562 = vst [vmem:[%s3770_s28 + $0x5a0] sm:$0xff] %v561_v52  ;;  %564 = vst [vmem:[%s3770_s28 + $0x5a8] sm:$0xff] %v563_v53  ;;  %v567_v55 = vld [vmem:[%s3765_s27 + $0x1bb8] sm:$0xff]  ;;  %v569_v56 = vld [vmem:[%s3765_s27 + $0x1bc0] sm:$0xff] }
  0x6b   : > { %566 = vst [vmem:[%s3770_s28 + $0x5b0] sm:$0xff] %v565_v54  ;;  %v571_v57 = vld [vmem:[%s3765_s27 + $0x1bc8] sm:$0xff]  ;;  %568 = vst [vmem:[%s3770_s28 + $0x5b8] sm:$0xff] %v567_v55  ;;  %v573_v58 = vld [vmem:[%s3765_s27 + $0x1bd0] sm:$0xff] }
  0x6c   : > { %570 = vst [vmem:[%s3770_s28 + $0x5c0] sm:$0xff] %v569_v56  ;;  %572 = vst [vmem:[%s3770_s28 + $0x5c8] sm:$0xff] %v571_v57  ;;  %v575_v59 = vld [vmem:[%s3765_s27 + $0x1bd8] sm:$0xff]  ;;  %v577_v60 = vld [vmem:[%s3765_s27 + $0x1be0] sm:$0xff] }
  0x6d   : > { %574 = vst [vmem:[%s3770_s28 + $0x5d0] sm:$0xff] %v573_v58  ;;  %576 = vst [vmem:[%s3770_s28 + $0x5d8] sm:$0xff] %v575_v59  ;;  %v579_v61 = vld [vmem:[%s3765_s27 + $0x1be8] sm:$0xff]  ;;  %v581_v62 = vld [vmem:[%s3765_s27 + $0x1bf0] sm:$0xff] }
  0x6e   : > { %578 = vst [vmem:[%s3770_s28 + $0x5e0] sm:$0xff] %v577_v60  ;;  %v583_v63 = vld [vmem:[%s3765_s27 + $0x1bf8] sm:$0xff]  ;;  %580 = vst [vmem:[%s3770_s28 + $0x5e8] sm:$0xff] %v579_v61  ;;  %v585_v0 = vld [vmem:[%s3765_s27 + $0x1e00] sm:$0xff] }
  0x6f   : > { %582 = vst [vmem:[%s3770_s28 + $0x5f0] sm:$0xff] %v581_v62  ;;  %584 = vst [vmem:[%s3770_s28 + $0x5f8] sm:$0xff] %v583_v63  ;;  %v587_v1 = vld [vmem:[%s3765_s27 + $0x1e08] sm:$0xff]  ;;  %v589_v2 = vld [vmem:[%s3765_s27 + $0x1e10] sm:$0xff] }
  0x70   : > { %586 = vst [vmem:[%s3770_s28 + $0x600] sm:$0xff] %v585_v0  ;;  %588 = vst [vmem:[%s3770_s28 + $0x608] sm:$0xff] %v587_v1  ;;  %v591_v3 = vld [vmem:[%s3765_s27 + $0x1e18] sm:$0xff]  ;;  %v593_v4 = vld [vmem:[%s3765_s27 + $0x1e20] sm:$0xff] }
  0x71   : > { %590 = vst [vmem:[%s3770_s28 + $0x610] sm:$0xff] %v589_v2  ;;  %v595_v5 = vld [vmem:[%s3765_s27 + $0x1e28] sm:$0xff]  ;;  %592 = vst [vmem:[%s3770_s28 + $0x618] sm:$0xff] %v591_v3  ;;  %v597_v6 = vld [vmem:[%s3765_s27 + $0x1e30] sm:$0xff] }
  0x72   : > { %594 = vst [vmem:[%s3770_s28 + $0x620] sm:$0xff] %v593_v4  ;;  %596 = vst [vmem:[%s3770_s28 + $0x628] sm:$0xff] %v595_v5  ;;  %v599_v7 = vld [vmem:[%s3765_s27 + $0x1e38] sm:$0xff]  ;;  %v601_v8 = vld [vmem:[%s3765_s27 + $0x1e40] sm:$0xff] }
  0x73   : > { %598 = vst [vmem:[%s3770_s28 + $0x630] sm:$0xff] %v597_v6  ;;  %600 = vst [vmem:[%s3770_s28 + $0x638] sm:$0xff] %v599_v7  ;;  %v603_v9 = vld [vmem:[%s3765_s27 + $0x1e48] sm:$0xff]  ;;  %v605_v10 = vld [vmem:[%s3765_s27 + $0x1e50] sm:$0xff] }
  0x74   : > { %602 = vst [vmem:[%s3770_s28 + $0x640] sm:$0xff] %v601_v8  ;;  %v607_v11 = vld [vmem:[%s3765_s27 + $0x1e58] sm:$0xff]  ;;  %604 = vst [vmem:[%s3770_s28 + $0x648] sm:$0xff] %v603_v9  ;;  %v609_v12 = vld [vmem:[%s3765_s27 + $0x1e60] sm:$0xff] }
  0x75   : > { %606 = vst [vmem:[%s3770_s28 + $0x650] sm:$0xff] %v605_v10  ;;  %608 = vst [vmem:[%s3770_s28 + $0x658] sm:$0xff] %v607_v11  ;;  %v611_v13 = vld [vmem:[%s3765_s27 + $0x1e68] sm:$0xff]  ;;  %v613_v14 = vld [vmem:[%s3765_s27 + $0x1e70] sm:$0xff] }
  0x76   : > { %610 = vst [vmem:[%s3770_s28 + $0x660] sm:$0xff] %v609_v12  ;;  %612 = vst [vmem:[%s3770_s28 + $0x668] sm:$0xff] %v611_v13  ;;  %v615_v15 = vld [vmem:[%s3765_s27 + $0x1e78] sm:$0xff]  ;;  %v617_v16 = vld [vmem:[%s3765_s27 + $0x2080] sm:$0xff] }
  0x77   : > { %614 = vst [vmem:[%s3770_s28 + $0x670] sm:$0xff] %v613_v14  ;;  %v619_v17 = vld [vmem:[%s3765_s27 + $0x2088] sm:$0xff]  ;;  %616 = vst [vmem:[%s3770_s28 + $0x678] sm:$0xff] %v615_v15  ;;  %v621_v18 = vld [vmem:[%s3765_s27 + $0x2090] sm:$0xff] }
  0x78   : > { %618 = vst [vmem:[%s3770_s28 + $0x680] sm:$0xff] %v617_v16  ;;  %620 = vst [vmem:[%s3770_s28 + $0x688] sm:$0xff] %v619_v17  ;;  %v623_v19 = vld [vmem:[%s3765_s27 + $0x2098] sm:$0xff]  ;;  %v625_v20 = vld [vmem:[%s3765_s27 + $0x20a0] sm:$0xff] }
  0x79   : > { %622 = vst [vmem:[%s3770_s28 + $0x690] sm:$0xff] %v621_v18  ;;  %624 = vst [vmem:[%s3770_s28 + $0x698] sm:$0xff] %v623_v19  ;;  %v627_v21 = vld [vmem:[%s3765_s27 + $0x20a8] sm:$0xff]  ;;  %v629_v22 = vld [vmem:[%s3765_s27 + $0x20b0] sm:$0xff] }
  0x7a   : > { %626 = vst [vmem:[%s3770_s28 + $0x6a0] sm:$0xff] %v625_v20  ;;  %v631_v23 = vld [vmem:[%s3765_s27 + $0x20b8] sm:$0xff]  ;;  %628 = vst [vmem:[%s3770_s28 + $0x6a8] sm:$0xff] %v627_v21  ;;  %v633_v24 = vld [vmem:[%s3765_s27 + $0x20c0] sm:$0xff] }
  0x7b   : > { %630 = vst [vmem:[%s3770_s28 + $0x6b0] sm:$0xff] %v629_v22  ;;  %632 = vst [vmem:[%s3770_s28 + $0x6b8] sm:$0xff] %v631_v23  ;;  %v635_v25 = vld [vmem:[%s3765_s27 + $0x20c8] sm:$0xff]  ;;  %v637_v26 = vld [vmem:[%s3765_s27 + $0x20d0] sm:$0xff] }
  0x7c   : > { %634 = vst [vmem:[%s3770_s28 + $0x6c0] sm:$0xff] %v633_v24  ;;  %636 = vst [vmem:[%s3770_s28 + $0x6c8] sm:$0xff] %v635_v25  ;;  %v639_v27 = vld [vmem:[%s3765_s27 + $0x20d8] sm:$0xff]  ;;  %v641_v28 = vld [vmem:[%s3765_s27 + $0x20e0] sm:$0xff] }
  0x7d   : > { %638 = vst [vmem:[%s3770_s28 + $0x6d0] sm:$0xff] %v637_v26  ;;  %v643_v29 = vld [vmem:[%s3765_s27 + $0x20e8] sm:$0xff]  ;;  %640 = vst [vmem:[%s3770_s28 + $0x6d8] sm:$0xff] %v639_v27  ;;  %v645_v30 = vld [vmem:[%s3765_s27 + $0x20f0] sm:$0xff] }
  0x7e   : > { %642 = vst [vmem:[%s3770_s28 + $0x6e0] sm:$0xff] %v641_v28  ;;  %644 = vst [vmem:[%s3770_s28 + $0x6e8] sm:$0xff] %v643_v29  ;;  %v647_v31 = vld [vmem:[%s3765_s27 + $0x20f8] sm:$0xff]  ;;  %v649_v32 = vld [vmem:[%s3765_s27 + $0x2300] sm:$0xff] }
  0x7f   : > { %646 = vst [vmem:[%s3770_s28 + $0x6f0] sm:$0xff] %v645_v30  ;;  %648 = vst [vmem:[%s3770_s28 + $0x6f8] sm:$0xff] %v647_v31  ;;  %v651_v33 = vld [vmem:[%s3765_s27 + $0x2308] sm:$0xff]  ;;  %v653_v34 = vld [vmem:[%s3765_s27 + $0x2310] sm:$0xff] }
  0x80   : > { %650 = vst [vmem:[%s3770_s28 + $0x700] sm:$0xff] %v649_v32  ;;  %v655_v35 = vld [vmem:[%s3765_s27 + $0x2318] sm:$0xff]  ;;  %652 = vst [vmem:[%s3770_s28 + $0x708] sm:$0xff] %v651_v33  ;;  %v657_v36 = vld [vmem:[%s3765_s27 + $0x2320] sm:$0xff] }
  0x81   : > { %654 = vst [vmem:[%s3770_s28 + $0x710] sm:$0xff] %v653_v34  ;;  %656 = vst [vmem:[%s3770_s28 + $0x718] sm:$0xff] %v655_v35  ;;  %v659_v37 = vld [vmem:[%s3765_s27 + $0x2328] sm:$0xff]  ;;  %v661_v38 = vld [vmem:[%s3765_s27 + $0x2330] sm:$0xff] }
  0x82   : > { %658 = vst [vmem:[%s3770_s28 + $0x720] sm:$0xff] %v657_v36  ;;  %660 = vst [vmem:[%s3770_s28 + $0x728] sm:$0xff] %v659_v37  ;;  %v663_v39 = vld [vmem:[%s3765_s27 + $0x2338] sm:$0xff]  ;;  %v665_v40 = vld [vmem:[%s3765_s27 + $0x2340] sm:$0xff] }
  0x83   : > { %662 = vst [vmem:[%s3770_s28 + $0x730] sm:$0xff] %v661_v38  ;;  %v667_v41 = vld [vmem:[%s3765_s27 + $0x2348] sm:$0xff]  ;;  %664 = vst [vmem:[%s3770_s28 + $0x738] sm:$0xff] %v663_v39  ;;  %v669_v42 = vld [vmem:[%s3765_s27 + $0x2350] sm:$0xff] }
  0x84   : > { %666 = vst [vmem:[%s3770_s28 + $0x740] sm:$0xff] %v665_v40  ;;  %668 = vst [vmem:[%s3770_s28 + $0x748] sm:$0xff] %v667_v41  ;;  %v671_v43 = vld [vmem:[%s3765_s27 + $0x2358] sm:$0xff]  ;;  %v673_v44 = vld [vmem:[%s3765_s27 + $0x2360] sm:$0xff] }
  0x85   : > { %670 = vst [vmem:[%s3770_s28 + $0x750] sm:$0xff] %v669_v42  ;;  %672 = vst [vmem:[%s3770_s28 + $0x758] sm:$0xff] %v671_v43  ;;  %v675_v45 = vld [vmem:[%s3765_s27 + $0x2368] sm:$0xff]  ;;  %v677_v46 = vld [vmem:[%s3765_s27 + $0x2370] sm:$0xff] }
  0x86   : > { %674 = vst [vmem:[%s3770_s28 + $0x760] sm:$0xff] %v673_v44  ;;  %v679_v47 = vld [vmem:[%s3765_s27 + $0x2378] sm:$0xff]  ;;  %676 = vst [vmem:[%s3770_s28 + $0x768] sm:$0xff] %v675_v45  ;;  %v681_v48 = vld [vmem:[%s3765_s27 + $0x2580] sm:$0xff] }
  0x87   : > { %678 = vst [vmem:[%s3770_s28 + $0x770] sm:$0xff] %v677_v46  ;;  %680 = vst [vmem:[%s3770_s28 + $0x778] sm:$0xff] %v679_v47  ;;  %v683_v49 = vld [vmem:[%s3765_s27 + $0x2588] sm:$0xff]  ;;  %v685_v50 = vld [vmem:[%s3765_s27 + $0x2590] sm:$0xff] }
  0x88   : > { %682 = vst [vmem:[%s3770_s28 + $0x780] sm:$0xff] %v681_v48  ;;  %684 = vst [vmem:[%s3770_s28 + $0x788] sm:$0xff] %v683_v49  ;;  %v687_v51 = vld [vmem:[%s3765_s27 + $0x2598] sm:$0xff]  ;;  %v689_v52 = vld [vmem:[%s3765_s27 + $0x25a0] sm:$0xff] }
  0x89   : > { %686 = vst [vmem:[%s3770_s28 + $0x790] sm:$0xff] %v685_v50  ;;  %v691_v53 = vld [vmem:[%s3765_s27 + $0x25a8] sm:$0xff]  ;;  %688 = vst [vmem:[%s3770_s28 + $0x798] sm:$0xff] %v687_v51  ;;  %v693_v54 = vld [vmem:[%s3765_s27 + $0x25b0] sm:$0xff] }
  0x8a   : > { %690 = vst [vmem:[%s3770_s28 + $0x7a0] sm:$0xff] %v689_v52  ;;  %692 = vst [vmem:[%s3770_s28 + $0x7a8] sm:$0xff] %v691_v53  ;;  %v695_v55 = vld [vmem:[%s3765_s27 + $0x25b8] sm:$0xff]  ;;  %v697_v56 = vld [vmem:[%s3765_s27 + $0x25c0] sm:$0xff] }
  0x8b   : > { %694 = vst [vmem:[%s3770_s28 + $0x7b0] sm:$0xff] %v693_v54  ;;  %696 = vst [vmem:[%s3770_s28 + $0x7b8] sm:$0xff] %v695_v55  ;;  %v699_v57 = vld [vmem:[%s3765_s27 + $0x25c8] sm:$0xff]  ;;  %v701_v58 = vld [vmem:[%s3765_s27 + $0x25d0] sm:$0xff] }
  0x8c   : > { %698 = vst [vmem:[%s3770_s28 + $0x7c0] sm:$0xff] %v697_v56  ;;  %v703_v59 = vld [vmem:[%s3765_s27 + $0x25d8] sm:$0xff]  ;;  %700 = vst [vmem:[%s3770_s28 + $0x7c8] sm:$0xff] %v699_v57  ;;  %v705_v60 = vld [vmem:[%s3765_s27 + $0x25e0] sm:$0xff] }
  0x8d   : > { %702 = vst [vmem:[%s3770_s28 + $0x7d0] sm:$0xff] %v701_v58  ;;  %704 = vst [vmem:[%s3770_s28 + $0x7d8] sm:$0xff] %v703_v59  ;;  %v707_v61 = vld [vmem:[%s3765_s27 + $0x25e8] sm:$0xff]  ;;  %v709_v62 = vld [vmem:[%s3765_s27 + $0x25f0] sm:$0xff] }
  0x8e   : > { %706 = vst [vmem:[%s3770_s28 + $0x7e0] sm:$0xff] %v705_v60  ;;  %708 = vst [vmem:[%s3770_s28 + $0x7e8] sm:$0xff] %v707_v61  ;;  %v711_v63 = vld [vmem:[%s3765_s27 + $0x25f8] sm:$0xff] }
  0x8f   : > { %710 = vst [vmem:[%s3770_s28 + $0x7f0] sm:$0xff] %v709_v62  ;;  %712 = vst [vmem:[%s3770_s28 + $0x7f8] sm:$0xff] %v711_v63 }
  0x90 PF: > { %p3287_p6 = scmp.ge.s32.totalorder %s3694_s19, 1  ;;  %p717_p7 = scmp.lt.s32.totalorder %s3694_s19, 6 }
  0x92   : > { %p718_p8 = pnand %p3287_p6, %p717_p7 }
  0x93   : > { %s724_s29 = sand.u32 (!%p718_p8), 1, %s3678_s15   ;;  %s3289_s10 = sshll.u32 (!%p718_p8), %s3686_s17, 5 }
  0x94   : > { %721 = sbr.rel (%p718_p8) target bundleno = 624 (0x270), region = 55  ;;  %s3288_s30 = sshll.u32 (!%p718_p8), %s724_s29, 11 }
  0x95   : > { %s4286_s5 = scalar_lea.vmem (!%p718_p8), [#allocation3], %s3288_s30  ;;  %p4562_p9 = scmp.lt.s32.totalorder (!%p718_p8), %s3289_s10, 159 }
  0x99   : > { %v3696_v0 = vmov 0   ;;  %v1059_v1 = vld [vmem:[%s4286_s5 + $0x700] sm:$0xff]  ;;  %v1060_v3 = vld [vmem:[%s4286_s5 + $0x708] sm:$0xff]  ;;  %v1061_v63 = vld [vmem:[%s4286_s5 + $0x710] sm:$0xff]  ;;  %s4660_s10 = smov (!%p4562_p9, %s3289_s10), 159 }
  0x9a   : > { %2403 = vmatprep.mubr.bf16.mxu0 %v3696_v0  ;;  %2444 = vmatprep.mubr.bf16.mxu1 %v3696_v0  ;;  %v1075_v2 = vld [vmem:[%s4286_s5 + $0x780] sm:$0xff]  ;;  %v1076_v5 = vld [vmem:[%s4286_s5 + $0x788] sm:$0xff]  ;;  %s3290_s12 = sshll.u32 %s4660_s10, 3 }
  0x9b   : > { %v3516_v4 = vcombine.high %v1059_v1, %v1075_v2  ;;  %v3515_v6 = vcombine.low %v1059_v1, %v1075_v2  ;;  %v1027_v7 = vld [vmem:[%s4286_s5 + $0x600] sm:$0xff]  ;;  %v3518_v9 = vcombine.high %v1060_v3, %v1076_v5  ;;  %v3517_v10 = vcombine.low %v1060_v3, %v1076_v5  ;;  %v1028_v12 = vld [vmem:[%s4286_s5 + $0x608] sm:$0xff]  ;;  %v1077_v1 = vld [vmem:[%s4286_s5 + $0x790] sm:$0xff]  ;;  %s4586_s15 = scalar_lea.vmem %s4651_s4, %s3290_s12 }
  0x9c   : > { %v1043_v8 = vld [vmem:[%s4286_s5 + $0x680] sm:$0xff]  ;;  %v1044_v13 = vld [vmem:[%s4286_s5 + $0x688] sm:$0xff]  ;;  %v1062_v2 = vld [vmem:[%s4286_s5 + $0x718] sm:$0xff] }
  0x9d   : > { %v3484_v11 = vcombine.high %v1027_v7, %v1043_v8  ;;  %v995_v14 = vld [vmem:[%s4286_s5 + $0x500] sm:$0xff]  ;;  %2371 = vmatprep.subr.bf16.mxu0 %v3516_v4  ;;  %v3486_v15 = vcombine.high %v1028_v12, %v1044_v13  ;;  %v996_v17 = vld [vmem:[%s4286_s5 + $0x508] sm:$0xff]  ;;  %2412 = vmatprep.subr.bf16.mxu1 %v3518_v9  ;;  %v3483_v19 = vcombine.low %v1027_v7, %v1043_v8  ;;  %v1078_v3 = vld [vmem:[%s4286_s5 + $0x798] sm:$0xff] }
  0x9e   : > { %v1011_v16 = vld [vmem:[%s4286_s5 + $0x580] sm:$0xff]  ;;  %v1012_v18 = vld [vmem:[%s4286_s5 + $0x588] sm:$0xff]  ;;  %2372 = vmatpush1.bf16.msra.mxu0 %v3515_v6  ;;  %2413 = vmatpush1.bf16.msra.mxu1 %v3517_v10  ;;  %v3485_v20 = vcombine.low %v1028_v12, %v1044_v13  ;;  %v3520_v6 = vcombine.high %v1061_v63, %v1077_v1  ;;  %v3522_v7 = vcombine.high %v1062_v2, %v1078_v3  ;;  %v1029_v8 = vld [vmem:[%s4286_s5 + $0x610] sm:$0xff] }
  0x9f   : > { %2373 = vmatprep.subr.bf16.mxu0 %v3484_v11  ;;  %v3452_v21 = vcombine.high %v995_v14, %v1011_v16  ;;  %2414 = vmatprep.subr.bf16.mxu1 %v3486_v15  ;;  %v3454_v22 = vcombine.high %v996_v17, %v1012_v18  ;;  %v963_v23 = vld [vmem:[%s4286_s5 + $0x400] sm:$0xff]  ;;  %v964_v25 = vld [vmem:[%s4286_s5 + $0x408] sm:$0xff]  ;;  %v3451_v27 = vcombine.low %v995_v14, %v1011_v16  ;;  %v1045_v9 = vld [vmem:[%s4286_s5 + $0x690] sm:$0xff] }
  0xa0   : > { %v979_v24 = vld [vmem:[%s4286_s5 + $0x480] sm:$0xff]  ;;  %v980_v26 = vld [vmem:[%s4286_s5 + $0x488] sm:$0xff]  ;;  %v3453_v28 = vcombine.low %v996_v17, %v1012_v18  ;;  %v1030_v10 = vld [vmem:[%s4286_s5 + $0x618] sm:$0xff]  ;;  %v3519_v13 = vcombine.low %v1061_v63, %v1077_v1  ;;  %v3521_v14 = vcombine.low %v1062_v2, %v1078_v3  ;;  %v3488_v15 = vcombine.high %v1029_v8, %v1045_v9 }
  0xa1   : > { %v3420_v29 = vcombine.high %v963_v23, %v979_v24  ;;  %v3422_v30 = vcombine.high %v964_v25, %v980_v26  ;;  %v931_v31 = vld [vmem:[%s4286_s5 + $0x300] sm:$0xff]  ;;  %v932_v33 = vld [vmem:[%s4286_s5 + $0x308] sm:$0xff]  ;;  %v3419_v35 = vcombine.low %v963_v23, %v979_v24  ;;  %v3421_v36 = vcombine.low %v964_v25, %v980_v26  ;;  %v1046_v11 = vld [vmem:[%s4286_s5 + $0x698] sm:$0xff] }
  0xa2   : > { %2374 = vmatpush1.bf16.msra.mxu0 %v3483_v19  ;;  %2415 = vmatpush1.bf16.msra.mxu1 %v3485_v20  ;;  %v947_v32 = vld [vmem:[%s4286_s5 + $0x380] sm:$0xff]  ;;  %v948_v34 = vld [vmem:[%s4286_s5 + $0x388] sm:$0xff]  ;;  %v3490_v16 = vcombine.high %v1030_v10, %v1046_v11  ;;  %v997_v17 = vld [vmem:[%s4286_s5 + $0x510] sm:$0xff] }
  0xa3   : > { %2375 = vmatprep.subr.bf16.mxu0 %v3452_v21  ;;  %2416 = vmatprep.subr.bf16.mxu1 %v3454_v22  ;;  %v3388_v37 = vcombine.high %v931_v31, %v947_v32  ;;  %v3390_v38 = vcombine.high %v932_v33, %v948_v34  ;;  %v899_v39 = vld [vmem:[%s4286_s5 + $0x200] sm:$0xff]  ;;  %v900_v41 = vld [vmem:[%s4286_s5 + $0x208] sm:$0xff]  ;;  %v3387_v43 = vcombine.low %v931_v31, %v947_v32  ;;  %v1013_v18 = vld [vmem:[%s4286_s5 + $0x590] sm:$0xff] }
  0xa4   : > { %v915_v40 = vld [vmem:[%s4286_s5 + $0x280] sm:$0xff]  ;;  %v916_v42 = vld [vmem:[%s4286_s5 + $0x288] sm:$0xff]  ;;  %v3389_v44 = vcombine.low %v932_v33, %v948_v34  ;;  %v998_v19 = vld [vmem:[%s4286_s5 + $0x518] sm:$0xff]  ;;  %v3487_v21 = vcombine.low %v1029_v8, %v1045_v9  ;;  %v3489_v22 = vcombine.low %v1030_v10, %v1046_v11  ;;  %v3456_v23 = vcombine.high %v997_v17, %v1013_v18 }
  0xa5   : > { %v3356_v45 = vcombine.high %v899_v39, %v915_v40  ;;  %v3358_v46 = vcombine.high %v900_v41, %v916_v42  ;;  %v867_v47 = vld [vmem:[%s4286_s5 + $0x100] sm:$0xff]  ;;  %v868_v49 = vld [vmem:[%s4286_s5 + $0x108] sm:$0xff]  ;;  %v3355_v51 = vcombine.low %v899_v39, %v915_v40  ;;  %v3357_v52 = vcombine.low %v900_v41, %v916_v42  ;;  %v1014_v20 = vld [vmem:[%s4286_s5 + $0x598] sm:$0xff] }
  0xa6   : > { %2376 = vmatpush1.bf16.msra.mxu0 %v3451_v27  ;;  %2417 = vmatpush1.bf16.msra.mxu1 %v3453_v28  ;;  %v883_v48 = vld [vmem:[%s4286_s5 + $0x180] sm:$0xff]  ;;  %v884_v50 = vld [vmem:[%s4286_s5 + $0x188] sm:$0xff]  ;;  %v3458_v24 = vcombine.high %v998_v19, %v1014_v20  ;;  %v965_v25 = vld [vmem:[%s4286_s5 + $0x410] sm:$0xff] }
  0xa7   : > { %2377 = vmatprep.subr.bf16.mxu0 %v3420_v29  ;;  %2418 = vmatprep.subr.bf16.mxu1 %v3422_v30  ;;  %v3324_v53 = vcombine.high %v867_v47, %v883_v48  ;;  %v3326_v54 = vcombine.high %v868_v49, %v884_v50  ;;  %v835_v55 = vld [vmem:[%s4286_s5] sm:$0xff]  ;;  %v836_v57 = vld [vmem:[%s4286_s5 + $0x8] sm:$0xff]  ;;  %v3323_v59 = vcombine.low %v867_v47, %v883_v48  ;;  %v981_v26 = vld [vmem:[%s4286_s5 + $0x490] sm:$0xff] }
  0xa8   : > { %v851_v56 = vld [vmem:[%s4286_s5 + $0x80] sm:$0xff]  ;;  %v852_v58 = vld [vmem:[%s4286_s5 + $0x88] sm:$0xff]  ;;  %v3325_v60 = vcombine.low %v868_v49, %v884_v50  ;;  %v966_v27 = vld [vmem:[%s4286_s5 + $0x418] sm:$0xff]  ;;  %v3455_v29 = vcombine.low %v997_v17, %v1013_v18  ;;  %v3457_v30 = vcombine.low %v998_v19, %v1014_v20  ;;  %v3424_v31 = vcombine.high %v965_v25, %v981_v26 }
  0xa9   : > { %v3292_v61 = vcombine.high %v835_v55, %v851_v56  ;;  %v3294_v62 = vcombine.high %v836_v57, %v852_v58  ;;  %v3291_v4 = vcombine.low %v835_v55, %v851_v56  ;;  %v3293_v5 = vcombine.low %v836_v57, %v852_v58  ;;  %v4331_v12 = vld [vmem:[%s4647_s0] sm:$0xf]  ;;  %v982_v28 = vld [vmem:[%s4286_s5 + $0x498] sm:$0xff]  ;;  %v933_v33 = vld [vmem:[%s4286_s5 + $0x310] sm:$0xff] }
  0xaa   : > { %2378 = vmatpush1.bf16.msra.mxu0 %v3419_v35  ;;  %2419 = vmatpush1.bf16.msra.mxu1 %v3421_v36  ;;  %v3426_v32 = vcombine.high %v966_v27, %v982_v28  ;;  %v949_v34 = vld [vmem:[%s4286_s5 + $0x390] sm:$0xff]  ;;  %v934_v35 = vld [vmem:[%s4286_s5 + $0x318] sm:$0xff]  ;;  %v1063_v2 = vld [vmem:[%s4286_s5 + $0x720] sm:$0xff] }
  0xab   : > { %2379 = vmatprep.subr.bf16.mxu0 %v3388_v37  ;;  %2420 = vmatprep.subr.bf16.mxu1 %v3390_v38  ;;  %v950_v36 = vld [vmem:[%s4286_s5 + $0x398] sm:$0xff]  ;;  %v3423_v37 = vcombine.low %v965_v25, %v981_v26  ;;  %v3425_v38 = vcombine.low %v966_v27, %v982_v28  ;;  %v3392_v39 = vcombine.high %v933_v33, %v949_v34  ;;  %v901_v41 = vld [vmem:[%s4286_s5 + $0x210] sm:$0xff]  ;;  %v1079_v3 = vld [vmem:[%s4286_s5 + $0x7a0] sm:$0xff] }
  0xac   : > { %v3394_v40 = vcombine.high %v934_v35, %v950_v36  ;;  %v917_v42 = vld [vmem:[%s4286_s5 + $0x290] sm:$0xff]  ;;  %v3524_v8 = vcombine.high %v1063_v2, %v1079_v3  ;;  %v1031_v10 = vld [vmem:[%s4286_s5 + $0x620] sm:$0xff] }
  0xad   : > { %v3360_v47 = vcombine.high %v901_v41, %v917_v42  ;;  %v869_v49 = vld [vmem:[%s4286_s5 + $0x110] sm:$0xff]  ;;  %v1047_v11 = vld [vmem:[%s4286_s5 + $0x6a0] sm:$0xff] }
  0xae   : > { %2380 = vmatpush1.bf16.msra.mxu0 %v3387_v43  ;;  %2421 = vmatpush1.bf16.msra.mxu1 %v3389_v44  ;;  %v902_v43 = vld [vmem:[%s4286_s5 + $0x218] sm:$0xff]  ;;  %v885_v50 = vld [vmem:[%s4286_s5 + $0x190] sm:$0xff]  ;;  %v3492_v17 = vcombine.high %v1031_v10, %v1047_v11  ;;  %v999_v19 = vld [vmem:[%s4286_s5 + $0x520] sm:$0xff] }
  0xaf   : > { %2381 = vmatprep.subr.bf16.mxu0 %v3356_v45  ;;  %2422 = vmatprep.subr.bf16.mxu1 %v3358_v46  ;;  %v918_v44 = vld [vmem:[%s4286_s5 + $0x298] sm:$0xff]  ;;  %v3391_v45 = vcombine.low %v933_v33, %v949_v34  ;;  %v3393_v46 = vcombine.low %v934_v35, %v950_v36  ;;  %v3328_v55 = vcombine.high %v869_v49, %v885_v50  ;;  %v837_v57 = vld [vmem:[%s4286_s5 + $0x10] sm:$0xff]  ;;  %v1015_v20 = vld [vmem:[%s4286_s5 + $0x5a0] sm:$0xff] }
  0xb0   : > { %v3362_v48 = vcombine.high %v902_v43, %v918_v44  ;;  %v853_v58 = vld [vmem:[%s4286_s5 + $0x90] sm:$0xff]  ;;  %v3460_v25 = vcombine.high %v999_v19, %v1015_v20  ;;  %v967_v27 = vld [vmem:[%s4286_s5 + $0x420] sm:$0xff] }
  0xb1   : > { %v3296_v63 = vcombine.high %v837_v57, %v853_v58  ;;  %v983_v28 = vld [vmem:[%s4286_s5 + $0x4a0] sm:$0xff] }
  0xb2   : > { %2382 = vmatpush1.bf16.msra.mxu0 %v3355_v51  ;;  %2423 = vmatpush1.bf16.msra.mxu1 %v3357_v52  ;;  %v870_v51 = vld [vmem:[%s4286_s5 + $0x118] sm:$0xff]  ;;  %v3428_v33 = vcombine.high %v967_v27, %v983_v28  ;;  %v935_v35 = vld [vmem:[%s4286_s5 + $0x320] sm:$0xff] }
  0xb3   : > { %2383 = vmatprep.subr.bf16.mxu0 %v3324_v53  ;;  %2424 = vmatprep.subr.bf16.mxu1 %v3326_v54  ;;  %v886_v52 = vld [vmem:[%s4286_s5 + $0x198] sm:$0xff]  ;;  %v3359_v53 = vcombine.low %v901_v41, %v917_v42  ;;  %v3361_v54 = vcombine.low %v902_v43, %v918_v44  ;;  %v951_v36 = vld [vmem:[%s4286_s5 + $0x3a0] sm:$0xff] }
  0xb4   : > { %v3330_v56 = vcombine.high %v870_v51, %v886_v52  ;;  %v3396_v41 = vcombine.high %v935_v35, %v951_v36  ;;  %v903_v43 = vld [vmem:[%s4286_s5 + $0x220] sm:$0xff] }
  0xb5   : > { %v919_v44 = vld [vmem:[%s4286_s5 + $0x2a0] sm:$0xff] }
  0xb6   : > { %2384 = vmatpush1.bf16.msra.mxu0 %v3323_v59  ;;  %2425 = vmatpush1.bf16.msra.mxu1 %v3325_v60  ;;  %v838_v59 = vld [vmem:[%s4286_s5 + $0x18] sm:$0xff] }
  0xb7   : > { %2385 = vmatprep.subr.bf16.mxu0 %v3292_v61  ;;  %2426 = vmatprep.subr.bf16.mxu1 %v3294_v62  ;;  %v854_v60 = vld [vmem:[%s4286_s5 + $0x98] sm:$0xff]  ;;  %v3327_v61 = vcombine.low %v869_v49, %v885_v50  ;;  %v3329_v62 = vcombine.low %v870_v51, %v886_v52  ;;  %v3364_v49 = vcombine.high %v903_v43, %v919_v44  ;;  %v871_v51 = vld [vmem:[%s4286_s5 + $0x120] sm:$0xff] }
  0xb8   : > { %v3298_v1 = vcombine.high %v838_v59, %v854_v60  ;;  %v887_v52 = vld [vmem:[%s4286_s5 + $0x1a0] sm:$0xff] }
  0xba   : > { %2386 = vmatpush1.bf16.msra.mxu0 %v3291_v4  ;;  %2427 = vmatpush1.bf16.msra.mxu1 %v3293_v5  ;;  %v1064_v4 = vld [vmem:[%s4286_s5 + $0x728] sm:$0xff] }
  0xbb   : > { %2453 = vmatprep.subr.bf16.mxu0 %v3520_v6  ;;  %2494 = vmatprep.subr.bf16.mxu1 %v3522_v7  ;;  %v1080_v5 = vld [vmem:[%s4286_s5 + $0x7a8] sm:$0xff]  ;;  %v3295_v6 = vcombine.low %v837_v57, %v853_v58  ;;  %v3297_v7 = vcombine.low %v838_v59, %v854_v60  ;;  %v3332_v57 = vcombine.high %v871_v51, %v887_v52  ;;  %v839_v59 = vld [vmem:[%s4286_s5 + $0x20] sm:$0xff] }
  0xbc   : > { %v3526_v9 = vcombine.high %v1064_v4, %v1080_v5  ;;  %v855_v60 = vld [vmem:[%s4286_s5 + $0xa0] sm:$0xff] }
  0xbd   : > { %2404 = vmatmul.mubr.bf16.vlgmr.msra.gmra.mxu0 %v4331_v12  ;;  %2445 = vmatmul.mubr.bf16.vlgmr.msra.gmra.mxu1 %v4331_v12 }
  0xbe   : > { %2454 = vmatpush1.bf16.msra.mxu0 %v3519_v13  ;;  %2495 = vmatpush1.bf16.msra.mxu1 %v3521_v14  ;;  %v1032_v13 = vld [vmem:[%s4286_s5 + $0x628] sm:$0xff] }
  0xbf   : > { %2455 = vmatprep.subr.bf16.mxu0 %v3488_v15  ;;  %2496 = vmatprep.subr.bf16.mxu1 %v3490_v16  ;;  %v1048_v14 = vld [vmem:[%s4286_s5 + $0x6a8] sm:$0xff]  ;;  %v3523_v15 = vcombine.low %v1063_v2, %v1079_v3  ;;  %v3525_v16 = vcombine.low %v1064_v4, %v1080_v5  ;;  %v3300_v2 = vcombine.high %v839_v59, %v855_v60  ;;  %v1065_v4 = vld [vmem:[%s4286_s5 + $0x730] sm:$0xff] }
  0xc0   : > { %2485 = vmatprep.mubr.bf16.mxu0 %v3696_v0  ;;  %2526 = vmatprep.mubr.bf16.mxu1 %v3696_v0  ;;  %v3494_v18 = vcombine.high %v1032_v13, %v1048_v14  ;;  %v1081_v5 = vld [vmem:[%s4286_s5 + $0x7b0] sm:$0xff] }
  0xc2   : > { %2456 = vmatpush1.bf16.msra.mxu0 %v3487_v21  ;;  %2497 = vmatpush1.bf16.msra.mxu1 %v3489_v22  ;;  %v1000_v21 = vld [vmem:[%s4286_s5 + $0x528] sm:$0xff] }
  0xc3   : > { %2457 = vmatprep.subr.bf16.mxu0 %v3456_v23  ;;  %2498 = vmatprep.subr.bf16.mxu1 %v3458_v24  ;;  %v1016_v22 = vld [vmem:[%s4286_s5 + $0x5a8] sm:$0xff]  ;;  %v3491_v23 = vcombine.low %v1031_v10, %v1047_v11  ;;  %v3493_v24 = vcombine.low %v1032_v13, %v1048_v14  ;;  %v3528_v10 = vcombine.high %v1065_v4, %v1081_v5  ;;  %v1033_v13 = vld [vmem:[%s4286_s5 + $0x630] sm:$0xff] }
  0xc4   : > { %v3462_v26 = vcombine.high %v1000_v21, %v1016_v22  ;;  %v1049_v14 = vld [vmem:[%s4286_s5 + $0x6b0] sm:$0xff] }
  0xc6   : > { %2458 = vmatpush1.bf16.msra.mxu0 %v3455_v29  ;;  %2499 = vmatpush1.bf16.msra.mxu1 %v3457_v30  ;;  %v968_v29 = vld [vmem:[%s4286_s5 + $0x428] sm:$0xff] }
  0xc7   : > { %2459 = vmatprep.subr.bf16.mxu0 %v3424_v31  ;;  %2500 = vmatprep.subr.bf16.mxu1 %v3426_v32  ;;  %v984_v30 = vld [vmem:[%s4286_s5 + $0x4a8] sm:$0xff]  ;;  %v3459_v31 = vcombine.low %v999_v19, %v1015_v20  ;;  %v3461_v32 = vcombine.low %v1000_v21, %v1016_v22  ;;  %v3496_v19 = vcombine.high %v1033_v13, %v1049_v14  ;;  %v1001_v21 = vld [vmem:[%s4286_s5 + $0x530] sm:$0xff] }
  0xc8   : > { %v3430_v34 = vcombine.high %v968_v29, %v984_v30  ;;  %v1017_v22 = vld [vmem:[%s4286_s5 + $0x5b0] sm:$0xff] }
  0xca   : > { %2460 = vmatpush1.bf16.msra.mxu0 %v3423_v37  ;;  %2501 = vmatpush1.bf16.msra.mxu1 %v3425_v38  ;;  %v936_v37 = vld [vmem:[%s4286_s5 + $0x328] sm:$0xff] }
  0xcb   : > { %2461 = vmatprep.subr.bf16.mxu0 %v3392_v39  ;;  %2502 = vmatprep.subr.bf16.mxu1 %v3394_v40  ;;  %v952_v38 = vld [vmem:[%s4286_s5 + $0x3a8] sm:$0xff]  ;;  %v3427_v39 = vcombine.low %v967_v27, %v983_v28  ;;  %v3429_v40 = vcombine.low %v968_v29, %v984_v30  ;;  %v3464_v27 = vcombine.high %v1001_v21, %v1017_v22  ;;  %v969_v29 = vld [vmem:[%s4286_s5 + $0x430] sm:$0xff] }
  0xcc   : > { %v3398_v42 = vcombine.high %v936_v37, %v952_v38  ;;  %v985_v30 = vld [vmem:[%s4286_s5 + $0x4b0] sm:$0xff] }
  0xce   : > { %2462 = vmatpush1.bf16.msra.mxu0 %v3391_v45  ;;  %2503 = vmatpush1.bf16.msra.mxu1 %v3393_v46  ;;  %v904_v45 = vld [vmem:[%s4286_s5 + $0x228] sm:$0xff] }
  0xcf   : > { %2463 = vmatprep.subr.bf16.mxu0 %v3360_v47  ;;  %2504 = vmatprep.subr.bf16.mxu1 %v3362_v48  ;;  %v920_v46 = vld [vmem:[%s4286_s5 + $0x2a8] sm:$0xff]  ;;  %v3395_v47 = vcombine.low %v935_v35, %v951_v36  ;;  %v3397_v48 = vcombine.low %v936_v37, %v952_v38  ;;  %v3432_v35 = vcombine.high %v969_v29, %v985_v30  ;;  %v937_v37 = vld [vmem:[%s4286_s5 + $0x330] sm:$0xff] }
  0xd0   : > { %v3366_v50 = vcombine.high %v904_v45, %v920_v46  ;;  %v953_v38 = vld [vmem:[%s4286_s5 + $0x3b0] sm:$0xff] }
  0xd2   : > { %2464 = vmatpush1.bf16.msra.mxu0 %v3359_v53  ;;  %2505 = vmatpush1.bf16.msra.mxu1 %v3361_v54  ;;  %v872_v53 = vld [vmem:[%s4286_s5 + $0x128] sm:$0xff] }
  0xd3   : > { %2465 = vmatprep.subr.bf16.mxu0 %v3328_v55  ;;  %2506 = vmatprep.subr.bf16.mxu1 %v3330_v56  ;;  %v888_v54 = vld [vmem:[%s4286_s5 + $0x1a8] sm:$0xff]  ;;  %v3363_v55 = vcombine.low %v903_v43, %v919_v44  ;;  %v3365_v56 = vcombine.low %v904_v45, %v920_v46  ;;  %v3400_v43 = vcombine.high %v937_v37, %v953_v38  ;;  %v905_v45 = vld [vmem:[%s4286_s5 + $0x230] sm:$0xff] }
  0xd4   : > { %v3334_v58 = vcombine.high %v872_v53, %v888_v54  ;;  %v921_v46 = vld [vmem:[%s4286_s5 + $0x2b0] sm:$0xff] }
  0xd6   : > { %2466 = vmatpush1.bf16.msra.mxu0 %v3327_v61  ;;  %2507 = vmatpush1.bf16.msra.mxu1 %v3329_v62  ;;  %v840_v61 = vld [vmem:[%s4286_s5 + $0x28] sm:$0xff] }
  0xd7   : > { %2467 = vmatprep.subr.bf16.mxu0 %v3296_v63  ;;  %2508 = vmatprep.subr.bf16.mxu1 %v3298_v1  ;;  %v856_v62 = vld [vmem:[%s4286_s5 + $0xa8] sm:$0xff]  ;;  %v3331_v63 = vcombine.low %v871_v51, %v887_v52  ;;  %v3333_v1 = vcombine.low %v872_v53, %v888_v54  ;;  %v3368_v51 = vcombine.high %v905_v45, %v921_v46  ;;  %v873_v53 = vld [vmem:[%s4286_s5 + $0x130] sm:$0xff] }
  0xd8   : > { %v3302_v3 = vcombine.high %v840_v61, %v856_v62  ;;  %v889_v54 = vld [vmem:[%s4286_s5 + $0x1b0] sm:$0xff] }
  0xda   : > { %2468 = vmatpush1.bf16.msra.mxu0 %v3295_v6  ;;  %2509 = vmatpush1.bf16.msra.mxu1 %v3297_v7  ;;  %v1066_v6 = vld [vmem:[%s4286_s5 + $0x738] sm:$0xff] }
  0xdb   : > { %2535 = vmatprep.subr.bf16.mxu0 %v3524_v8  ;;  %2576 = vmatprep.subr.bf16.mxu1 %v3526_v9  ;;  %v1082_v7 = vld [vmem:[%s4286_s5 + $0x7b8] sm:$0xff]  ;;  %v3299_v8 = vcombine.low %v839_v59, %v855_v60  ;;  %v3301_v9 = vcombine.low %v840_v61, %v856_v62  ;;  %v3336_v59 = vcombine.high %v873_v53, %v889_v54  ;;  %v841_v61 = vld [vmem:[%s4286_s5 + $0x30] sm:$0xff] }
  0xdc   : > { %v3530_v11 = vcombine.high %v1066_v6, %v1082_v7  ;;  %v857_v62 = vld [vmem:[%s4286_s5 + $0xb0] sm:$0xff] }
  0xdd   : > { %2486 = vmatmul.mubr.bf16.vlgmr.msra.gmra.mxu0 %v4331_v12  ;;  %2527 = vmatmul.mubr.bf16.vlgmr.msra.gmra.mxu1 %v4331_v12 }
  0xde   : > { %2536 = vmatpush1.bf16.msra.mxu0 %v3523_v15  ;;  %2577 = vmatpush1.bf16.msra.mxu1 %v3525_v16  ;;  %v1034_v15 = vld [vmem:[%s4286_s5 + $0x638] sm:$0xff] }
  0xdf   : > { %2537 = vmatprep.subr.bf16.mxu0 %v3492_v17  ;;  %2578 = vmatprep.subr.bf16.mxu1 %v3494_v18  ;;  %v1050_v16 = vld [vmem:[%s4286_s5 + $0x6b8] sm:$0xff]  ;;  %v3527_v17 = vcombine.low %v1065_v4, %v1081_v5  ;;  %v3529_v18 = vcombine.low %v1066_v6, %v1082_v7  ;;  %v3304_v4 = vcombine.high %v841_v61, %v857_v62  ;;  %v1067_v6 = vld [vmem:[%s4286_s5 + $0x740] sm:$0xff] }
  0xe0   : > { %2567 = vmatprep.mubr.bf16.mxu0 %v3696_v0  ;;  %2608 = vmatprep.mubr.bf16.mxu1 %v3696_v0  ;;  %v3498_v20 = vcombine.high %v1034_v15, %v1050_v16  ;;  %v1083_v7 = vld [vmem:[%s4286_s5 + $0x7c0] sm:$0xff] }
  0xe2   : > { %2538 = vmatpush1.bf16.msra.mxu0 %v3491_v23  ;;  %2579 = vmatpush1.bf16.msra.mxu1 %v3493_v24  ;;  %v1002_v23 = vld [vmem:[%s4286_s5 + $0x538] sm:$0xff] }
  0xe3   : > { %2539 = vmatprep.subr.bf16.mxu0 %v3460_v25  ;;  %2580 = vmatprep.subr.bf16.mxu1 %v3462_v26  ;;  %v1018_v24 = vld [vmem:[%s4286_s5 + $0x5b8] sm:$0xff]  ;;  %v3495_v25 = vcombine.low %v1033_v13, %v1049_v14  ;;  %v3497_v26 = vcombine.low %v1034_v15, %v1050_v16  ;;  %v3532_v13 = vcombine.high %v1067_v6, %v1083_v7  ;;  %v1035_v15 = vld [vmem:[%s4286_s5 + $0x640] sm:$0xff] }
  0xe4   : > { %v3466_v28 = vcombine.high %v1002_v23, %v1018_v24  ;;  %v1051_v16 = vld [vmem:[%s4286_s5 + $0x6c0] sm:$0xff] }
  0xe6   : > { %2540 = vmatpush1.bf16.msra.mxu0 %v3459_v31  ;;  %2581 = vmatpush1.bf16.msra.mxu1 %v3461_v32  ;;  %v970_v31 = vld [vmem:[%s4286_s5 + $0x438] sm:$0xff] }
  0xe7   : > { %2541 = vmatprep.subr.bf16.mxu0 %v3428_v33  ;;  %2582 = vmatprep.subr.bf16.mxu1 %v3430_v34  ;;  %v986_v32 = vld [vmem:[%s4286_s5 + $0x4b8] sm:$0xff]  ;;  %v3463_v33 = vcombine.low %v1001_v21, %v1017_v22  ;;  %v3465_v34 = vcombine.low %v1002_v23, %v1018_v24  ;;  %v3500_v21 = vcombine.high %v1035_v15, %v1051_v16  ;;  %v1003_v23 = vld [vmem:[%s4286_s5 + $0x540] sm:$0xff] }
  0xe8   : > { %v3434_v36 = vcombine.high %v970_v31, %v986_v32  ;;  %v1019_v24 = vld [vmem:[%s4286_s5 + $0x5c0] sm:$0xff] }
  0xea   : > { %2542 = vmatpush1.bf16.msra.mxu0 %v3427_v39  ;;  %2583 = vmatpush1.bf16.msra.mxu1 %v3429_v40  ;;  %v938_v39 = vld [vmem:[%s4286_s5 + $0x338] sm:$0xff] }
  0xeb   : > { %2543 = vmatprep.subr.bf16.mxu0 %v3396_v41  ;;  %2584 = vmatprep.subr.bf16.mxu1 %v3398_v42  ;;  %v954_v40 = vld [vmem:[%s4286_s5 + $0x3b8] sm:$0xff]  ;;  %v3431_v41 = vcombine.low %v969_v29, %v985_v30  ;;  %v3433_v42 = vcombine.low %v970_v31, %v986_v32  ;;  %v3468_v29 = vcombine.high %v1003_v23, %v1019_v24  ;;  %v971_v31 = vld [vmem:[%s4286_s5 + $0x440] sm:$0xff] }
  0xec   : > { %v3402_v44 = vcombine.high %v938_v39, %v954_v40  ;;  %v987_v32 = vld [vmem:[%s4286_s5 + $0x4c0] sm:$0xff] }
  0xee   : > { %2544 = vmatpush1.bf16.msra.mxu0 %v3395_v47  ;;  %2585 = vmatpush1.bf16.msra.mxu1 %v3397_v48  ;;  %v906_v47 = vld [vmem:[%s4286_s5 + $0x238] sm:$0xff] }
  0xef   : > { %2545 = vmatprep.subr.bf16.mxu0 %v3364_v49  ;;  %2586 = vmatprep.subr.bf16.mxu1 %v3366_v50  ;;  %v922_v48 = vld [vmem:[%s4286_s5 + $0x2b8] sm:$0xff]  ;;  %v3399_v49 = vcombine.low %v937_v37, %v953_v38  ;;  %v3401_v50 = vcombine.low %v938_v39, %v954_v40  ;;  %v3436_v37 = vcombine.high %v971_v31, %v987_v32  ;;  %v939_v39 = vld [vmem:[%s4286_s5 + $0x340] sm:$0xff] }
  0xf0   : > { %v3370_v52 = vcombine.high %v906_v47, %v922_v48  ;;  %v955_v40 = vld [vmem:[%s4286_s5 + $0x3c0] sm:$0xff] }
  0xf2   : > { %2546 = vmatpush1.bf16.msra.mxu0 %v3363_v55  ;;  %2587 = vmatpush1.bf16.msra.mxu1 %v3365_v56  ;;  %v874_v55 = vld [vmem:[%s4286_s5 + $0x138] sm:$0xff] }
  0xf3   : > { %2547 = vmatprep.subr.bf16.mxu0 %v3332_v57  ;;  %2588 = vmatprep.subr.bf16.mxu1 %v3334_v58  ;;  %v890_v56 = vld [vmem:[%s4286_s5 + $0x1b8] sm:$0xff]  ;;  %v3367_v57 = vcombine.low %v905_v45, %v921_v46  ;;  %v3369_v58 = vcombine.low %v906_v47, %v922_v48  ;;  %v3404_v45 = vcombine.high %v939_v39, %v955_v40  ;;  %v907_v47 = vld [vmem:[%s4286_s5 + $0x240] sm:$0xff] }
  0xf4   : > { %v3338_v60 = vcombine.high %v874_v55, %v890_v56  ;;  %v923_v48 = vld [vmem:[%s4286_s5 + $0x2c0] sm:$0xff] }
  0xf6   : > { %2548 = vmatpush1.bf16.msra.mxu0 %v3331_v63  ;;  %2589 = vmatpush1.bf16.msra.mxu1 %v3333_v1  ;;  %v842_v63 = vld [vmem:[%s4286_s5 + $0x38] sm:$0xff] }
  0xf7   : > { %2549 = vmatprep.subr.bf16.mxu0 %v3300_v2  ;;  %2590 = vmatprep.subr.bf16.mxu1 %v3302_v3  ;;  %v858_v1 = vld [vmem:[%s4286_s5 + $0xb8] sm:$0xff]  ;;  %v3335_v2 = vcombine.low %v873_v53, %v889_v54  ;;  %v3337_v3 = vcombine.low %v874_v55, %v890_v56  ;;  %v3372_v53 = vcombine.high %v907_v47, %v923_v48  ;;  %v875_v55 = vld [vmem:[%s4286_s5 + $0x140] sm:$0xff] }
  0xf8   : > { %v3306_v5 = vcombine.high %v842_v63, %v858_v1  ;;  %v891_v56 = vld [vmem:[%s4286_s5 + $0x1c0] sm:$0xff] }
  0xfa   : > { %2550 = vmatpush1.bf16.msra.mxu0 %v3299_v8  ;;  %2591 = vmatpush1.bf16.msra.mxu1 %v3301_v9  ;;  %v1068_v8 = vld [vmem:[%s4286_s5 + $0x748] sm:$0xff] }
  0xfb   : > { %2617 = vmatprep.subr.bf16.mxu0 %v3528_v10  ;;  %2658 = vmatprep.subr.bf16.mxu1 %v3530_v11  ;;  %v1084_v9 = vld [vmem:[%s4286_s5 + $0x7c8] sm:$0xff]  ;;  %v3303_v10 = vcombine.low %v841_v61, %v857_v62  ;;  %v3305_v11 = vcombine.low %v842_v63, %v858_v1  ;;  %v3340_v61 = vcombine.high %v875_v55, %v891_v56  ;;  %v843_v63 = vld [vmem:[%s4286_s5 + $0x40] sm:$0xff] }
  0xfc   : > { %v3534_v14 = vcombine.high %v1068_v8, %v1084_v9  ;;  %v859_v1 = vld [vmem:[%s4286_s5 + $0xc0] sm:$0xff] }
  0xfd   : > { %2568 = vmatmul.mubr.bf16.vlgmr.msra.gmra.mxu0 %v4331_v12  ;;  %2609 = vmatmul.mubr.bf16.vlgmr.msra.gmra.mxu1 %v4331_v12 }
  0xfe   : > { %2618 = vmatpush1.bf16.msra.mxu0 %v3527_v17  ;;  %2659 = vmatpush1.bf16.msra.mxu1 %v3529_v18  ;;  %v1036_v17 = vld [vmem:[%s4286_s5 + $0x648] sm:$0xff] }
  0xff   : > { %2619 = vmatprep.subr.bf16.mxu0 %v3496_v19  ;;  %2660 = vmatprep.subr.bf16.mxu1 %v3498_v20  ;;  %v1052_v18 = vld [vmem:[%s4286_s5 + $0x6c8] sm:$0xff]  ;;  %v3531_v19 = vcombine.low %v1067_v6, %v1083_v7  ;;  %v3533_v20 = vcombine.low %v1068_v8, %v1084_v9  ;;  %v3308_v6 = vcombine.high %v843_v63, %v859_v1  ;;  %v1069_v8 = vld [vmem:[%s4286_s5 + $0x750] sm:$0xff] }
 0x100   : > { %2649 = vmatprep.mubr.bf16.mxu0 %v3696_v0  ;;  %2690 = vmatprep.mubr.bf16.mxu1 %v3696_v0  ;;  %v3502_v22 = vcombine.high %v1036_v17, %v1052_v18  ;;  %v1085_v9 = vld [vmem:[%s4286_s5 + $0x7d0] sm:$0xff] }
 0x102   : > { %2620 = vmatpush1.bf16.msra.mxu0 %v3495_v25  ;;  %2661 = vmatpush1.bf16.msra.mxu1 %v3497_v26  ;;  %v1004_v25 = vld [vmem:[%s4286_s5 + $0x548] sm:$0xff] }
 0x103   : > { %2621 = vmatprep.subr.bf16.mxu0 %v3464_v27  ;;  %2662 = vmatprep.subr.bf16.mxu1 %v3466_v28  ;;  %v1020_v26 = vld [vmem:[%s4286_s5 + $0x5c8] sm:$0xff]  ;;  %v3499_v27 = vcombine.low %v1035_v15, %v1051_v16  ;;  %v3501_v28 = vcombine.low %v1036_v17, %v1052_v18  ;;  %v3536_v15 = vcombine.high %v1069_v8, %v1085_v9  ;;  %v1037_v17 = vld [vmem:[%s4286_s5 + $0x650] sm:$0xff] }
 0x104   : > { %v3470_v30 = vcombine.high %v1004_v25, %v1020_v26  ;;  %v1053_v18 = vld [vmem:[%s4286_s5 + $0x6d0] sm:$0xff] }
 0x106   : > { %2622 = vmatpush1.bf16.msra.mxu0 %v3463_v33  ;;  %2663 = vmatpush1.bf16.msra.mxu1 %v3465_v34  ;;  %v972_v33 = vld [vmem:[%s4286_s5 + $0x448] sm:$0xff] }
 0x107   : > { %2623 = vmatprep.subr.bf16.mxu0 %v3432_v35  ;;  %2664 = vmatprep.subr.bf16.mxu1 %v3434_v36  ;;  %v988_v34 = vld [vmem:[%s4286_s5 + $0x4c8] sm:$0xff]  ;;  %v3467_v35 = vcombine.low %v1003_v23, %v1019_v24  ;;  %v3469_v36 = vcombine.low %v1004_v25, %v1020_v26  ;;  %v3504_v23 = vcombine.high %v1037_v17, %v1053_v18  ;;  %v1005_v25 = vld [vmem:[%s4286_s5 + $0x550] sm:$0xff] }
 0x108   : > { %v3438_v38 = vcombine.high %v972_v33, %v988_v34  ;;  %v1021_v26 = vld [vmem:[%s4286_s5 + $0x5d0] sm:$0xff] }
 0x10a   : > { %2624 = vmatpush1.bf16.msra.mxu0 %v3431_v41  ;;  %2665 = vmatpush1.bf16.msra.mxu1 %v3433_v42  ;;  %v940_v41 = vld [vmem:[%s4286_s5 + $0x348] sm:$0xff] }
 0x10b   : > { %2625 = vmatprep.subr.bf16.mxu0 %v3400_v43  ;;  %2666 = vmatprep.subr.bf16.mxu1 %v3402_v44  ;;  %v956_v42 = vld [vmem:[%s4286_s5 + $0x3c8] sm:$0xff]  ;;  %v3435_v43 = vcombine.low %v971_v31, %v987_v32  ;;  %v3437_v44 = vcombine.low %v972_v33, %v988_v34  ;;  %v3472_v31 = vcombine.high %v1005_v25, %v1021_v26  ;;  %v973_v33 = vld [vmem:[%s4286_s5 + $0x450] sm:$0xff] }
 0x10c   : > { %v3406_v46 = vcombine.high %v940_v41, %v956_v42  ;;  %v989_v34 = vld [vmem:[%s4286_s5 + $0x4d0] sm:$0xff] }
 0x10e   : > { %2626 = vmatpush1.bf16.msra.mxu0 %v3399_v49  ;;  %2667 = vmatpush1.bf16.msra.mxu1 %v3401_v50  ;;  %v908_v49 = vld [vmem:[%s4286_s5 + $0x248] sm:$0xff] }
 0x10f   : > { %2627 = vmatprep.subr.bf16.mxu0 %v3368_v51  ;;  %2668 = vmatprep.subr.bf16.mxu1 %v3370_v52  ;;  %v924_v50 = vld [vmem:[%s4286_s5 + $0x2c8] sm:$0xff]  ;;  %v3403_v51 = vcombine.low %v939_v39, %v955_v40  ;;  %v3405_v52 = vcombine.low %v940_v41, %v956_v42  ;;  %v3440_v39 = vcombine.high %v973_v33, %v989_v34  ;;  %v941_v41 = vld [vmem:[%s4286_s5 + $0x350] sm:$0xff] }
 0x110   : > { %v3374_v54 = vcombine.high %v908_v49, %v924_v50  ;;  %v957_v42 = vld [vmem:[%s4286_s5 + $0x3d0] sm:$0xff] }
 0x112   : > { %2628 = vmatpush1.bf16.msra.mxu0 %v3367_v57  ;;  %2669 = vmatpush1.bf16.msra.mxu1 %v3369_v58  ;;  %v876_v57 = vld [vmem:[%s4286_s5 + $0x148] sm:$0xff] }
 0x113   : > { %2629 = vmatprep.subr.bf16.mxu0 %v3336_v59  ;;  %2670 = vmatprep.subr.bf16.mxu1 %v3338_v60  ;;  %v892_v58 = vld [vmem:[%s4286_s5 + $0x1c8] sm:$0xff]  ;;  %v3371_v59 = vcombine.low %v907_v47, %v923_v48  ;;  %v3373_v60 = vcombine.low %v908_v49, %v924_v50  ;;  %v3408_v47 = vcombine.high %v941_v41, %v957_v42  ;;  %v909_v49 = vld [vmem:[%s4286_s5 + $0x250] sm:$0xff] }
 0x114   : > { %v3342_v62 = vcombine.high %v876_v57, %v892_v58  ;;  %v925_v50 = vld [vmem:[%s4286_s5 + $0x2d0] sm:$0xff] }
 0x116   : > { %2630 = vmatpush1.bf16.msra.mxu0 %v3335_v2  ;;  %2671 = vmatpush1.bf16.msra.mxu1 %v3337_v3  ;;  %v844_v2 = vld [vmem:[%s4286_s5 + $0x48] sm:$0xff] }
 0x117   : > { %2631 = vmatprep.subr.bf16.mxu0 %v3304_v4  ;;  %2672 = vmatprep.subr.bf16.mxu1 %v3306_v5  ;;  %v860_v3 = vld [vmem:[%s4286_s5 + $0xc8] sm:$0xff]  ;;  %v3339_v4 = vcombine.low %v875_v55, %v891_v56  ;;  %v3341_v5 = vcombine.low %v876_v57, %v892_v58  ;;  %v3376_v55 = vcombine.high %v909_v49, %v925_v50  ;;  %v877_v57 = vld [vmem:[%s4286_s5 + $0x150] sm:$0xff] }
 0x118   : > { %v3310_v7 = vcombine.high %v844_v2, %v860_v3  ;;  %v893_v58 = vld [vmem:[%s4286_s5 + $0x1d0] sm:$0xff] }
 0x11a   : > { %2632 = vmatpush1.bf16.msra.mxu0 %v3303_v10  ;;  %2673 = vmatpush1.bf16.msra.mxu1 %v3305_v11  ;;  %v1070_v10 = vld [vmem:[%s4286_s5 + $0x758] sm:$0xff] }
 0x11b   : > { %2699 = vmatprep.subr.bf16.mxu0 %v3532_v13  ;;  %2740 = vmatprep.subr.bf16.mxu1 %v3534_v14  ;;  %v1086_v11 = vld [vmem:[%s4286_s5 + $0x7d8] sm:$0xff]  ;;  %v3307_v13 = vcombine.low %v843_v63, %v859_v1  ;;  %v3309_v14 = vcombine.low %v844_v2, %v860_v3  ;;  %v3344_v63 = vcombine.high %v877_v57, %v893_v58  ;;  %v845_v2 = vld [vmem:[%s4286_s5 + $0x50] sm:$0xff] }
 0x11c   : > { %v3538_v16 = vcombine.high %v1070_v10, %v1086_v11  ;;  %v861_v3 = vld [vmem:[%s4286_s5 + $0xd0] sm:$0xff] }
 0x11d   : > { %2650 = vmatmul.mubr.bf16.vlgmr.msra.gmra.mxu0 %v4331_v12  ;;  %2691 = vmatmul.mubr.bf16.vlgmr.msra.gmra.mxu1 %v4331_v12 }
 0x11e   : > { %2700 = vmatpush1.bf16.msra.mxu0 %v3531_v19  ;;  %2741 = vmatpush1.bf16.msra.mxu1 %v3533_v20  ;;  %v1038_v19 = vld [vmem:[%s4286_s5 + $0x658] sm:$0xff] }
 0x11f   : > { %2701 = vmatprep.subr.bf16.mxu0 %v3500_v21  ;;  %2742 = vmatprep.subr.bf16.mxu1 %v3502_v22  ;;  %v1054_v20 = vld [vmem:[%s4286_s5 + $0x6d8] sm:$0xff]  ;;  %v3535_v21 = vcombine.low %v1069_v8, %v1085_v9  ;;  %v3537_v22 = vcombine.low %v1070_v10, %v1086_v11  ;;  %v3312_v8 = vcombine.high %v845_v2, %v861_v3  ;;  %v1071_v10 = vld [vmem:[%s4286_s5 + $0x760] sm:$0xff] }
 0x120   : > { %2731 = vmatprep.mubr.bf16.mxu0 %v3696_v0  ;;  %2772 = vmatprep.mubr.bf16.mxu1 %v3696_v0  ;;  %v3506_v24 = vcombine.high %v1038_v19, %v1054_v20  ;;  %v1087_v11 = vld [vmem:[%s4286_s5 + $0x7e0] sm:$0xff] }
 0x122   : > { %2702 = vmatpush1.bf16.msra.mxu0 %v3499_v27  ;;  %2743 = vmatpush1.bf16.msra.mxu1 %v3501_v28  ;;  %v1006_v27 = vld [vmem:[%s4286_s5 + $0x558] sm:$0xff] }
 0x123   : > { %2703 = vmatprep.subr.bf16.mxu0 %v3468_v29  ;;  %2744 = vmatprep.subr.bf16.mxu1 %v3470_v30  ;;  %v1022_v28 = vld [vmem:[%s4286_s5 + $0x5d8] sm:$0xff]  ;;  %v3503_v29 = vcombine.low %v1037_v17, %v1053_v18  ;;  %v3505_v30 = vcombine.low %v1038_v19, %v1054_v20  ;;  %v3540_v17 = vcombine.high %v1071_v10, %v1087_v11  ;;  %v1039_v19 = vld [vmem:[%s4286_s5 + $0x660] sm:$0xff] }
 0x124   : > { %v3474_v32 = vcombine.high %v1006_v27, %v1022_v28  ;;  %v1055_v20 = vld [vmem:[%s4286_s5 + $0x6e0] sm:$0xff] }
 0x126   : > { %2704 = vmatpush1.bf16.msra.mxu0 %v3467_v35  ;;  %2745 = vmatpush1.bf16.msra.mxu1 %v3469_v36  ;;  %v974_v35 = vld [vmem:[%s4286_s5 + $0x458] sm:$0xff] }
 0x127   : > { %2705 = vmatprep.subr.bf16.mxu0 %v3436_v37  ;;  %2746 = vmatprep.subr.bf16.mxu1 %v3438_v38  ;;  %v990_v36 = vld [vmem:[%s4286_s5 + $0x4d8] sm:$0xff]  ;;  %v3471_v37 = vcombine.low %v1005_v25, %v1021_v26  ;;  %v3473_v38 = vcombine.low %v1006_v27, %v1022_v28  ;;  %v3508_v25 = vcombine.high %v1039_v19, %v1055_v20  ;;  %v1007_v27 = vld [vmem:[%s4286_s5 + $0x560] sm:$0xff] }
 0x128   : > { %v3442_v40 = vcombine.high %v974_v35, %v990_v36  ;;  %v1023_v28 = vld [vmem:[%s4286_s5 + $0x5e0] sm:$0xff] }
 0x12a   : > { %2706 = vmatpush1.bf16.msra.mxu0 %v3435_v43  ;;  %2747 = vmatpush1.bf16.msra.mxu1 %v3437_v44  ;;  %v942_v43 = vld [vmem:[%s4286_s5 + $0x358] sm:$0xff] }
 0x12b   : > { %2707 = vmatprep.subr.bf16.mxu0 %v3404_v45  ;;  %2748 = vmatprep.subr.bf16.mxu1 %v3406_v46  ;;  %v958_v44 = vld [vmem:[%s4286_s5 + $0x3d8] sm:$0xff]  ;;  %v3439_v45 = vcombine.low %v973_v33, %v989_v34  ;;  %v3441_v46 = vcombine.low %v974_v35, %v990_v36  ;;  %v3476_v34 = vcombine.high %v1007_v27, %v1023_v28  ;;  %v975_v35 = vld [vmem:[%s4286_s5 + $0x460] sm:$0xff] }
 0x12c   : > { %v3410_v48 = vcombine.high %v942_v43, %v958_v44  ;;  %v991_v36 = vld [vmem:[%s4286_s5 + $0x4e0] sm:$0xff] }
 0x12e   : > { %2708 = vmatpush1.bf16.msra.mxu0 %v3403_v51  ;;  %2749 = vmatpush1.bf16.msra.mxu1 %v3405_v52  ;;  %v910_v51 = vld [vmem:[%s4286_s5 + $0x258] sm:$0xff] }
 0x12f   : > { %2709 = vmatprep.subr.bf16.mxu0 %v3372_v53  ;;  %2750 = vmatprep.subr.bf16.mxu1 %v3374_v54  ;;  %v926_v52 = vld [vmem:[%s4286_s5 + $0x2d8] sm:$0xff]  ;;  %v3407_v53 = vcombine.low %v941_v41, %v957_v42  ;;  %v3409_v54 = vcombine.low %v942_v43, %v958_v44  ;;  %v3444_v41 = vcombine.high %v975_v35, %v991_v36  ;;  %v943_v43 = vld [vmem:[%s4286_s5 + $0x360] sm:$0xff] }
 0x130   : > { %v3378_v56 = vcombine.high %v910_v51, %v926_v52  ;;  %v959_v44 = vld [vmem:[%s4286_s5 + $0x3e0] sm:$0xff] }
 0x132   : > { %2710 = vmatpush1.bf16.msra.mxu0 %v3371_v59  ;;  %2751 = vmatpush1.bf16.msra.mxu1 %v3373_v60  ;;  %v878_v59 = vld [vmem:[%s4286_s5 + $0x158] sm:$0xff] }
 0x133   : > { %2711 = vmatprep.subr.bf16.mxu0 %v3340_v61  ;;  %2752 = vmatprep.subr.bf16.mxu1 %v3342_v62  ;;  %v894_v60 = vld [vmem:[%s4286_s5 + $0x1d8] sm:$0xff]  ;;  %v3375_v61 = vcombine.low %v909_v49, %v925_v50  ;;  %v3377_v62 = vcombine.low %v910_v51, %v926_v52  ;;  %v3412_v49 = vcombine.high %v943_v43, %v959_v44  ;;  %v911_v51 = vld [vmem:[%s4286_s5 + $0x260] sm:$0xff] }
 0x134   : > { %v3346_v1 = vcombine.high %v878_v59, %v894_v60  ;;  %v927_v52 = vld [vmem:[%s4286_s5 + $0x2e0] sm:$0xff] }
 0x136   : > { %2712 = vmatpush1.bf16.msra.mxu0 %v3339_v4  ;;  %2753 = vmatpush1.bf16.msra.mxu1 %v3341_v5  ;;  %v846_v4 = vld [vmem:[%s4286_s5 + $0x58] sm:$0xff] }
 0x137   : > { %2713 = vmatprep.subr.bf16.mxu0 %v3308_v6  ;;  %2754 = vmatprep.subr.bf16.mxu1 %v3310_v7  ;;  %v862_v5 = vld [vmem:[%s4286_s5 + $0xd8] sm:$0xff]  ;;  %v3343_v6 = vcombine.low %v877_v57, %v893_v58  ;;  %v3345_v7 = vcombine.low %v878_v59, %v894_v60  ;;  %v3380_v57 = vcombine.high %v911_v51, %v927_v52  ;;  %v879_v59 = vld [vmem:[%s4286_s5 + $0x160] sm:$0xff] }
 0x138   : > { %v3314_v9 = vcombine.high %v846_v4, %v862_v5  ;;  %v895_v60 = vld [vmem:[%s4286_s5 + $0x1e0] sm:$0xff] }
 0x13a   : > { %2714 = vmatpush1.bf16.msra.mxu0 %v3307_v13  ;;  %2755 = vmatpush1.bf16.msra.mxu1 %v3309_v14  ;;  %v1072_v13 = vld [vmem:[%s4286_s5 + $0x768] sm:$0xff] }
 0x13b   : > { %2781 = vmatprep.subr.bf16.mxu0 %v3536_v15  ;;  %2822 = vmatprep.subr.bf16.mxu1 %v3538_v16  ;;  %v1088_v14 = vld [vmem:[%s4286_s5 + $0x7e8] sm:$0xff]  ;;  %v3311_v15 = vcombine.low %v845_v2, %v861_v3  ;;  %v3313_v16 = vcombine.low %v846_v4, %v862_v5  ;;  %v3348_v2 = vcombine.high %v879_v59, %v895_v60  ;;  %v847_v4 = vld [vmem:[%s4286_s5 + $0x60] sm:$0xff] }
 0x13c   : > { %v3542_v18 = vcombine.high %v1072_v13, %v1088_v14  ;;  %v863_v5 = vld [vmem:[%s4286_s5 + $0xe0] sm:$0xff] }
 0x13d   : > { %2732 = vmatmul.mubr.bf16.vlgmr.msra.gmra.mxu0 %v4331_v12  ;;  %2773 = vmatmul.mubr.bf16.vlgmr.msra.gmra.mxu1 %v4331_v12 }
 0x13e   : > { %2782 = vmatpush1.bf16.msra.mxu0 %v3535_v21  ;;  %2823 = vmatpush1.bf16.msra.mxu1 %v3537_v22  ;;  %v1040_v21 = vld [vmem:[%s4286_s5 + $0x668] sm:$0xff] }
 0x13f   : > { %2783 = vmatprep.subr.bf16.mxu0 %v3504_v23  ;;  %2824 = vmatprep.subr.bf16.mxu1 %v3506_v24  ;;  %v1056_v22 = vld [vmem:[%s4286_s5 + $0x6e8] sm:$0xff]  ;;  %v3539_v23 = vcombine.low %v1071_v10, %v1087_v11  ;;  %v3541_v24 = vcombine.low %v1072_v13, %v1088_v14  ;;  %v3316_v10 = vcombine.high %v847_v4, %v863_v5  ;;  %v1073_v13 = vld [vmem:[%s4286_s5 + $0x770] sm:$0xff] }
 0x140   : > { %2813 = vmatprep.mubr.bf16.mxu0 %v3696_v0  ;;  %2854 = vmatprep.mubr.bf16.mxu1 %v3696_v0  ;;  %v3510_v26 = vcombine.high %v1040_v21, %v1056_v22  ;;  %v3509_v33 = vcombine.low %v1040_v21, %v1056_v22  ;;  %v1089_v14 = vld [vmem:[%s4286_s5 + $0x7f0] sm:$0xff] }
 0x141   : > { %v1041_v21 = vld [vmem:[%s4286_s5 + $0x670] sm:$0xff] }
 0x142   : > { %2784 = vmatpush1.bf16.msra.mxu0 %v3503_v29  ;;  %2825 = vmatpush1.bf16.msra.mxu1 %v3505_v30  ;;  %v1008_v29 = vld [vmem:[%s4286_s5 + $0x568] sm:$0xff]  ;;  %v1057_v22 = vld [vmem:[%s4286_s5 + $0x6f0] sm:$0xff] }
 0x143   : > { %2785 = vmatprep.subr.bf16.mxu0 %v3472_v31  ;;  %2826 = vmatprep.subr.bf16.mxu1 %v3474_v32  ;;  %v1024_v30 = vld [vmem:[%s4286_s5 + $0x5e8] sm:$0xff]  ;;  %v4521_v31 = vld [vmem:[%s4647_s0] sm:$0xf]  ;;  %v3507_v32 = vcombine.low %v1039_v19, %v1055_v20  ;;  %v3544_v19 = vcombine.high %v1073_v13, %v1089_v14 }
 0x146   : > { %2786 = vmatpush1.bf16.msra.mxu0 %v3471_v37  ;;  %2827 = vmatpush1.bf16.msra.mxu1 %v3473_v38  ;;  %v976_v37 = vld [vmem:[%s4286_s5 + $0x468] sm:$0xff] }
 0x147   : > { %2787 = vmatprep.subr.bf16.mxu0 %v3440_v39  ;;  %2828 = vmatprep.subr.bf16.mxu1 %v3442_v40  ;;  %v992_v38 = vld [vmem:[%s4286_s5 + $0x4e8] sm:$0xff]  ;;  %v3475_v39 = vcombine.low %v1007_v27, %v1023_v28  ;;  %v3477_v40 = vcombine.low %v1008_v29, %v1024_v30  ;;  %v3512_v27 = vcombine.high %v1041_v21, %v1057_v22 }
 0x148   : > { %v3446_v42 = vcombine.high %v976_v37, %v992_v38 }
 0x14a   : > { %2788 = vmatpush1.bf16.msra.mxu0 %v3439_v45  ;;  %2829 = vmatpush1.bf16.msra.mxu1 %v3441_v46  ;;  %v944_v45 = vld [vmem:[%s4286_s5 + $0x368] sm:$0xff] }
 0x14b   : > { %2789 = vmatprep.subr.bf16.mxu0 %v3408_v47  ;;  %2830 = vmatprep.subr.bf16.mxu1 %v3410_v48  ;;  %v960_v46 = vld [vmem:[%s4286_s5 + $0x3e8] sm:$0xff]  ;;  %v3443_v47 = vcombine.low %v975_v35, %v991_v36  ;;  %v3445_v48 = vcombine.low %v976_v37, %v992_v38  ;;  %v3511_v35 = vcombine.low %v1041_v21, %v1057_v22  ;;  %v866_v21 = vld [vmem:[%s4286_s5 + $0xf8] sm:$0xff] }
 0x14c   : > { %v3414_v50 = vcombine.high %v944_v45, %v960_v46 }
 0x14e   : > { %2790 = vmatpush1.bf16.msra.mxu0 %v3407_v53  ;;  %2831 = vmatpush1.bf16.msra.mxu1 %v3409_v54  ;;  %v912_v53 = vld [vmem:[%s4286_s5 + $0x268] sm:$0xff] }
 0x14f   : > { %2791 = vmatprep.subr.bf16.mxu0 %v3376_v55  ;;  %2832 = vmatprep.subr.bf16.mxu1 %v3378_v56  ;;  %v928_v54 = vld [vmem:[%s4286_s5 + $0x2e8] sm:$0xff]  ;;  %v3411_v55 = vcombine.low %v943_v43, %v959_v44  ;;  %v3413_v56 = vcombine.low %v944_v45, %v960_v46  ;;  %v978_v44 = vld [vmem:[%s4286_s5 + $0x478] sm:$0xff] }
 0x150   : > { %v3382_v58 = vcombine.high %v912_v53, %v928_v54  ;;  %v994_v45 = vld [vmem:[%s4286_s5 + $0x4f8] sm:$0xff] }
 0x152   : > { %2792 = vmatpush1.bf16.msra.mxu0 %v3375_v61  ;;  %2833 = vmatpush1.bf16.msra.mxu1 %v3377_v62  ;;  %v880_v61 = vld [vmem:[%s4286_s5 + $0x168] sm:$0xff] }
 0x153   : > { %2793 = vmatprep.subr.bf16.mxu0 %v3344_v63  ;;  %2834 = vmatprep.subr.bf16.mxu1 %v3346_v1  ;;  %v896_v62 = vld [vmem:[%s4286_s5 + $0x1e8] sm:$0xff]  ;;  %v3379_v63 = vcombine.low %v911_v51, %v927_v52  ;;  %v3381_v1 = vcombine.low %v912_v53, %v928_v54  ;;  %v3450_v52 = vcombine.high %v978_v44, %v994_v45  ;;  %v945_v53 = vld [vmem:[%s4286_s5 + $0x370] sm:$0xff]  ;;  %v946_v54 = vld [vmem:[%s4286_s5 + $0x378] sm:$0xff] }
 0x154   : > { %v3350_v3 = vcombine.high %v880_v61, %v896_v62 }
 0x156   : > { %2794 = vmatpush1.bf16.msra.mxu0 %v3343_v6  ;;  %2835 = vmatpush1.bf16.msra.mxu1 %v3345_v7  ;;  %v848_v6 = vld [vmem:[%s4286_s5 + $0x68] sm:$0xff] }
 0x157   : > { %2795 = vmatprep.subr.bf16.mxu0 %v3312_v8  ;;  %2836 = vmatprep.subr.bf16.mxu1 %v3314_v9  ;;  %v864_v7 = vld [vmem:[%s4286_s5 + $0xe8] sm:$0xff]  ;;  %v3347_v8 = vcombine.low %v879_v59, %v895_v60  ;;  %v3349_v9 = vcombine.low %v880_v61, %v896_v62  ;;  %v913_v60 = vld [vmem:[%s4286_s5 + $0x270] sm:$0xff]  ;;  %v914_v62 = vld [vmem:[%s4286_s5 + $0x278] sm:$0xff] }
 0x158   : > { %v3318_v11 = vcombine.high %v848_v6, %v864_v7  ;;  %v929_v61 = vld [vmem:[%s4286_s5 + $0x2f0] sm:$0xff] }
 0x15a   : > { %2796 = vmatpush1.bf16.msra.mxu0 %v3311_v15  ;;  %2837 = vmatpush1.bf16.msra.mxu1 %v3313_v16  ;;  %v1074_v15 = vld [vmem:[%s4286_s5 + $0x778] sm:$0xff] }
 0x15b   : > { %2863 = vmatprep.subr.bf16.mxu0 %v3540_v17  ;;  %2904 = vmatprep.subr.bf16.mxu1 %v3542_v18  ;;  %v1090_v16 = vld [vmem:[%s4286_s5 + $0x7f8] sm:$0xff]  ;;  %v3315_v17 = vcombine.low %v847_v4, %v863_v5  ;;  %v3317_v18 = vcombine.low %v848_v6, %v864_v7  ;;  %v3384_v4 = vcombine.high %v913_v60, %v929_v61  ;;  %v881_v7 = vld [vmem:[%s4286_s5 + $0x170] sm:$0xff] }
 0x15c   : > { %v3546_v20 = vcombine.high %v1074_v15, %v1090_v16 }
 0x15d   : > { %2814 = vmatmul.mubr.bf16.vlgmr.msra.gmra.mxu0 %v4331_v12  ;;  %2855 = vmatmul.mubr.bf16.vlgmr.msra.gmra.mxu1 %v4521_v31  ;;  %v3478_v12 = vcombine.high %v1008_v29, %v1024_v30  ;;  %v1009_v29 = vld [vmem:[%s4286_s5 + $0x570] sm:$0xff] }
 0x15e   : > { %2864 = vmatpush1.bf16.msra.mxu0 %v3539_v23  ;;  %2905 = vmatpush1.bf16.msra.mxu1 %v3541_v24  ;;  %v1042_v23 = vld [vmem:[%s4286_s5 + $0x678] sm:$0xff]  ;;  %v1025_v30 = vld [vmem:[%s4286_s5 + $0x5f0] sm:$0xff] }
 0x15f   : > { %2865 = vmatprep.subr.bf16.mxu0 %v3508_v25  ;;  %2906 = vmatprep.subr.bf16.mxu1 %v3510_v26  ;;  %v1058_v24 = vld [vmem:[%s4286_s5 + $0x6f8] sm:$0xff]  ;;  %v3543_v25 = vcombine.low %v1073_v13, %v1089_v14  ;;  %v3545_v26 = vcombine.low %v1074_v15, %v1090_v16  ;;  %v3480_v38 = vcombine.high %v1009_v29, %v1025_v30 }
 0x160   : > { %2895 = vmatprep.mubr.bf16.mxu0 %v3696_v0  ;;  %2936 = vmatprep.mubr.bf16.mxu1 %v3696_v0  ;;  %v3514_v28 = vcombine.high %v1042_v23, %v1058_v24  ;;  %v3513_v37 = vcombine.low %v1042_v23, %v1058_v24  ;;  %v3383_v14 = vcombine.low %v913_v60, %v929_v61 }
 0x162   : > { %2866 = vmatpush1.bf16.msra.mxu0 %v3507_v32  ;;  %2907 = vmatpush1.bf16.msra.mxu1 %v3509_v33  ;;  %v1010_v33 = vld [vmem:[%s4286_s5 + $0x578] sm:$0xff] }
 0x163   : > { %2867 = vmatprep.subr.bf16.mxu0 %v3476_v34  ;;  %2908 = vmatprep.subr.bf16.mxu1 %v3478_v12  ;;  %v1026_v34 = vld [vmem:[%s4286_s5 + $0x5f8] sm:$0xff] }
 0x166   : > { %2868 = vmatpush1.bf16.msra.mxu0 %v3475_v39  ;;  %2909 = vmatpush1.bf16.msra.mxu1 %v3477_v40  ;;  %v3482_v40 = vcombine.high %v1010_v33, %v1026_v34 }
 0x167   : > { %2869 = vmatprep.subr.bf16.mxu0 %v3444_v41  ;;  %2910 = vmatprep.subr.bf16.mxu1 %v3446_v42  ;;  %v977_v41 = vld [vmem:[%s4286_s5 + $0x470] sm:$0xff] }
 0x168   : > { %v993_v42 = vld [vmem:[%s4286_s5 + $0x4f0] sm:$0xff] }
 0x16a   : > { %2870 = vmatpush1.bf16.msra.mxu0 %v3443_v47  ;;  %2911 = vmatpush1.bf16.msra.mxu1 %v3445_v48  ;;  %v3479_v47 = vcombine.low %v1009_v29, %v1025_v30 }
 0x16b   : > { %2871 = vmatprep.subr.bf16.mxu0 %v3412_v49  ;;  %2912 = vmatprep.subr.bf16.mxu1 %v3414_v50  ;;  %v3481_v49 = vcombine.low %v1010_v33, %v1026_v34  ;;  %v3448_v50 = vcombine.high %v977_v41, %v993_v42 }
 0x16e   : > { %2872 = vmatpush1.bf16.msra.mxu0 %v3411_v55  ;;  %2913 = vmatpush1.bf16.msra.mxu1 %v3413_v56  ;;  %v962_v55 = vld [vmem:[%s4286_s5 + $0x3f8] sm:$0xff]  ;;  %v3447_v56 = vcombine.low %v977_v41, %v993_v42 }
 0x16f   : > { %2873 = vmatprep.subr.bf16.mxu0 %v3380_v57  ;;  %2914 = vmatprep.subr.bf16.mxu1 %v3382_v58  ;;  %v3449_v57 = vcombine.low %v978_v44, %v994_v45  ;;  %v3418_v59 = vcombine.high %v946_v54, %v962_v55 }
 0x172   : > { %2874 = vmatpush1.bf16.msra.mxu0 %v3379_v63  ;;  %2915 = vmatpush1.bf16.msra.mxu1 %v3381_v1  ;;  %v930_v63 = vld [vmem:[%s4286_s5 + $0x2f8] sm:$0xff] }
 0x173   : > { %2875 = vmatprep.subr.bf16.mxu0 %v3348_v2  ;;  %2916 = vmatprep.subr.bf16.mxu1 %v3350_v3  ;;  %v3417_v3 = vcombine.low %v946_v54, %v962_v55  ;;  %v3386_v6 = vcombine.high %v914_v62, %v930_v63  ;;  %v3385_v15 = vcombine.low %v914_v62, %v930_v63 }
 0x176   : > { %2876 = vmatpush1.bf16.msra.mxu0 %v3347_v8  ;;  %2917 = vmatpush1.bf16.msra.mxu1 %v3349_v9  ;;  %v897_v8 = vld [vmem:[%s4286_s5 + $0x1f0] sm:$0xff] }
 0x177   : > { %2877 = vmatprep.subr.bf16.mxu0 %v3316_v10  ;;  %2918 = vmatprep.subr.bf16.mxu1 %v3318_v11  ;;  %v882_v10 = vld [vmem:[%s4286_s5 + $0x178] sm:$0xff]  ;;  %v3352_v16 = vcombine.high %v881_v7, %v897_v8  ;;  %v3351_v22 = vcombine.low %v881_v7, %v897_v8 }
 0x178   : > { %v898_v11 = vld [vmem:[%s4286_s5 + $0x1f8] sm:$0xff] }
 0x179   : > { %v3353_v23 = vcombine.low %v882_v10, %v898_v11 }
 0x17a   : > { %2878 = vmatpush1.bf16.msra.mxu0 %v3315_v17  ;;  %2919 = vmatpush1.bf16.msra.mxu1 %v3317_v18  ;;  %v3354_v17 = vcombine.high %v882_v10, %v898_v11  ;;  %v849_v18 = vld [vmem:[%s4286_s5 + $0x70] sm:$0xff] }
 0x17b   : > { %2945 = vmatprep.subr.bf16.mxu0 %v3544_v19  ;;  %2986 = vmatprep.subr.bf16.mxu1 %v3546_v20  ;;  %v865_v19 = vld [vmem:[%s4286_s5 + $0xf0] sm:$0xff]  ;;  %v850_v20 = vld [vmem:[%s4286_s5 + $0x78] sm:$0xff] }
 0x17c   : > { %v3320_v24 = vcombine.high %v849_v18, %v865_v19 }
 0x17d   : > { %v2405_v32 = vpop.f32.mrf.mxu0  ;;  %2896 = vmatmul.mubr.bf16.vlgmr.msra.gmra.mxu0 %v4521_v31  ;;  %v2446_v12 = vpop.f32.mrf.mxu1  ;;  %2937 = vmatmul.mubr.bf16.vlgmr.msra.gmra.mxu1 %v4521_v31 }
 0x17e   : > { %3591 = vtanh.f32 %v2405_v32  ;;  %2946 = vmatpush1.bf16.msra.mxu0 %v3543_v25  ;;  %2987 = vmatpush1.bf16.msra.mxu1 %v3545_v26  ;;  %v3322_v25 = vcombine.high %v850_v20, %v866_v21  ;;  %v3319_v26 = vcombine.low %v849_v18, %v865_v19 }
 0x17f   : > { %3593 = vtanh.f32 %v2446_v12  ;;  %v2407_v36 = vpop.f32.mrf.mxu0  ;;  %2947 = vmatprep.subr.bf16.mxu0 %v3512_v27  ;;  %v2448_v39 = vpop.f32.mrf.mxu1  ;;  %2988 = vmatprep.subr.bf16.mxu1 %v3514_v28  ;;  %v3321_v27 = vcombine.low %v850_v20, %v866_v21 }
 0x180   : > { %3595 = vtanh.f32 %v2407_v36  ;;  %2977 = vmatprep.mubr.bf16.mxu0 %v3696_v0  ;;  %3018 = vmatprep.mubr.bf16.mxu1 %v3696_v0  ;;  %v961_v0 = vld [vmem:[%s4286_s5 + $0x3f0] sm:$0xff] }
 0x181   : > { %3597 = vtanh.f32 %v2448_v39  ;;  %v2409_v43 = vpop.f32.mrf.mxu0  ;;  %v2450_v46 = vpop.f32.mrf.mxu1  ;;  %v3416_v58 = vcombine.high %v945_v53, %v961_v0  ;;  %v3415_v1 = vcombine.low %v945_v53, %v961_v0 }
 0x182   : > { %2948 = vmatpush1.bf16.msra.mxu0 %v3511_v35  ;;  %2989 = vmatpush1.bf16.msra.mxu1 %v3513_v37 }
 0x183   : > { %v2410_v48 = vpop.f32.mrf.mxu0  ;;  %2949 = vmatprep.subr.bf16.mxu0 %v3480_v38  ;;  %v2451_v51 = vpop.f32.mrf.mxu1  ;;  %2990 = vmatprep.subr.bf16.mxu1 %v3482_v40 }
 0x186   : > { %2950 = vmatpush1.bf16.msra.mxu0 %v3479_v47  ;;  %2991 = vmatpush1.bf16.msra.mxu1 %v3481_v49 }
 0x187   : > { %2951 = vmatprep.subr.bf16.mxu0 %v3448_v50  ;;  %2992 = vmatprep.subr.bf16.mxu1 %v3450_v52 }
 0x18a   : > { %2952 = vmatpush1.bf16.msra.mxu0 %v3447_v56  ;;  %2993 = vmatpush1.bf16.msra.mxu1 %v3449_v57 }
 0x18b   : > { %v3592_v2 = vpop.eup %3591  ;;  %2953 = vmatprep.subr.bf16.mxu0 %v3416_v58  ;;  %2994 = vmatprep.subr.bf16.mxu1 %v3418_v59 }
 0x18c   : > { %v3594_v5 = vpop.eup %3593  ;;  %3158 = vst [vmem:[%s4586_s15] sm:$0xff] %v3592_v2 }
 0x18d   : > { %v3596_v9 = vpop.eup %3595  ;;  %3160 = vst [vmem:[%s4586_s15 + $0x10] sm:$0xff] %v3594_v5 }
 0x18e   : > { %v3598_v13 = vpop.eup %3597  ;;  %3159 = vst [vmem:[%s4586_s15 + $0x8] sm:$0xff] %v3596_v9  ;;  %2954 = vmatpush1.bf16.msra.mxu0 %v3415_v1  ;;  %2995 = vmatpush1.bf16.msra.mxu1 %v3417_v3 }
 0x18f   : > { %3161 = vst [vmem:[%s4586_s15 + $0x18] sm:$0xff] %v3598_v13  ;;  %2955 = vmatprep.subr.bf16.mxu0 %v3384_v4  ;;  %2996 = vmatprep.subr.bf16.mxu1 %v3386_v6 }
 0x192   : > { %2956 = vmatpush1.bf16.msra.mxu0 %v3383_v14  ;;  %2997 = vmatpush1.bf16.msra.mxu1 %v3385_v15 }
 0x193   : > { %2957 = vmatprep.subr.bf16.mxu0 %v3352_v16  ;;  %2998 = vmatprep.subr.bf16.mxu1 %v3354_v17 }
 0x196   : > { %2958 = vmatpush1.bf16.msra.mxu0 %v3351_v22  ;;  %2999 = vmatpush1.bf16.msra.mxu1 %v3353_v23 }
 0x197   : > { %2959 = vmatprep.subr.bf16.mxu0 %v3320_v24  ;;  %3000 = vmatprep.subr.bf16.mxu1 %v3322_v25 }
 0x19a   : > { %2960 = vmatpush1.bf16.msra.mxu0 %v3319_v26  ;;  %3001 = vmatpush1.bf16.msra.mxu1 %v3321_v27 }
 0x19d   : > { %v2487_v28 = vpop.f32.mrf.mxu0  ;;  %2978 = vmatmul.mubr.bf16.vlgmr.msra.gmra.mxu0 %v4521_v31  ;;  %v2528_v29 = vpop.f32.mrf.mxu1  ;;  %3019 = vmatmul.mubr.bf16.vlgmr.msra.gmra.mxu1 %v4521_v31 }
 0x19e   : > { %3599 = vtanh.f32 %v2487_v28 }
 0x19f   : > { %3601 = vtanh.f32 %v2528_v29  ;;  %v2489_v30 = vpop.f32.mrf.mxu0  ;;  %v2530_v32 = vpop.f32.mrf.mxu1 }
 0x1a0   : > { %3603 = vtanh.f32 %v2489_v30 }
 0x1a1   : > { %3605 = vtanh.f32 %v2530_v32  ;;  %v2491_v33 = vpop.f32.mrf.mxu0  ;;  %v2532_v34 = vpop.f32.mrf.mxu1 }
 0x1a3   : > { %v2492_v12 = vpop.f32.mrf.mxu0  ;;  %v2533_v35 = vpop.f32.mrf.mxu1 }
 0x1ab   : > { %v3600_v36 = vpop.eup %3599 }
 0x1ac   : > { %v3602_v37 = vpop.eup %3601  ;;  %3162 = vst [vmem:[%s4586_s15 + $0x20] sm:$0xff] %v3600_v36 }
 0x1ad   : > { %v3604_v38 = vpop.eup %3603  ;;  %3164 = vst [vmem:[%s4586_s15 + $0x30] sm:$0xff] %v3602_v37 }
 0x1ae   : > { %v3606_v39 = vpop.eup %3605  ;;  %3163 = vst [vmem:[%s4586_s15 + $0x28] sm:$0xff] %v3604_v38 }
 0x1af   : > { %3165 = vst [vmem:[%s4586_s15 + $0x38] sm:$0xff] %v3606_v39 }
 0x1bd   : > { %v2569_v31 = vpop.f32.mrf.mxu0  ;;  %v2610_v40 = vpop.f32.mrf.mxu1 }
 0x1be   : > { %3607 = vtanh.f32 %v2569_v31 }
 0x1bf   : > { %3609 = vtanh.f32 %v2610_v40  ;;  %v2571_v41 = vpop.f32.mrf.mxu0  ;;  %v2612_v42 = vpop.f32.mrf.mxu1 }
 0x1c0   : > { %3611 = vtanh.f32 %v2571_v41 }
 0x1c1   : > { %3613 = vtanh.f32 %v2612_v42  ;;  %v2573_v43 = vpop.f32.mrf.mxu0  ;;  %v2614_v44 = vpop.f32.mrf.mxu1 }
 0x1c3   : > { %v2574_v45 = vpop.f32.mrf.mxu0  ;;  %v2615_v46 = vpop.f32.mrf.mxu1 }
 0x1cb   : > { %v3608_v47 = vpop.eup %3607 }
 0x1cc   : > { %v3610_v48 = vpop.eup %3609  ;;  %3166 = vst [vmem:[%s4586_s15 + $0x40] sm:$0xff] %v3608_v47 }
 0x1cd   : > { %v3612_v49 = vpop.eup %3611  ;;  %3168 = vst [vmem:[%s4586_s15 + $0x50] sm:$0xff] %v3610_v48 }
 0x1ce   : > { %v3614_v50 = vpop.eup %3613  ;;  %3167 = vst [vmem:[%s4586_s15 + $0x48] sm:$0xff] %v3612_v49 }
 0x1cf   : > { %3169 = vst [vmem:[%s4586_s15 + $0x58] sm:$0xff] %v3614_v50 }
 0x1dd   : > { %v2651_v51 = vpop.f32.mrf.mxu0  ;;  %v2692_v52 = vpop.f32.mrf.mxu1 }
 0x1de   : > { %3615 = vtanh.f32 %v2651_v51 }
 0x1df   : > { %3617 = vtanh.f32 %v2692_v52  ;;  %v2653_v53 = vpop.f32.mrf.mxu0  ;;  %v2694_v0 = vpop.f32.mrf.mxu1 }
 0x1e0   : > { %3619 = vtanh.f32 %v2653_v53 }
 0x1e1   : > { %3621 = vtanh.f32 %v2694_v0  ;;  %v2655_v54 = vpop.f32.mrf.mxu0  ;;  %v2696_v55 = vpop.f32.mrf.mxu1 }
 0x1e3   : > { %v2656_v56 = vpop.f32.mrf.mxu0  ;;  %v2697_v57 = vpop.f32.mrf.mxu1 }
 0x1eb   : > { %v3616_v58 = vpop.eup %3615 }
 0x1ec   : > { %v3618_v59 = vpop.eup %3617  ;;  %3170 = vst [vmem:[%s4586_s15 + $0x60] sm:$0xff] %v3616_v58 }
 0x1ed   : > { %v3620_v60 = vpop.eup %3619  ;;  %3172 = vst [vmem:[%s4586_s15 + $0x70] sm:$0xff] %v3618_v59 }
 0x1ee   : > { %v3622_v61 = vpop.eup %3621  ;;  %3171 = vst [vmem:[%s4586_s15 + $0x68] sm:$0xff] %v3620_v60 }
 0x1ef   : > { %3173 = vst [vmem:[%s4586_s15 + $0x78] sm:$0xff] %v3622_v61 }
 0x1fd   : > { %v2733_v62 = vpop.f32.mrf.mxu0  ;;  %v2774_v63 = vpop.f32.mrf.mxu1 }
 0x1fe   : > { %3623 = vtanh.f32 %v2733_v62 }
 0x1ff   : > { %3625 = vtanh.f32 %v2774_v63  ;;  %v2735_v1 = vpop.f32.mrf.mxu0  ;;  %v2776_v2 = vpop.f32.mrf.mxu1 }
 0x200   : > { %3627 = vtanh.f32 %v2735_v1 }
 0x201   : > { %3629 = vtanh.f32 %v2776_v2  ;;  %v2737_v3 = vpop.f32.mrf.mxu0  ;;  %v2778_v4 = vpop.f32.mrf.mxu1 }
 0x203   : > { %v2738_v5 = vpop.f32.mrf.mxu0  ;;  %v2779_v6 = vpop.f32.mrf.mxu1 }
 0x20b   : > { %v3624_v7 = vpop.eup %3623 }
 0x20c   : > { %v3626_v8 = vpop.eup %3625  ;;  %3174 = vst [vmem:[%s4586_s15 + $0x80] sm:$0xff] %v3624_v7 }
 0x20d   : > { %v3628_v9 = vpop.eup %3627  ;;  %3176 = vst [vmem:[%s4586_s15 + $0x90] sm:$0xff] %v3626_v8 }
 0x20e   : > { %v3630_v10 = vpop.eup %3629  ;;  %3175 = vst [vmem:[%s4586_s15 + $0x88] sm:$0xff] %v3628_v9 }
 0x20f   : > { %3177 = vst [vmem:[%s4586_s15 + $0x98] sm:$0xff] %v3630_v10 }
 0x21d   : > { %v2815_v11 = vpop.f32.mrf.mxu0  ;;  %v2856_v13 = vpop.f32.mrf.mxu1 }
 0x21e   : > { %3631 = vtanh.f32 %v2815_v11 }
 0x21f   : > { %3633 = vtanh.f32 %v2856_v13  ;;  %v2817_v14 = vpop.f32.mrf.mxu0  ;;  %v2858_v15 = vpop.f32.mrf.mxu1 }
 0x220   : > { %3635 = vtanh.f32 %v2817_v14 }
 0x221   : > { %3637 = vtanh.f32 %v2858_v15  ;;  %v2819_v16 = vpop.f32.mrf.mxu0  ;;  %v2860_v17 = vpop.f32.mrf.mxu1 }
 0x223   : > { %v2820_v18 = vpop.f32.mrf.mxu0  ;;  %v2861_v19 = vpop.f32.mrf.mxu1 }
 0x22b   : > { %v3632_v20 = vpop.eup %3631 }
 0x22c   : > { %v3634_v21 = vpop.eup %3633  ;;  %3178 = vst [vmem:[%s4586_s15 + $0xa0] sm:$0xff] %v3632_v20 }
 0x22d   : > { %v3636_v22 = vpop.eup %3635  ;;  %3180 = vst [vmem:[%s4586_s15 + $0xb0] sm:$0xff] %v3634_v21 }
 0x22e   : > { %v3638_v23 = vpop.eup %3637  ;;  %3179 = vst [vmem:[%s4586_s15 + $0xa8] sm:$0xff] %v3636_v22 }
 0x22f   : > { %3181 = vst [vmem:[%s4586_s15 + $0xb8] sm:$0xff] %v3638_v23 }
 0x23d   : > { %v2897_v24 = vpop.f32.mrf.mxu0  ;;  %v2938_v25 = vpop.f32.mrf.mxu1 }
 0x23e   : > { %3639 = vtanh.f32 %v2897_v24 }
 0x23f   : > { %3641 = vtanh.f32 %v2938_v25  ;;  %v2899_v26 = vpop.f32.mrf.mxu0  ;;  %v2940_v27 = vpop.f32.mrf.mxu1 }
 0x240   : > { %3643 = vtanh.f32 %v2899_v26 }
 0x241   : > { %3645 = vtanh.f32 %v2940_v27  ;;  %v2901_v28 = vpop.f32.mrf.mxu0  ;;  %v2942_v29 = vpop.f32.mrf.mxu1 }
 0x243   : > { %v2902_v30 = vpop.f32.mrf.mxu0  ;;  %v2943_v32 = vpop.f32.mrf.mxu1 }
 0x24b   : > { %v3640_v33 = vpop.eup %3639 }
 0x24c   : > { %v3642_v34 = vpop.eup %3641  ;;  %3182 = vst [vmem:[%s4586_s15 + $0xc0] sm:$0xff] %v3640_v33 }
 0x24d   : > { %v3644_v12 = vpop.eup %3643  ;;  %3184 = vst [vmem:[%s4586_s15 + $0xd0] sm:$0xff] %v3642_v34 }
 0x24e   : > { %v3646_v35 = vpop.eup %3645  ;;  %3183 = vst [vmem:[%s4586_s15 + $0xc8] sm:$0xff] %v3644_v12 }
 0x24f   : > { %3185 = vst [vmem:[%s4586_s15 + $0xd8] sm:$0xff] %v3646_v35 }
 0x25d   : > { %v2979_v36 = vpop.f32.mrf.mxu0  ;;  %v3020_v37 = vpop.f32.mrf.mxu1 }
 0x25e   : > { %3647 = vtanh.f32 %v2979_v36 }
 0x25f   : > { %3649 = vtanh.f32 %v3020_v37  ;;  %v2981_v38 = vpop.f32.mrf.mxu0  ;;  %v3022_v39 = vpop.f32.mrf.mxu1 }
 0x260   : > { %3651 = vtanh.f32 %v2981_v38 }
 0x261   : > { %3653 = vtanh.f32 %v3022_v39  ;;  %v2983_v31 = vpop.f32.mrf.mxu0  ;;  %v3024_v40 = vpop.f32.mrf.mxu1 }
 0x263   : > { %v2984_v41 = vpop.f32.mrf.mxu0  ;;  %v3025_v42 = vpop.f32.mrf.mxu1 }
 0x26b   : > { %v3648_v43 = vpop.eup %3647 }
 0x26c   : > { %v3650_v44 = vpop.eup %3649  ;;  %3186 = vst [vmem:[%s4586_s15 + $0xe0] sm:$0xff] %v3648_v43 }
 0x26d   : > { %v3652_v45 = vpop.eup %3651  ;;  %3188 = vst [vmem:[%s4586_s15 + $0xf0] sm:$0xff] %v3650_v44 }
 0x26e   : > { %v3654_v46 = vpop.eup %3653  ;;  %3187 = vst [vmem:[%s4586_s15 + $0xe8] sm:$0xff] %v3652_v45 }
 0x26f   : > { %3189 = vst [vmem:[%s4586_s15 + $0xf8] sm:$0xff] %v3654_v46 }
 0x270 PF: > { %s14_s19 = sadd.s32 1, %s3694_s19   ;;  %s4653_s15 = smov %s3682_s16 }
 0x271   : > { %p11_p10 = scmp.ge.s32.totalorder %s14_s19, 7   ;;  %s4654_s16 = smov %s3757_s21 }
 0x272   : > { %s4655_s17 = smov %s3690_s18  ;;  %s4656_s18 = smov %s4658_s2 }
 0x273   :  { %13 = sbr.rel (!%p11_p10) target bundleno = 3 (0x3), region = 105 }

</bundles_post_ra>
